<compile_context>
chip_gen: v5e
topology: v5e:2x2
jax: 0.10.0
libtpu: 0.0.40
codegen_flags: <defaults>
</compile_context>

<pallas_src>
import jax
import jax.numpy as jnp
from jax.experimental import pallas as pl
from jax.experimental.pallas import tpu as pltpu

CHANNEL = 128          # conv output channels
SEQ = 128              # sequence length implied by MaxPool2d((128 - kh + 1, 1))
EMB = 50               # embedding dim implied by Conv2d kernel width 50
NUM_CLASSES = 5        # Linear(3 * CHANNEL, 5)
KHS = (3, 4, 5)
KMAX = max(KHS)        # 5
KPAD = 256             # padded contraction depth (>= KMAX*EMB = 250); fills MXU exactly
SEQ_PAD = SEQ + 8      # zero-pad time so shifted slices stay in-bounds (multiple of 8)
NFC_PAD = 128          # lane-dense FC output width
NEG = -1e30            # additive mask value for invalid window positions


def cnn_kernel(x_ref, wconv_ref, mask_ref, bconv_ref, wfc_ref, bfc_ref, out_ref):
    tb = x_ref.shape[0]

    # Shared im2col LHS: lanes dh*EMB:(dh+1)*EMB hold x[:, t+dh, :]; last 6 lanes are zero.
    pieces = [x_ref[:, dh:dh + SEQ, :] for dh in range(KMAX)]
    pieces.append(jnp.zeros((tb, SEQ, KPAD - KMAX * EMB), jnp.float32))
    lhs = jnp.concatenate(pieces, axis=-1).reshape(tb * SEQ, KPAD)      # (tb*128, 256)

    # All three conv branches fused into one MXU matmul: (tb*128, 256) @ (256, 384).
    s = jnp.dot(lhs, wconv_ref[...], preferred_element_type=jnp.float32)
    s = s.reshape(tb, SEQ, 3 * CHANNEL)

    # Kill invalid window positions (t >= SEQ-kh+1, incl. zero-pad rows), then max-pool.
    pooled = jnp.max(s + mask_ref[...], axis=1)                          # (tb, 3*C) branch-major

    # Conv bias + ReLU commute with the max (bias is t-invariant, ReLU monotone).
    feat = jnp.maximum(pooled + bconv_ref[...], 0.0)
    # (The fullconnect nn.ReLU() is identity here since feat >= 0 already.)

    # Lane-dense FC: (tb, 384) @ (384, 128); wrapper slices the 5 real classes.
    out_ref[...] = (jnp.dot(feat, wfc_ref[...], preferred_element_type=jnp.float32)
                    + bfc_ref[...])


def cnn_forward(x, wconv, mask, bconv, wfc, bfc, *, tb=8):
    B = x.shape[0]
    tb = max(1, min(tb, B))
    n_steps = pl.cdiv(B, tb)
    b_pad = n_steps * tb
    # Pad batch to a multiple of tb and pad time with 8 zero rows (masked before max-pool).
    x = jnp.pad(x, ((0, b_pad - B), (0, SEQ_PAD - SEQ), (0, 0)))

    def full(shape):
        return pl.BlockSpec(shape, lambda b: (0,) * len(shape))

    out = pl.pallas_call(
        cnn_kernel,
        out_shape=jax.ShapeDtypeStruct((b_pad, NFC_PAD), jnp.float32),
        grid_spec=pltpu.PrefetchScalarGridSpec(
            num_scalar_prefetch=0,
            grid=(n_steps,),
            in_specs=[
                pl.BlockSpec((tb, SEQ_PAD, EMB), lambda b: (b, 0, 0)),
                full((KPAD, 3 * CHANNEL)),          # fused conv weights (branch-major columns)
                full((SEQ, 3 * CHANNEL)),           # additive validity mask
                full((1, 3 * CHANNEL)),             # conv biases
                full((3 * CHANNEL, NFC_PAD)),       # FC weights (N padded to 128)
                full((1, NFC_PAD)),                 # FC bias   (N padded to 128)
            ],
            out_specs=pl.BlockSpec((tb, NFC_PAD), lambda b: (b, 0)),
        ),
        compiler_params=pltpu.CompilerParams(
            dimension_semantics=("parallel",),
            vmem_limit_bytes=32 * 1024 * 1024,
        ),
    )(x, wconv, mask, bconv, wfc, bfc)
    return out[:B, :NUM_CLASSES]


def make_params(key):
    """Deterministic synthetic parameters in PyTorch layouts."""
    ks = jax.random.split(key, 8)
    params = {}
    for i, kh in enumerate(KHS):
        params[f"conv{kh}_w"] = 0.1 * jax.random.normal(
            ks[2 * i], (CHANNEL, 1, kh, EMB), jnp.float32)      # torch Conv2d weight (C,1,kh,E)
        params[f"conv{kh}_b"] = 0.05 * jax.random.normal(
            ks[2 * i + 1], (CHANNEL,), jnp.float32)
    params["fc_w"] = 0.1 * jax.random.normal(ks[6], (NUM_CLASSES, 3 * CHANNEL), jnp.float32)
    params["fc_b"] = 0.05 * jax.random.normal(ks[7], (NUM_CLASSES,), jnp.float32)
    return params


def repack_params(params):
    """Convert torch-layout params into the fused, kernel-friendly layouts."""
    wblocks, bblocks, mblocks = [], [], []
    t_idx = jnp.arange(SEQ)[:, None]
    for kh in KHS:
        w = params[f"conv{kh}_w"][:, 0]                           # (C, kh, E)
        wk = jnp.transpose(w, (1, 2, 0)).reshape(kh * EMB, CHANNEL)   # row dh*E+e -> W[c,dh,e]
        wblocks.append(jnp.pad(wk, ((0, KPAD - kh * EMB), (0, 0))))   # zero rows beyond kh*E
        bblocks.append(params[f"conv{kh}_b"].reshape(1, CHANNEL))
        valid = jnp.where(t_idx < (SEQ - kh + 1), 0.0, NEG)          # (SEQ, 1)
        mblocks.append(jnp.broadcast_to(valid, (SEQ, CHANNEL)))
    wconv = jnp.concatenate(wblocks, axis=1).astype(jnp.float32)     # (256, 384) branch-major
    bconv = jnp.concatenate(bblocks, axis=1).astype(jnp.float32)     # (1, 384)
    mask = jnp.concatenate(mblocks, axis=1).astype(jnp.float32)      # (128, 384)

    # torch's `c.view(B, -1)` interleaves the 3 branches per channel (column 3*c + branch);
    # the kernel produces branch-major features (column branch*128 + c) -> permute FC columns,
    # then pad the output dim to 128 lanes for unmasked stores.
    wf = params["fc_w"].reshape(NUM_CLASSES, CHANNEL, 3).transpose(0, 2, 1).reshape(
        NUM_CLASSES, 3 * CHANNEL)                                    # branch-major columns
    wfc = jnp.pad(jnp.transpose(wf), ((0, 0), (0, NFC_PAD - NUM_CLASSES)))   # (384, 128)
    bfc = jnp.pad(params["fc_b"].reshape(1, NUM_CLASSES),
                  ((0, 0), (0, NFC_PAD - NUM_CLASSES)))                      # (1, 128)
    return wconv, mask, bconv, wfc, bfc


def reference_forward(x, params):
    """Pure-JAX reference reproducing the PyTorch forward exactly (eval mode)."""
    B = x.shape[0]
    feats = []
    for kh in KHS:
        w = params[f"conv{kh}_w"][:, 0]                      # (C, kh, E)
        b = params[f"conv{kh}_b"]
        T = SEQ - kh + 1
        s = jnp.zeros((B, T, CHANNEL), jnp.float32)
        for dh in range(kh):
            s = s + jnp.einsum("bte,ce->btc", x[:, dh:dh + T, :], w[:, dh, :])
        s = jnp.maximum(s + b, 0.0)                          # Conv bias + ReLU
        feats.append(jnp.max(s, axis=1))                     # MaxPool2d((T,1)) -> (B, C)
    c = jnp.stack(feats, axis=2).reshape(B, 3 * CHANNEL)     # torch cat(dim=3) + view order
    c = jnp.maximum(c, 0.0)
    return c @ params["fc_w"].T + params["fc_b"]


if __name__ == "__main__":
    key = jax.random.PRNGKey(0)
    kx, kp = jax.random.split(key)

    B = 16
    x = jax.random.normal(kx, (B, SEQ, EMB), jnp.float32)    # torch input before unsqueeze(1)

    params = make_params(kp)
    packed = repack_params(params)

    out = cnn_forward(x, *packed, tb=8)                      # grid of 2 "parallel" steps
    out = jax.block_until_ready(out)

    ref = reference_forward(x, params)
    assert out.shape == (B, NUM_CLASSES)
    assert jnp.allclose(out, ref, rtol=1e-4, atol=1e-4), (out, ref)

    print("KERNEL_OK")
</pallas_src>

<mosaic_0001>
module attributes {stable_mosaic.version = 11 : i64} {
  func.func @cnn_kernel(%arg0: i32, %arg1: memref<8x136x50xf32, #tpu.memory_space<vmem>>, %arg2: memref<256x384xf32, #tpu.memory_space<vmem>>, %arg3: memref<128x384xf32, #tpu.memory_space<vmem>>, %arg4: memref<1x384xf32, #tpu.memory_space<vmem>>, %arg5: memref<384x128xf32, #tpu.memory_space<vmem>>, %arg6: memref<1x128xf32, #tpu.memory_space<vmem>>, %arg7: memref<8x128xf32, #tpu.memory_space<vmem>>) attributes {dimension_semantics = [#tpu.dimension_semantics<parallel>], iteration_bounds = array<i64: 2>, scalar_prefetch = 0 : i64, scratch_operands = 0 : i64, tpu.core_type = #tpu.core_type<tc>, window_params = [{transform_indices = @transform_0, window_bounds = array<i64: 8, 136, 50>}, {pipeline_mode = #tpu.pipeline_mode<synchronous>, transform_indices = @transform_1, window_bounds = array<i64: 256, 384>}, {pipeline_mode = #tpu.pipeline_mode<synchronous>, transform_indices = @transform_2, window_bounds = array<i64: 128, 384>}, {pipeline_mode = #tpu.pipeline_mode<synchronous>, transform_indices = @transform_3, window_bounds = array<i64: 1, 384>}, {pipeline_mode = #tpu.pipeline_mode<synchronous>, transform_indices = @transform_4, window_bounds = array<i64: 384, 128>}, {pipeline_mode = #tpu.pipeline_mode<synchronous>, transform_indices = @transform_5, window_bounds = array<i64: 1, 128>}, {transform_indices = @transform_6, window_bounds = array<i64: 8, 128>}]} {
    %c0 = arith.constant 0 : index
    %c0_0 = arith.constant 0 : index
    %c0_1 = arith.constant 0 : index
    %0 = vector.load %arg1[%c0, %c0_0, %c0_1] : memref<8x136x50xf32, #tpu.memory_space<vmem>>, vector<8x128x50xf32>
    %c0_2 = arith.constant 0 : index
    %c1 = arith.constant 1 : index
    %c0_3 = arith.constant 0 : index
    %1 = vector.load %arg1[%c0_2, %c1, %c0_3] : memref<8x136x50xf32, #tpu.memory_space<vmem>>, vector<8x128x50xf32>
    %c0_4 = arith.constant 0 : index
    %c2 = arith.constant 2 : index
    %c0_5 = arith.constant 0 : index
    %2 = vector.load %arg1[%c0_4, %c2, %c0_5] : memref<8x136x50xf32, #tpu.memory_space<vmem>>, vector<8x128x50xf32>
    %c0_6 = arith.constant 0 : index
    %c3 = arith.constant 3 : index
    %c0_7 = arith.constant 0 : index
    %3 = vector.load %arg1[%c0_6, %c3, %c0_7] : memref<8x136x50xf32, #tpu.memory_space<vmem>>, vector<8x128x50xf32>
    %c0_8 = arith.constant 0 : index
    %c4 = arith.constant 4 : index
    %c0_9 = arith.constant 0 : index
    %4 = vector.load %arg1[%c0_8, %c4, %c0_9] : memref<8x136x50xf32, #tpu.memory_space<vmem>>, vector<8x128x50xf32>
    %cst = arith.constant 0.000000e+00 : f32
    %5 = vector.broadcast %cst : f32 to vector<8x128x6xf32>
    %6 = tpu.concatenate %0, %1, %2, %3, %4, %5 in 2 : vector<8x128x50xf32>, vector<8x128x50xf32>, vector<8x128x50xf32>, vector<8x128x50xf32>, vector<8x128x50xf32>, vector<8x128x6xf32> -> vector<8x128x256xf32>
    %7 = vector.shape_cast %6 : vector<8x128x256xf32> to vector<1024x256xf32>
    %c0_10 = arith.constant 0 : index
    %c0_11 = arith.constant 0 : index
    %8 = vector.load %arg2[%c0_10, %c0_11] : memref<256x384xf32, #tpu.memory_space<vmem>>, vector<256x384xf32>
    %cst_12 = arith.constant dense<0.000000e+00> : vector<1024x384xf32>
    %9 = tpu.matmul %7, %8, %cst_12 {dimension_numbers = #tpu.dot_dimension_numbers<[1], [0], [0], [1], [0, 0, 1, 1], [], []>} : vector<1024x256xf32>, vector<256x384xf32>, vector<1024x384xf32> -> vector<1024x384xf32>
    %10 = vector.shape_cast %9 : vector<1024x384xf32> to vector<8x128x384xf32>
    %c0_13 = arith.constant 0 : index
    %c0_14 = arith.constant 0 : index
    %11 = vector.load %arg3[%c0_13, %c0_14] : memref<128x384xf32, #tpu.memory_space<vmem>>, vector<128x384xf32>
    %12 = vector.shape_cast %11 : vector<128x384xf32> to vector<1x128x384xf32>
    %13 = vector.broadcast %12 : vector<1x128x384xf32> to vector<8x128x384xf32>
    %14 = arith.addf %10, %13 : vector<8x128x384xf32>
    %cst_15 = arith.constant dense<0xFF800000> : vector<8x384xf32>
    %15 = vector.multi_reduction <maximumf>, %14, %cst_15 [1] : vector<8x128x384xf32> to vector<8x384xf32>
    %c0_16 = arith.constant 0 : index
    %c0_17 = arith.constant 0 : index
    %16 = vector.load %arg4[%c0_16, %c0_17] : memref<1x384xf32, #tpu.memory_space<vmem>>, vector<1x384xf32>
    %17 = vector.broadcast %16 : vector<1x384xf32> to vector<8x384xf32>
    %18 = arith.addf %15, %17 : vector<8x384xf32>
    %cst_18 = arith.constant 0.000000e+00 : f32
    %19 = vector.broadcast %cst_18 : f32 to vector<8x384xf32>
    %20 = arith.maximumf %18, %19 : vector<8x384xf32>
    %c0_19 = arith.constant 0 : index
    %c0_20 = arith.constant 0 : index
    %21 = vector.load %arg5[%c0_19, %c0_20] : memref<384x128xf32, #tpu.memory_space<vmem>>, vector<384x128xf32>
    %cst_21 = arith.constant dense<0.000000e+00> : vector<8x128xf32>
    %22 = tpu.matmul %20, %21, %cst_21 {dimension_numbers = #tpu.dot_dimension_numbers<[1], [0], [0], [1], [0, 0, 1, 1], [], []>} : vector<8x384xf32>, vector<384x128xf32>, vector<8x128xf32> -> vector<8x128xf32>
    %c0_22 = arith.constant 0 : index
    %c0_23 = arith.constant 0 : index
    %23 = vector.load %arg6[%c0_22, %c0_23] : memref<1x128xf32, #tpu.memory_space<vmem>>, vector<1x128xf32>
    %24 = vector.broadcast %23 : vector<1x128xf32> to vector<8x128xf32>
    %25 = arith.addf %22, %24 : vector<8x128xf32>
    %c0_24 = arith.constant 0 : index
    %c0_25 = arith.constant 0 : index
    %26 = vector.load %arg7[%c0_24, %c0_25] : memref<8x128xf32, #tpu.memory_space<vmem>>, vector<8x128xf32>
    tpu.vector_store %arg7[%c0_24, %c0_25], %25 {strides = array<i32>} : memref<8x128xf32, #tpu.memory_space<vmem>>, vector<8x128xf32>,
    return
  }
  func.func @transform_0(%arg0: i32) -> (i32, i32, i32) {
    %c0_i32 = arith.constant 0 : i32
    %c0_i32_0 = arith.constant 0 : i32
    %c0_i32_1 = arith.constant 0 : i32
    return %arg0, %c0_i32, %c0_i32_0 : i32, i32, i32
  }
  func.func @transform_1(%arg0: i32) -> (i32, i32) {
    %c0_i32 = arith.constant 0 : i32
    %c0_i32_0 = arith.constant 0 : i32
    %c0_i32_1 = arith.constant 0 : i32
    return %c0_i32, %c0_i32_0 : i32, i32
  }
  func.func @transform_2(%arg0: i32) -> (i32, i32) {
    %c0_i32 = arith.constant 0 : i32
    %c0_i32_0 = arith.constant 0 : i32
    %c0_i32_1 = arith.constant 0 : i32
    return %c0_i32, %c0_i32_0 : i32, i32
  }
  func.func @transform_3(%arg0: i32) -> (i32, i32) {
    %c0_i32 = arith.constant 0 : i32
    %c0_i32_0 = arith.constant 0 : i32
    %c0_i32_1 = arith.constant 0 : i32
    return %c0_i32, %c0_i32_0 : i32, i32
  }
  func.func @transform_4(%arg0: i32) -> (i32, i32) {
    %c0_i32 = arith.constant 0 : i32
    %c0_i32_0 = arith.constant 0 : i32
    %c0_i32_1 = arith.constant 0 : i32
    return %c0_i32, %c0_i32_0 : i32, i32
  }
  func.func @transform_5(%arg0: i32) -> (i32, i32) {
    %c0_i32 = arith.constant 0 : i32
    %c0_i32_0 = arith.constant 0 : i32
    %c0_i32_1 = arith.constant 0 : i32
    return %c0_i32, %c0_i32_0 : i32, i32
  }
  func.func @transform_6(%arg0: i32) -> (i32, i32) {
    %c0_i32 = arith.constant 0 : i32
    %c0_i32_0 = arith.constant 0 : i32
    return %arg0, %c0_i32 : i32, i32
  }
}

</mosaic_0001>

<bundles_post_ra>
// kernel: tpu_custom_call.1
= control target key start
LH: loop header
LB: loop body
LE: loop exit
PB: predicated region body
PF: predicated region fallthrough
CT: control target
= control target key end

     0   :  { %11 = vsyncpa [#allocation3], 0  ;;  %s14375_s0 = inlined_call_operand.vmem [shape: f32[16,136,50], index: 0, kind: input, shape index: {}]   ;;  %s14376_s1 = inlined_call_operand.vmem [shape: f32[256,384], index: 1, kind: input, shape index: {}]   ;;  %s14377_s2 = inlined_call_operand.vmem [shape: f32[128,384], index: 2, kind: input, shape index: {}]   ;;  %s14378_s3 = inlined_call_operand.vmem [shape: f32[1,384], index: 3, kind: input, shape index: {}]   ;;  %s14379_s4 = inlined_call_operand.vmem [shape: f32[384,128], index: 4, kind: input, shape index: {}]   ;;  %s14380_s5 = inlined_call_operand.vmem [shape: f32[1,128], index: 5, kind: input, shape index: {}]   ;;  %s14381_s6 = inlined_call_operand.hbm [shape: f32[16,128], index: 6, kind: output, shape index: {}]  }
   0x1   :  { %13 = vsyncpa [#allocation3 + $0x1], 0  ;;  %s8312_s21 = smov 0   ;;  %s8314_s22 = smov 0  }
   0x2   :  { %s8316_s23 = smov 0   ;;  %s8318_s24 = smov 0  }
   0x3 LB: > { %s7345_s25 = sadd.s32 4294967295, %s8271_s24   ;;  %s7346_s26 = sadd.s32 4294967294, %s8271_s24   ;;  %s8271_s24 = sphi %s8318_s24, %s15746_s24   ;;  %s8267_s23 = sphi %s8316_s23, %s15745_s23   ;;  %s8263_s22 = sphi %s8314_s22, %s15744_s22   ;;  %s8259_s21 = sphi %s8312_s21, %s15743_s21  }
   0x4   : > { %s8335_s27 = sadd.s32 1, %s8271_s24   ;;  %s157_s28 = sadd.s32 1, %s8267_s23 }
   0x5   : > { %s154_s29 = ssub.s32 %s8271_s24, %s8335_s27  ;;  %p167_p0 = scmp.ne.s32.totalorder %s8267_s23, %s8263_s22 }
   0x6   : > { %p155_p1 = scmp.eq.s32.totalorder %s154_s29, 0  ;;  %p168_p2 = scmp.eq.s32.totalorder %s7345_s25, 1 }
   0x7   : > { %p173_p3 = scmp.ne.s32.totalorder %s8263_s22, %s8259_s21  ;;  %p174_p4 = scmp.eq.s32.totalorder %s7346_s26, 1 }
   0x8   : > { %s8345_s30 = scalar_select %p155_p1, %s8267_s23, %s157_s28  }
   0x9   : > { %p8347_p5 = por %p168_p2, %p167_p0  ;;  %p8351_p6 = por %p174_p4, %p173_p3 }
   0xa   : > { %p7349_p7 = scmp.ge.s32.totalorder %s8271_s24, 1  ;;  %p217_p8 = scmp.lt.s32.totalorder %s8271_s24, 3 }
   0xc   : > { %p218_p9 = pnand %p7349_p7, %p217_p8 }
   0xe   : > { %221 = sbr.rel (%p218_p9) target bundleno = 2651 (0xa5b), region = 44 }
  0x13   : > { %s8357_s9 = sshll.u32 %s7345_s25, 3  ;;  %s8273_s15 = smov 22   ;;  %v3633_v34 = vld [vmem:[%s14376_s1 + $0x168] sm:$0xff]  ;;  %v3630_v39 = vld [vmem:[%s14376_s1 + $0x150] sm:$0xff]  ;;  %v3627_v41 = vld [vmem:[%s14376_s1 + $0x138] sm:$0xff]  ;;  %vm2943_vm0 = vcmask 408576  }
  0x14   : > { %p249_p10 = scmp.lt.s32.totalorder %s8357_s9, 15  ;;  %s8274_s16 = smov 100   ;;  %3684 = vmatpush.msra.mxu0 %v3633_v34  ;;  %v3681_v35 = vld [vmem:[%s14376_s1 + $0x2e8] sm:$0xff]  ;;  %7741 = vmatpush.msra.mxu3 %v3633_v34  ;;  %v3678_v40 = vld [vmem:[%s14376_s1 + $0x2d0] sm:$0xff]  ;;  %v3675_v42 = vld [vmem:[%s14376_s1 + $0x2b8] sm:$0xff]  ;;  %vm3201_vm1 = vcmask 179200  }
  0x15   : > { %s8275_s17 = smov 50   ;;  %s8276_s18 = smov 72   ;;  %4085 = vmatpush.msra.mxu1 %v3681_v35  ;;  %7757 = vmatpush.msra.mxu2 %v3681_v35  ;;  %v3624_v43 = vld [vmem:[%s14376_s1 + $0x120] sm:$0xff]  ;;  %v3621_v45 = vld [vmem:[%s14376_s1 + $0x108] sm:$0xff]  ;;  %v3618_v50 = vld [vmem:[%s14376_s1 + $0xf0] sm:$0xff]  ;;  %vm3330_vm2 = vcmask 588800  }
  0x16   : > { %s250_s10 = scalar_select %p249_p10, %s8357_s9, 15  ;;  %3685 = vmatpush.msra.mxu0 %v3630_v39  ;;  %v3672_v44 = vld [vmem:[%s14376_s1 + $0x2a0] sm:$0xff]  ;;  %7742 = vmatpush.msra.mxu3 %v3630_v39  ;;  %v3669_v47 = vld [vmem:[%s14376_s1 + $0x288] sm:$0xff]  ;;  %v3666_v51 = vld [vmem:[%s14376_s1 + $0x270] sm:$0xff]  ;;  %vm3072_vm3 = vcmask 818176   ;;  %vm3459_vm4 = vcmask 998400  }
  0x17   : > { %4086 = vmatpush.msra.mxu1 %v3678_v40  ;;  %7758 = vmatpush.msra.mxu2 %v3678_v40  ;;  %v3615_v54 = vld [vmem:[%s14376_s1 + $0xd8] sm:$0xff]  ;;  %v3612_v56 = vld [vmem:[%s14376_s1 + $0xc0] sm:$0xff]  ;;  %v3609_v58 = vld [vmem:[%s14376_s1 + $0xa8] sm:$0xff]  ;;  %vm7159_vm5 = vcmask 1041409   ;;  %vm7162_vm6 = vcmask 1042434   ;;  %vm7165_vm7 = vcmask 1043459   ;;  %s7282_s25 = scalar_lea.hbm %s14381_s6, %s8357_s9 }
  0x18   : > { %s7773_s11 = smul.u32 136, %s250_s10  ;;  %3686 = vmatpush.msra.mxu0 %v3627_v41  ;;  %7743 = vmatpush.msra.mxu3 %v3627_v41  ;;  %v3663_v55 = vld [vmem:[%s14376_s1 + $0x258] sm:$0xff]  ;;  %v3660_v57 = vld [vmem:[%s14376_s1 + $0x240] sm:$0xff]  ;;  %v3657_v61 = vld [vmem:[%s14376_s1 + $0x228] sm:$0xff]  ;;  %vm7168_vm8 = vcmask 1044484   ;;  %vm7171_vm9 = vcmask 1045509  }
  0x19   : > { %4087 = vmatpush.msra.mxu1 %v3675_v42  ;;  %7759 = vmatpush.msra.mxu2 %v3675_v42  ;;  %v3606_v63 = vld [vmem:[%s14376_s1 + $0x90] sm:$0xff]  ;;  %vm7174_vm10 = vcmask 1046534   ;;  %vm7177_vm11 = vcmask 1047559   ;;  %s245_s12 = sand.u32 1, %s8263_s22  }
  0x1a   : > { %s8364_s14 = scalar_lea.vmem %s14375_s0, %s7773_s11  ;;  %3687 = vmatpush.msra.mxu0 %v3624_v43  ;;  %7744 = vmatpush.msra.mxu3 %v3624_v43  ;;  %s7350_s13 = sshll.u32 %s245_s12, 3 }
  0x1b   : > { %v639_v0 = vld [vmem:[%s8364_s14 + $0x3] sm:$0xff]  ;;  %v640_v6 = vld [vmem:[%s8364_s14 + $0xb] sm:$0xff]  ;;  %v386_v9 = vld [vmem:[%s8364_s14 + $0x19] sm:$0xff]  ;;  %4088 = vmatpush.msra.mxu1 %v3672_v44  ;;  %7760 = vmatpush.msra.mxu2 %v3672_v44  ;;  %s7272_s28 = scalar_lea.sflag [#allocation3], %s245_s12 }
  0x1c   : > { %v383_v1 = vld [vmem:[%s8364_s14 + $0x1] sm:$0xff]  ;;  %v384_v2 = vld [vmem:[%s8364_s14 + $0x9] sm:$0xff]  ;;  %2047 = vrot.lane.b32.xlu1 %v639_v0, %s8273_s15  ;;  %v385_v8 = vld [vmem:[%s8364_s14 + $0x11] sm:$0xff]  ;;  %3688 = vmatpush.msra.mxu0 %v3621_v45 }
  0x1d   : > { %v7817_v3 = vpack.i.bf16 %v384_v2, %v383_v1  ;;  %v512_v4 = vld [vmem:[%s8364_s14 + $0xa] sm:$0xff]  ;;  %v511_v7 = vld [vmem:[%s8364_s14 + $0x2] sm:$0xff]  ;;  %v7822_v10 = vpack.i.bf16 %v386_v9, %v385_v8  ;;  %v513_v11 = vld [vmem:[%s8364_s14 + $0x12] sm:$0xff]  ;;  %4089 = vmatpush.msra.mxu1 %v3669_v47  ;;  %7745 = vmatpush.msra.mxu3 %v3621_v45 }
  0x1e   : > { %1537 = vrot.lane.b32.xlu2 %v512_v4, %s8274_s16  ;;  %v767_v5 = vld [vmem:[%s8364_s14 + $0x4] sm:$0xff]  ;;  %v768_v12 = vld [vmem:[%s8364_s14 + $0xc] sm:$0xff]  ;;  %v769_v15 = vld [vmem:[%s8364_s14 + $0x14] sm:$0xff]  ;;  %3689 = vmatpush.msra.mxu0 %v3618_v50 }
  0x1f   : > { %7818 = vrot.lane.b32.xlu0 %v7817_v3, %s8275_s17  ;;  %v387_v13 = vld [vmem:[%s8364_s14 + $0x21] sm:$0xff]  ;;  %v449_v14 = vld [vmem:[%s8364_s14 + $0x231] sm:$0xff]  ;;  %v388_v24 = vld [vmem:[%s8364_s14 + $0x29] sm:$0xff]  ;;  %4090 = vmatpush.msra.mxu1 %v3666_v51 }
  0x20   : > { %v7827_v16 = vpack.i.bf16 %v387_v13, %v449_v14  ;;  %v641_v17 = vld [vmem:[%s8364_s14 + $0x13] sm:$0xff]  ;;  %v642_v19 = vld [vmem:[%s8364_s14 + $0x1b] sm:$0xff]  ;;  %v771_v30 = vld [vmem:[%s8364_s14 + $0x24] sm:$0xff]  ;;  %3690 = vmatpush.msra.mxu0 %v3615_v54  ;;  %7746 = vmatpush.msra.mxu3 %v3618_v50 }
  0x21   : > { %v577_v18 = vld [vmem:[%s8364_s14 + $0x232] sm:$0xff]  ;;  %v514_v20 = vld [vmem:[%s8364_s14 + $0x1a] sm:$0xff]  ;;  %v515_v26 = vld [vmem:[%s8364_s14 + $0x22] sm:$0xff]  ;;  %4091 = vmatpush.msra.mxu1 %v3663_v55  ;;  %7761 = vmatpush.msra.mxu2 %v3669_v47 }
  0x22   : > { %v770_v21 = vld [vmem:[%s8364_s14 + $0x1c] sm:$0xff]  ;;  %v833_v22 = vld [vmem:[%s8364_s14 + $0x234] sm:$0xff]  ;;  %v516_v37 = vld [vmem:[%s8364_s14 + $0x2a] sm:$0xff]  ;;  %3691 = vmatpush.msra.mxu0 %v3612_v56  ;;  %7747 = vmatpush.msra.mxu3 %v3615_v54 }
  0x23   : > { %v705_v23 = vld [vmem:[%s8364_s14 + $0x233] sm:$0xff]  ;;  %v706_v29 = vld [vmem:[%s8364_s14 + $0x23b] sm:$0xff]  ;;  %v643_v31 = vld [vmem:[%s8364_s14 + $0x23] sm:$0xff]  ;;  %4092 = vmatpush.msra.mxu1 %v3660_v57  ;;  %7762 = vmatpush.msra.mxu2 %v3666_v51 }
  0x24   : > { %2559 = vrot.lane.b32.xlu1 %v767_v5, %s8276_s18  ;;  %v450_v25 = vld [vmem:[%s8364_s14 + $0x239] sm:$0xff]  ;;  %v389_v32 = vld [vmem:[%s8364_s14 + $0x31] sm:$0xff]  ;;  %v451_v33 = vld [vmem:[%s8364_s14 + $0x241] sm:$0xff]  ;;  %3692 = vmatpush.msra.mxu0 %v3609_v58 }
  0x25   : > { %v7832_v27 = vpack.i.bf16 %v388_v24, %v450_v25  ;;  %v578_v28 = vld [vmem:[%s8364_s14 + $0x23a] sm:$0xff]  ;;  %v7837_v36 = vpack.i.bf16 %v389_v32, %v451_v33  ;;  %v644_v46 = vld [vmem:[%s8364_s14 + $0x2b] sm:$0xff]  ;;  %v707_v48 = vld [vmem:[%s8364_s14 + $0x243] sm:$0xff]  ;;  %4093 = vmatpush.msra.mxu1 %v3657_v61  ;;  %7748 = vmatpush.msra.mxu3 %v3612_v56 }
  0x26   : > { %2049 = vrot.lane.b32.xlu2 %v640_v6, %s8273_s15  ;;  %v834_v38 = vld [vmem:[%s8364_s14 + $0x23c] sm:$0xff]  ;;  %v452_v53 = vld [vmem:[%s8364_s14 + $0x249] sm:$0xff]  ;;  %3693 = vmatpush.msra.mxu0 %v3606_v63  ;;  %v645_v8 = vld [vmem:[%s8364_s14 + $0x33] sm:$0xff] }
  0x27   : > { %1535 = vrot.lane.b32.xlu0 %v511_v7, %s8274_s16  ;;  %v579_v49 = vld [vmem:[%s8364_s14 + $0x242] sm:$0xff]  ;;  %v390_v52 = vld [vmem:[%s8364_s14 + $0x39] sm:$0xff]  ;;  %v772_v62 = vld [vmem:[%s8364_s14 + $0x2c] sm:$0xff]  ;;  %7749 = vmatpush.msra.mxu3 %v3609_v58 }
  0x28   : > { %v835_v59 = vld [vmem:[%s8364_s14 + $0x244] sm:$0xff]  ;;  %v7842_v60 = vpack.i.bf16 %v390_v52, %v452_v53  ;;  %v3654_v0 = vld [vmem:[%s14376_s1 + $0x210] sm:$0xff]  ;;  %v3603_v1 = vld [vmem:[%s14376_s1 + $0x78] sm:$0xff]  ;;  %7763 = vmatpush.msra.mxu2 %v3663_v55 }
  0x29   : > { %4094 = vmatpush.msra.mxu1 %v3654_v0  ;;  %v3651_v2 = vld [vmem:[%s14376_s1 + $0x1f8] sm:$0xff]  ;;  %3694 = vmatpush.msra.mxu0 %v3603_v1  ;;  %v580_v3 = vld [vmem:[%s8364_s14 + $0x24a] sm:$0xff]  ;;  %v3600_v4 = vld [vmem:[%s14376_s1 + $0x60] sm:$0xff] }
  0x2a   : > { %v3648_v5 = vld [vmem:[%s14376_s1 + $0x1e0] sm:$0xff]  ;;  %v3597_v6 = vld [vmem:[%s14376_s1 + $0x48] sm:$0xff]  ;;  %v517_v9 = vld [vmem:[%s8364_s14 + $0x32] sm:$0xff]  ;;  %7750 = vmatpush.msra.mxu3 %v3606_v63  ;;  %7764 = vmatpush.msra.mxu2 %v3660_v57 }
  0x2b   : > { %4095 = vmatpush.msra.mxu1 %v3651_v2  ;;  %3695 = vmatpush.msra.mxu0 %v3600_v4  ;;  %v3645_v7 = vld [vmem:[%s14376_s1 + $0x1c8] sm:$0xff]  ;;  %v3639_v13 = vld [vmem:[%s14376_s1 + $0x198] sm:$0xff]  ;;  %v255_v39 = vld [vmem:[%s8364_s14] sm:$0xff] }
  0x2c   : > { %7823 = vrot.lane.b32.xlu1 %v7822_v10, %s8275_s17  ;;  %v3594_v10 = vld [vmem:[%s14376_s1 + $0x30] sm:$0xff]  ;;  %7751 = vmatpush.msra.mxu3 %v3603_v1  ;;  %v582_v50 = vld [vmem:[%s8364_s14 + $0x25a] sm:$0xff]  ;;  %v256_v51 = vld [vmem:[%s8364_s14 + $0x8] sm:$0xff] }
  0x2d   : > { %4096 = vmatpush.msra.mxu1 %v3648_v5  ;;  %3696 = vmatpush.msra.mxu0 %v3597_v6  ;;  %v581_v25 = vld [vmem:[%s8364_s14 + $0x252] sm:$0xff]  ;;  %v455_v55 = vld [vmem:[%s8364_s14 + $0x261] sm:$0xff] }
  0x2e   : > { %1539 = vrot.lane.b32.xlu2 %v513_v11, %s8274_s16  ;;  %v3642_v11 = vld [vmem:[%s14376_s1 + $0x1b0] sm:$0xff]  ;;  %7752 = vmatpush.msra.mxu3 %v3600_v4  ;;  %v775_v1 = vld [vmem:[%s8364_s14 + $0x44] sm:$0xff] }
  0x2f   : > { %2561 = vrot.lane.b32.xlu0 %v768_v12, %s8276_s18  ;;  %4097 = vmatpush.msra.mxu1 %v3645_v7  ;;  %v3591_v12 = vld [vmem:[%s14376_s1 + $0x18] sm:$0xff]  ;;  %v257_v63 = vld [vmem:[%s8364_s14 + $0x10] sm:$0xff] }
  0x30   : > { %3697 = vmatpush.msra.mxu0 %v3594_v10  ;;  %7765 = vmatpush.msra.mxu2 %v3657_v61  ;;  %v393_v54 = vld [vmem:[%s8364_s14 + $0x51] sm:$0xff] }
  0x31   : > { %4098 = vmatpush.msra.mxu1 %v3642_v11  ;;  %7753 = vmatpush.msra.mxu3 %v3597_v6 }
  0x32   : > { %3698 = vmatpush.msra.mxu0 %v3591_v12  ;;  %7766 = vmatpush.msra.mxu2 %v3654_v0  ;;  %v7857_v0 = vpack.i.bf16 %v393_v54, %v455_v55  ;;  %v649_v54 = vld [vmem:[%s8364_s14 + $0x53] sm:$0xff] }
  0x33   : > { %4099 = vmatpush.msra.mxu1 %v3639_v13  ;;  %7754 = vmatpush.msra.mxu3 %v3594_v10  ;;  %v321_v10 = vld [vmem:[%s8364_s14 + $0x230] sm:$0xff] }
  0x34   : > { %2563 = vrot.lane.b32.xlu1 %v769_v15, %s8276_s18  ;;  %v3588_v15 = vld [vmem:[%s14376_s1] sm:$0xff]  ;;  %7767 = vmatpush.msra.mxu2 %v3651_v2 }
  0x35   : > { %3699 = vmatpush.msra.mxu0 %v3588_v15  ;;  %7755 = vmatpush.msra.mxu3 %v3591_v12  ;;  %v648_v12 = vld [vmem:[%s8364_s14 + $0x4b] sm:$0xff] }
  0x36   : > { %7828 = vrot.lane.b32.xlu2 %v7827_v16, %s8275_s17  ;;  %v773_v16 = vld [vmem:[%s8364_s14 + $0x34] sm:$0xff]  ;;  %7768 = vmatpush.msra.mxu2 %v3648_v5 }
  0x37   : > { %2051 = vrot.lane.b32.xlu0 %v641_v17, %s8273_s15  ;;  %v3636_v17 = vld [vmem:[%s14376_s1 + $0x180] sm:$0xff]  ;;  %7756 = vmatpush.msra.mxu3 %v3588_v15 }
  0x38   : > { %4100 = vmatpush.msra.mxu1 %v3636_v17  ;;  %7769 = vmatpush.msra.mxu2 %v3645_v7 }
  0x3a   : > { %7770 = vmatpush.msra.mxu2 %v3642_v11 }
  0x3c   : > { %1667 = vrot.lane.b32.xlu1 %v577_v18, %s8274_s16  ;;  %v836_v18 = vld [vmem:[%s8364_s14 + $0x24c] sm:$0xff]  ;;  %7771 = vmatpush.msra.mxu2 %v3639_v13 }
  0x3d   : > { %v520_v13 = vld [vmem:[%s8364_s14 + $0x4a] sm:$0xff] }
  0x3e   : > { %2053 = vrot.lane.b32.xlu2 %v642_v19, %s8273_s15  ;;  %v708_v19 = vld [vmem:[%s8364_s14 + $0x24b] sm:$0xff]  ;;  %7772 = vmatpush.msra.mxu2 %v3636_v17 }
  0x3f   : > { %1541 = vrot.lane.b32.xlu0 %v514_v20, %s8274_s16  ;;  %v391_v20 = vld [vmem:[%s8364_s14 + $0x41] sm:$0xff] }
  0x44   : > { %2565 = vrot.lane.b32.xlu1 %v770_v21, %s8276_s18  ;;  %v453_v21 = vld [vmem:[%s8364_s14 + $0x251] sm:$0xff] }
  0x45   : > { %v7847_v24 = vpack.i.bf16 %v391_v20, %v453_v21 }
  0x46   : > { %2691 = vrot.lane.b32.xlu2 %v833_v22, %s8276_s18 }
  0x47   : > { %2179 = vrot.lane.b32.xlu0 %v705_v23, %s8273_s15  ;;  %v518_v23 = vld [vmem:[%s8364_s14 + $0x3a] sm:$0xff] }
  0x4c   : > { %1543 = vrot.lane.b32.xlu1 %v515_v26, %s8274_s16 }
  0x4e   : > { %1669 = vrot.lane.b32.xlu2 %v578_v28, %s8274_s16  ;;  %v774_v28 = vld [vmem:[%s8364_s14 + $0x3c] sm:$0xff] }
  0x4f   : > { %7833 = vrot.lane.b32.xlu0 %v7832_v27, %s8275_s17  ;;  %v709_v27 = vld [vmem:[%s8364_s14 + $0x253] sm:$0xff] }
  0x54   : > { %2181 = vrot.lane.b32.xlu1 %v706_v29, %s8273_s15  ;;  %v646_v29 = vld [vmem:[%s8364_s14 + $0x3b] sm:$0xff] }
  0x56   : > { %2567 = vrot.lane.b32.xlu2 %v771_v30, %s8276_s18  ;;  %v392_v30 = vld [vmem:[%s8364_s14 + $0x49] sm:$0xff] }
  0x57   : > { %2055 = vrot.lane.b32.xlu0 %v643_v31, %s8273_s15  ;;  %v454_v31 = vld [vmem:[%s8364_s14 + $0x259] sm:$0xff] }
  0x58   : > { %v7852_v35 = vpack.i.bf16 %v392_v30, %v454_v31  ;;  %v456_v30 = vld [vmem:[%s8364_s14 + $0x269] sm:$0xff] }
  0x5c   : > { %7838 = vrot.lane.b32.xlu1 %v7837_v36, %s8275_s17  ;;  %v519_v36 = vld [vmem:[%s8364_s14 + $0x42] sm:$0xff] }
  0x5e   : > { %1545 = vrot.lane.b32.xlu2 %v516_v37, %s8274_s16  ;;  %v837_v37 = vld [vmem:[%s8364_s14 + $0x254] sm:$0xff] }
  0x5f   : > { %2693 = vrot.lane.b32.xlu0 %v834_v38, %s8276_s18 }
  0x64   : > { %2057 = vrot.lane.b32.xlu1 %v644_v46, %s8273_s15  ;;  %v647_v46 = vld [vmem:[%s8364_s14 + $0x43] sm:$0xff] }
  0x66   : > { %2183 = vrot.lane.b32.xlu2 %v707_v48, %s8273_s15 }
  0x67   : > { %1671 = vrot.lane.b32.xlu0 %v579_v49, %s8274_s16  ;;  %v710_v49 = vld [vmem:[%s8364_s14 + $0x25b] sm:$0xff] }
  0x6c   : > { %2695 = vrot.lane.b32.xlu1 %v835_v59, %s8276_s18 }
  0x6e   : > { %7843 = vrot.lane.b32.xlu2 %v7842_v60, %s8275_s17 }
  0x6f   : > { %2569 = vrot.lane.b32.xlu0 %v772_v62, %s8276_s18  ;;  %v838_v62 = vld [vmem:[%s8364_s14 + $0x25c] sm:$0xff] }
  0x74   : > { %1673 = vrot.lane.b32.xlu1 %v580_v3, %s8274_s16 }
  0x76   : > { %2059 = vrot.lane.b32.xlu2 %v645_v8, %s8273_s15 }
  0x77   : > { %1547 = vrot.lane.b32.xlu0 %v517_v9, %s8274_s16  ;;  %v583_v9 = vld [vmem:[%s8364_s14 + $0x262] sm:$0xff] }
  0x78   : > { %v8534_v14 = vpop.permute.xlu2 %1537 }
  0x7c   : > { %2571 = vrot.lane.b32.xlu1 %v773_v16, %s8276_s18  ;;  %v258_v16 = vld [vmem:[%s8364_s14 + $0x18] sm:$0xff] }
  0x7e   : > { %2697 = vrot.lane.b32.xlu2 %v836_v18, %s8276_s18 }
  0x7f   : > { %2185 = vrot.lane.b32.xlu0 %v708_v19, %s8273_s15 }
  0x80   : > { %v2050_v22 = vpop.permute.xlu2 %2049 }
  0x81   : > { %v3203_v57 = vsel %vm3201_vm1, %v8534_v14, %v2050_v22 }
  0x84   : > { %1549 = vrot.lane.b32.xlu1 %v518_v23, %s8274_s16  ;;  %v776_v23 = vld [vmem:[%s8364_s14 + $0x4c] sm:$0xff] }
  0x86   : > { %1675 = vrot.lane.b32.xlu2 %v581_v25, %s8274_s16  ;;  %v711_v25 = vld [vmem:[%s8364_s14 + $0x263] sm:$0xff] }
  0x87   : > { %7848 = vrot.lane.b32.xlu0 %v7847_v24, %s8275_s17  ;;  %v839_v24 = vld [vmem:[%s8364_s14 + $0x264] sm:$0xff] }
  0x88   : > { %v8555_v26 = vpop.permute.xlu2 %1539 }
  0x8c   : > { %2187 = vrot.lane.b32.xlu1 %v709_v27, %s8273_s15 }
  0x8e   : > { %2573 = vrot.lane.b32.xlu2 %v774_v28, %s8276_s18  ;;  %v2048_v32 = vpop.permute.xlu1 %2047 }
  0x8f   : > { %2061 = vrot.lane.b32.xlu0 %v646_v29, %s8273_s15  ;;  %v394_v29 = vld [vmem:[%s8364_s14 + $0x59] sm:$0xff] }
  0x90   : > { %v8565_v33 = vpop.permute.xlu2 %7828 }
  0x91   : > { %v7819_v34 = vpop.permute.xlu0 %7818  ;;  %v7830_v6 = vunpack.i.l.bf16 %v8565_v33 }
  0x92   : > { %v7820_v38 = vunpack.i.l.bf16 %v7819_v34  ;;  %v7821_v47 = vunpack.i.h.bf16 %v7819_v34 }
  0x93   : > { %v3010_v15 = vsel %vm2943_vm0, %v321_v10, %v7830_v6  ;;  %v522_v6 = vld [vmem:[%s8364_s14 + $0x5a] sm:$0xff] }
  0x94   : > { %7853 = vrot.lane.b32.xlu1 %v7852_v35, %s8275_s17  ;;  %v2944_v43 = vsel %vm2943_vm0, %v255_v39, %v7820_v38  ;;  %v2945_v53 = vsel %vm2943_vm0, %v256_v51, %v7821_v47  ;;  %v521_v35 = vld [vmem:[%s8364_s14 + $0x52] sm:$0xff]  ;;  %v7862_v38 = vpack.i.bf16 %v394_v29, %v456_v30  ;;  %v584_v39 = vld [vmem:[%s8364_s14 + $0x26a] sm:$0xff]  ;;  %v778_v30 = vld [vmem:[%s8364_s14 + $0x5c] sm:$0xff] }
  0x95   : > { %v8600_v60 = vsel %vm3072_vm3, %v2945_v53, %v8534_v14  ;;  %v260_v51 = vld [vmem:[%s8364_s14 + $0x28] sm:$0xff] }
  0x96   : > { %1551 = vrot.lane.b32.xlu2 %v519_v36, %s8274_s16  ;;  %v2560_v40 = vpop.permute.xlu1 %2559  ;;  %v7831_v36 = vunpack.i.h.bf16 %v8565_v33 }
  0x97   : > { %2699 = vrot.lane.b32.xlu0 %v837_v37, %s8276_s18 }
  0x98   : > { %v8573_v41 = vpop.permute.xlu2 %2053 }
  0x99   : > { %v1536_v42 = vpop.permute.xlu0 %1535 }
  0x9a   : > { %v3202_v44 = vsel %vm3201_vm1, %v1536_v42, %v2048_v32  ;;  %v8578_v45 = vsel %vm3072_vm3, %v2944_v43, %v1536_v42 }
  0x9b   : > { %3700 = vmatmul.f32.vlgmr.msra.gmra.mxu0 %v8578_v45  ;;  %v8583_v48 = vsel %vm3330_vm2, %v3202_v44, %v2560_v40  ;;  %v259_v40 = vld [vmem:[%s8364_s14 + $0x20] sm:$0xff] }
  0x9c   : > { %7353 = vmatmul.msk.f32.vlgmr.msra.gmra.mxu1 %vm3459_vm4, %v8583_v48  ;;  %2063 = vrot.lane.b32.xlu1 %v647_v46, %s8273_s15  ;;  %v2948_v33 = vsel %vm2943_vm0, %v259_v40, %v7831_v36  ;;  %v322_v46 = vld [vmem:[%s8364_s14 + $0x238] sm:$0xff] }
  0x9e   : > { %2189 = vrot.lane.b32.xlu2 %v710_v49, %s8273_s15  ;;  %v7824_v52 = vpop.permute.xlu1 %7823 }
  0x9f   : > { %1677 = vrot.lane.b32.xlu0 %v582_v50, %s8274_s16  ;;  %v7825_v58 = vunpack.i.l.bf16 %v7824_v52  ;;  %v7826_v14 = vunpack.i.h.bf16 %v7824_v52  ;;  %v712_v50 = vld [vmem:[%s8364_s14 + $0x26b] sm:$0xff]  ;;  %v777_v52 = vld [vmem:[%s8364_s14 + $0x54] sm:$0xff] }
  0xa0   : > { %v2692_v56 = vpop.permute.xlu2 %2691 }
  0xa1   : > { %v2562_v59 = vpop.permute.xlu0 %2561  ;;  %v2946_v2 = vsel %vm2943_vm0, %v257_v63, %v7825_v58  ;;  %v2947_v21 = vsel %vm2943_vm0, %v258_v16, %v7826_v14  ;;  %v457_v58 = vld [vmem:[%s8364_s14 + $0x271] sm:$0xff]  ;;  %v650_v14 = vld [vmem:[%s8364_s14 + $0x5b] sm:$0xff] }
  0xa2   : > { %v8603_v61 = vsel %vm3330_vm2, %v3203_v57, %v2562_v59  ;;  %v8617_v4 = vsel %vm3072_vm3, %v2946_v2, %v8555_v26  ;;  %v395_v57 = vld [vmem:[%s8364_s14 + $0x61] sm:$0xff]  ;;  %v713_v16 = vld [vmem:[%s8364_s14 + $0x273] sm:$0xff] }
  0xa3   : > { %3703 = vmatmul.f32.gmra.mxu0 %v8600_v60 }
  0xa4   : > { %7354 = vmatmul.msk.f32.gmra.mxu1 %vm3459_vm4, %v8603_v61  ;;  %2701 = vrot.lane.b32.xlu1 %v838_v62, %s8276_s18 }
  0xa6   : > { %7858 = vrot.lane.b32.xlu2 %v7857_v0, %s8275_s17  ;;  %v2564_v3 = vpop.permute.xlu1 %2563 }
  0xa7   : > { %2575 = vrot.lane.b32.xlu0 %v775_v1, %s8276_s18  ;;  %v7867_v1 = vpack.i.bf16 %v395_v57, %v457_v58  ;;  %v779_v57 = vld [vmem:[%s8364_s14 + $0x64] sm:$0xff]  ;;  %v842_v58 = vld [vmem:[%s8364_s14 + $0x27c] sm:$0xff] }
  0xa8   : > { %v8619_v5 = vpop.permute.xlu2 %1669 }
  0xa9   : > { %v2052_v7 = vpop.permute.xlu0 %2051 }
  0xaa   : > { %v3204_v8 = vsel %vm3201_vm1, %v8555_v26, %v2052_v7  ;;  %v840_v7 = vld [vmem:[%s8364_s14 + $0x26c] sm:$0xff] }
  0xab   : > { %3706 = vmatmul.f32.gmra.mxu0 %v8617_v4  ;;  %v8628_v11 = vsel %vm3330_vm2, %v3204_v8, %v2564_v3 }
  0xac   : > { %7355 = vmatmul.msk.f32.gmra.mxu1 %vm3459_vm4, %v8628_v11  ;;  %1679 = vrot.lane.b32.xlu1 %v583_v9, %s8274_s16 }
  0xae   : > { %2065 = vrot.lane.b32.xlu2 %v648_v12, %s8273_s15  ;;  %v1668_v17 = vpop.permute.xlu1 %1667 }
  0xaf   : > { %1553 = vrot.lane.b32.xlu0 %v520_v13, %s8274_s16  ;;  %v8640_v18 = vsel %vm3072_vm3, %v3010_v15, %v1668_v17 }
  0xb0   : > { %14876 = vst [vmem:[#allocation5_spill] sm:$0xff] %v8640_v18  ;;  %v2568_v19 = vpop.permute.xlu2 %2567  ;;  %3898 = vmatmul.f32.vlgmr.msra.gmra.mxu3 %v8640_v18 }
  0xb1   : > { %v1542_v20 = vpop.permute.xlu0 %1541 }
  0xb2   : > { %v8645_v22 = vsel %vm3072_vm3, %v2947_v21, %v1542_v20  ;;  %v3205_v26 = vsel %vm3201_vm1, %v1542_v20, %v8573_v41  ;;  %v396_v21 = vld [vmem:[%s8364_s14 + $0x69] sm:$0xff] }
  0xb3   : > { %3709 = vmatmul.f32.gmra.mxu0 %v8645_v22 }
  0xb4   : > { %2577 = vrot.lane.b32.xlu1 %v776_v23, %s8276_s18  ;;  %v458_v23 = vld [vmem:[%s8364_s14 + $0x279] sm:$0xff] }
  0xb5   : > { %v7872_v29 = vpack.i.bf16 %v396_v21, %v458_v23 }
  0xb6   : > { %2703 = vrot.lane.b32.xlu2 %v839_v24, %s8276_s18  ;;  %v2566_v27 = vpop.permute.xlu1 %2565 }
  0xb7   : > { %2191 = vrot.lane.b32.xlu0 %v711_v25, %s8273_s15  ;;  %v8657_v28 = vsel %vm3330_vm2, %v3205_v26, %v2566_v27  ;;  %v841_v27 = vld [vmem:[%s8364_s14 + $0x274] sm:$0xff] }
  0xb8   : > { %v8661_v31 = vpop.permute.xlu2 %1545  ;;  %7356 = vmatmul.msk.f32.gmra.mxu1 %vm3459_vm4, %v8657_v28 }
  0xb9   : > { %v2180_v32 = vpop.permute.xlu0 %2179 }
  0xba   : > { %v3268_v34 = vsel %vm3201_vm1, %v1668_v17, %v2180_v32  ;;  %v585_v17 = vld [vmem:[%s8364_s14 + $0x272] sm:$0xff] }
  0xbb   : > { %v8669_v37 = vsel %vm3330_vm2, %v3268_v34, %v2692_v56 }
  0xbc   : > { %14877 = vst [vmem:[#allocation6_spill] sm:$0xff] %v8669_v37  ;;  %7419 = vmatmul.msk.f32.vlgmr.msra.gmra.mxu2 %vm3459_vm4, %v8669_v37  ;;  %1555 = vrot.lane.b32.xlu1 %v521_v35, %s8274_s16 }
  0xbe   : > { %1681 = vrot.lane.b32.xlu2 %v584_v39, %s8274_s16  ;;  %v1544_v41 = vpop.permute.xlu1 %1543 }
  0xbf   : > { %7863 = vrot.lane.b32.xlu0 %v7862_v38, %s8275_s17  ;;  %v8680_v42 = vsel %vm3072_vm3, %v2948_v33, %v1544_v41  ;;  %v586_v33 = vld [vmem:[%s8364_s14 + $0x27a] sm:$0xff] }
  0xc0   : > { %v2184_v43 = vpop.permute.xlu2 %2183  ;;  %3712 = vmatmul.f32.gmra.mxu0 %v8680_v42 }
  0xc1   : > { %v7834_v44 = vpop.permute.xlu0 %7833 }
  0xc2   : > { %v7836_v47 = vunpack.i.h.bf16 %v7834_v44  ;;  %v7835_v49 = vunpack.i.l.bf16 %v7834_v44  ;;  %v651_v44 = vld [vmem:[%s8364_s14 + $0x63] sm:$0xff] }
  0xc4   : > { %v3011_v53 = vsel %vm2943_vm0, %v322_v46, %v7835_v49  ;;  %2193 = vrot.lane.b32.xlu1 %v712_v50, %s8273_s15  ;;  %v2949_v56 = vsel %vm2943_vm0, %v260_v51, %v7836_v47  ;;  %v523_v46 = vld [vmem:[%s8364_s14 + $0x62] sm:$0xff]  ;;  %v261_v49 = vld [vmem:[%s8364_s14 + $0x30] sm:$0xff] }
  0xc5   : > { %v8692_v55 = vsel %vm3072_vm3, %v3011_v53, %v8619_v5  ;;  %v8702_v62 = vsel %vm3072_vm3, %v2949_v56, %v8661_v31 }
  0xc6   : > { %14878 = vst [vmem:[#allocation7_spill] sm:$0xff] %v8692_v55  ;;  %3901 = vmatmul.f32.gmra.mxu3 %v8692_v55  ;;  %2579 = vrot.lane.b32.xlu2 %v777_v52, %s8276_s18  ;;  %v2182_v59 = vpop.permute.xlu1 %2181 }
  0xc7   : > { %2067 = vrot.lane.b32.xlu0 %v649_v54, %s8273_s15  ;;  %14879 = vst [vmem:[#allocation8_spill] sm:$0xff] %v8702_v62  ;;  %v3269_v10 = vsel %vm3201_vm1, %v8619_v5, %v2182_v59  ;;  %v714_v59 = vld [vmem:[%s8364_s14 + $0x27b] sm:$0xff] }
  0xc8   : > { %v8704_v63 = vpop.permute.xlu2 %7843  ;;  %3715 = vmatmul.f32.gmra.mxu0 %v8702_v62  ;;  %v679_v62 = vld [vmem:[%s8364_s14 + $0x153] sm:$0xff] }
  0xc9   : > { %v2056_v0 = vpop.permute.xlu0 %2055  ;;  %v7845_v38 = vunpack.i.l.bf16 %v8704_v63 }
  0xca   : > { %v3206_v2 = vsel %vm3201_vm1, %v1544_v41, %v2056_v0 }
  0xcb   : > { %v8709_v3 = vsel %vm3330_vm2, %v3206_v2, %v2568_v19  ;;  %v323_v19 = vld [vmem:[%s8364_s14 + $0x240] sm:$0xff] }
  0xcc   : > { %7357 = vmatmul.msk.f32.gmra.mxu1 %vm3459_vm4, %v8709_v3  ;;  %7868 = vrot.lane.b32.xlu1 %v7867_v1, %s8275_s17 }
  0xce   : > { %1557 = vrot.lane.b32.xlu2 %v522_v6, %s8274_s16  ;;  %v7839_v8 = vpop.permute.xlu1 %7838  ;;  %v397_v6 = vld [vmem:[%s8364_s14 + $0x71] sm:$0xff] }
  0xcf   : > { %2705 = vrot.lane.b32.xlu0 %v840_v7, %s8276_s18  ;;  %v7840_v15 = vunpack.i.l.bf16 %v7839_v8  ;;  %v7841_v47 = vunpack.i.h.bf16 %v7839_v8  ;;  %v459_v7 = vld [vmem:[%s8364_s14 + $0x281] sm:$0xff] }
  0xd0   : > { %v2060_v9 = vpop.permute.xlu2 %2059 }
  0xd1   : > { %v2694_v12 = vpop.permute.xlu0 %2693  ;;  %v3012_v5 = vsel %vm2943_vm0, %v323_v19, %v7840_v15  ;;  %v2950_v54 = vsel %vm2943_vm0, %v261_v49, %v7841_v47  ;;  %v262_v19 = vld [vmem:[%s8364_s14 + $0x38] sm:$0xff] }
  0xd2   : > { %v8721_v13 = vsel %vm3330_vm2, %v3269_v10, %v2694_v12 }
  0xd3   : > { %14880 = vst [vmem:[#allocation9_spill] sm:$0xff] %v8721_v13  ;;  %7420 = vmatmul.msk.f32.gmra.mxu2 %vm3459_vm4, %v8721_v13 }
  0xd4   : > { %2069 = vrot.lane.b32.xlu1 %v650_v14, %s8273_s15  ;;  %v524_v14 = vld [vmem:[%s8364_s14 + $0x6a] sm:$0xff] }
  0xd6   : > { %2195 = vrot.lane.b32.xlu2 %v713_v16, %s8273_s15  ;;  %v2058_v20 = vpop.permute.xlu1 %2057  ;;  %v7877_v16 = vpack.i.bf16 %v397_v6, %v459_v7  ;;  %v653_v6 = vld [vmem:[%s8364_s14 + $0x73] sm:$0xff] }
  0xd7   : > { %1683 = vrot.lane.b32.xlu0 %v585_v17, %s8274_s16  ;;  %v3207_v39 = vsel %vm3201_vm1, %v8661_v31, %v2058_v20  ;;  %v587_v17 = vld [vmem:[%s8364_s14 + $0x282] sm:$0xff] }
  0xd8   : > { %v2698_v24 = vpop.permute.xlu2 %2697 }
  0xd9   : > { %v1672_v25 = vpop.permute.xlu0 %1671 }
  0xda   : > { %v8736_v26 = vsel %vm3072_vm3, %v3012_v5, %v1672_v25  ;;  %v3270_v32 = vsel %vm3201_vm1, %v1672_v25, %v2184_v43  ;;  %v324_v43 = vld [vmem:[%s8364_s14 + $0x248] sm:$0xff] }
  0xdb   : > { %14881 = vst [vmem:[#allocation10_spill] sm:$0xff] %v8736_v26  ;;  %3904 = vmatmul.f32.gmra.mxu3 %v8736_v26  ;;  %v3013_v31 = vsel %vm2943_vm0, %v324_v43, %v7845_v38  ;;  %v652_v38 = vld [vmem:[%s8364_s14 + $0x6b] sm:$0xff] }
  0xdc   : > { %2707 = vrot.lane.b32.xlu1 %v841_v27, %s8276_s18  ;;  %v460_v43 = vld [vmem:[%s8364_s14 + $0x289] sm:$0xff] }
  0xde   : > { %7873 = vrot.lane.b32.xlu2 %v7872_v29, %s8275_s17  ;;  %v2696_v34 = vpop.permute.xlu1 %2695  ;;  %v715_v29 = vld [vmem:[%s8364_s14 + $0x283] sm:$0xff] }
  0xdf   : > { %2581 = vrot.lane.b32.xlu0 %v778_v30, %s8276_s18  ;;  %v8746_v35 = vsel %vm3330_vm2, %v3270_v32, %v2696_v34  ;;  %v263_v30 = vld [vmem:[%s8364_s14 + $0x40] sm:$0xff]  ;;  %v780_v32 = vld [vmem:[%s8364_s14 + $0x6c] sm:$0xff] }
  0xe0   : > { %14882 = vst [vmem:[#allocation11_spill] sm:$0xff] %v8746_v35  ;;  %v8748_v36 = vpop.permute.xlu2 %1675  ;;  %7421 = vmatmul.msk.f32.gmra.mxu2 %vm3459_vm4, %v8746_v35  ;;  %v278_v35 = vld [vmem:[%s8364_s14 + $0xc0] sm:$0xff] }
  0xe1   : > { %v2570_v40 = vpop.permute.xlu0 %2569 }
  0xe2   : > { %v8756_v41 = vsel %vm3330_vm2, %v3207_v39, %v2570_v40 }
  0xe3   : > { %7358 = vmatmul.msk.f32.gmra.mxu1 %vm3459_vm4, %v8756_v41 }
  0xe4   : > { %1685 = vrot.lane.b32.xlu1 %v586_v33, %s8274_s16  ;;  %v398_v33 = vld [vmem:[%s8364_s14 + $0x79] sm:$0xff] }
  0xe5   : > { %v7882_v49 = vpack.i.bf16 %v398_v33, %v460_v43  ;;  %v589_v33 = vld [vmem:[%s8364_s14 + $0x292] sm:$0xff]  ;;  %v327_v43 = vld [vmem:[%s8364_s14 + $0x260] sm:$0xff] }
  0xe6   : > { %2071 = vrot.lane.b32.xlu2 %v651_v44, %s8273_s15  ;;  %v1674_v50 = vpop.permute.xlu1 %1673 }
  0xe7   : > { %1559 = vrot.lane.b32.xlu0 %v523_v46, %s8274_s16  ;;  %v8770_v51 = vsel %vm3072_vm3, %v3013_v31, %v1674_v50 }
  0xe8   : > { %14883 = vst [vmem:[#allocation12_spill] sm:$0xff] %v8770_v51  ;;  %v2574_v52 = vpop.permute.xlu2 %2573  ;;  %3907 = vmatmul.f32.gmra.mxu3 %v8770_v51 }
  0xe9   : > { %v1548_v53 = vpop.permute.xlu0 %1547 }
  0xea   : > { %v8775_v56 = vsel %vm3072_vm3, %v2950_v54, %v1548_v53  ;;  %v3208_v0 = vsel %vm3201_vm1, %v1548_v53, %v2060_v9  ;;  %v7846_v9 = vunpack.i.h.bf16 %v8704_v63  ;;  %v525_v54 = vld [vmem:[%s8364_s14 + $0x72] sm:$0xff] }
  0xeb   : > { %14884 = vst [vmem:[#allocation13_spill] sm:$0xff] %v8775_v56  ;;  %3718 = vmatmul.f32.gmra.mxu0 %v8775_v56 }
  0xec   : > { %2583 = vrot.lane.b32.xlu1 %v779_v57, %s8276_s18  ;;  %v2951_v63 = vsel %vm2943_vm0, %v262_v19, %v7846_v9  ;;  %v843_v57 = vld [vmem:[%s8364_s14 + $0x284] sm:$0xff] }
  0xee   : > { %2709 = vrot.lane.b32.xlu2 %v842_v58, %s8276_s18  ;;  %v2572_v1 = vpop.permute.xlu1 %2571 }
  0xef   : > { %2197 = vrot.lane.b32.xlu0 %v714_v59, %s8273_s15  ;;  %v8786_v2 = vsel %vm3330_vm2, %v3208_v0, %v2572_v1 }
  0xf0   : > { %14885 = vst [vmem:[#allocation14_spill] sm:$0xff] %v8786_v2  ;;  %v8790_v8 = vpop.permute.xlu2 %1551  ;;  %7359 = vmatmul.msk.f32.gmra.mxu1 %vm3459_vm4, %v8786_v2 }
  0xf1   : > { %v2186_v10 = vpop.permute.xlu0 %2185 }
  0xf2   : > { %v3271_v12 = vsel %vm3201_vm1, %v1674_v50, %v2186_v10  ;;  %v716_v10 = vld [vmem:[%s8364_s14 + $0x28b] sm:$0xff] }
  0xf3   : > { %v8798_v15 = vsel %vm3330_vm2, %v3271_v12, %v2698_v24  ;;  %v325_v24 = vld [vmem:[%s8364_s14 + $0x250] sm:$0xff] }
  0xf4   : > { %14886 = vst [vmem:[#allocation15_spill] sm:$0xff] %v8798_v15  ;;  %7422 = vmatmul.msk.f32.gmra.mxu2 %vm3459_vm4, %v8798_v15  ;;  %1561 = vrot.lane.b32.xlu1 %v524_v14, %s8274_s16  ;;  %v588_v12 = vld [vmem:[%s8364_s14 + $0x28a] sm:$0xff]  ;;  %v326_v14 = vld [vmem:[%s8364_s14 + $0x258] sm:$0xff] }
  0xf6   : > { %1687 = vrot.lane.b32.xlu2 %v587_v17, %s8274_s16  ;;  %v1550_v20 = vpop.permute.xlu1 %1549  ;;  %v461_v17 = vld [vmem:[%s8364_s14 + $0x291] sm:$0xff] }
  0xf7   : > { %7878 = vrot.lane.b32.xlu0 %v7877_v16, %s8275_s17  ;;  %v8809_v5 = vsel %vm3072_vm3, %v2951_v63, %v1550_v20  ;;  %v399_v16 = vld [vmem:[%s8364_s14 + $0x89] sm:$0xff] }
  0xf8   : > { %14887 = vst [vmem:[#allocation16_spill] sm:$0xff] %v8809_v5  ;;  %v2190_v21 = vpop.permute.xlu2 %2189  ;;  %3721 = vmatmul.f32.gmra.mxu0 %v8809_v5 }
  0xf9   : > { %v7849_v23 = vpop.permute.xlu0 %7848 }
  0xfa   : > { %v7851_v25 = vunpack.i.h.bf16 %v7849_v23  ;;  %v7850_v27 = vunpack.i.l.bf16 %v7849_v23  ;;  %v844_v23 = vld [vmem:[%s8364_s14 + $0x28c] sm:$0xff] }
  0xfc   : > { %v3014_v34 = vsel %vm2943_vm0, %v325_v24, %v7850_v27  ;;  %2199 = vrot.lane.b32.xlu1 %v715_v29, %s8273_s15  ;;  %v2952_v40 = vsel %vm2943_vm0, %v263_v30, %v7851_v25  ;;  %v7887_v24 = vpack.i.bf16 %v399_v16, %v461_v17  ;;  %v781_v25 = vld [vmem:[%s8364_s14 + $0x74] sm:$0xff] }
  0xfd   : > { %v8821_v39 = vsel %vm3072_vm3, %v3014_v34, %v8748_v36  ;;  %v8831_v46 = vsel %vm3072_vm3, %v2952_v40, %v8790_v8  ;;  %v400_v16 = vld [vmem:[%s8364_s14 + $0x91] sm:$0xff]  ;;  %v462_v17 = vld [vmem:[%s8364_s14 + $0x299] sm:$0xff] }
  0xfe   : > { %14888 = vst [vmem:[#allocation17_spill] sm:$0xff] %v8821_v39  ;;  %3910 = vmatmul.f32.gmra.mxu3 %v8821_v39  ;;  %2585 = vrot.lane.b32.xlu2 %v780_v32, %s8276_s18  ;;  %v2188_v44 = vpop.permute.xlu1 %2187 }
  0xff   : > { %2073 = vrot.lane.b32.xlu0 %v652_v38, %s8273_s15  ;;  %14889 = vst [vmem:[#allocation18_spill] sm:$0xff] %v8831_v46 }
 0x100   : > { %v8833_v47 = vpop.permute.xlu2 %7858  ;;  %3724 = vmatmul.f32.gmra.mxu0 %v8831_v46 }
 0x101   : > { %v2062_v31 = vpop.permute.xlu0 %2061  ;;  %v7860_v34 = vunpack.i.l.bf16 %v8833_v47 }
 0x102   : > { %v3209_v50 = vsel %vm3201_vm1, %v1550_v20, %v2062_v31  ;;  %v526_v31 = vld [vmem:[%s8364_s14 + $0x7a] sm:$0xff] }
 0x103   : > { %v8838_v53 = vsel %vm3330_vm2, %v3209_v50, %v2574_v52  ;;  %v3272_v52 = vsel %vm3201_vm1, %v8748_v36, %v2188_v44  ;;  %v654_v44 = vld [vmem:[%s8364_s14 + $0x7b] sm:$0xff]  ;;  %v264_v50 = vld [vmem:[%s8364_s14 + $0x48] sm:$0xff] }
 0x104   : > { %14890 = vst [vmem:[#allocation19_spill] sm:$0xff] %v8838_v53  ;;  %7360 = vmatmul.msk.f32.gmra.mxu1 %vm3459_vm4, %v8838_v53  ;;  %7883 = vrot.lane.b32.xlu1 %v7882_v49, %s8275_s17  ;;  %v290_v53 = vld [vmem:[%s8364_s14 + $0x128] sm:$0xff] }
 0x106   : > { %1563 = vrot.lane.b32.xlu2 %v525_v54, %s8274_s16  ;;  %v7854_v58 = vpop.permute.xlu1 %7853 }
 0x107   : > { %2711 = vrot.lane.b32.xlu0 %v843_v57, %s8276_s18  ;;  %v7855_v7 = vunpack.i.l.bf16 %v7854_v58  ;;  %v7856_v49 = vunpack.i.h.bf16 %v7854_v58 }
 0x108   : > { %v2066_v59 = vpop.permute.xlu2 %2065 }
 0x109   : > { %v2700_v0 = vpop.permute.xlu0 %2699  ;;  %v3015_v36 = vsel %vm2943_vm0, %v326_v14, %v7855_v7  ;;  %v2953_v58 = vsel %vm2943_vm0, %v264_v50, %v7856_v49  ;;  %v782_v7 = vld [vmem:[%s8364_s14 + $0x7c] sm:$0xff] }
 0x10a   : > { %v8850_v1 = vsel %vm3330_vm2, %v3272_v52, %v2700_v0  ;;  %v266_v50 = vld [vmem:[%s8364_s14 + $0x58] sm:$0xff] }
 0x10b   : > { %14891 = vst [vmem:[#allocation20_spill] sm:$0xff] %v8850_v1  ;;  %7423 = vmatmul.msk.f32.gmra.mxu2 %vm3459_vm4, %v8850_v1 }
 0x10c   : > { %2075 = vrot.lane.b32.xlu1 %v653_v6, %s8273_s15 }
 0x10e   : > { %2201 = vrot.lane.b32.xlu2 %v716_v10, %s8273_s15  ;;  %v2064_v9 = vpop.permute.xlu1 %2063  ;;  %v845_v10 = vld [vmem:[%s8364_s14 + $0x294] sm:$0xff] }
 0x10f   : > { %1689 = vrot.lane.b32.xlu0 %v588_v12, %s8274_s16  ;;  %v3210_v38 = vsel %vm3201_vm1, %v8790_v8, %v2064_v9  ;;  %v3016_v8 = vsel %vm2943_vm0, %v327_v43, %v7860_v34  ;;  %v717_v12 = vld [vmem:[%s8364_s14 + $0x293] sm:$0xff] }
 0x110   : > { %v2704_v19 = vpop.permute.xlu2 %2703  ;;  %v590_v34 = vld [vmem:[%s8364_s14 + $0x29a] sm:$0xff] }
 0x111   : > { %v1678_v20 = vpop.permute.xlu0 %1677 }
 0x112   : > { %v8865_v63 = vsel %vm3072_vm3, %v3015_v36, %v1678_v20  ;;  %v3273_v27 = vsel %vm3201_vm1, %v1678_v20, %v2190_v21 }
 0x113   : > { %14892 = vst [vmem:[#allocation21_spill] sm:$0xff] %v8865_v63  ;;  %3913 = vmatmul.f32.gmra.mxu3 %v8865_v63 }
 0x114   : > { %2713 = vrot.lane.b32.xlu1 %v844_v23, %s8276_s18 }
 0x116   : > { %7888 = vrot.lane.b32.xlu2 %v7887_v24, %s8275_s17  ;;  %v2702_v29 = vpop.permute.xlu1 %2701 }
 0x117   : > { %2587 = vrot.lane.b32.xlu0 %v781_v25, %s8276_s18  ;;  %v8875_v30 = vsel %vm3330_vm2, %v3273_v27, %v2702_v29  ;;  %v527_v25 = vld [vmem:[%s8364_s14 + $0x8a] sm:$0xff]  ;;  %v7892_v29 = vpack.i.bf16 %v400_v16, %v462_v17 }
 0x118   : > { %14893 = vst [vmem:[#allocation22_spill] sm:$0xff] %v8875_v30  ;;  %v8877_v32 = vpop.permute.xlu2 %1681  ;;  %7424 = vmatmul.msk.f32.gmra.mxu2 %vm3459_vm4, %v8875_v30  ;;  %v275_v30 = vld [vmem:[%s8364_s14 + $0xa8] sm:$0xff] }
 0x119   : > { %v2576_v40 = vpop.permute.xlu0 %2575 }
 0x11a   : > { %v8885_v21 = vsel %vm3330_vm2, %v3210_v38, %v2576_v40  ;;  %v265_v38 = vld [vmem:[%s8364_s14 + $0x50] sm:$0xff] }
 0x11b   : > { %14894 = vst [vmem:[#allocation23_spill] sm:$0xff] %v8885_v21  ;;  %7361 = vmatmul.msk.f32.gmra.mxu1 %vm3459_vm4, %v8885_v21 }
 0x11c   : > { %1691 = vrot.lane.b32.xlu1 %v589_v33, %s8274_s16 }
 0x11e   : > { %2077 = vrot.lane.b32.xlu2 %v654_v44, %s8273_s15  ;;  %v1680_v54 = vpop.permute.xlu1 %1679  ;;  %v328_v44 = vld [vmem:[%s8364_s14 + $0x268] sm:$0xff] }
 0x11f   : > { %1565 = vrot.lane.b32.xlu0 %v526_v31, %s8274_s16  ;;  %v8899_v57 = vsel %vm3072_vm3, %v3016_v8, %v1680_v54  ;;  %v718_v8 = vld [vmem:[%s8364_s14 + $0x29b] sm:$0xff] }
 0x120   : > { %14895 = vst [vmem:[#allocation24_spill] sm:$0xff] %v8899_v57  ;;  %v2580_v52 = vpop.permute.xlu2 %2579  ;;  %3916 = vmatmul.f32.gmra.mxu3 %v8899_v57 }
 0x121   : > { %v1554_v0 = vpop.permute.xlu0 %1553 }
 0x122   : > { %v8904_v6 = vsel %vm3072_vm3, %v2953_v58, %v1554_v0  ;;  %v3211_v14 = vsel %vm3201_vm1, %v1554_v0, %v2066_v59  ;;  %v7861_v59 = vunpack.i.h.bf16 %v8833_v47  ;;  %v655_v58 = vld [vmem:[%s8364_s14 + $0x8b] sm:$0xff] }
 0x123   : > { %14896 = vst [vmem:[#allocation25_spill] sm:$0xff] %v8904_v6  ;;  %3727 = vmatmul.f32.gmra.mxu0 %v8904_v6 }
 0x124   : > { %2589 = vrot.lane.b32.xlu1 %v782_v7, %s8276_s18  ;;  %v2954_v47 = vsel %vm2943_vm0, %v265_v38, %v7861_v59 }
 0x126   : > { %2715 = vrot.lane.b32.xlu2 %v845_v10, %s8276_s18  ;;  %v2578_v9 = vpop.permute.xlu1 %2577 }
 0x127   : > { %2203 = vrot.lane.b32.xlu0 %v717_v12, %s8273_s15  ;;  %v8915_v36 = vsel %vm3330_vm2, %v3211_v14, %v2578_v9  ;;  %v401_v12 = vld [vmem:[%s8364_s14 + $0x99] sm:$0xff]  ;;  %v463_v14 = vld [vmem:[%s8364_s14 + $0x2a9] sm:$0xff] }
 0x128   : > { %14897 = vst [vmem:[#allocation26_spill] sm:$0xff] %v8915_v36  ;;  %v8919_v20 = vpop.permute.xlu2 %1557  ;;  %7362 = vmatmul.msk.f32.gmra.mxu1 %vm3459_vm4, %v8915_v36 }
 0x129   : > { %v2192_v23 = vpop.permute.xlu0 %2191 }
 0x12a   : > { %v3274_v24 = vsel %vm3201_vm1, %v1680_v54, %v2192_v23  ;;  %v783_v54 = vld [vmem:[%s8364_s14 + $0x8c] sm:$0xff] }
 0x12b   : > { %v8927_v27 = vsel %vm3330_vm2, %v3274_v24, %v2704_v19  ;;  %v7897_v24 = vpack.i.bf16 %v401_v12, %v463_v14 }
 0x12c   : > { %14898 = vst [vmem:[#allocation27_spill] sm:$0xff] %v8927_v27  ;;  %7425 = vmatmul.msk.f32.gmra.mxu2 %vm3459_vm4, %v8927_v27  ;;  %1567 = vrot.lane.b32.xlu1 %v527_v25, %s8274_s16 }
 0x12e   : > { %1693 = vrot.lane.b32.xlu2 %v590_v34, %s8274_s16  ;;  %v1556_v40 = vpop.permute.xlu1 %1555  ;;  %v846_v34 = vld [vmem:[%s8364_s14 + $0x29c] sm:$0xff] }
 0x12f   : > { %7893 = vrot.lane.b32.xlu0 %v7892_v29, %s8275_s17  ;;  %v8938_v19 = vsel %vm3072_vm3, %v2954_v47, %v1556_v40  ;;  %v528_v29 = vld [vmem:[%s8364_s14 + $0x92] sm:$0xff] }
 0x130   : > { %14899 = vst [vmem:[#allocation28_spill] sm:$0xff] %v8938_v19  ;;  %v2196_v33 = vpop.permute.xlu2 %2195  ;;  %3730 = vmatmul.f32.gmra.mxu0 %v8938_v19 }
 0x131   : > { %v7864_v43 = vpop.permute.xlu0 %7863 }
 0x132   : > { %v7866_v31 = vunpack.i.h.bf16 %v7864_v43  ;;  %v7865_v49 = vunpack.i.l.bf16 %v7864_v43 }
 0x134   : > { %v3017_v0 = vsel %vm2943_vm0, %v328_v44, %v7865_v49  ;;  %2205 = vrot.lane.b32.xlu1 %v718_v8, %s8273_s15  ;;  %v2955_v10 = vsel %vm2943_vm0, %v266_v50, %v7866_v31  ;;  %v656_v44 = vld [vmem:[%s8364_s14 + $0x93] sm:$0xff]  ;;  %v719_v49 = vld [vmem:[%s8364_s14 + $0x2ab] sm:$0xff] }
 0x135   : > { %v8950_v7 = vsel %vm3072_vm3, %v3017_v0, %v8877_v32  ;;  %v8960_v16 = vsel %vm3072_vm3, %v2955_v10, %v8919_v20  ;;  %v591_v8 = vld [vmem:[%s8364_s14 + $0x2aa] sm:$0xff]  ;;  %v402_v0 = vld [vmem:[%s8364_s14 + $0xa1] sm:$0xff] }
 0x136   : > { %14900 = vst [vmem:[#allocation29_spill] sm:$0xff] %v8950_v7  ;;  %3919 = vmatmul.f32.gmra.mxu3 %v8950_v7  ;;  %2591 = vrot.lane.b32.xlu2 %v783_v54, %s8276_s18  ;;  %v2194_v9 = vpop.permute.xlu1 %2193  ;;  %v329_v50 = vld [vmem:[%s8364_s14 + $0x270] sm:$0xff] }
 0x137   : > { %2079 = vrot.lane.b32.xlu0 %v655_v58, %s8273_s15  ;;  %14901 = vst [vmem:[#allocation30_spill] sm:$0xff] %v8960_v16  ;;  %v464_v58 = vld [vmem:[%s8364_s14 + $0x2b1] sm:$0xff] }
 0x138   : > { %v8962_v17 = vpop.permute.xlu2 %7873  ;;  %3733 = vmatmul.f32.gmra.mxu0 %v8960_v16  ;;  %v804_v16 = vld [vmem:[%s8364_s14 + $0x13c] sm:$0xff] }
 0x139   : > { %v2068_v23 = vpop.permute.xlu0 %2067 }
 0x13a   : > { %v3212_v25 = vsel %vm3201_vm1, %v1556_v40, %v2068_v23  ;;  %v7902_v23 = vpack.i.bf16 %v402_v0, %v464_v58 }
 0x13b   : > { %v8967_v59 = vsel %vm3330_vm2, %v3212_v25, %v2580_v52  ;;  %v3275_v52 = vsel %vm3201_vm1, %v8877_v32, %v2194_v9  ;;  %v847_v9 = vld [vmem:[%s8364_s14 + $0x2ac] sm:$0xff] }
 0x13c   : > { %14902 = vst [vmem:[#allocation31_spill] sm:$0xff] %v8967_v59  ;;  %7363 = vmatmul.msk.f32.gmra.mxu1 %vm3459_vm4, %v8967_v59  ;;  %7898 = vrot.lane.b32.xlu1 %v7897_v24, %s8275_s17  ;;  %v784_v24 = vld [vmem:[%s8364_s14 + $0x94] sm:$0xff] }
 0x13e   : > { %1569 = vrot.lane.b32.xlu2 %v528_v29, %s8274_s16  ;;  %v7869_v38 = vpop.permute.xlu1 %7868 }
 0x13f   : > { %2717 = vrot.lane.b32.xlu0 %v846_v34, %s8276_s18  ;;  %v7870_v31 = vunpack.i.l.bf16 %v7869_v38  ;;  %v7871_v0 = vunpack.i.h.bf16 %v7869_v38 }
 0x140   : > { %v2072_v40 = vpop.permute.xlu2 %2071 }
 0x141   : > { %v2706_v47 = vpop.permute.xlu0 %2705  ;;  %v3018_v32 = vsel %vm2943_vm0, %v329_v50, %v7870_v31  ;;  %v657_v50 = vld [vmem:[%s8364_s14 + $0x9b] sm:$0xff] }
 0x142   : > { %v8979_v43 = vsel %vm3330_vm2, %v3275_v52, %v2706_v47  ;;  %v7875_v47 = vunpack.i.l.bf16 %v8962_v17 }
 0x143   : > { %14903 = vst [vmem:[#allocation32_spill] sm:$0xff] %v8979_v43  ;;  %7426 = vmatmul.msk.f32.gmra.mxu2 %vm3459_vm4, %v8979_v43 }
 0x144   : > { %2081 = vrot.lane.b32.xlu1 %v656_v44, %s8273_s15 }
 0x146   : > { %2207 = vrot.lane.b32.xlu2 %v719_v49, %s8273_s15  ;;  %v2070_v54 = vpop.permute.xlu1 %2069  ;;  %v592_v49 = vld [vmem:[%s8364_s14 + $0x2b2] sm:$0xff] }
 0x147   : > { %1695 = vrot.lane.b32.xlu0 %v591_v8, %s8274_s16  ;;  %v3213_v44 = vsel %vm3201_vm1, %v8919_v20, %v2070_v54  ;;  %v330_v8 = vld [vmem:[%s8364_s14 + $0x278] sm:$0xff]  ;;  %v267_v54 = vld [vmem:[%s8364_s14 + $0x60] sm:$0xff] }
 0x148   : > { %v2710_v10 = vpop.permute.xlu2 %2709  ;;  %v3019_v20 = vsel %vm2943_vm0, %v330_v8, %v7875_v47  ;;  %v2956_v38 = vsel %vm2943_vm0, %v267_v54, %v7871_v0  ;;  %v720_v47 = vld [vmem:[%s8364_s14 + $0x2b3] sm:$0xff]  ;;  %v403_v8 = vld [vmem:[%s8364_s14 + $0xa9] sm:$0xff] }
 0x149   : > { %v1684_v12 = vpop.permute.xlu0 %1683  ;;  %v530_v54 = vld [vmem:[%s8364_s14 + $0xa2] sm:$0xff] }
 0x14a   : > { %v8994_v14 = vsel %vm3072_vm3, %v3018_v32, %v1684_v12  ;;  %v3276_v25 = vsel %vm3201_vm1, %v1684_v12, %v2196_v33  ;;  %v529_v32 = vld [vmem:[%s8364_s14 + $0x9a] sm:$0xff] }
 0x14b   : > { %14904 = vst [vmem:[#allocation33_spill] sm:$0xff] %v8994_v14  ;;  %3922 = vmatmul.f32.gmra.mxu3 %v8994_v14 }
 0x14c   : > { %2719 = vrot.lane.b32.xlu1 %v847_v9, %s8276_s18 }
 0x14e   : > { %7903 = vrot.lane.b32.xlu2 %v7902_v23, %s8275_s17  ;;  %v2708_v29 = vpop.permute.xlu1 %2707 }
 0x14f   : > { %2593 = vrot.lane.b32.xlu0 %v784_v24, %s8276_s18  ;;  %v9004_v34 = vsel %vm3330_vm2, %v3276_v25, %v2708_v29  ;;  %v785_v25 = vld [vmem:[%s8364_s14 + $0x9c] sm:$0xff]  ;;  %v848_v29 = vld [vmem:[%s8364_s14 + $0x2b4] sm:$0xff] }
 0x150   : > { %14905 = vst [vmem:[#allocation34_spill] sm:$0xff] %v9004_v34  ;;  %v9006_v52 = vpop.permute.xlu2 %1687  ;;  %7427 = vmatmul.msk.f32.gmra.mxu2 %vm3459_vm4, %v9004_v34  ;;  %v272_v34 = vld [vmem:[%s8364_s14 + $0x90] sm:$0xff] }
 0x151   : > { %v2582_v31 = vpop.permute.xlu0 %2581 }
 0x152   : > { %v9014_v33 = vsel %vm3330_vm2, %v3213_v44, %v2582_v31 }
 0x153   : > { %14906 = vst [vmem:[#allocation35_spill] sm:$0xff] %v9014_v33  ;;  %7364 = vmatmul.msk.f32.gmra.mxu1 %vm3459_vm4, %v9014_v33 }
 0x154   : > { %1697 = vrot.lane.b32.xlu1 %v592_v49, %s8274_s16 }
 0x156   : > { %2083 = vrot.lane.b32.xlu2 %v657_v50, %s8273_s15  ;;  %v1686_v58 = vpop.permute.xlu1 %1685  ;;  %v465_v50 = vld [vmem:[%s8364_s14 + $0x2b9] sm:$0xff] }
 0x157   : > { %1571 = vrot.lane.b32.xlu0 %v529_v32, %s8274_s16  ;;  %v9028_v12 = vsel %vm3072_vm3, %v3019_v20, %v1686_v58 }
 0x158   : > { %14907 = vst [vmem:[#allocation36_spill] sm:$0xff] %v9028_v12  ;;  %v2586_v9 = vpop.permute.xlu2 %2585  ;;  %3925 = vmatmul.f32.gmra.mxu3 %v9028_v12 }
 0x159   : > { %v1560_v23 = vpop.permute.xlu0 %1559 }
 0x15a   : > { %v9033_v24 = vsel %vm3072_vm3, %v2956_v38, %v1560_v23  ;;  %v3214_v44 = vsel %vm3201_vm1, %v1560_v23, %v2072_v40  ;;  %v7876_v40 = vunpack.i.h.bf16 %v8962_v17  ;;  %v7907_v38 = vpack.i.bf16 %v403_v8, %v465_v50 }
 0x15b   : > { %14908 = vst [vmem:[#allocation37_spill] sm:$0xff] %v9033_v24  ;;  %3736 = vmatmul.f32.gmra.mxu0 %v9033_v24 }
 0x15c   : > { %2595 = vrot.lane.b32.xlu1 %v785_v25, %s8276_s18  ;;  %v593_v25 = vld [vmem:[%s8364_s14 + $0x2ba] sm:$0xff] }
 0x15e   : > { %2721 = vrot.lane.b32.xlu2 %v848_v29, %s8276_s18  ;;  %v2584_v31 = vpop.permute.xlu1 %2583  ;;  %v268_v29 = vld [vmem:[%s8364_s14 + $0x68] sm:$0xff] }
 0x15f   : > { %2209 = vrot.lane.b32.xlu0 %v720_v47, %s8273_s15  ;;  %v9044_v49 = vsel %vm3330_vm2, %v3214_v44, %v2584_v31  ;;  %v2957_v17 = vsel %vm2943_vm0, %v268_v29, %v7876_v40  ;;  %v331_v31 = vld [vmem:[%s8364_s14 + $0x280] sm:$0xff] }
 0x160   : > { %14909 = vst [vmem:[#allocation38_spill] sm:$0xff] %v9044_v49  ;;  %v9048_v32 = vpop.permute.xlu2 %1563  ;;  %7365 = vmatmul.msk.f32.gmra.mxu1 %vm3459_vm4, %v9044_v49  ;;  %v676_v49 = vld [vmem:[%s8364_s14 + $0x13b] sm:$0xff] }
 0x161   : > { %v2198_v0 = vpop.permute.xlu0 %2197 }
 0x162   : > { %v3277_v20 = vsel %vm3201_vm1, %v1686_v58, %v2198_v0  ;;  %v721_v0 = vld [vmem:[%s8364_s14 + $0x2bb] sm:$0xff] }
 0x163   : > { %v9056_v23 = vsel %vm3330_vm2, %v3277_v20, %v2710_v10  ;;  %v269_v20 = vld [vmem:[%s8364_s14 + $0x70] sm:$0xff] }
 0x164   : > { %14910 = vst [vmem:[#allocation39_spill] sm:$0xff] %v9056_v23  ;;  %7428 = vmatmul.msk.f32.gmra.mxu2 %vm3459_vm4, %v9056_v23  ;;  %1573 = vrot.lane.b32.xlu1 %v530_v54, %s8274_s16  ;;  %v786_v54 = vld [vmem:[%s8364_s14 + $0xa4] sm:$0xff] }
 0x166   : > { %1699 = vrot.lane.b32.xlu2 %v593_v25, %s8274_s16  ;;  %v1562_v58 = vpop.permute.xlu1 %1561 }
 0x167   : > { %7908 = vrot.lane.b32.xlu0 %v7907_v38, %s8275_s17  ;;  %v9067_v10 = vsel %vm3072_vm3, %v2957_v17, %v1562_v58  ;;  %v658_v38 = vld [vmem:[%s8364_s14 + $0xa3] sm:$0xff]  ;;  %v404_v17 = vld [vmem:[%s8364_s14 + $0xb1] sm:$0xff] }
 0x168   : > { %14911 = vst [vmem:[#allocation40_spill] sm:$0xff] %v9067_v10  ;;  %v2202_v47 = vpop.permute.xlu2 %2201  ;;  %3739 = vmatmul.f32.gmra.mxu0 %v9067_v10 }
 0x169   : > { %v7879_v44 = vpop.permute.xlu0 %7878 }
 0x16a   : > { %v7881_v8 = vunpack.i.h.bf16 %v7879_v44  ;;  %v7880_v50 = vunpack.i.l.bf16 %v7879_v44  ;;  %v466_v44 = vld [vmem:[%s8364_s14 + $0x2c1] sm:$0xff] }
 0x16c   : > { %v3020_v25 = vsel %vm2943_vm0, %v331_v31, %v7880_v50  ;;  %2211 = vrot.lane.b32.xlu1 %v721_v0, %s8273_s15  ;;  %v2958_v29 = vsel %vm2943_vm0, %v269_v20, %v7881_v8  ;;  %v7912_v8 = vpack.i.bf16 %v404_v17, %v466_v44 }
 0x16d   : > { %v9079_v40 = vsel %vm3072_vm3, %v3020_v25, %v9006_v52  ;;  %v9089_v31 = vsel %vm3072_vm3, %v2958_v29, %v9048_v32 }
 0x16e   : > { %14912 = vst [vmem:[#allocation41_spill] sm:$0xff] %v9079_v40  ;;  %3928 = vmatmul.f32.gmra.mxu3 %v9079_v40  ;;  %2597 = vrot.lane.b32.xlu2 %v786_v54, %s8276_s18  ;;  %v2200_v12 = vpop.permute.xlu1 %2199  ;;  %v531_v54 = vld [vmem:[%s8364_s14 + $0xaa] sm:$0xff] }
 0x16f   : > { %2085 = vrot.lane.b32.xlu0 %v658_v38, %s8273_s15  ;;  %14913 = vst [vmem:[#allocation42_spill] sm:$0xff] %v9089_v31  ;;  %v849_v38 = vld [vmem:[%s8364_s14 + $0x2bc] sm:$0xff] }
 0x170   : > { %v9091_v50 = vpop.permute.xlu2 %7888  ;;  %3742 = vmatmul.f32.gmra.mxu0 %v9089_v31 }
 0x171   : > { %v2074_v0 = vpop.permute.xlu0 %2073 }
 0x172   : > { %v3215_v20 = vsel %vm3201_vm1, %v1562_v58, %v2074_v0  ;;  %v659_v0 = vld [vmem:[%s8364_s14 + $0xab] sm:$0xff] }
 0x173   : > { %v9096_v25 = vsel %vm3330_vm2, %v3215_v20, %v2586_v9  ;;  %v3278_v9 = vsel %vm3201_vm1, %v9006_v52, %v2200_v12  ;;  %v405_v12 = vld [vmem:[%s8364_s14 + $0xb9] sm:$0xff] }
 0x174   : > { %14914 = vst [vmem:[#allocation43_spill] sm:$0xff] %v9096_v25  ;;  %7366 = vmatmul.msk.f32.gmra.mxu1 %vm3459_vm4, %v9096_v25  ;;  %7913 = vrot.lane.b32.xlu1 %v7912_v8, %s8275_s17  ;;  %v722_v8 = vld [vmem:[%s8364_s14 + $0x2c3] sm:$0xff]  ;;  %v287_v25 = vld [vmem:[%s8364_s14 + $0x110] sm:$0xff] }
 0x176   : > { %1575 = vrot.lane.b32.xlu2 %v531_v54, %s8274_s16  ;;  %v7884_v29 = vpop.permute.xlu1 %7883  ;;  %v594_v54 = vld [vmem:[%s8364_s14 + $0x2c2] sm:$0xff] }
 0x177   : > { %2723 = vrot.lane.b32.xlu0 %v849_v38, %s8276_s18  ;;  %v7885_v20 = vunpack.i.l.bf16 %v7884_v29  ;;  %v332_v38 = vld [vmem:[%s8364_s14 + $0x288] sm:$0xff] }
 0x178   : > { %v2078_v58 = vpop.permute.xlu2 %2077 }
 0x179   : > { %v2712_v17 = vpop.permute.xlu0 %2711  ;;  %v3021_v52 = vsel %vm2943_vm0, %v332_v38, %v7885_v20 }
 0x17a   : > { %v9108_v44 = vsel %vm3330_vm2, %v3278_v9, %v2712_v17  ;;  %v467_v9 = vld [vmem:[%s8364_s14 + $0x2c9] sm:$0xff] }
 0x17b   : > { %14915 = vst [vmem:[#allocation44_spill] sm:$0xff] %v9108_v44  ;;  %7429 = vmatmul.msk.f32.gmra.mxu2 %vm3459_vm4, %v9108_v44  ;;  %v850_v44 = vld [vmem:[%s8364_s14 + $0x2c4] sm:$0xff]  ;;  %v7917_v7 = vpack.i.bf16 %v405_v12, %v467_v9  ;;  %v660_v9 = vld [vmem:[%s8364_s14 + $0xb3] sm:$0xff] }
 0x17c   : > { %2087 = vrot.lane.b32.xlu1 %v659_v0, %s8273_s15  ;;  %v787_v0 = vld [vmem:[%s8364_s14 + $0xac] sm:$0xff] }
 0x17e   : > { %2213 = vrot.lane.b32.xlu2 %v722_v8, %s8273_s15  ;;  %v2076_v40 = vpop.permute.xlu1 %2075 }
 0x17f   : > { %1701 = vrot.lane.b32.xlu0 %v594_v54, %s8274_s16  ;;  %v3216_v12 = vsel %vm3201_vm1, %v9048_v32, %v2076_v40  ;;  %v270_v40 = vld [vmem:[%s8364_s14 + $0x78] sm:$0xff] }
 0x180   : > { %v2716_v17 = vpop.permute.xlu2 %2715 }
 0x181   : > { %v1690_v14 = vpop.permute.xlu0 %1689 }
 0x182   : > { %v9123_v23 = vsel %vm3072_vm3, %v3021_v52, %v1690_v14  ;;  %v3279_v20 = vsel %vm3201_vm1, %v1690_v14, %v2202_v47  ;;  %v7890_v52 = vunpack.i.l.bf16 %v9091_v50  ;;  %v595_v47 = vld [vmem:[%s8364_s14 + $0x2ca] sm:$0xff] }
 0x183   : > { %14916 = vst [vmem:[#allocation45_spill] sm:$0xff] %v9123_v23  ;;  %3931 = vmatmul.f32.gmra.mxu3 %v9123_v23 }
 0x184   : > { %2725 = vrot.lane.b32.xlu1 %v850_v44, %s8276_s18  ;;  %v333_v44 = vld [vmem:[%s8364_s14 + $0x290] sm:$0xff] }
 0x185   : > { %v3022_v32 = vsel %vm2943_vm0, %v333_v44, %v7890_v52  ;;  %v788_v52 = vld [vmem:[%s8364_s14 + $0xb4] sm:$0xff]  ;;  %v851_v44 = vld [vmem:[%s8364_s14 + $0x2cc] sm:$0xff] }
 0x186   : > { %7918 = vrot.lane.b32.xlu2 %v7917_v7, %s8275_s17  ;;  %v2714_v8 = vpop.permute.xlu1 %2713 }
 0x187   : > { %2599 = vrot.lane.b32.xlu0 %v787_v0, %s8276_s18  ;;  %v9133_v54 = vsel %vm3330_vm2, %v3279_v20, %v2714_v8  ;;  %v532_v0 = vld [vmem:[%s8364_s14 + $0xb2] sm:$0xff]  ;;  %v7886_v20 = vunpack.i.h.bf16 %v7884_v29 }
 0x188   : > { %14917 = vst [vmem:[#allocation46_spill] sm:$0xff] %v9133_v54  ;;  %v9135_v38 = vpop.permute.xlu2 %1693  ;;  %7430 = vmatmul.msk.f32.gmra.mxu2 %vm3459_vm4, %v9133_v54 }
 0x189   : > { %v2588_v7 = vpop.permute.xlu0 %2587  ;;  %v2959_v29 = vsel %vm2943_vm0, %v270_v40, %v7886_v20  ;;  %v406_v40 = vld [vmem:[%s8364_s14 + $0xc1] sm:$0xff] }
 0x18a   : > { %v9143_v14 = vsel %vm3330_vm2, %v3216_v12, %v2588_v7 }
 0x18b   : > { %14918 = vst [vmem:[#allocation47_spill] sm:$0xff] %v9143_v14  ;;  %7367 = vmatmul.msk.f32.gmra.mxu1 %vm3459_vm4, %v9143_v14 }
 0x18c   : > { %1703 = vrot.lane.b32.xlu1 %v595_v47, %s8274_s16 }
 0x18e   : > { %2089 = vrot.lane.b32.xlu2 %v660_v9, %s8273_s15  ;;  %v1692_v8 = vpop.permute.xlu1 %1691  ;;  %v723_v9 = vld [vmem:[%s8364_s14 + $0x2cb] sm:$0xff] }
 0x18f   : > { %1577 = vrot.lane.b32.xlu0 %v532_v0, %s8274_s16  ;;  %v9157_v12 = vsel %vm3072_vm3, %v3022_v32, %v1692_v8 }
 0x190   : > { %14919 = vst [vmem:[#allocation48_spill] sm:$0xff] %v9157_v12  ;;  %v2592_v7 = vpop.permute.xlu2 %2591  ;;  %3934 = vmatmul.f32.gmra.mxu3 %v9157_v12 }
 0x191   : > { %v1566_v23 = vpop.permute.xlu0 %1565 }
 0x192   : > { %v9162_v47 = vsel %vm3072_vm3, %v2959_v29, %v1566_v23  ;;  %v3217_v0 = vsel %vm3201_vm1, %v1566_v23, %v2078_v58  ;;  %v468_v29 = vld [vmem:[%s8364_s14 + $0x2d1] sm:$0xff]  ;;  %v7891_v23 = vunpack.i.h.bf16 %v9091_v50 }
 0x193   : > { %14920 = vst [vmem:[#allocation49_spill] sm:$0xff] %v9162_v47  ;;  %3745 = vmatmul.f32.gmra.mxu0 %v9162_v47 }
 0x194   : > { %2601 = vrot.lane.b32.xlu1 %v788_v52, %s8276_s18 }
 0x196   : > { %2727 = vrot.lane.b32.xlu2 %v851_v44, %s8276_s18  ;;  %v2590_v20 = vpop.permute.xlu1 %2589  ;;  %v533_v44 = vld [vmem:[%s8364_s14 + $0xba] sm:$0xff] }
 0x197   : > { %2215 = vrot.lane.b32.xlu0 %v723_v9, %s8273_s15  ;;  %v9173_v32 = vsel %vm3330_vm2, %v3217_v0, %v2590_v20  ;;  %v7922_v9 = vpack.i.bf16 %v406_v40, %v468_v29  ;;  %v596_v0 = vld [vmem:[%s8364_s14 + $0x2d2] sm:$0xff]  ;;  %v271_v20 = vld [vmem:[%s8364_s14 + $0x88] sm:$0xff] }
 0x198   : > { %14921 = vst [vmem:[#allocation50_spill] sm:$0xff] %v9173_v32  ;;  %v9177_v12 = vpop.permute.xlu2 %1569  ;;  %7368 = vmatmul.msk.f32.gmra.mxu1 %vm3459_vm4, %v9173_v32  ;;  %v2960_v50 = vsel %vm2943_vm0, %v271_v20, %v7891_v23  ;;  %v334_v29 = vld [vmem:[%s8364_s14 + $0x298] sm:$0xff] }
 0x199   : > { %v2204_v52 = vpop.permute.xlu0 %2203 }
 0x19a   : > { %v3280_v54 = vsel %vm3201_vm1, %v1692_v8, %v2204_v52 }
 0x19b   : > { %v9185_v58 = vsel %vm3330_vm2, %v3280_v54, %v2716_v17 }
 0x19c   : > { %14922 = vst [vmem:[#allocation51_spill] sm:$0xff] %v9185_v58  ;;  %7431 = vmatmul.msk.f32.gmra.mxu2 %vm3459_vm4, %v9185_v58  ;;  %1579 = vrot.lane.b32.xlu1 %v533_v44, %s8274_s16  ;;  %v724_v58 = vld [vmem:[%s8364_s14 + $0x2d3] sm:$0xff] }
 0x19e   : > { %1705 = vrot.lane.b32.xlu2 %v596_v0, %s8274_s16  ;;  %v1568_v8 = vpop.permute.xlu1 %1567  ;;  %v789_v0 = vld [vmem:[%s8364_s14 + $0xbc] sm:$0xff] }
 0x19f   : > { %7923 = vrot.lane.b32.xlu0 %v7922_v9, %s8275_s17  ;;  %v9196_v17 = vsel %vm3072_vm3, %v2960_v50, %v1568_v8  ;;  %v661_v9 = vld [vmem:[%s8364_s14 + $0xbb] sm:$0xff]  ;;  %v407_v50 = vld [vmem:[%s8364_s14 + $0xc9] sm:$0xff] }
 0x1a0   : > { %14923 = vst [vmem:[#allocation52_spill] sm:$0xff] %v9196_v17  ;;  %v2208_v54 = vpop.permute.xlu2 %2207  ;;  %3748 = vmatmul.f32.gmra.mxu0 %v9196_v17 }
 0x1a1   : > { %v7894_v40 = vpop.permute.xlu0 %7893 }
 0x1a2   : > { %v7896_v52 = vunpack.i.h.bf16 %v7894_v40  ;;  %v7895_v44 = vunpack.i.l.bf16 %v7894_v40  ;;  %v469_v40 = vld [vmem:[%s8364_s14 + $0x2d9] sm:$0xff] }
 0x1a4   : > { %v3023_v57 = vsel %vm2943_vm0, %v334_v29, %v7895_v44  ;;  %2217 = vrot.lane.b32.xlu1 %v724_v58, %s8273_s15  ;;  %v2961_v20 = vsel %vm2943_vm0, %v272_v34, %v7896_v52  ;;  %v7927_v34 = vpack.i.bf16 %v407_v50, %v469_v40 }
 0x1a5   : > { %v9208_v23 = vsel %vm3072_vm3, %v3023_v57, %v9135_v38  ;;  %v9218_v58 = vsel %vm3072_vm3, %v2961_v20, %v9177_v12 }
 0x1a6   : > { %14924 = vst [vmem:[#allocation53_spill] sm:$0xff] %v9208_v23  ;;  %3937 = vmatmul.f32.gmra.mxu3 %v9208_v23  ;;  %2603 = vrot.lane.b32.xlu2 %v789_v0, %s8276_s18  ;;  %v2206_v43 = vpop.permute.xlu1 %2205  ;;  %v534_v0 = vld [vmem:[%s8364_s14 + $0xc2] sm:$0xff] }
 0x1a7   : > { %2091 = vrot.lane.b32.xlu0 %v661_v9, %s8273_s15  ;;  %14925 = vst [vmem:[#allocation54_spill] sm:$0xff] %v9218_v58  ;;  %v852_v9 = vld [vmem:[%s8364_s14 + $0x2d4] sm:$0xff] }
 0x1a8   : > { %v9220_v29 = vpop.permute.xlu2 %7903  ;;  %3751 = vmatmul.f32.gmra.mxu0 %v9218_v58  ;;  %v801_v58 = vld [vmem:[%s8364_s14 + $0x124] sm:$0xff] }
 0x1a9   : > { %v2080_v57 = vpop.permute.xlu0 %2079 }
 0x1aa   : > { %v3218_v52 = vsel %vm3201_vm1, %v1568_v8, %v2080_v57  ;;  %v662_v57 = vld [vmem:[%s8364_s14 + $0xc3] sm:$0xff] }
 0x1ab   : > { %v9225_v44 = vsel %vm3330_vm2, %v3218_v52, %v2592_v7  ;;  %v3281_v7 = vsel %vm3201_vm1, %v9135_v38, %v2206_v43  ;;  %v408_v38 = vld [vmem:[%s8364_s14 + $0xd1] sm:$0xff] }
 0x1ac   : > { %14926 = vst [vmem:[#allocation55_spill] sm:$0xff] %v9225_v44  ;;  %7369 = vmatmul.msk.f32.gmra.mxu1 %vm3459_vm4, %v9225_v44  ;;  %7928 = vrot.lane.b32.xlu1 %v7927_v34, %s8275_s17  ;;  %v725_v34 = vld [vmem:[%s8364_s14 + $0x2db] sm:$0xff] }
 0x1ae   : > { %1581 = vrot.lane.b32.xlu2 %v534_v0, %s8274_s16  ;;  %v7899_v20 = vpop.permute.xlu1 %7898  ;;  %v597_v0 = vld [vmem:[%s8364_s14 + $0x2da] sm:$0xff] }
 0x1af   : > { %2729 = vrot.lane.b32.xlu0 %v852_v9, %s8276_s18  ;;  %v7900_v52 = vunpack.i.l.bf16 %v7899_v20  ;;  %v335_v9 = vld [vmem:[%s8364_s14 + $0x2a8] sm:$0xff] }
 0x1b0   : > { %v2084_v8 = vpop.permute.xlu2 %2083 }
 0x1b1   : > { %v2718_v50 = vpop.permute.xlu0 %2717  ;;  %v3024_v43 = vsel %vm2943_vm0, %v335_v9, %v7900_v52 }
 0x1b2   : > { %v9237_v40 = vsel %vm3330_vm2, %v3281_v7, %v2718_v50  ;;  %v470_v7 = vld [vmem:[%s8364_s14 + $0x2e1] sm:$0xff] }
 0x1b3   : > { %14927 = vst [vmem:[#allocation56_spill] sm:$0xff] %v9237_v40  ;;  %7432 = vmatmul.msk.f32.gmra.mxu2 %vm3459_vm4, %v9237_v40  ;;  %v853_v40 = vld [vmem:[%s8364_s14 + $0x2dc] sm:$0xff]  ;;  %v7932_v39 = vpack.i.bf16 %v408_v38, %v470_v7  ;;  %v663_v7 = vld [vmem:[%s8364_s14 + $0xcb] sm:$0xff] }
 0x1b4   : > { %2093 = vrot.lane.b32.xlu1 %v662_v57, %s8273_s15  ;;  %v790_v57 = vld [vmem:[%s8364_s14 + $0xc4] sm:$0xff] }
 0x1b6   : > { %2219 = vrot.lane.b32.xlu2 %v725_v34, %s8273_s15  ;;  %v2082_v23 = vpop.permute.xlu1 %2081 }
 0x1b7   : > { %1707 = vrot.lane.b32.xlu0 %v597_v0, %s8274_s16  ;;  %v3219_v38 = vsel %vm3201_vm1, %v9177_v12, %v2082_v23  ;;  %v273_v23 = vld [vmem:[%s8364_s14 + $0x98] sm:$0xff] }
 0x1b8   : > { %v2722_v50 = vpop.permute.xlu2 %2721 }
 0x1b9   : > { %v1696_v63 = vpop.permute.xlu0 %1695 }
 0x1ba   : > { %v9252_v27 = vsel %vm3072_vm3, %v3024_v43, %v1696_v63  ;;  %v3282_v52 = vsel %vm3201_vm1, %v1696_v63, %v2208_v54  ;;  %v7905_v43 = vunpack.i.l.bf16 %v9220_v29  ;;  %v598_v54 = vld [vmem:[%s8364_s14 + $0x2e2] sm:$0xff] }
 0x1bb   : > { %14928 = vst [vmem:[#allocation57_spill] sm:$0xff] %v9252_v27  ;;  %3940 = vmatmul.f32.gmra.mxu3 %v9252_v27 }
 0x1bc   : > { %2731 = vrot.lane.b32.xlu1 %v853_v40, %s8276_s18  ;;  %v336_v40 = vld [vmem:[%s8364_s14 + $0x2b0] sm:$0xff] }
 0x1bd   : > { %v3025_v12 = vsel %vm2943_vm0, %v336_v40, %v7905_v43  ;;  %v791_v43 = vld [vmem:[%s8364_s14 + $0xcc] sm:$0xff]  ;;  %v854_v40 = vld [vmem:[%s8364_s14 + $0x2e4] sm:$0xff] }
 0x1be   : > { %7933 = vrot.lane.b32.xlu2 %v7932_v39, %s8275_s17  ;;  %v2720_v34 = vpop.permute.xlu1 %2719 }
 0x1bf   : > { %2605 = vrot.lane.b32.xlu0 %v790_v57, %s8276_s18  ;;  %v9262_v0 = vsel %vm3330_vm2, %v3282_v52, %v2720_v34  ;;  %v535_v57 = vld [vmem:[%s8364_s14 + $0xca] sm:$0xff]  ;;  %v7901_v52 = vunpack.i.h.bf16 %v7899_v20 }
 0x1c0   : > { %14929 = vst [vmem:[#allocation58_spill] sm:$0xff] %v9262_v0  ;;  %v9264_v9 = vpop.permute.xlu2 %1699  ;;  %7433 = vmatmul.msk.f32.gmra.mxu2 %vm3459_vm4, %v9262_v0 }
 0x1c1   : > { %v2594_v39 = vpop.permute.xlu0 %2593  ;;  %v2962_v20 = vsel %vm2943_vm0, %v273_v23, %v7901_v52  ;;  %v409_v23 = vld [vmem:[%s8364_s14 + $0xd9] sm:$0xff] }
 0x1c2   : > { %v9272_v63 = vsel %vm3330_vm2, %v3219_v38, %v2594_v39 }
 0x1c3   : > { %14930 = vst [vmem:[#allocation59_spill] sm:$0xff] %v9272_v63  ;;  %7370 = vmatmul.msk.f32.gmra.mxu1 %vm3459_vm4, %v9272_v63 }
 0x1c4   : > { %1709 = vrot.lane.b32.xlu1 %v598_v54, %s8274_s16 }
 0x1c6   : > { %2095 = vrot.lane.b32.xlu2 %v663_v7, %s8273_s15  ;;  %v1698_v34 = vpop.permute.xlu1 %1697  ;;  %v726_v7 = vld [vmem:[%s8364_s14 + $0x2e3] sm:$0xff] }
 0x1c7   : > { %1583 = vrot.lane.b32.xlu0 %v535_v57, %s8274_s16  ;;  %v9286_v38 = vsel %vm3072_vm3, %v3025_v12, %v1698_v34 }
 0x1c8   : > { %14931 = vst [vmem:[#allocation60_spill] sm:$0xff] %v9286_v38  ;;  %v2598_v39 = vpop.permute.xlu2 %2597  ;;  %3943 = vmatmul.f32.gmra.mxu3 %v9286_v38 }
 0x1c9   : > { %v1572_v27 = vpop.permute.xlu0 %1571 }
 0x1ca   : > { %v9291_v54 = vsel %vm3072_vm3, %v2962_v20, %v1572_v27  ;;  %v3220_v57 = vsel %vm3201_vm1, %v1572_v27, %v2084_v8  ;;  %v471_v20 = vld [vmem:[%s8364_s14 + $0x2e9] sm:$0xff]  ;;  %v7906_v27 = vunpack.i.h.bf16 %v9220_v29 }
 0x1cb   : > { %14932 = vst [vmem:[#allocation61_spill] sm:$0xff] %v9291_v54  ;;  %3754 = vmatmul.f32.gmra.mxu0 %v9291_v54  ;;  %v9733_v54 = vpop.f32.mrf.mxu2 }
 0x1cc   : > { %2607 = vrot.lane.b32.xlu1 %v791_v43, %s8276_s18 }
 0x1ce   : > { %2733 = vrot.lane.b32.xlu2 %v854_v40, %s8276_s18  ;;  %v2596_v52 = vpop.permute.xlu1 %2595  ;;  %v536_v40 = vld [vmem:[%s8364_s14 + $0xd2] sm:$0xff] }
 0x1cf   : > { %2221 = vrot.lane.b32.xlu0 %v726_v7, %s8273_s15  ;;  %v9302_v12 = vsel %vm3330_vm2, %v3220_v57, %v2596_v52  ;;  %v7937_v7 = vpack.i.bf16 %v409_v23, %v471_v20  ;;  %v599_v57 = vld [vmem:[%s8364_s14 + $0x2ea] sm:$0xff]  ;;  %v274_v52 = vld [vmem:[%s8364_s14 + $0xa0] sm:$0xff]  ;;  %v337_v20 = vld [vmem:[%s8364_s14 + $0x2b8] sm:$0xff] }
 0x1d0   : > { %14933 = vst [vmem:[#allocation62_spill] sm:$0xff] %v9302_v12  ;;  %v9306_v38 = vpop.permute.xlu2 %1575  ;;  %7371 = vmatmul.msk.f32.gmra.mxu1 %vm3459_vm4, %v9302_v12  ;;  %v2963_v29 = vsel %vm2943_vm0, %v274_v52, %v7906_v27  ;;  %v673_v12 = vld [vmem:[%s8364_s14 + $0x123] sm:$0xff] }
 0x1d1   : > { %v2210_v43 = vpop.permute.xlu0 %2209 }
 0x1d2   : > { %v3283_v0 = vsel %vm3201_vm1, %v1698_v34, %v2210_v43 }
 0x1d3   : > { %v9314_v8 = vsel %vm3330_vm2, %v3283_v0, %v2722_v50 }
 0x1d4   : > { %14934 = vst [vmem:[#allocation63_spill] sm:$0xff] %v9314_v8  ;;  %7434 = vmatmul.msk.f32.gmra.mxu2 %vm3459_vm4, %v9314_v8  ;;  %1585 = vrot.lane.b32.xlu1 %v536_v40, %s8274_s16  ;;  %v727_v8 = vld [vmem:[%s8364_s14 + $0x2eb] sm:$0xff] }
 0x1d6   : > { %1711 = vrot.lane.b32.xlu2 %v599_v57, %s8274_s16  ;;  %v1574_v34 = vpop.permute.xlu1 %1573  ;;  %v792_v57 = vld [vmem:[%s8364_s14 + $0xd4] sm:$0xff] }
 0x1d7   : > { %7938 = vrot.lane.b32.xlu0 %v7937_v7, %s8275_s17  ;;  %v9325_v50 = vsel %vm3072_vm3, %v2963_v29, %v1574_v34  ;;  %v664_v7 = vld [vmem:[%s8364_s14 + $0xd3] sm:$0xff]  ;;  %v410_v29 = vld [vmem:[%s8364_s14 + $0xe1] sm:$0xff] }
 0x1d8   : > { %14935 = vst [vmem:[#allocation64_spill] sm:$0xff] %v9325_v50  ;;  %v2214_v0 = vpop.permute.xlu2 %2213  ;;  %3757 = vmatmul.f32.gmra.mxu0 %v9325_v50 }
 0x1d9   : > { %v7909_v23 = vpop.permute.xlu0 %7908 }
 0x1da   : > { %v7911_v43 = vunpack.i.h.bf16 %v7909_v23  ;;  %v7910_v40 = vunpack.i.l.bf16 %v7909_v23  ;;  %v472_v23 = vld [vmem:[%s8364_s14 + $0x2f1] sm:$0xff] }
 0x1dc   : > { %v3026_v51 = vsel %vm2943_vm0, %v337_v20, %v7910_v40  ;;  %2223 = vrot.lane.b32.xlu1 %v727_v8, %s8273_s15  ;;  %v2964_v52 = vsel %vm2943_vm0, %v275_v30, %v7911_v43  ;;  %v7942_v30 = vpack.i.bf16 %v410_v29, %v472_v23 }
 0x1dd   : > { %v9337_v27 = vsel %vm3072_vm3, %v3026_v51, %v9264_v9  ;;  %v9347_v8 = vsel %vm3072_vm3, %v2964_v52, %v9306_v38 }
 0x1de   : > { %14936 = vst [vmem:[#allocation65_spill] sm:$0xff] %v9337_v27  ;;  %3946 = vmatmul.f32.gmra.mxu3 %v9337_v27  ;;  %2609 = vrot.lane.b32.xlu2 %v792_v57, %s8276_s18  ;;  %v2212_v1 = vpop.permute.xlu1 %2211  ;;  %v537_v57 = vld [vmem:[%s8364_s14 + $0xda] sm:$0xff] }
 0x1df   : > { %2097 = vrot.lane.b32.xlu0 %v664_v7, %s8273_s15  ;;  %14937 = vst [vmem:[#allocation66_spill] sm:$0xff] %v9347_v8  ;;  %v855_v7 = vld [vmem:[%s8364_s14 + $0x2ec] sm:$0xff] }
 0x1e0   : > { %v9349_v20 = vpop.permute.xlu2 %7918  ;;  %3760 = vmatmul.f32.gmra.mxu0 %v9347_v8 }
 0x1e1   : > { %v2086_v51 = vpop.permute.xlu0 %2085 }
 0x1e2   : > { %v3221_v43 = vsel %vm3201_vm1, %v1574_v34, %v2086_v51  ;;  %v665_v51 = vld [vmem:[%s8364_s14 + $0xdb] sm:$0xff] }
 0x1e3   : > { %v9354_v40 = vsel %vm3330_vm2, %v3221_v43, %v2598_v39  ;;  %v3284_v39 = vsel %vm3201_vm1, %v9264_v9, %v2212_v1  ;;  %v411_v9 = vld [vmem:[%s8364_s14 + $0xe9] sm:$0xff] }
 0x1e4   : > { %14938 = vst [vmem:[#allocation67_spill] sm:$0xff] %v9354_v40  ;;  %7372 = vmatmul.msk.f32.gmra.mxu1 %vm3459_vm4, %v9354_v40  ;;  %7943 = vrot.lane.b32.xlu1 %v7942_v30, %s8275_s17  ;;  %v728_v30 = vld [vmem:[%s8364_s14 + $0x2f3] sm:$0xff] }
 0x1e5   : > { %v284_v40 = vld [vmem:[%s8364_s14 + $0xf0] sm:$0xff] }
 0x1e6   : > { %1587 = vrot.lane.b32.xlu2 %v537_v57, %s8274_s16  ;;  %v7914_v52 = vpop.permute.xlu1 %7913  ;;  %v600_v57 = vld [vmem:[%s8364_s14 + $0x2f2] sm:$0xff] }
 0x1e7   : > { %2735 = vrot.lane.b32.xlu0 %v855_v7, %s8276_s18  ;;  %v7915_v43 = vunpack.i.l.bf16 %v7914_v52  ;;  %v338_v7 = vld [vmem:[%s8364_s14 + $0x2c0] sm:$0xff] }
 0x1e8   : > { %v2090_v34 = vpop.permute.xlu2 %2089 }
 0x1e9   : > { %v2724_v29 = vpop.permute.xlu0 %2723  ;;  %v3027_v1 = vsel %vm2943_vm0, %v338_v7, %v7915_v43 }
 0x1ea   : > { %v9366_v23 = vsel %vm3330_vm2, %v3284_v39, %v2724_v29  ;;  %v473_v39 = vld [vmem:[%s8364_s14 + $0x2f9] sm:$0xff] }
 0x1eb   : > { %14939 = vst [vmem:[#allocation68_spill] sm:$0xff] %v9366_v23  ;;  %7435 = vmatmul.msk.f32.gmra.mxu2 %vm3459_vm4, %v9366_v23  ;;  %v856_v23 = vld [vmem:[%s8364_s14 + $0x2f4] sm:$0xff]  ;;  %v7947_v55 = vpack.i.bf16 %v411_v9, %v473_v39  ;;  %v666_v39 = vld [vmem:[%s8364_s14 + $0xe3] sm:$0xff] }
 0x1ec   : > { %2099 = vrot.lane.b32.xlu1 %v665_v51, %s8273_s15  ;;  %v793_v51 = vld [vmem:[%s8364_s14 + $0xdc] sm:$0xff] }
 0x1ee   : > { %2225 = vrot.lane.b32.xlu2 %v728_v30, %s8273_s15  ;;  %v2088_v27 = vpop.permute.xlu1 %2087 }
 0x1ef   : > { %1713 = vrot.lane.b32.xlu0 %v600_v57, %s8274_s16  ;;  %v3222_v9 = vsel %vm3201_vm1, %v9306_v38, %v2088_v27  ;;  %v276_v27 = vld [vmem:[%s8364_s14 + $0xb0] sm:$0xff] }
 0x1f0   : > { %v2728_v29 = vpop.permute.xlu2 %2727 }
 0x1f1   : > { %v1702_v26 = vpop.permute.xlu0 %1701 }
 0x1f2   : > { %v9381_v15 = vsel %vm3072_vm3, %v3027_v1, %v1702_v26  ;;  %v3285_v43 = vsel %vm3201_vm1, %v1702_v26, %v2214_v0  ;;  %v7920_v1 = vunpack.i.l.bf16 %v9349_v20  ;;  %v601_v0 = vld [vmem:[%s8364_s14 + $0x2fa] sm:$0xff] }
 0x1f3   : > { %14940 = vst [vmem:[#allocation69_spill] sm:$0xff] %v9381_v15  ;;  %3949 = vmatmul.f32.gmra.mxu3 %v9381_v15 }
 0x1f4   : > { %2737 = vrot.lane.b32.xlu1 %v856_v23, %s8276_s18  ;;  %v339_v23 = vld [vmem:[%s8364_s14 + $0x2c8] sm:$0xff] }
 0x1f5   : > { %v3028_v38 = vsel %vm2943_vm0, %v339_v23, %v7920_v1  ;;  %v794_v1 = vld [vmem:[%s8364_s14 + $0xe4] sm:$0xff]  ;;  %v857_v23 = vld [vmem:[%s8364_s14 + $0x2fc] sm:$0xff] }
 0x1f6   : > { %7948 = vrot.lane.b32.xlu2 %v7947_v55, %s8275_s17  ;;  %v2726_v30 = vpop.permute.xlu1 %2725 }
 0x1f7   : > { %2611 = vrot.lane.b32.xlu0 %v793_v51, %s8276_s18  ;;  %v9391_v57 = vsel %vm3330_vm2, %v3285_v43, %v2726_v30  ;;  %v538_v51 = vld [vmem:[%s8364_s14 + $0xe2] sm:$0xff]  ;;  %v7916_v43 = vunpack.i.h.bf16 %v7914_v52 }
 0x1f8   : > { %14941 = vst [vmem:[#allocation70_spill] sm:$0xff] %v9391_v57  ;;  %v9393_v7 = vpop.permute.xlu2 %1705  ;;  %7436 = vmatmul.msk.f32.gmra.mxu2 %vm3459_vm4, %v9391_v57 }
 0x1f9   : > { %v2600_v55 = vpop.permute.xlu0 %2599  ;;  %v2965_v52 = vsel %vm2943_vm0, %v276_v27, %v7916_v43  ;;  %v412_v27 = vld [vmem:[%s8364_s14 + $0xf1] sm:$0xff] }
 0x1fa   : > { %v9401_v26 = vsel %vm3330_vm2, %v3222_v9, %v2600_v55 }
 0x1fb   : > { %14942 = vst [vmem:[#allocation71_spill] sm:$0xff] %v9401_v26  ;;  %7373 = vmatmul.msk.f32.gmra.mxu1 %vm3459_vm4, %v9401_v26 }
 0x1fc   : > { %1715 = vrot.lane.b32.xlu1 %v601_v0, %s8274_s16 }
 0x1fe   : > { %2101 = vrot.lane.b32.xlu2 %v666_v39, %s8273_s15  ;;  %v1704_v30 = vpop.permute.xlu1 %1703  ;;  %v729_v39 = vld [vmem:[%s8364_s14 + $0x2fb] sm:$0xff] }
 0x1ff   : > { %1589 = vrot.lane.b32.xlu0 %v538_v51, %s8274_s16  ;;  %v9415_v9 = vsel %vm3072_vm3, %v3028_v38, %v1704_v30 }
 0x200   : > { %14943 = vst [vmem:[#allocation72_spill] sm:$0xff] %v9415_v9  ;;  %v2604_v55 = vpop.permute.xlu2 %2603  ;;  %3952 = vmatmul.f32.gmra.mxu3 %v9415_v9 }
 0x201   : > { %v1578_v15 = vpop.permute.xlu0 %1577 }
 0x202   : > { %v9420_v0 = vsel %vm3072_vm3, %v2965_v52, %v1578_v15  ;;  %v3223_v51 = vsel %vm3201_vm1, %v1578_v15, %v2090_v34  ;;  %v474_v52 = vld [vmem:[%s8364_s14 + $0x301] sm:$0xff]  ;;  %v7921_v15 = vunpack.i.h.bf16 %v9349_v20 }
 0x203   : > { %14944 = vst [vmem:[#allocation73_spill] sm:$0xff] %v9420_v0  ;;  %3763 = vmatmul.f32.gmra.mxu0 %v9420_v0  ;;  %v798_v0 = vld [vmem:[%s8364_s14 + $0x104] sm:$0xff] }
 0x204   : > { %2613 = vrot.lane.b32.xlu1 %v794_v1, %s8276_s18 }
 0x206   : > { %2739 = vrot.lane.b32.xlu2 %v857_v23, %s8276_s18  ;;  %v2602_v43 = vpop.permute.xlu1 %2601  ;;  %v539_v23 = vld [vmem:[%s8364_s14 + $0xea] sm:$0xff] }
 0x207   : > { %2227 = vrot.lane.b32.xlu0 %v729_v39, %s8273_s15  ;;  %v9431_v38 = vsel %vm3330_vm2, %v3223_v51, %v2602_v43  ;;  %v7952_v39 = vpack.i.bf16 %v412_v27, %v474_v52  ;;  %v602_v51 = vld [vmem:[%s8364_s14 + $0x302] sm:$0xff]  ;;  %v277_v43 = vld [vmem:[%s8364_s14 + $0xb8] sm:$0xff]  ;;  %v340_v52 = vld [vmem:[%s8364_s14 + $0x2d0] sm:$0xff] }
 0x208   : > { %14945 = vst [vmem:[#allocation74_spill] sm:$0xff] %v9431_v38  ;;  %v9435_v9 = vpop.permute.xlu2 %1581  ;;  %7374 = vmatmul.msk.f32.gmra.mxu1 %vm3459_vm4, %v9431_v38  ;;  %v2966_v20 = vsel %vm2943_vm0, %v277_v43, %v7921_v15 }
 0x209   : > { %v2216_v1 = vpop.permute.xlu0 %2215 }
 0x20a   : > { %v3286_v57 = vsel %vm3201_vm1, %v1704_v30, %v2216_v1 }
 0x20b   : > { %v9443_v34 = vsel %vm3330_vm2, %v3286_v57, %v2728_v29 }
 0x20c   : > { %14946 = vst [vmem:[#allocation75_spill] sm:$0xff] %v9443_v34  ;;  %7437 = vmatmul.msk.f32.gmra.mxu2 %vm3459_vm4, %v9443_v34  ;;  %1591 = vrot.lane.b32.xlu1 %v539_v23, %s8274_s16  ;;  %v730_v34 = vld [vmem:[%s8364_s14 + $0x303] sm:$0xff] }
 0x20e   : > { %1717 = vrot.lane.b32.xlu2 %v602_v51, %s8274_s16  ;;  %v1580_v30 = vpop.permute.xlu1 %1579  ;;  %v795_v51 = vld [vmem:[%s8364_s14 + $0xec] sm:$0xff] }
 0x20f   : > { %7953 = vrot.lane.b32.xlu0 %v7952_v39, %s8275_s17  ;;  %v9454_v29 = vsel %vm3072_vm3, %v2966_v20, %v1580_v30  ;;  %v667_v39 = vld [vmem:[%s8364_s14 + $0xeb] sm:$0xff]  ;;  %v413_v20 = vld [vmem:[%s8364_s14 + $0xf9] sm:$0xff] }
 0x210   : > { %14947 = vst [vmem:[#allocation76_spill] sm:$0xff] %v9454_v29  ;;  %v2220_v57 = vpop.permute.xlu2 %2219  ;;  %3766 = vmatmul.f32.gmra.mxu0 %v9454_v29 }
 0x211   : > { %v7924_v27 = vpop.permute.xlu0 %7923 }
 0x212   : > { %v7926_v1 = vunpack.i.h.bf16 %v7924_v27  ;;  %v7925_v23 = vunpack.i.l.bf16 %v7924_v27  ;;  %v475_v27 = vld [vmem:[%s8364_s14 + $0x309] sm:$0xff] }
 0x214   : > { %v3029_v18 = vsel %vm2943_vm0, %v340_v52, %v7925_v23  ;;  %2229 = vrot.lane.b32.xlu1 %v730_v34, %s8273_s15  ;;  %v2967_v43 = vsel %vm2943_vm0, %v278_v35, %v7926_v1  ;;  %v7957_v35 = vpack.i.bf16 %v413_v20, %v475_v27 }
 0x215   : > { %v9466_v15 = vsel %vm3072_vm3, %v3029_v18, %v9393_v7  ;;  %v9476_v34 = vsel %vm3072_vm3, %v2967_v43, %v9435_v9 }
 0x216   : > { %14948 = vst [vmem:[#allocation77_spill] sm:$0xff] %v9466_v15  ;;  %3955 = vmatmul.f32.gmra.mxu3 %v9466_v15  ;;  %2615 = vrot.lane.b32.xlu2 %v795_v51, %s8276_s18  ;;  %v2218_v13 = vpop.permute.xlu1 %2217  ;;  %v540_v51 = vld [vmem:[%s8364_s14 + $0xf2] sm:$0xff] }
 0x217   : > { %2103 = vrot.lane.b32.xlu0 %v667_v39, %s8273_s15  ;;  %14949 = vst [vmem:[#allocation78_spill] sm:$0xff] %v9476_v34  ;;  %v858_v39 = vld [vmem:[%s8364_s14 + $0x304] sm:$0xff] }
 0x218   : > { %v9478_v52 = vpop.permute.xlu2 %7933  ;;  %3769 = vmatmul.f32.gmra.mxu0 %v9476_v34 }
 0x219   : > { %v2092_v18 = vpop.permute.xlu0 %2091 }
 0x21a   : > { %v3224_v1 = vsel %vm3201_vm1, %v1580_v30, %v2092_v18  ;;  %v668_v18 = vld [vmem:[%s8364_s14 + $0xf3] sm:$0xff] }
 0x21b   : > { %v9483_v23 = vsel %vm3330_vm2, %v3224_v1, %v2604_v55  ;;  %v3287_v55 = vsel %vm3201_vm1, %v9393_v7, %v2218_v13  ;;  %v414_v7 = vld [vmem:[%s8364_s14 + $0x101] sm:$0xff] }
 0x21c   : > { %14950 = vst [vmem:[#allocation79_spill] sm:$0xff] %v9483_v23  ;;  %7375 = vmatmul.msk.f32.gmra.mxu1 %vm3459_vm4, %v9483_v23  ;;  %7958 = vrot.lane.b32.xlu1 %v7957_v35, %s8275_s17  ;;  %v731_v35 = vld [vmem:[%s8364_s14 + $0x30b] sm:$0xff]  ;;  %v670_v23 = vld [vmem:[%s8364_s14 + $0x103] sm:$0xff] }
 0x21e   : > { %1593 = vrot.lane.b32.xlu2 %v540_v51, %s8274_s16  ;;  %v7929_v43 = vpop.permute.xlu1 %7928  ;;  %v603_v51 = vld [vmem:[%s8364_s14 + $0x30a] sm:$0xff] }
 0x21f   : > { %2741 = vrot.lane.b32.xlu0 %v858_v39, %s8276_s18  ;;  %v7930_v1 = vunpack.i.l.bf16 %v7929_v43  ;;  %v341_v39 = vld [vmem:[%s8364_s14 + $0x2d8] sm:$0xff] }
 0x220   : > { %v2096_v30 = vpop.permute.xlu2 %2095 }
 0x221   : > { %v2730_v20 = vpop.permute.xlu0 %2729  ;;  %v3030_v13 = vsel %vm2943_vm0, %v341_v39, %v7930_v1 }
 0x222   : > { %v9495_v27 = vsel %vm3330_vm2, %v3287_v55, %v2730_v20  ;;  %v476_v55 = vld [vmem:[%s8364_s14 + $0x311] sm:$0xff] }
 0x223   : > { %14951 = vst [vmem:[#allocation80_spill] sm:$0xff] %v9495_v27  ;;  %7438 = vmatmul.msk.f32.gmra.mxu2 %vm3459_vm4, %v9495_v27  ;;  %v859_v27 = vld [vmem:[%s8364_s14 + $0x30c] sm:$0xff]  ;;  %v7962_v29 = vpack.i.bf16 %v414_v7, %v476_v55  ;;  %v669_v55 = vld [vmem:[%s8364_s14 + $0xfb] sm:$0xff] }
 0x224   : > { %2105 = vrot.lane.b32.xlu1 %v668_v18, %s8273_s15  ;;  %v796_v18 = vld [vmem:[%s8364_s14 + $0xf4] sm:$0xff] }
 0x226   : > { %2231 = vrot.lane.b32.xlu2 %v731_v35, %s8273_s15  ;;  %v2094_v15 = vpop.permute.xlu1 %2093 }
 0x227   : > { %1719 = vrot.lane.b32.xlu0 %v603_v51, %s8274_s16  ;;  %v3225_v7 = vsel %vm3201_vm1, %v9435_v9, %v2094_v15  ;;  %v279_v15 = vld [vmem:[%s8364_s14 + $0xc8] sm:$0xff] }
 0x228   : > { %v2734_v20 = vpop.permute.xlu2 %2733 }
 0x229   : > { %v1708_v37 = vpop.permute.xlu0 %1707 }
 0x22a   : > { %v9510_v34 = vsel %vm3072_vm3, %v3030_v13, %v1708_v37  ;;  %v3288_v1 = vsel %vm3201_vm1, %v1708_v37, %v2220_v57  ;;  %v7935_v13 = vunpack.i.l.bf16 %v9478_v52  ;;  %v604_v57 = vld [vmem:[%s8364_s14 + $0x312] sm:$0xff] }
 0x22b   : > { %14952 = vst [vmem:[#allocation81_spill] sm:$0xff] %v9510_v34  ;;  %3958 = vmatmul.f32.gmra.mxu3 %v9510_v34 }
 0x22c   : > { %2743 = vrot.lane.b32.xlu1 %v859_v27, %s8276_s18  ;;  %v342_v27 = vld [vmem:[%s8364_s14 + $0x2e0] sm:$0xff] }
 0x22d   : > { %v3031_v9 = vsel %vm2943_vm0, %v342_v27, %v7935_v13  ;;  %v9554_v27 = vpop.f32.mrf.mxu0 }
 0x22e   : > { %7963 = vrot.lane.b32.xlu2 %v7962_v29, %s8275_s17  ;;  %v2732_v35 = vpop.permute.xlu1 %2731 }
 0x22f   : > { %2617 = vrot.lane.b32.xlu0 %v796_v18, %s8276_s18  ;;  %v9520_v51 = vsel %vm3330_vm2, %v3288_v1, %v2732_v35  ;;  %v541_v18 = vld [vmem:[%s8364_s14 + $0xfa] sm:$0xff]  ;;  %v7931_v1 = vunpack.i.h.bf16 %v7929_v43 }
 0x230   : > { %14953 = vst [vmem:[#allocation82_spill] sm:$0xff] %v9520_v51  ;;  %v9522_v39 = vpop.permute.xlu2 %1711  ;;  %7439 = vmatmul.msk.f32.gmra.mxu2 %vm3459_vm4, %v9520_v51 }
 0x231   : > { %v2606_v29 = vpop.permute.xlu0 %2605  ;;  %v2968_v43 = vsel %vm2943_vm0, %v279_v15, %v7931_v1 }
 0x232   : > { %v9530_v37 = vsel %vm3330_vm2, %v3225_v7, %v2606_v29 }
 0x233   : > { %14954 = vst [vmem:[#allocation83_spill] sm:$0xff] %v9530_v37  ;;  %7376 = vmatmul.msk.f32.gmra.mxu1 %vm3459_vm4, %v9530_v37  ;;  %v280_v37 = vld [vmem:[%s8364_s14 + $0xd0] sm:$0xff] }
 0x234   : > { %1721 = vrot.lane.b32.xlu1 %v604_v57, %s8274_s16  ;;  %v797_v57 = vld [vmem:[%s8364_s14 + $0xfc] sm:$0xff] }
 0x236   : > { %2107 = vrot.lane.b32.xlu2 %v669_v55, %s8273_s15  ;;  %v1710_v35 = vpop.permute.xlu1 %1709  ;;  %v860_v55 = vld [vmem:[%s8364_s14 + $0x314] sm:$0xff] }
 0x237   : > { %1595 = vrot.lane.b32.xlu0 %v541_v18, %s8274_s16  ;;  %v9544_v7 = vsel %vm3072_vm3, %v3031_v9, %v1710_v35  ;;  %v732_v18 = vld [vmem:[%s8364_s14 + $0x313] sm:$0xff] }
 0x238   : > { %14955 = vst [vmem:[#allocation84_spill] sm:$0xff] %v9544_v7  ;;  %v9546_v29 = vpop.permute.xlu2 %2609  ;;  %3961 = vmatmul.f32.gmra.mxu3 %v9544_v7  ;;  %v477_v7 = vld [vmem:[%s8364_s14 + $0x319] sm:$0xff] }
 0x239   : > { %v1584_v34 = vpop.permute.xlu0 %1583 }
 0x23a   : > { %v9551_v13 = vsel %vm3072_vm3, %v2968_v43, %v1584_v34  ;;  %v3226_v1 = vsel %vm3201_vm1, %v1584_v34, %v2096_v30  ;;  %v415_v43 = vld [vmem:[%s8364_s14 + $0x111] sm:$0xff]  ;;  %v542_v34 = vld [vmem:[%s8364_s14 + $0x102] sm:$0xff]  ;;  %v7936_v30 = vunpack.i.h.bf16 %v9478_v52 }
 0x23b   : > { %14956 = vst [vmem:[#allocation85_spill] sm:$0xff] %v9551_v13  ;;  %3772 = vmatmul.f32.gmra.mxu0 %v9551_v13  ;;  %v9570_v13 = vpop.f32.mrf.mxu1 }
 0x23c   : > { %2619 = vrot.lane.b32.xlu1 %v797_v57, %s8276_s18 }
 0x23e   : > { %2745 = vrot.lane.b32.xlu2 %v860_v55, %s8276_s18  ;;  %v2608_v9 = vpop.permute.xlu1 %2607 }
 0x23f   : > { %2233 = vrot.lane.b32.xlu0 %v732_v18, %s8273_s15  ;;  %v9564_v15 = vsel %vm3330_vm2, %v3226_v1, %v2608_v9  ;;  %v7967_v1 = vpack.i.bf16 %v415_v43, %v477_v7  ;;  %v605_v9 = vld [vmem:[%s8364_s14 + $0x31a] sm:$0xff] }
 0x240   : > { %14957 = vst [vmem:[#allocation86_spill] sm:$0xff] %v9564_v15  ;;  %v9568_v51 = vpop.permute.xlu2 %1587  ;;  %7377 = vmatmul.msk.f32.gmra.mxu1 %vm3459_vm4, %v9564_v15  ;;  %v281_v15 = vld [vmem:[%s8364_s14 + $0xd8] sm:$0xff] }
 0x241   : > { %v2222_v57 = vpop.permute.xlu0 %2221 }
 0x242   : > { %v3289_v55 = vsel %vm3201_vm1, %v1710_v35, %v2222_v57  ;;  %v9586_v35 = vpop.f32.mrf.mxu0 }
 0x243   : > { %v9578_v18 = vsel %vm3330_vm2, %v3289_v55, %v2734_v20  ;;  %v2969_v20 = vsel %vm2943_vm0, %v280_v37, %v7936_v30  ;;  %v343_v55 = vld [vmem:[%s8364_s14 + $0x2e8] sm:$0xff] }
 0x244   : > { %14958 = vst [vmem:[#allocation87_spill] sm:$0xff] %v9578_v18  ;;  %7440 = vmatmul.msk.f32.gmra.mxu2 %vm3459_vm4, %v9578_v18  ;;  %1597 = vrot.lane.b32.xlu1 %v542_v34, %s8274_s16  ;;  %v733_v18 = vld [vmem:[%s8364_s14 + $0x31b] sm:$0xff] }
 0x246   : > { %1723 = vrot.lane.b32.xlu2 %v605_v9, %s8274_s16  ;;  %v1586_v52 = vpop.permute.xlu1 %1585 }
 0x247   : > { %7968 = vrot.lane.b32.xlu0 %v7967_v1, %s8275_s17  ;;  %v9591_v7 = vsel %vm3072_vm3, %v2969_v20, %v1586_v52  ;;  %v416_v20 = vld [vmem:[%s8364_s14 + $0x119] sm:$0xff] }
 0x248   : > { %14959 = vst [vmem:[#allocation88_spill] sm:$0xff] %v9591_v7  ;;  %v9593_v43 = vpop.permute.xlu2 %2225  ;;  %3775 = vmatmul.f32.gmra.mxu0 %v9591_v7 }
 0x249   : > { %v7939_v57 = vpop.permute.xlu0 %7938 }
 0x24a   : > { %v7941_v34 = vunpack.i.h.bf16 %v7939_v57  ;;  %v7940_v9 = vunpack.i.l.bf16 %v7939_v57  ;;  %v478_v57 = vld [vmem:[%s8364_s14 + $0x321] sm:$0xff] }
 0x24c   : > { %v3032_v1 = vsel %vm2943_vm0, %v343_v55, %v7940_v9  ;;  %2235 = vrot.lane.b32.xlu1 %v733_v18, %s8273_s15  ;;  %v2970_v30 = vsel %vm2943_vm0, %v281_v15, %v7941_v34  ;;  %v9619_v9 = vpop.f32.mrf.mxu0  ;;  %v7972_v15 = vpack.i.bf16 %v416_v20, %v478_v57 }
 0x24d   : > { %v9605_v37 = vsel %vm3072_vm3, %v3032_v1, %v9522_v39  ;;  %v9615_v18 = vsel %vm3072_vm3, %v2970_v30, %v9568_v51  ;;  %v9628_v30 = vpop.f32.mrf.mxu1 }
 0x24e   : > { %14960 = vst [vmem:[#allocation89_spill] sm:$0xff] %v9605_v37  ;;  %3964 = vmatmul.f32.gmra.mxu3 %v9605_v37  ;;  %2621 = vrot.lane.b32.xlu2 %v798_v0, %s8276_s18  ;;  %v2224_v7 = vpop.permute.xlu1 %2223  ;;  %v861_v37 = vld [vmem:[%s8364_s14 + $0x31c] sm:$0xff] }
 0x24f   : > { %2109 = vrot.lane.b32.xlu0 %v670_v23, %s8273_s15  ;;  %14961 = vst [vmem:[#allocation90_spill] sm:$0xff] %v9615_v18  ;;  %v543_v23 = vld [vmem:[%s8364_s14 + $0x112] sm:$0xff] }
 0x250   : > { %v9617_v55 = vpop.permute.xlu2 %7948  ;;  %3778 = vmatmul.f32.gmra.mxu0 %v9615_v18 }
 0x251   : > { %v2098_v1 = vpop.permute.xlu0 %2097 }
 0x252   : > { %v3227_v34 = vsel %vm3201_vm1, %v1586_v52, %v2098_v1  ;;  %v3290_v52 = vsel %vm3201_vm1, %v9522_v39, %v2224_v7  ;;  %v417_v7 = vld [vmem:[%s8364_s14 + $0x121] sm:$0xff] }
 0x253   : > { %v9625_v0 = vsel %vm3330_vm2, %v3227_v34, %v9546_v29  ;;  %v671_v34 = vld [vmem:[%s8364_s14 + $0x113] sm:$0xff] }
 0x254   : > { %14962 = vst [vmem:[#allocation91_spill] sm:$0xff] %v9625_v0  ;;  %7378 = vmatmul.msk.f32.gmra.mxu1 %vm3459_vm4, %v9625_v0  ;;  %7973 = vrot.lane.b32.xlu1 %v7972_v15, %s8275_s17  ;;  %v734_v15 = vld [vmem:[%s8364_s14 + $0x323] sm:$0xff] }
 0x256   : > { %1599 = vrot.lane.b32.xlu2 %v543_v23, %s8274_s16  ;;  %v7944_v20 = vpop.permute.xlu1 %7943  ;;  %v344_v23 = vld [vmem:[%s8364_s14 + $0x2f0] sm:$0xff] }
 0x257   : > { %2747 = vrot.lane.b32.xlu0 %v861_v37, %s8276_s18  ;;  %v7945_v18 = vunpack.i.l.bf16 %v7944_v20  ;;  %v606_v37 = vld [vmem:[%s8364_s14 + $0x322] sm:$0xff] }
 0x258   : > { %v9636_v29 = vpop.permute.xlu2 %2101 }
 0x259   : > { %v2736_v57 = vpop.permute.xlu0 %2735  ;;  %v3033_v39 = vsel %vm2943_vm0, %v344_v23, %v7945_v18 }
 0x25a   : > { %v9641_v1 = vsel %vm3330_vm2, %v3290_v52, %v2736_v57  ;;  %v479_v52 = vld [vmem:[%s8364_s14 + $0x331] sm:$0xff] }
 0x25b   : > { %14963 = vst [vmem:[#allocation92_spill] sm:$0xff] %v9641_v1  ;;  %7441 = vmatmul.msk.f32.gmra.mxu2 %vm3459_vm4, %v9641_v1  ;;  %v862_v1 = vld [vmem:[%s8364_s14 + $0x324] sm:$0xff]  ;;  %v7977_v50 = vpack.i.bf16 %v417_v7, %v479_v52  ;;  %v345_v7 = vld [vmem:[%s8364_s14 + $0x2f8] sm:$0xff]  ;;  %v9681_v52 = vpop.f32.mrf.mxu1 }
 0x25c   : > { %2111 = vrot.lane.b32.xlu1 %v671_v34, %s8273_s15  ;;  %v799_v34 = vld [vmem:[%s8364_s14 + $0x114] sm:$0xff] }
 0x25e   : > { %2237 = vrot.lane.b32.xlu2 %v734_v15, %s8273_s15  ;;  %v2100_v0 = vpop.permute.xlu1 %2099 }
 0x25f   : > { %1725 = vrot.lane.b32.xlu0 %v606_v37, %s8274_s16 }
 0x260   : > { %v2740_v57 = vpop.permute.xlu2 %2739 }
 0x261   : > { %v1714_v8 = vpop.permute.xlu0 %1713 }
 0x262   : > { %v9656_v38 = vsel %vm3072_vm3, %v3033_v39, %v1714_v8  ;;  %v3291_v18 = vsel %vm3201_vm1, %v1714_v8, %v9593_v43  ;;  %v7950_v39 = vunpack.i.l.bf16 %v9617_v55  ;;  %v607_v43 = vld [vmem:[%s8364_s14 + $0x332] sm:$0xff] }
 0x263   : > { %14964 = vst [vmem:[#allocation93_spill] sm:$0xff] %v9656_v38  ;;  %3967 = vmatmul.f32.gmra.mxu3 %v9656_v38  ;;  %v9722_v26 = vpop.f32.mrf.mxu1 }
 0x264   : > { %2749 = vrot.lane.b32.xlu1 %v862_v1, %s8276_s18  ;;  %v3228_v1 = vsel %vm3201_vm1, %v9568_v51, %v2100_v0  ;;  %v3034_v51 = vsel %vm2943_vm0, %v345_v7, %v7950_v39  ;;  %v282_v0 = vld [vmem:[%s8364_s14 + $0xe0] sm:$0xff] }
 0x265   : > { %v800_v7 = vld [vmem:[%s8364_s14 + $0x11c] sm:$0xff] }
 0x266   : > { %7978 = vrot.lane.b32.xlu2 %v7977_v50, %s8275_s17  ;;  %v2738_v15 = vpop.permute.xlu1 %2737 }
 0x267   : > { %2623 = vrot.lane.b32.xlu0 %v799_v34, %s8276_s18  ;;  %v9667_v37 = vsel %vm3330_vm2, %v3291_v18, %v2738_v15  ;;  %v672_v34 = vld [vmem:[%s8364_s14 + $0x11b] sm:$0xff]  ;;  %v7946_v15 = vunpack.i.h.bf16 %v7944_v20 }
 0x268   : > { %14965 = vst [vmem:[#allocation94_spill] sm:$0xff] %v9667_v37  ;;  %v9669_v23 = vpop.permute.xlu2 %1717  ;;  %7442 = vmatmul.msk.f32.gmra.mxu2 %vm3459_vm4, %v9667_v37  ;;  %v544_v18 = vld [vmem:[%s8364_s14 + $0x11a] sm:$0xff]  ;;  %v9697_v37 = vpop.f32.mrf.mxu3 }
 0x269   : > { %v2612_v50 = vpop.permute.xlu0 %2611 }
 0x26a   : > { %v9677_v8 = vsel %vm3330_vm2, %v3228_v1, %v2612_v50 }
 0x26b   : > { %14966 = vst [vmem:[#allocation95_spill] sm:$0xff] %v9677_v8  ;;  %7379 = vmatmul.msk.f32.gmra.mxu1 %vm3459_vm4, %v9677_v8  ;;  %v9784_v17 = vpop.f32.mrf.mxu1 }
 0x26c   : > { %1727 = vrot.lane.b32.xlu1 %v607_v43, %s8274_s16  ;;  %v2971_v43 = vsel %vm2943_vm0, %v282_v0, %v7946_v15 }
 0x26e   : > { %2113 = vrot.lane.b32.xlu2 %v672_v34, %s8273_s15  ;;  %v1716_v1 = vpop.permute.xlu1 %1715  ;;  %v9705_v34 = vpop.f32.mrf.mxu0 }
 0x26f   : > { %1601 = vrot.lane.b32.xlu0 %v544_v18, %s8274_s16  ;;  %v9693_v50 = vsel %vm3072_vm3, %v3034_v51, %v1716_v1  ;;  %v863_v18 = vld [vmem:[%s8364_s14 + $0x334] sm:$0xff] }
 0x270   : > { %14967 = vst [vmem:[#allocation96_spill] sm:$0xff] %v9693_v50  ;;  %v9695_v38 = vpop.permute.xlu2 %2615  ;;  %3970 = vmatmul.f32.gmra.mxu3 %v9693_v50  ;;  %v735_v51 = vld [vmem:[%s8364_s14 + $0x333] sm:$0xff]  ;;  %v418_v50 = vld [vmem:[%s8364_s14 + $0x129] sm:$0xff] }
 0x271   : > { %v1590_v20 = vpop.permute.xlu0 %1589 }
 0x272   : > { %v9702_v39 = vsel %vm3072_vm3, %v2971_v43, %v1590_v20  ;;  %v3229_v15 = vsel %vm3201_vm1, %v1590_v20, %v9636_v29  ;;  %v545_v29 = vld [vmem:[%s8364_s14 + $0x122] sm:$0xff]  ;;  %v7951_v20 = vunpack.i.h.bf16 %v9617_v55 }
 0x273   : > { %14968 = vst [vmem:[#allocation97_spill] sm:$0xff] %v9702_v39  ;;  %3781 = vmatmul.f32.gmra.mxu0 %v9702_v39  ;;  %v480_v39 = vld [vmem:[%s8364_s14 + $0x339] sm:$0xff] }
 0x274   : > { %2625 = vrot.lane.b32.xlu1 %v800_v7, %s8276_s18 }
 0x276   : > { %2751 = vrot.lane.b32.xlu2 %v863_v18, %s8276_s18  ;;  %v2614_v0 = vpop.permute.xlu1 %2613  ;;  %v9740_v55 = vpop.f32.mrf.mxu0 }
 0x277   : > { %2239 = vrot.lane.b32.xlu0 %v735_v51, %s8273_s15  ;;  %v9716_v43 = vsel %vm3330_vm2, %v3229_v15, %v2614_v0  ;;  %v7982_v15 = vpack.i.bf16 %v418_v50, %v480_v39  ;;  %v608_v0 = vld [vmem:[%s8364_s14 + $0x33a] sm:$0xff] }
 0x278   : > { %14969 = vst [vmem:[#allocation98_spill] sm:$0xff] %v9716_v43  ;;  %v9720_v8 = vpop.permute.xlu2 %1593  ;;  %7380 = vmatmul.msk.f32.gmra.mxu1 %vm3459_vm4, %v9716_v43  ;;  %v283_v43 = vld [vmem:[%s8364_s14 + $0xe8] sm:$0xff] }
 0x279   : > { %v2228_v7 = vpop.permute.xlu0 %2227 }
 0x27a   : > { %v3292_v18 = vsel %vm3201_vm1, %v1716_v1, %v2228_v7  ;;  %v2972_v1 = vsel %vm2943_vm0, %v283_v43, %v7951_v20 }
 0x27b   : > { %v9730_v51 = vsel %vm3330_vm2, %v3292_v18, %v2740_v57  ;;  %v346_v18 = vld [vmem:[%s8364_s14 + $0x300] sm:$0xff] }
 0x27c   : > { %14970 = vst [vmem:[#allocation99_spill] sm:$0xff] %v9730_v51  ;;  %7443 = vmatmul.msk.f32.gmra.mxu2 %vm3459_vm4, %v9730_v51  ;;  %1603 = vrot.lane.b32.xlu1 %v545_v29, %s8274_s16  ;;  %v736_v51 = vld [vmem:[%s8364_s14 + $0x33b] sm:$0xff] }
 0x27e   : > { %1729 = vrot.lane.b32.xlu2 %v608_v0, %s8274_s16  ;;  %v1592_v57 = vpop.permute.xlu1 %1591 }
 0x27f   : > { %7983 = vrot.lane.b32.xlu0 %v7982_v15, %s8275_s17  ;;  %v9745_v50 = vsel %vm3072_vm3, %v2972_v1, %v1592_v57  ;;  %v9762_v1 = vpop.f32.mrf.mxu3 }
 0x280   : > { %14971 = vst [vmem:[#allocation100_spill] sm:$0xff] %v9745_v50  ;;  %v9747_v39 = vpop.permute.xlu2 %2231  ;;  %3784 = vmatmul.f32.gmra.mxu0 %v9745_v50  ;;  %v481_v50 = vld [vmem:[%s8364_s14 + $0x341] sm:$0xff] }
 0x281   : > { %v7954_v7 = vpop.permute.xlu0 %7953 }
 0x282   : > { %v7956_v29 = vunpack.i.h.bf16 %v7954_v7  ;;  %v7955_v0 = vunpack.i.l.bf16 %v7954_v7  ;;  %v419_v7 = vld [vmem:[%s8364_s14 + $0x131] sm:$0xff] }
 0x284   : > { %v3035_v15 = vsel %vm2943_vm0, %v346_v18, %v7955_v0  ;;  %2241 = vrot.lane.b32.xlu1 %v736_v51, %s8273_s15  ;;  %v2973_v20 = vsel %vm2943_vm0, %v284_v40, %v7956_v29  ;;  %v9775_v40 = vpop.f32.mrf.mxu0 }
 0x285   : > { %v9759_v43 = vsel %vm3072_vm3, %v3035_v15, %v9669_v23  ;;  %v9771_v51 = vsel %vm3072_vm3, %v2973_v20, %v9720_v8  ;;  %v7987_v15 = vpack.i.bf16 %v419_v7, %v481_v50  ;;  %v864_v20 = vld [vmem:[%s8364_s14 + $0x33c] sm:$0xff] }
 0x286   : > { %14972 = vst [vmem:[#allocation101_spill] sm:$0xff] %v9759_v43  ;;  %3973 = vmatmul.f32.gmra.mxu3 %v9759_v43  ;;  %2627 = vrot.lane.b32.xlu2 %v801_v58, %s8276_s18  ;;  %v2230_v18 = vpop.permute.xlu1 %2229 }
 0x287   : > { %2115 = vrot.lane.b32.xlu0 %v673_v12, %s8273_s15  ;;  %14973 = vst [vmem:[#allocation102_spill] sm:$0xff] %v9771_v51  ;;  %v546_v12 = vld [vmem:[%s8364_s14 + $0x12a] sm:$0xff]  ;;  %v9817_v32 = vpop.f32.mrf.mxu3 }
 0x288   : > { %v9773_v0 = vpop.permute.xlu2 %7963  ;;  %3787 = vmatmul.f32.gmra.mxu0 %v9771_v51  ;;  %v9800_v51 = vpop.f32.mrf.mxu2 }
 0x289   : > { %v2104_v29 = vpop.permute.xlu0 %2103 }
 0x28a   : > { %v3230_v43 = vsel %vm3201_vm1, %v1592_v57, %v2104_v29  ;;  %v674_v29 = vld [vmem:[%s8364_s14 + $0x12b] sm:$0xff] }
 0x28b   : > { %v9781_v58 = vsel %vm3330_vm2, %v3230_v43, %v9695_v38  ;;  %v3293_v38 = vsel %vm3201_vm1, %v9669_v23, %v2230_v18 }
 0x28c   : > { %14974 = vst [vmem:[#allocation103_spill] sm:$0xff] %v9781_v58  ;;  %7381 = vmatmul.msk.f32.gmra.mxu1 %vm3459_vm4, %v9781_v58  ;;  %7988 = vrot.lane.b32.xlu1 %v7987_v15, %s8275_s17  ;;  %v347_v58 = vld [vmem:[%s8364_s14 + $0x308] sm:$0xff] }
 0x28e   : > { %1605 = vrot.lane.b32.xlu2 %v546_v12, %s8274_s16  ;;  %v7959_v50 = vpop.permute.xlu1 %7958  ;;  %v737_v12 = vld [vmem:[%s8364_s14 + $0x343] sm:$0xff] }
 0x28f   : > { %2753 = vrot.lane.b32.xlu0 %v864_v20, %s8276_s18  ;;  %v7960_v15 = vunpack.i.l.bf16 %v7959_v50  ;;  %v609_v20 = vld [vmem:[%s8364_s14 + $0x342] sm:$0xff] }
 0x290   : > { %v9792_v57 = vpop.permute.xlu2 %2107 }
 0x291   : > { %v2742_v43 = vpop.permute.xlu0 %2741  ;;  %v3036_v18 = vsel %vm2943_vm0, %v347_v58, %v7960_v15 }
 0x292   : > { %v9797_v7 = vsel %vm3330_vm2, %v3293_v38, %v2742_v43  ;;  %v420_v38 = vld [vmem:[%s8364_s14 + $0x139] sm:$0xff]  ;;  %v482_v43 = vld [vmem:[%s8364_s14 + $0x349] sm:$0xff] }
 0x293   : > { %14975 = vst [vmem:[#allocation104_spill] sm:$0xff] %v9797_v7  ;;  %7444 = vmatmul.msk.f32.gmra.mxu2 %vm3459_vm4, %v9797_v7  ;;  %v865_v7 = vld [vmem:[%s8364_s14 + $0x344] sm:$0xff]  ;;  %v7992_v31 = vpack.i.bf16 %v420_v38, %v482_v43  ;;  %v348_v43 = vld [vmem:[%s8364_s14 + $0x310] sm:$0xff] }
 0x294   : > { %2117 = vrot.lane.b32.xlu1 %v674_v29, %s8273_s15  ;;  %v802_v29 = vld [vmem:[%s8364_s14 + $0x12c] sm:$0xff] }
 0x295   : > { %v610_v38 = vld [vmem:[%s8364_s14 + $0x34a] sm:$0xff] }
 0x296   : > { %2243 = vrot.lane.b32.xlu2 %v737_v12, %s8273_s15  ;;  %v2106_v23 = vpop.permute.xlu1 %2105 }
 0x297   : > { %1731 = vrot.lane.b32.xlu0 %v609_v20, %s8274_s16 }
 0x298   : > { %v2746_v63 = vpop.permute.xlu2 %2745 }
 0x299   : > { %v1720_v47 = vpop.permute.xlu0 %1719 }
 0x29a   : > { %v9814_v44 = vsel %vm3072_vm3, %v3036_v18, %v1720_v47  ;;  %v3294_v58 = vsel %vm3201_vm1, %v1720_v47, %v9747_v39  ;;  %v9831_v18 = vpop.f32.mrf.mxu2 }
 0x29b   : > { %14976 = vst [vmem:[#allocation105_spill] sm:$0xff] %v9814_v44  ;;  %3976 = vmatmul.f32.gmra.mxu3 %v9814_v44  ;;  %v7961_v44 = vunpack.i.h.bf16 %v7959_v50 }
 0x29c   : > { %2755 = vrot.lane.b32.xlu1 %v865_v7, %s8276_s18  ;;  %v7965_v7 = vunpack.i.l.bf16 %v9773_v0 }
 0x29e   : > { %7993 = vrot.lane.b32.xlu2 %v7992_v31, %s8275_s17  ;;  %v2744_v15 = vpop.permute.xlu1 %2743  ;;  %v3231_v31 = vsel %vm3201_vm1, %v9720_v8, %v2106_v23  ;;  %v3037_v8 = vsel %vm2943_vm0, %v348_v43, %v7965_v7  ;;  %v285_v23 = vld [vmem:[%s8364_s14 + $0xf8] sm:$0xff] }
 0x29f   : > { %2629 = vrot.lane.b32.xlu0 %v802_v29, %s8276_s18  ;;  %v9827_v12 = vsel %vm3330_vm2, %v3294_v58, %v2744_v15  ;;  %v9843_v29 = vpop.f32.mrf.mxu1  ;;  %v675_v58 = vld [vmem:[%s8364_s14 + $0x133] sm:$0xff] }
 0x2a0   : > { %14977 = vst [vmem:[#allocation106_spill] sm:$0xff] %v9827_v12  ;;  %v9829_v20 = vpop.permute.xlu2 %1723  ;;  %7445 = vmatmul.msk.f32.gmra.mxu2 %vm3459_vm4, %v9827_v12  ;;  %v547_v15 = vld [vmem:[%s8364_s14 + $0x132] sm:$0xff] }
 0x2a1   : > { %v2618_v47 = vpop.permute.xlu0 %2617  ;;  %v803_v43 = vld [vmem:[%s8364_s14 + $0x134] sm:$0xff] }
 0x2a2   : > { %v9839_v39 = vsel %vm3330_vm2, %v3231_v31, %v2618_v47  ;;  %v9895_v24 = vpop.f32.mrf.mxu2 }
 0x2a3   : > { %14978 = vst [vmem:[#allocation107_spill] sm:$0xff] %v9839_v39  ;;  %7382 = vmatmul.msk.f32.gmra.mxu1 %vm3459_vm4, %v9839_v39  ;;  %v9859_v39 = vpop.f32.mrf.mxu3 }
 0x2a4   : > { %1733 = vrot.lane.b32.xlu1 %v610_v38, %s8274_s16  ;;  %v2974_v38 = vsel %vm2943_vm0, %v285_v23, %v7961_v44 }
 0x2a6   : > { %2119 = vrot.lane.b32.xlu2 %v675_v58, %s8273_s15  ;;  %v1722_v31 = vpop.permute.xlu1 %1721  ;;  %v9867_v58 = vpop.f32.mrf.mxu0 }
 0x2a7   : > { %1607 = vrot.lane.b32.xlu0 %v547_v15, %s8274_s16  ;;  %v9855_v47 = vsel %vm3072_vm3, %v3037_v8, %v1722_v31  ;;  %v866_v15 = vld [vmem:[%s8364_s14 + $0x34c] sm:$0xff]  ;;  %v9884_v14 = vpop.f32.mrf.mxu1 }
 0x2a8   : > { %14979 = vst [vmem:[#allocation108_spill] sm:$0xff] %v9855_v47  ;;  %v9857_v12 = vpop.permute.xlu2 %2621  ;;  %3979 = vmatmul.f32.gmra.mxu3 %v9855_v47  ;;  %v738_v8 = vld [vmem:[%s8364_s14 + $0x34b] sm:$0xff]  ;;  %v421_v47 = vld [vmem:[%s8364_s14 + $0x141] sm:$0xff] }
 0x2a9   : > { %v1596_v50 = vpop.permute.xlu0 %1595 }
 0x2aa   : > { %v9864_v7 = vsel %vm3072_vm3, %v2974_v38, %v1596_v50  ;;  %v3232_v44 = vsel %vm3201_vm1, %v1596_v50, %v9792_v57  ;;  %v548_v57 = vld [vmem:[%s8364_s14 + $0x13a] sm:$0xff]  ;;  %v7966_v50 = vunpack.i.h.bf16 %v9773_v0 }
 0x2ab   : > { %14980 = vst [vmem:[#allocation109_spill] sm:$0xff] %v9864_v7  ;;  %3790 = vmatmul.f32.gmra.mxu0 %v9864_v7  ;;  %v483_v7 = vld [vmem:[%s8364_s14 + $0x351] sm:$0xff] }
 0x2ac   : > { %2631 = vrot.lane.b32.xlu1 %v803_v43, %s8276_s18 }
 0x2ae   : > { %2757 = vrot.lane.b32.xlu2 %v866_v15, %s8276_s18  ;;  %v2620_v23 = vpop.permute.xlu1 %2619  ;;  %v9902_v0 = vpop.f32.mrf.mxu0 }
 0x2af   : > { %2245 = vrot.lane.b32.xlu0 %v738_v8, %s8273_s15  ;;  %v9878_v38 = vsel %vm3330_vm2, %v3232_v44, %v2620_v23  ;;  %v7997_v44 = vpack.i.bf16 %v421_v47, %v483_v7  ;;  %v611_v23 = vld [vmem:[%s8364_s14 + $0x352] sm:$0xff]  ;;  %v9946_v19 = vpop.f32.mrf.mxu1 }
 0x2b0   : > { %14981 = vst [vmem:[#allocation110_spill] sm:$0xff] %v9878_v38  ;;  %v9882_v10 = vpop.permute.xlu2 %1599  ;;  %7383 = vmatmul.msk.f32.gmra.mxu1 %vm3459_vm4, %v9878_v38  ;;  %v286_v38 = vld [vmem:[%s8364_s14 + $0x100] sm:$0xff] }
 0x2b1   : > { %v2234_v43 = vpop.permute.xlu0 %2233 }
 0x2b2   : > { %v3295_v15 = vsel %vm3201_vm1, %v1722_v31, %v2234_v43  ;;  %v2975_v31 = vsel %vm2943_vm0, %v286_v38, %v7966_v50 }
 0x2b3   : > { %v9892_v8 = vsel %vm3330_vm2, %v3295_v15, %v2746_v63  ;;  %v349_v15 = vld [vmem:[%s8364_s14 + $0x318] sm:$0xff] }
 0x2b4   : > { %14982 = vst [vmem:[#allocation111_spill] sm:$0xff] %v9892_v8  ;;  %7446 = vmatmul.msk.f32.gmra.mxu2 %vm3459_vm4, %v9892_v8  ;;  %1609 = vrot.lane.b32.xlu1 %v548_v57, %s8274_s16  ;;  %v739_v8 = vld [vmem:[%s8364_s14 + $0x353] sm:$0xff] }
 0x2b6   : > { %1735 = vrot.lane.b32.xlu2 %v611_v23, %s8274_s16  ;;  %v1598_v63 = vpop.permute.xlu1 %1597 }
 0x2b7   : > { %7998 = vrot.lane.b32.xlu0 %v7997_v44, %s8275_s17  ;;  %v9907_v47 = vsel %vm3072_vm3, %v2975_v31, %v1598_v63  ;;  %v9924_v31 = vpop.f32.mrf.mxu3 }
 0x2b8   : > { %14983 = vst [vmem:[#allocation112_spill] sm:$0xff] %v9907_v47  ;;  %v9909_v7 = vpop.permute.xlu2 %2237  ;;  %3793 = vmatmul.f32.gmra.mxu0 %v9907_v47  ;;  %v484_v47 = vld [vmem:[%s8364_s14 + $0x359] sm:$0xff] }
 0x2b9   : > { %v7969_v43 = vpop.permute.xlu0 %7968 }
 0x2ba   : > { %v7971_v57 = vunpack.i.h.bf16 %v7969_v43  ;;  %v7970_v23 = vunpack.i.l.bf16 %v7969_v43  ;;  %v422_v43 = vld [vmem:[%s8364_s14 + $0x149] sm:$0xff] }
 0x2bc   : > { %v3038_v44 = vsel %vm2943_vm0, %v349_v15, %v7970_v23  ;;  %2247 = vrot.lane.b32.xlu1 %v739_v8, %s8273_s15  ;;  %v2976_v50 = vsel %vm2943_vm0, %v287_v25, %v7971_v57  ;;  %v9937_v25 = vpop.f32.mrf.mxu0 }
 0x2bd   : > { %v9921_v38 = vsel %vm3072_vm3, %v3038_v44, %v9829_v20  ;;  %v9933_v8 = vsel %vm3072_vm3, %v2976_v50, %v9882_v10  ;;  %v8002_v44 = vpack.i.bf16 %v422_v43, %v484_v47  ;;  %v867_v50 = vld [vmem:[%s8364_s14 + $0x354] sm:$0xff] }
 0x2be   : > { %14984 = vst [vmem:[#allocation113_spill] sm:$0xff] %v9921_v38  ;;  %3982 = vmatmul.f32.gmra.mxu3 %v9921_v38  ;;  %2633 = vrot.lane.b32.xlu2 %v804_v16, %s8276_s18  ;;  %v2236_v15 = vpop.permute.xlu1 %2235 }
 0x2bf   : > { %2121 = vrot.lane.b32.xlu0 %v676_v49, %s8273_s15  ;;  %14985 = vst [vmem:[#allocation114_spill] sm:$0xff] %v9933_v8  ;;  %v549_v49 = vld [vmem:[%s8364_s14 + $0x142] sm:$0xff]  ;;  %v9979_v36 = vpop.f32.mrf.mxu3 }
 0x2c0   : > { %v9935_v23 = vpop.permute.xlu2 %7978  ;;  %3796 = vmatmul.f32.gmra.mxu0 %v9933_v8  ;;  %v9962_v8 = vpop.f32.mrf.mxu2 }
 0x2c1   : > { %v2110_v57 = vpop.permute.xlu0 %2109 }
 0x2c2   : > { %v3233_v38 = vsel %vm3201_vm1, %v1598_v63, %v2110_v57  ;;  %v677_v57 = vld [vmem:[%s8364_s14 + $0x143] sm:$0xff] }
 0x2c3   : > { %v9943_v16 = vsel %vm3330_vm2, %v3233_v38, %v9857_v12  ;;  %v3296_v12 = vsel %vm3201_vm1, %v9829_v20, %v2236_v15 }
 0x2c4   : > { %14986 = vst [vmem:[#allocation115_spill] sm:$0xff] %v9943_v16  ;;  %7384 = vmatmul.msk.f32.gmra.mxu1 %vm3459_vm4, %v9943_v16  ;;  %8003 = vrot.lane.b32.xlu1 %v8002_v44, %s8275_s17  ;;  %v350_v16 = vld [vmem:[%s8364_s14 + $0x320] sm:$0xff] }
 0x2c6   : > { %1611 = vrot.lane.b32.xlu2 %v549_v49, %s8274_s16  ;;  %v7974_v47 = vpop.permute.xlu1 %7973  ;;  %v740_v49 = vld [vmem:[%s8364_s14 + $0x35b] sm:$0xff] }
 0x2c7   : > { %2759 = vrot.lane.b32.xlu0 %v867_v50, %s8276_s18  ;;  %v7975_v44 = vunpack.i.l.bf16 %v7974_v47  ;;  %v612_v50 = vld [vmem:[%s8364_s14 + $0x35a] sm:$0xff] }
 0x2c8   : > { %v9954_v63 = vpop.permute.xlu2 %2113 }
 0x2c9   : > { %v2748_v38 = vpop.permute.xlu0 %2747  ;;  %v3039_v15 = vsel %vm2943_vm0, %v350_v16, %v7975_v44 }
 0x2ca   : > { %v9959_v43 = vsel %vm3330_vm2, %v3296_v12, %v2748_v38  ;;  %v423_v12 = vld [vmem:[%s8364_s14 + $0x151] sm:$0xff]  ;;  %v485_v38 = vld [vmem:[%s8364_s14 + $0x361] sm:$0xff] }
 0x2cb   : > { %14987 = vst [vmem:[#allocation116_spill] sm:$0xff] %v9959_v43  ;;  %7447 = vmatmul.msk.f32.gmra.mxu2 %vm3459_vm4, %v9959_v43  ;;  %v868_v43 = vld [vmem:[%s8364_s14 + $0x35c] sm:$0xff]  ;;  %v8007_v46 = vpack.i.bf16 %v423_v12, %v485_v38  ;;  %v351_v38 = vld [vmem:[%s8364_s14 + $0x330] sm:$0xff] }
 0x2cc   : > { %2123 = vrot.lane.b32.xlu1 %v677_v57, %s8273_s15  ;;  %v805_v57 = vld [vmem:[%s8364_s14 + $0x144] sm:$0xff] }
 0x2cd   : > { %v613_v12 = vld [vmem:[%s8364_s14 + $0x362] sm:$0xff] }
 0x2ce   : > { %2249 = vrot.lane.b32.xlu2 %v740_v49, %s8273_s15  ;;  %v2112_v20 = vpop.permute.xlu1 %2111 }
 0x2cf   : > { %1737 = vrot.lane.b32.xlu0 %v612_v50, %s8274_s16 }
 0x2d0   : > { %v2752_v33 = vpop.permute.xlu2 %2751 }
 0x2d1   : > { %v1726_v6 = vpop.permute.xlu0 %1725 }
 0x2d2   : > { %v9976_v59 = vsel %vm3072_vm3, %v3039_v15, %v1726_v6  ;;  %v3297_v16 = vsel %vm3201_vm1, %v1726_v6, %v9909_v7  ;;  %v9993_v15 = vpop.f32.mrf.mxu2 }
 0x2d3   : > { %14988 = vst [vmem:[#allocation117_spill] sm:$0xff] %v9976_v59  ;;  %3985 = vmatmul.f32.gmra.mxu3 %v9976_v59  ;;  %v7976_v59 = vunpack.i.h.bf16 %v7974_v47 }
 0x2d4   : > { %2761 = vrot.lane.b32.xlu1 %v868_v43, %s8276_s18  ;;  %v7980_v43 = vunpack.i.l.bf16 %v9935_v23 }
 0x2d6   : > { %8008 = vrot.lane.b32.xlu2 %v8007_v46, %s8275_s17  ;;  %v2750_v44 = vpop.permute.xlu1 %2749  ;;  %v3234_v46 = vsel %vm3201_vm1, %v9882_v10, %v2112_v20  ;;  %v3040_v10 = vsel %vm2943_vm0, %v351_v38, %v7980_v43  ;;  %v288_v20 = vld [vmem:[%s8364_s14 + $0x118] sm:$0xff]  ;;  %v806_v38 = vld [vmem:[%s8364_s14 + $0x14c] sm:$0xff] }
 0x2d7   : > { %2635 = vrot.lane.b32.xlu0 %v805_v57, %s8276_s18  ;;  %v9989_v49 = vsel %vm3330_vm2, %v3297_v16, %v2750_v44  ;;  %v10005_v57 = vpop.f32.mrf.mxu1  ;;  %v678_v16 = vld [vmem:[%s8364_s14 + $0x14b] sm:$0xff] }
 0x2d8   : > { %14989 = vst [vmem:[#allocation118_spill] sm:$0xff] %v9989_v49  ;;  %v9991_v50 = vpop.permute.xlu2 %1729  ;;  %7448 = vmatmul.msk.f32.gmra.mxu2 %vm3459_vm4, %v9989_v49  ;;  %v550_v44 = vld [vmem:[%s8364_s14 + $0x14a] sm:$0xff] }
 0x2d9   : > { %v2624_v6 = vpop.permute.xlu0 %2623 }
 0x2da   : > { %v10001_v7 = vsel %vm3330_vm2, %v3234_v46, %v2624_v6  ;;  %v10057_v56 = vpop.f32.mrf.mxu2 }
 0x2db   : > { %14990 = vst [vmem:[#allocation119_spill] sm:$0xff] %v10001_v7  ;;  %7385 = vmatmul.msk.f32.gmra.mxu1 %vm3459_vm4, %v10001_v7  ;;  %v10021_v7 = vpop.f32.mrf.mxu3 }
 0x2dc   : > { %1739 = vrot.lane.b32.xlu1 %v613_v12, %s8274_s16  ;;  %14992 = vst [vmem:[#allocation121_spill] sm:$0xff] %v10021_v7  ;;  %v2977_v12 = vsel %vm2943_vm0, %v288_v20, %v7976_v59 }
 0x2dd   : > { %14996 = vst [vmem:[#allocation125_spill] sm:$0xff] %v10057_v56 }
 0x2de   : > { %2125 = vrot.lane.b32.xlu2 %v678_v16, %s8273_s15  ;;  %v1728_v46 = vpop.permute.xlu1 %1727  ;;  %v10029_v16 = vpop.f32.mrf.mxu0 }
 0x2df   : > { %1613 = vrot.lane.b32.xlu0 %v550_v44, %s8274_s16  ;;  %v10017_v6 = vsel %vm3072_vm3, %v3040_v10, %v1728_v46  ;;  %v869_v44 = vld [vmem:[%s8364_s14 + $0x364] sm:$0xff]  ;;  %v10046_v21 = vpop.f32.mrf.mxu1 }
 0x2e0   : > { %14991 = vst [vmem:[#allocation120_spill] sm:$0xff] %v10017_v6  ;;  %v10019_v49 = vpop.permute.xlu2 %2627  ;;  %3988 = vmatmul.f32.gmra.mxu3 %v10017_v6  ;;  %v741_v10 = vld [vmem:[%s8364_s14 + $0x363] sm:$0xff]  ;;  %v424_v6 = vld [vmem:[%s8364_s14 + $0x159] sm:$0xff] }
 0x2e1   : > { %v1602_v47 = vpop.permute.xlu0 %1601 }
 0x2e2   : > { %v10026_v43 = vsel %vm3072_vm3, %v2977_v12, %v1602_v47  ;;  %v3235_v59 = vsel %vm3201_vm1, %v1602_v47, %v9954_v63  ;;  %v551_v63 = vld [vmem:[%s8364_s14 + $0x152] sm:$0xff]  ;;  %v7981_v47 = vunpack.i.h.bf16 %v9935_v23 }
 0x2e3   : > { %14993 = vst [vmem:[#allocation122_spill] sm:$0xff] %v10026_v43  ;;  %3799 = vmatmul.f32.gmra.mxu0 %v10026_v43  ;;  %v486_v43 = vld [vmem:[%s8364_s14 + $0x369] sm:$0xff] }
 0x2e4   : > { %2637 = vrot.lane.b32.xlu1 %v806_v38, %s8276_s18 }
 0x2e6   : > { %2763 = vrot.lane.b32.xlu2 %v869_v44, %s8276_s18  ;;  %v2626_v20 = vpop.permute.xlu1 %2625  ;;  %v10064_v23 = vpop.f32.mrf.mxu0 }
 0x2e7   : > { %2251 = vrot.lane.b32.xlu0 %v741_v10, %s8273_s15  ;;  %v10040_v12 = vsel %vm3330_vm2, %v3235_v59, %v2626_v20  ;;  %v8012_v59 = vpack.i.bf16 %v424_v6, %v486_v43  ;;  %v614_v20 = vld [vmem:[%s8364_s14 + $0x36a] sm:$0xff]  ;;  %14997 = vst [vmem:[#allocation126_spill] sm:$0xff] %v10064_v23  ;;  %v807_v23 = vld [vmem:[%s8364_s14 + $0x154] sm:$0xff] }
 0x2e8   : > { %14994 = vst [vmem:[#allocation123_spill] sm:$0xff] %v10040_v12  ;;  %v10044_v5 = vpop.permute.xlu2 %1605  ;;  %7386 = vmatmul.msk.f32.gmra.mxu1 %vm3459_vm4, %v10040_v12  ;;  %v289_v12 = vld [vmem:[%s8364_s14 + $0x120] sm:$0xff] }
 0x2e9   : > { %v2240_v38 = vpop.permute.xlu0 %2239 }
 0x2ea   : > { %v3298_v44 = vsel %vm3201_vm1, %v1728_v46, %v2240_v38  ;;  %v2978_v46 = vsel %vm2943_vm0, %v289_v12, %v7981_v47 }
 0x2eb   : > { %v10054_v10 = vsel %vm3330_vm2, %v3298_v44, %v2752_v33  ;;  %v352_v44 = vld [vmem:[%s8364_s14 + $0x338] sm:$0xff] }
 0x2ec   : > { %14995 = vst [vmem:[#allocation124_spill] sm:$0xff] %v10054_v10  ;;  %7449 = vmatmul.msk.f32.gmra.mxu2 %vm3459_vm4, %v10054_v10  ;;  %1615 = vrot.lane.b32.xlu1 %v551_v63, %s8274_s16  ;;  %v742_v10 = vld [vmem:[%s8364_s14 + $0x36b] sm:$0xff] }
 0x2ee   : > { %1741 = vrot.lane.b32.xlu2 %v614_v20, %s8274_s16  ;;  %v1604_v33 = vpop.permute.xlu1 %1603 }
 0x2ef   : > { %8013 = vrot.lane.b32.xlu0 %v8012_v59, %s8275_s17  ;;  %v10069_v6 = vsel %vm3072_vm3, %v2978_v46, %v1604_v33  ;;  %v10086_v46 = vpop.f32.mrf.mxu3 }
 0x2f0   : > { %14998 = vst [vmem:[#allocation127_spill] sm:$0xff] %v10069_v6  ;;  %v10071_v43 = vpop.permute.xlu2 %2243  ;;  %3802 = vmatmul.f32.gmra.mxu0 %v10069_v6  ;;  %v487_v6 = vld [vmem:[%s8364_s14 + $0x371] sm:$0xff] }
 0x2f1   : > { %v7984_v38 = vpop.permute.xlu0 %7983  ;;  %15000 = vst [vmem:[#allocation129_spill] sm:$0xff] %v10086_v46  ;;  %v10108_v46 = vpop.f32.mrf.mxu1 }
 0x2f2   : > { %v7986_v63 = vunpack.i.h.bf16 %v7984_v38  ;;  %v7985_v20 = vunpack.i.l.bf16 %v7984_v38  ;;  %v425_v38 = vld [vmem:[%s8364_s14 + $0x161] sm:$0xff]  ;;  %15004 = vst [vmem:[#allocation133_spill] sm:$0xff] %v10108_v46  ;;  %v871_v46 = vld [vmem:[%s8364_s14 + $0x374] sm:$0xff] }
 0x2f4   : > { %v3041_v59 = vsel %vm2943_vm0, %v352_v44, %v7985_v20  ;;  %2253 = vrot.lane.b32.xlu1 %v742_v10, %s8273_s15  ;;  %v2979_v47 = vsel %vm2943_vm0, %v290_v53, %v7986_v63  ;;  %v10099_v53 = vpop.f32.mrf.mxu0 }
 0x2f5   : > { %v10083_v12 = vsel %vm3072_vm3, %v3041_v59, %v9991_v50  ;;  %v10095_v10 = vsel %vm3072_vm3, %v2979_v47, %v10044_v5  ;;  %15002 = vst [vmem:[#allocation131_spill] sm:$0xff] %v10099_v53  ;;  %v8017_v59 = vpack.i.bf16 %v425_v38, %v487_v6  ;;  %v870_v47 = vld [vmem:[%s8364_s14 + $0x36c] sm:$0xff] }
 0x2f6   : > { %14999 = vst [vmem:[#allocation128_spill] sm:$0xff] %v10083_v12  ;;  %3991 = vmatmul.f32.gmra.mxu3 %v10083_v12  ;;  %2639 = vrot.lane.b32.xlu2 %v807_v23, %s8276_s18  ;;  %v2242_v44 = vpop.permute.xlu1 %2241 }
 0x2f7   : > { %2127 = vrot.lane.b32.xlu0 %v679_v62, %s8273_s15  ;;  %15001 = vst [vmem:[#allocation130_spill] sm:$0xff] %v10095_v10  ;;  %v552_v62 = vld [vmem:[%s8364_s14 + $0x15a] sm:$0xff]  ;;  %v10146_v7 = vpop.f32.mrf.mxu3 }
 0x2f8   : > { %v10097_v20 = vpop.permute.xlu2 %7993  ;;  %3805 = vmatmul.f32.gmra.mxu0 %v10095_v10  ;;  %v10126_v10 = vpop.f32.mrf.mxu2  ;;  %15008 = vst [vmem:[#allocation137_spill] sm:$0xff] %v10146_v7 }
 0x2f9   : > { %v2116_v63 = vpop.permute.xlu0 %2115  ;;  %15006 = vst [vmem:[#allocation135_spill] sm:$0xff] %v10126_v10 }
 0x2fa   : > { %v3236_v12 = vsel %vm3201_vm1, %v1604_v33, %v2116_v63  ;;  %v3299_v33 = vsel %vm3201_vm1, %v9991_v50, %v2242_v44  ;;  %v680_v63 = vld [vmem:[%s8364_s14 + $0x15b] sm:$0xff] }
 0x2fb   : > { %v10105_v23 = vsel %vm3330_vm2, %v3236_v12, %v10019_v49 }
 0x2fc   : > { %15003 = vst [vmem:[#allocation132_spill] sm:$0xff] %v10105_v23  ;;  %7387 = vmatmul.msk.f32.gmra.mxu1 %vm3459_vm4, %v10105_v23  ;;  %8018 = vrot.lane.b32.xlu1 %v8017_v59, %s8275_s17  ;;  %v353_v23 = vld [vmem:[%s8364_s14 + $0x340] sm:$0xff] }
 0x2fe   : > { %1617 = vrot.lane.b32.xlu2 %v552_v62, %s8274_s16  ;;  %v10115_v6 = vpop.permute.xlu1 %7988  ;;  %v743_v62 = vld [vmem:[%s8364_s14 + $0x373] sm:$0xff] }
 0x2ff   : > { %2765 = vrot.lane.b32.xlu0 %v870_v47, %s8276_s18  ;;  %v7990_v59 = vunpack.i.l.bf16 %v10115_v6  ;;  %v615_v47 = vld [vmem:[%s8364_s14 + $0x372] sm:$0xff] }
 0x300   : > { %v10118_v49 = vpop.permute.xlu2 %2119 }
 0x301   : > { %v2754_v12 = vpop.permute.xlu0 %2753  ;;  %v3042_v44 = vsel %vm2943_vm0, %v353_v23, %v7990_v59 }
 0x302   : > { %v10123_v38 = vsel %vm3330_vm2, %v3299_v33, %v2754_v12  ;;  %v426_v33 = vld [vmem:[%s8364_s14 + $0x169] sm:$0xff]  ;;  %v488_v12 = vld [vmem:[%s8364_s14 + $0x379] sm:$0xff] }
 0x303   : > { %15005 = vst [vmem:[#allocation134_spill] sm:$0xff] %v10123_v38  ;;  %7450 = vmatmul.msk.f32.gmra.mxu2 %vm3459_vm4, %v10123_v38  ;;  %v8022_v56 = vpack.i.bf16 %v426_v33, %v488_v12  ;;  %v7995_v33 = vunpack.i.l.bf16 %v10097_v20  ;;  %v354_v12 = vld [vmem:[%s8364_s14 + $0x348] sm:$0xff] }
 0x304   : > { %2129 = vrot.lane.b32.xlu1 %v680_v63, %s8273_s15  ;;  %v808_v63 = vld [vmem:[%s8364_s14 + $0x15c] sm:$0xff] }
 0x306   : > { %2255 = vrot.lane.b32.xlu2 %v743_v62, %s8273_s15  ;;  %v2118_v50 = vpop.permute.xlu1 %2117 }
 0x307   : > { %1743 = vrot.lane.b32.xlu0 %v615_v47, %s8274_s16 }
 0x308   : > { %v10140_v10 = vpop.permute.xlu2 %2757 }
 0x309   : > { %v1732_v53 = vpop.permute.xlu0 %1731 }
 0x30a   : > { %v10143_v38 = vsel %vm3072_vm3, %v3042_v44, %v1732_v53  ;;  %v3300_v23 = vsel %vm3201_vm1, %v1732_v53, %v10071_v43  ;;  %v10160_v44 = vpop.f32.mrf.mxu2  ;;  %v616_v53 = vld [vmem:[%s8364_s14 + $0x37a] sm:$0xff] }
 0x30b   : > { %15007 = vst [vmem:[#allocation136_spill] sm:$0xff] %v10143_v38  ;;  %3994 = vmatmul.f32.gmra.mxu3 %v10143_v38  ;;  %v291_v38 = vld [vmem:[%s8364_s14 + $0x130] sm:$0xff] }
 0x30c   : > { %2767 = vrot.lane.b32.xlu1 %v871_v46, %s8276_s18  ;;  %15010 = vst [vmem:[#allocation139_spill] sm:$0xff] %v10160_v44 }
 0x30e   : > { %8023 = vrot.lane.b32.xlu2 %v8022_v56, %s8275_s17  ;;  %v2756_v59 = vpop.permute.xlu1 %2755  ;;  %v3237_v56 = vsel %vm3201_vm1, %v10044_v5, %v2118_v50  ;;  %v3635_v5 = vld [vmem:[%s14376_s1 + $0x178] sm:$0xff] }
 0x30f   : > { %2641 = vrot.lane.b32.xlu0 %v808_v63, %s8276_s18  ;;  %v10156_v62 = vsel %vm3330_vm2, %v3300_v23, %v2756_v59  ;;  %v10172_v63 = vpop.f32.mrf.mxu1  ;;  %v681_v23 = vld [vmem:[%s8364_s14 + $0x163] sm:$0xff]  ;;  %v3683_v50 = vld [vmem:[%s14376_s1 + $0x2f8] sm:$0xff]  ;;  %5288 = vmatpush.msrb.mxu0 %v3635_v5 }
 0x310   : > { %15009 = vst [vmem:[#allocation138_spill] sm:$0xff] %v10156_v62  ;;  %v10158_v47 = vpop.permute.xlu2 %1735  ;;  %7451 = vmatmul.msk.f32.gmra.mxu2 %vm3459_vm4, %v10156_v62  ;;  %v553_v59 = vld [vmem:[%s8364_s14 + $0x162] sm:$0xff]  ;;  %5689 = vmatpush.msrb.mxu1 %v3683_v50  ;;  %v10195_v50 = vpop.f32.mrf.mxu3 }
 0x311   : > { %v2630_v43 = vpop.permute.xlu0 %2629  ;;  %15012 = vst [vmem:[#allocation141_spill] sm:$0xff] %v10172_v63 }
 0x312   : > { %v10168_v46 = vsel %vm3330_vm2, %v3237_v56, %v2630_v43  ;;  %v7991_v56 = vunpack.i.h.bf16 %v10115_v6  ;;  %v3043_v43 = vsel %vm2943_vm0, %v354_v12, %v7995_v33  ;;  %15014 = vst [vmem:[#allocation143_spill] sm:$0xff] %v10195_v50  ;;  %v809_v12 = vld [vmem:[%s8364_s14 + $0x164] sm:$0xff]  ;;  %v10232_v7 = vpop.f32.mrf.mxu2 }
 0x313   : > { %15011 = vst [vmem:[#allocation140_spill] sm:$0xff] %v10168_v46  ;;  %7388 = vmatmul.msk.f32.gmra.mxu1 %vm3459_vm4, %v10168_v46 }
 0x314   : > { %1745 = vrot.lane.b32.xlu1 %v616_v53, %s8274_s16  ;;  %v2980_v53 = vsel %vm2943_vm0, %v291_v38, %v7991_v56  ;;  %15020 = vst [vmem:[#allocation149_spill] sm:$0xff] %v10232_v7  ;;  %v293_v7 = vld [vmem:[%s8364_s14 + $0x140] sm:$0xff] }
 0x316   : > { %2131 = vrot.lane.b32.xlu2 %v681_v23, %s8273_s15  ;;  %v1734_v62 = vpop.permute.xlu1 %1733  ;;  %v10203_v23 = vpop.f32.mrf.mxu0 }
 0x317   : > { %1619 = vrot.lane.b32.xlu0 %v553_v59, %s8274_s16  ;;  %v10191_v46 = vsel %vm3072_vm3, %v3043_v43, %v1734_v62  ;;  %15016 = vst [vmem:[#allocation145_spill] sm:$0xff] %v10203_v23  ;;  %v872_v59 = vld [vmem:[%s8364_s14 + $0x37c] sm:$0xff]  ;;  %v10220_v44 = vpop.f32.mrf.mxu1 }
 0x318   : > { %15013 = vst [vmem:[#allocation142_spill] sm:$0xff] %v10191_v46  ;;  %v10193_v5 = vpop.permute.xlu2 %2633  ;;  %3997 = vmatmul.f32.gmra.mxu3 %v10191_v46  ;;  %v744_v43 = vld [vmem:[%s8364_s14 + $0x37b] sm:$0xff]  ;;  %v427_v46 = vld [vmem:[%s8364_s14 + $0x171] sm:$0xff] }
 0x319   : > { %v1608_v6 = vpop.permute.xlu0 %1607  ;;  %15018 = vst [vmem:[#allocation147_spill] sm:$0xff] %v10220_v44  ;;  %v682_v44 = vld [vmem:[%s8364_s14 + $0x16b] sm:$0xff] }
 0x31a   : > { %v10200_v33 = vsel %vm3072_vm3, %v2980_v53, %v1608_v6  ;;  %v3238_v38 = vsel %vm3201_vm1, %v1608_v6, %v10118_v49  ;;  %v554_v49 = vld [vmem:[%s8364_s14 + $0x16a] sm:$0xff]  ;;  %v7996_v6 = vunpack.i.h.bf16 %v10097_v20 }
 0x31b   : > { %15015 = vst [vmem:[#allocation144_spill] sm:$0xff] %v10200_v33  ;;  %3808 = vmatmul.f32.gmra.mxu0 %v10200_v33  ;;  %v489_v33 = vld [vmem:[%s8364_s14 + $0x381] sm:$0xff] }
 0x31c   : > { %2643 = vrot.lane.b32.xlu1 %v809_v12, %s8276_s18 }
 0x31e   : > { %2769 = vrot.lane.b32.xlu2 %v872_v59, %s8276_s18  ;;  %v2632_v56 = vpop.permute.xlu1 %2631  ;;  %v10239_v20 = vpop.f32.mrf.mxu0 }
 0x31f   : > { %2257 = vrot.lane.b32.xlu0 %v744_v43, %s8273_s15  ;;  %v10214_v53 = vsel %vm3330_vm2, %v3238_v38, %v2632_v56  ;;  %v8027_v38 = vpack.i.bf16 %v427_v46, %v489_v33  ;;  %v617_v56 = vld [vmem:[%s8364_s14 + $0x382] sm:$0xff]  ;;  %15021 = vst [vmem:[#allocation150_spill] sm:$0xff] %v10239_v20  ;;  %v810_v20 = vld [vmem:[%s8364_s14 + $0x16c] sm:$0xff] }
 0x320   : > { %15017 = vst [vmem:[#allocation146_spill] sm:$0xff] %v10214_v53  ;;  %v10218_v50 = vpop.permute.xlu2 %1611  ;;  %7389 = vmatmul.msk.f32.gmra.mxu1 %vm3459_vm4, %v10214_v53  ;;  %v292_v53 = vld [vmem:[%s8364_s14 + $0x138] sm:$0xff] }
 0x321   : > { %v2246_v12 = vpop.permute.xlu0 %2245 }
 0x322   : > { %v3301_v59 = vsel %vm3201_vm1, %v1734_v62, %v2246_v12  ;;  %v2981_v62 = vsel %vm2943_vm0, %v292_v53, %v7996_v6 }
 0x323   : > { %v10229_v43 = vsel %vm3330_vm2, %v3301_v59, %v10140_v10  ;;  %v355_v59 = vld [vmem:[%s8364_s14 + $0x350] sm:$0xff] }
 0x324   : > { %15019 = vst [vmem:[#allocation148_spill] sm:$0xff] %v10229_v43  ;;  %7452 = vmatmul.msk.f32.gmra.mxu2 %vm3459_vm4, %v10229_v43  ;;  %1621 = vrot.lane.b32.xlu1 %v554_v49, %s8274_s16  ;;  %v745_v43 = vld [vmem:[%s8364_s14 + $0x383] sm:$0xff] }
 0x326   : > { %1747 = vrot.lane.b32.xlu2 %v617_v56, %s8274_s16  ;;  %v1610_v10 = vpop.permute.xlu1 %1609 }
 0x327   : > { %8028 = vrot.lane.b32.xlu0 %v8027_v38, %s8275_s17  ;;  %v10244_v46 = vsel %vm3072_vm3, %v2981_v62, %v1610_v10  ;;  %v10261_v62 = vpop.f32.mrf.mxu3 }
 0x328   : > { %15022 = vst [vmem:[#allocation151_spill] sm:$0xff] %v10244_v46  ;;  %v10246_v33 = vpop.permute.xlu2 %2249  ;;  %3811 = vmatmul.f32.gmra.mxu0 %v10244_v46  ;;  %v490_v46 = vld [vmem:[%s8364_s14 + $0x389] sm:$0xff] }
 0x329   : > { %v7999_v12 = vpop.permute.xlu0 %7998  ;;  %15024 = vst [vmem:[#allocation153_spill] sm:$0xff] %v10261_v62  ;;  %v555_v62 = vld [vmem:[%s8364_s14 + $0x172] sm:$0xff] }
 0x32a   : > { %v8001_v49 = vunpack.i.h.bf16 %v7999_v12  ;;  %v8000_v56 = vunpack.i.l.bf16 %v7999_v12  ;;  %v428_v12 = vld [vmem:[%s8364_s14 + $0x179] sm:$0xff] }
 0x32c   : > { %v3044_v38 = vsel %vm2943_vm0, %v355_v59, %v8000_v56  ;;  %2259 = vrot.lane.b32.xlu1 %v745_v43, %s8273_s15  ;;  %v2982_v6 = vsel %vm2943_vm0, %v293_v7, %v8001_v49  ;;  %v10274_v7 = vpop.f32.mrf.mxu0 }
 0x32d   : > { %v10258_v53 = vsel %vm3072_vm3, %v3044_v38, %v10158_v47  ;;  %v10270_v43 = vsel %vm3072_vm3, %v2982_v6, %v10218_v50  ;;  %15026 = vst [vmem:[#allocation155_spill] sm:$0xff] %v10274_v7  ;;  %v8032_v38 = vpack.i.bf16 %v428_v12, %v490_v46  ;;  %v873_v6 = vld [vmem:[%s8364_s14 + $0x384] sm:$0xff]  ;;  %v3682_v46 = vld [vmem:[%s14376_s1 + $0x2f0] sm:$0xff] }
 0x32e   : > { %15023 = vst [vmem:[#allocation152_spill] sm:$0xff] %v10258_v53  ;;  %4000 = vmatmul.f32.gmra.mxu3 %v10258_v53  ;;  %2645 = vrot.lane.b32.xlu2 %v810_v20, %s8276_s18  ;;  %v2248_v59 = vpop.permute.xlu1 %2247 }
 0x32f   : > { %2133 = vrot.lane.b32.xlu0 %v682_v44, %s8273_s15  ;;  %15025 = vst [vmem:[#allocation154_spill] sm:$0xff] %v10270_v43  ;;  %v10283_v44 = vpop.f32.mrf.mxu1  ;;  %4887 = vmatpush.msrb.mxu3 %v3682_v46  ;;  %v10333_v63 = vpop.f32.mrf.mxu3 }
 0x330   : > { %v10272_v56 = vpop.permute.xlu2 %8008  ;;  %3814 = vmatmul.f32.gmra.mxu0 %v10270_v43  ;;  %15028 = vst [vmem:[#allocation157_spill] sm:$0xff] %v10283_v44 }
 0x331   : > { %v2122_v49 = vpop.permute.xlu0 %2121  ;;  %15032 = vst [vmem:[#allocation161_spill] sm:$0xff] %v10333_v63 }
 0x332   : > { %v3239_v53 = vsel %vm3201_vm1, %v1610_v10, %v2122_v49  ;;  %v3680_v49 = vld [vmem:[%s14376_s1 + $0x2e0] sm:$0xff] }
 0x333   : > { %v10280_v20 = vsel %vm3330_vm2, %v3239_v53, %v10193_v5  ;;  %v3634_v5 = vld [vmem:[%s14376_s1 + $0x170] sm:$0xff]  ;;  %v3632_v53 = vld [vmem:[%s14376_s1 + $0x160] sm:$0xff]  ;;  %5690 = vmatpush.msrb.mxu1 %v3680_v49 }
 0x334   : > { %15027 = vst [vmem:[#allocation156_spill] sm:$0xff] %v10280_v20  ;;  %7390 = vmatmul.msk.f32.gmra.mxu1 %vm3459_vm4, %v10280_v20  ;;  %8033 = vrot.lane.b32.xlu1 %v8032_v38, %s8275_s17  ;;  %v10313_v20 = vpop.f32.mrf.mxu2  ;;  %v874_v49 = vld [vmem:[%s8364_s14 + $0x38c] sm:$0xff] }
 0x335   : > { %4486 = vmatpush.msrb.mxu2 %v3634_v5  ;;  %5289 = vmatpush.msrb.mxu0 %v3632_v53  ;;  %15030 = vst [vmem:[#allocation159_spill] sm:$0xff] %v10313_v20  ;;  %v356_v5 = vld [vmem:[%s8364_s14 + $0x358] sm:$0xff] }
 0x336   : > { %1623 = vrot.lane.b32.xlu2 %v555_v62, %s8274_s16  ;;  %v10290_v43 = vpop.permute.xlu1 %8003  ;;  %v3302_v62 = vsel %vm3201_vm1, %v10158_v47, %v2248_v59  ;;  %v746_v47 = vld [vmem:[%s8364_s14 + $0x38b] sm:$0xff] }
 0x337   : > { %2771 = vrot.lane.b32.xlu0 %v873_v6, %s8276_s18  ;;  %v683_v6 = vld [vmem:[%s8364_s14 + $0x173] sm:$0xff]  ;;  %v8005_v7 = vunpack.i.l.bf16 %v10290_v43  ;;  %v618_v59 = vld [vmem:[%s8364_s14 + $0x38a] sm:$0xff] }
 0x338   : > { %v10293_v10 = vpop.permute.xlu2 %2125 }
 0x339   : > { %v2760_v12 = vpop.permute.xlu0 %2759  ;;  %v3045_v53 = vsel %vm2943_vm0, %v356_v5, %v8005_v7 }
 0x33a   : > { %v10310_v38 = vsel %vm3330_vm2, %v3302_v62, %v2760_v12  ;;  %v429_v62 = vld [vmem:[%s8364_s14 + $0x181] sm:$0xff]  ;;  %v491_v12 = vld [vmem:[%s8364_s14 + $0x391] sm:$0xff] }
 0x33b   : > { %15029 = vst [vmem:[#allocation158_spill] sm:$0xff] %v10310_v38  ;;  %7453 = vmatmul.msk.f32.gmra.mxu2 %vm3459_vm4, %v10310_v38  ;;  %v8037_v23 = vpack.i.bf16 %v429_v62, %v491_v12  ;;  %v8010_v62 = vunpack.i.l.bf16 %v10272_v56  ;;  %v619_v12 = vld [vmem:[%s8364_s14 + $0x392] sm:$0xff] }
 0x33c   : > { %2135 = vrot.lane.b32.xlu1 %v683_v6, %s8273_s15  ;;  %v811_v6 = vld [vmem:[%s8364_s14 + $0x174] sm:$0xff] }
 0x33e   : > { %2261 = vrot.lane.b32.xlu2 %v746_v47, %s8273_s15  ;;  %v2124_v46 = vpop.permute.xlu1 %2123 }
 0x33f   : > { %1749 = vrot.lane.b32.xlu0 %v618_v59, %s8274_s16 }
 0x340   : > { %v10327_v20 = vpop.permute.xlu2 %2763 }
 0x341   : > { %v1738_v44 = vpop.permute.xlu0 %1737 }
 0x342   : > { %v10330_v38 = vsel %vm3072_vm3, %v3045_v53, %v1738_v44  ;;  %v3303_v7 = vsel %vm3201_vm1, %v1738_v44, %v10246_v33  ;;  %v10347_v53 = vpop.f32.mrf.mxu2 }
 0x343   : > { %15031 = vst [vmem:[#allocation160_spill] sm:$0xff] %v10330_v38  ;;  %4003 = vmatmul.f32.gmra.mxu3 %v10330_v38  ;;  %v8006_v38 = vunpack.i.h.bf16 %v10290_v43 }
 0x344   : > { %2773 = vrot.lane.b32.xlu1 %v874_v49, %s8276_s18  ;;  %15034 = vst [vmem:[#allocation163_spill] sm:$0xff] %v10347_v53  ;;  %v357_v49 = vld [vmem:[%s8364_s14 + $0x360] sm:$0xff] }
 0x345   : > { %v492_v53 = vld [vmem:[%s8364_s14 + $0x399] sm:$0xff] }
 0x346   : > { %8038 = vrot.lane.b32.xlu2 %v8037_v23, %s8275_s17  ;;  %v2762_v47 = vpop.permute.xlu1 %2761  ;;  %v3240_v23 = vsel %vm3201_vm1, %v10218_v50, %v2124_v46  ;;  %v3046_v50 = vsel %vm2943_vm0, %v357_v49, %v8010_v62  ;;  %v294_v46 = vld [vmem:[%s8364_s14 + $0x148] sm:$0xff]  ;;  %v3631_v62 = vld [vmem:[%s14376_s1 + $0x158] sm:$0xff] }
 0x347   : > { %2647 = vrot.lane.b32.xlu0 %v811_v6, %s8276_s18  ;;  %v10343_v59 = vsel %vm3330_vm2, %v3303_v7, %v2762_v47  ;;  %v10359_v6 = vpop.f32.mrf.mxu1  ;;  %v684_v7 = vld [vmem:[%s8364_s14 + $0x17b] sm:$0xff]  ;;  %4487 = vmatpush.msrb.mxu2 %v3631_v62 }
 0x348   : > { %15033 = vst [vmem:[#allocation162_spill] sm:$0xff] %v10343_v59  ;;  %v10345_v5 = vpop.permute.xlu2 %1741  ;;  %7454 = vmatmul.msk.f32.gmra.mxu2 %vm3459_vm4, %v10343_v59  ;;  %v556_v47 = vld [vmem:[%s8364_s14 + $0x17a] sm:$0xff] }
 0x349   : > { %v2636_v33 = vpop.permute.xlu0 %2635  ;;  %15036 = vst [vmem:[#allocation165_spill] sm:$0xff] %v10359_v6  ;;  %v3679_v49 = vld [vmem:[%s14376_s1 + $0x2d8] sm:$0xff] }
 0x34a   : > { %v10355_v44 = vsel %vm3330_vm2, %v3240_v23, %v2636_v33  ;;  %4888 = vmatpush.msrb.mxu3 %v3679_v49 }
 0x34b   : > { %15035 = vst [vmem:[#allocation164_spill] sm:$0xff] %v10355_v44  ;;  %7391 = vmatmul.msk.f32.gmra.mxu1 %vm3459_vm4, %v10355_v44  ;;  %v10376_v44 = vpop.f32.mrf.mxu3 }
 0x34c   : > { %1751 = vrot.lane.b32.xlu1 %v619_v12, %s8274_s16  ;;  %15038 = vst [vmem:[#allocation167_spill] sm:$0xff] %v10376_v44  ;;  %v2983_v12 = vsel %vm2943_vm0, %v294_v46, %v8006_v38  ;;  %v875_v38 = vld [vmem:[%s8364_s14 + $0x394] sm:$0xff]  ;;  %v3629_v46 = vld [vmem:[%s14376_s1 + $0x148] sm:$0xff] }
 0x34d   : > { %5290 = vmatpush.msrb.mxu0 %v3629_v46  ;;  %v430_v44 = vld [vmem:[%s8364_s14 + $0x189] sm:$0xff] }
 0x34e   : > { %2137 = vrot.lane.b32.xlu2 %v684_v7, %s8273_s15  ;;  %v1740_v23 = vpop.permute.xlu1 %1739 }
 0x34f   : > { %1625 = vrot.lane.b32.xlu0 %v556_v47, %s8274_s16  ;;  %v10372_v33 = vsel %vm3072_vm3, %v3046_v50, %v1740_v23  ;;  %v812_v47 = vld [vmem:[%s8364_s14 + $0x17c] sm:$0xff]  ;;  %v10390_v50 = vpop.f32.mrf.mxu0 }
 0x350   : > { %15037 = vst [vmem:[#allocation166_spill] sm:$0xff] %v10372_v33  ;;  %v10374_v59 = vpop.permute.xlu2 %2639  ;;  %4006 = vmatmul.f32.gmra.mxu3 %v10372_v33  ;;  %v3677_v33 = vld [vmem:[%s14376_s1 + $0x2c8] sm:$0xff] }
 0x351   : > { %v1614_v43 = vpop.permute.xlu0 %1613  ;;  %15040 = vst [vmem:[#allocation169_spill] sm:$0xff] %v10390_v50  ;;  %5691 = vmatpush.msrb.mxu1 %v3677_v33  ;;  %v10413_v33 = vpop.f32.mrf.mxu1  ;;  %v685_v50 = vld [vmem:[%s8364_s14 + $0x183] sm:$0xff] }
 0x352   : > { %v10387_v7 = vsel %vm3072_vm3, %v2983_v12, %v1614_v43  ;;  %v747_v12 = vld [vmem:[%s8364_s14 + $0x393] sm:$0xff]  ;;  %v3241_v62 = vsel %vm3201_vm1, %v1614_v43, %v10293_v10  ;;  %15042 = vst [vmem:[#allocation171_spill] sm:$0xff] %v10413_v33  ;;  %v557_v10 = vld [vmem:[%s8364_s14 + $0x182] sm:$0xff]  ;;  %v8011_v43 = vunpack.i.h.bf16 %v10272_v56 }
 0x353   : > { %15039 = vst [vmem:[#allocation168_spill] sm:$0xff] %v10387_v7  ;;  %3817 = vmatmul.f32.gmra.mxu0 %v10387_v7  ;;  %v813_v33 = vld [vmem:[%s8364_s14 + $0x184] sm:$0xff] }
 0x354   : > { %2649 = vrot.lane.b32.xlu1 %v812_v47, %s8276_s18 }
 0x356   : > { %2775 = vrot.lane.b32.xlu2 %v875_v38, %s8276_s18  ;;  %v2638_v49 = vpop.permute.xlu1 %2637 }
 0x357   : > { %2263 = vrot.lane.b32.xlu0 %v747_v12, %s8273_s15  ;;  %v10407_v7 = vsel %vm3330_vm2, %v3241_v62, %v2638_v49  ;;  %v8042_v12 = vpack.i.bf16 %v430_v44, %v492_v53  ;;  %v620_v62 = vld [vmem:[%s8364_s14 + $0x39a] sm:$0xff]  ;;  %v10425_v49 = vpop.f32.mrf.mxu2  ;;  %v10432_v56 = vpop.f32.mrf.mxu0 }
 0x358   : > { %15041 = vst [vmem:[#allocation170_spill] sm:$0xff] %v10407_v7  ;;  %v10411_v63 = vpop.permute.xlu2 %1617  ;;  %7392 = vmatmul.msk.f32.gmra.mxu1 %vm3459_vm4, %v10407_v7  ;;  %v295_v7 = vld [vmem:[%s8364_s14 + $0x150] sm:$0xff] }
 0x359   : > { %v2252_v47 = vpop.permute.xlu0 %2251  ;;  %15044 = vst [vmem:[#allocation173_spill] sm:$0xff] %v10425_v49  ;;  %v2984_v53 = vsel %vm2943_vm0, %v295_v7, %v8011_v43  ;;  %v296_v49 = vld [vmem:[%s8364_s14 + $0x158] sm:$0xff]  ;;  %v10482_v6 = vpop.f32.mrf.mxu1 }
 0x35a   : > { %v3304_v38 = vsel %vm3201_vm1, %v1740_v23, %v2252_v47  ;;  %15045 = vst [vmem:[#allocation174_spill] sm:$0xff] %v10432_v56 }
 0x35b   : > { %v10422_v46 = vsel %vm3330_vm2, %v3304_v38, %v10327_v20  ;;  %v358_v38 = vld [vmem:[%s8364_s14 + $0x368] sm:$0xff]  ;;  %15051 = vst [vmem:[#allocation180_spill] sm:$0xff] %v10482_v6 }
 0x35c   : > { %15043 = vst [vmem:[#allocation172_spill] sm:$0xff] %v10422_v46  ;;  %7455 = vmatmul.msk.f32.gmra.mxu2 %vm3459_vm4, %v10422_v46  ;;  %1627 = vrot.lane.b32.xlu1 %v557_v10, %s8274_s16  ;;  %v748_v46 = vld [vmem:[%s8364_s14 + $0x39b] sm:$0xff]  ;;  %v877_v6 = vld [vmem:[%s8364_s14 + $0x3a4] sm:$0xff] }
 0x35e   : > { %1753 = vrot.lane.b32.xlu2 %v620_v62, %s8274_s16  ;;  %v1616_v20 = vpop.permute.xlu1 %1615 }
 0x35f   : > { %8043 = vrot.lane.b32.xlu0 %v8042_v12, %s8275_s17  ;;  %v10437_v44 = vsel %vm3072_vm3, %v2984_v53, %v1616_v20  ;;  %v10454_v53 = vpop.f32.mrf.mxu3 }
 0x360   : > { %15046 = vst [vmem:[#allocation175_spill] sm:$0xff] %v10437_v44  ;;  %v10439_v23 = vpop.permute.xlu2 %2255  ;;  %3820 = vmatmul.f32.gmra.mxu0 %v10437_v44  ;;  %v493_v44 = vld [vmem:[%s8364_s14 + $0x3a1] sm:$0xff] }
 0x361   : > { %v8014_v47 = vpop.permute.xlu0 %8013  ;;  %15048 = vst [vmem:[#allocation177_spill] sm:$0xff] %v10454_v53  ;;  %v558_v53 = vld [vmem:[%s8364_s14 + $0x18a] sm:$0xff] }
 0x362   : > { %v8016_v10 = vunpack.i.h.bf16 %v8014_v47  ;;  %v8015_v62 = vunpack.i.l.bf16 %v8014_v47  ;;  %v431_v47 = vld [vmem:[%s8364_s14 + $0x199] sm:$0xff] }
 0x364   : > { %v3047_v12 = vsel %vm2943_vm0, %v358_v38, %v8015_v62  ;;  %2265 = vrot.lane.b32.xlu1 %v748_v46, %s8273_s15  ;;  %v2985_v43 = vsel %vm2943_vm0, %v296_v49, %v8016_v10  ;;  %v10467_v49 = vpop.f32.mrf.mxu0 }
 0x365   : > { %v10451_v7 = vsel %vm3072_vm3, %v3047_v12, %v10345_v5  ;;  %v10463_v46 = vsel %vm3072_vm3, %v2985_v43, %v10411_v63  ;;  %v8047_v12 = vpack.i.bf16 %v431_v47, %v493_v44  ;;  %v3676_v43 = vld [vmem:[%s14376_s1 + $0x2c0] sm:$0xff] }
 0x366   : > { %15047 = vst [vmem:[#allocation176_spill] sm:$0xff] %v10451_v7  ;;  %4009 = vmatmul.f32.gmra.mxu3 %v10451_v7  ;;  %2651 = vrot.lane.b32.xlu2 %v813_v33, %s8276_s18  ;;  %v2254_v38 = vpop.permute.xlu1 %2253 }
 0x367   : > { %2139 = vrot.lane.b32.xlu0 %v685_v50, %s8273_s15  ;;  %15049 = vst [vmem:[#allocation178_spill] sm:$0xff] %v10463_v46  ;;  %v3628_v50 = vld [vmem:[%s14376_s1 + $0x140] sm:$0xff]  ;;  %4889 = vmatpush.msrb.mxu3 %v3676_v43 }
 0x368   : > { %v10465_v62 = vpop.permute.xlu2 %8023  ;;  %3823 = vmatmul.f32.gmra.mxu0 %v10463_v46  ;;  %4488 = vmatpush.msrb.mxu2 %v3628_v50  ;;  %v686_v50 = vld [vmem:[%s8364_s14 + $0x18b] sm:$0xff]  ;;  %v749_v43 = vld [vmem:[%s8364_s14 + $0x3a3] sm:$0xff] }
 0x369   : > { %v2128_v10 = vpop.permute.xlu0 %2127  ;;  %v359_v46 = vld [vmem:[%s8364_s14 + $0x370] sm:$0xff] }
 0x36a   : > { %v3242_v7 = vsel %vm3201_vm1, %v1616_v20, %v2128_v10  ;;  %v876_v20 = vld [vmem:[%s8364_s14 + $0x39c] sm:$0xff] }
 0x36b   : > { %v10473_v33 = vsel %vm3330_vm2, %v3242_v7, %v10374_v59  ;;  %v3305_v7 = vsel %vm3201_vm1, %v10345_v5, %v2254_v38 }
 0x36c   : > { %15050 = vst [vmem:[#allocation179_spill] sm:$0xff] %v10473_v33  ;;  %7393 = vmatmul.msk.f32.gmra.mxu1 %vm3459_vm4, %v10473_v33  ;;  %8048 = vrot.lane.b32.xlu1 %v8047_v12, %s8275_s17  ;;  %v10500_v12 = vpop.f32.mrf.mxu2 }
 0x36d   : > { %15053 = vst [vmem:[#allocation182_spill] sm:$0xff] %v10500_v12 }
 0x36e   : > { %1629 = vrot.lane.b32.xlu2 %v558_v53, %s8274_s16  ;;  %v10489_v59 = vpop.permute.xlu1 %8018 }
 0x36f   : > { %2777 = vrot.lane.b32.xlu0 %v876_v20, %s8276_s18  ;;  %v8020_v53 = vunpack.i.l.bf16 %v10489_v59  ;;  %v621_v20 = vld [vmem:[%s8364_s14 + $0x3a2] sm:$0xff] }
 0x370   : > { %v10492_v44 = vpop.permute.xlu2 %2131 }
 0x371   : > { %v2766_v47 = vpop.permute.xlu0 %2765  ;;  %v3048_v38 = vsel %vm2943_vm0, %v359_v46, %v8020_v53  ;;  %v10526_v46 = vpop.f32.mrf.mxu3  ;;  %v814_v53 = vld [vmem:[%s8364_s14 + $0x18c] sm:$0xff] }
 0x372   : > { %v10497_v10 = vsel %vm3330_vm2, %v3305_v7, %v2766_v47  ;;  %v432_v7 = vld [vmem:[%s8364_s14 + $0x1a1] sm:$0xff]  ;;  %v494_v47 = vld [vmem:[%s8364_s14 + $0x3a9] sm:$0xff]  ;;  %15055 = vst [vmem:[#allocation184_spill] sm:$0xff] %v10526_v46 }
 0x373   : > { %15052 = vst [vmem:[#allocation181_spill] sm:$0xff] %v10497_v10  ;;  %7456 = vmatmul.msk.f32.gmra.mxu2 %vm3459_vm4, %v10497_v10  ;;  %v3626_v10 = vld [vmem:[%s14376_s1 + $0x130] sm:$0xff]  ;;  %v3625_v46 = vld [vmem:[%s14376_s1 + $0x128] sm:$0xff] }
 0x374   : > { %2141 = vrot.lane.b32.xlu1 %v686_v50, %s8273_s15  ;;  %v3674_v50 = vld [vmem:[%s14376_s1 + $0x2b0] sm:$0xff]  ;;  %5291 = vmatpush.msrb.mxu0 %v3626_v10 }
 0x375   : > { %5692 = vmatpush.msrb.mxu1 %v3674_v50  ;;  %4489 = vmatpush.msrb.mxu2 %v3625_v46 }
 0x376   : > { %2267 = vrot.lane.b32.xlu2 %v749_v43, %s8273_s15  ;;  %v2130_v5 = vpop.permute.xlu1 %2129 }
 0x377   : > { %1755 = vrot.lane.b32.xlu0 %v621_v20, %s8274_s16  ;;  %v8052_v20 = vpack.i.bf16 %v432_v7, %v494_v47  ;;  %v10540_v47 = vpop.f32.mrf.mxu2  ;;  %v3243_v50 = vsel %vm3201_vm1, %v10411_v63, %v2130_v5  ;;  %v297_v5 = vld [vmem:[%s8364_s14 + $0x160] sm:$0xff] }
 0x378   : > { %v10514_v33 = vpop.permute.xlu2 %2769  ;;  %15057 = vst [vmem:[#allocation186_spill] sm:$0xff] %v10540_v47  ;;  %v8021_v47 = vunpack.i.h.bf16 %v10489_v59 }
 0x379   : > { %v1744_v12 = vpop.permute.xlu0 %1743 }
 0x37a   : > { %v10523_v43 = vsel %vm3072_vm3, %v3048_v38, %v1744_v12  ;;  %v3306_v38 = vsel %vm3201_vm1, %v1744_v12, %v10439_v23 }
 0x37b   : > { %15054 = vst [vmem:[#allocation183_spill] sm:$0xff] %v10523_v43  ;;  %4012 = vmatmul.f32.gmra.mxu3 %v10523_v43  ;;  %v559_v43 = vld [vmem:[%s8364_s14 + $0x19a] sm:$0xff] }
 0x37c   : > { %2779 = vrot.lane.b32.xlu1 %v877_v6, %s8276_s18  ;;  %v8025_v6 = vunpack.i.l.bf16 %v10465_v62 }
 0x37e   : > { %8053 = vrot.lane.b32.xlu2 %v8052_v20, %s8275_s17  ;;  %v2768_v56 = vpop.permute.xlu1 %2767  ;;  %v622_v20 = vld [vmem:[%s8364_s14 + $0x3aa] sm:$0xff] }
 0x37f   : > { %2653 = vrot.lane.b32.xlu0 %v814_v53, %s8276_s18  ;;  %v10536_v10 = vsel %vm3330_vm2, %v3306_v38, %v2768_v56  ;;  %v360_v56 = vld [vmem:[%s8364_s14 + $0x378] sm:$0xff]  ;;  %v10552_v53 = vpop.f32.mrf.mxu1 }
 0x380   : > { %15056 = vst [vmem:[#allocation185_spill] sm:$0xff] %v10536_v10  ;;  %v10538_v7 = vpop.permute.xlu2 %1747  ;;  %7457 = vmatmul.msk.f32.gmra.mxu2 %vm3459_vm4, %v10536_v10  ;;  %v687_v38 = vld [vmem:[%s8364_s14 + $0x19b] sm:$0xff]  ;;  %v3049_v63 = vsel %vm2943_vm0, %v360_v56, %v8025_v6 }
 0x381   : > { %v2642_v23 = vpop.permute.xlu0 %2641  ;;  %15059 = vst [vmem:[#allocation188_spill] sm:$0xff] %v10552_v53  ;;  %v815_v56 = vld [vmem:[%s8364_s14 + $0x19c] sm:$0xff] }
 0x382   : > { %v10548_v12 = vsel %vm3330_vm2, %v3243_v50, %v2642_v23 }
 0x383   : > { %15058 = vst [vmem:[#allocation187_spill] sm:$0xff] %v10548_v12  ;;  %7394 = vmatmul.msk.f32.gmra.mxu1 %vm3459_vm4, %v10548_v12  ;;  %v10569_v12 = vpop.f32.mrf.mxu3 }
 0x384   : > { %1757 = vrot.lane.b32.xlu1 %v622_v20, %s8274_s16  ;;  %15061 = vst [vmem:[#allocation190_spill] sm:$0xff] %v10569_v12  ;;  %v2986_v20 = vsel %vm2943_vm0, %v297_v5, %v8021_v47  ;;  %v3673_v47 = vld [vmem:[%s14376_s1 + $0x2a8] sm:$0xff]  ;;  %v495_v12 = vld [vmem:[%s8364_s14 + $0x3b9] sm:$0xff] }
 0x385   : > { %4890 = vmatpush.msrb.mxu3 %v3673_v47 }
 0x386   : > { %2143 = vrot.lane.b32.xlu2 %v687_v38, %s8273_s15  ;;  %v1746_v50 = vpop.permute.xlu1 %1745  ;;  %v10577_v38 = vpop.f32.mrf.mxu0 }
 0x387   : > { %1631 = vrot.lane.b32.xlu0 %v559_v43, %s8274_s16  ;;  %v10565_v23 = vsel %vm3072_vm3, %v3049_v63, %v1746_v50  ;;  %15063 = vst [vmem:[#allocation192_spill] sm:$0xff] %v10577_v38  ;;  %v878_v43 = vld [vmem:[%s8364_s14 + $0x3ac] sm:$0xff] }
 0x388   : > { %15060 = vst [vmem:[#allocation189_spill] sm:$0xff] %v10565_v23  ;;  %v10567_v10 = vpop.permute.xlu2 %2645  ;;  %4015 = vmatmul.f32.gmra.mxu3 %v10565_v23  ;;  %v750_v63 = vld [vmem:[%s8364_s14 + $0x3ab] sm:$0xff] }
 0x389   : > { %v1620_v59 = vpop.permute.xlu0 %1619 }
 0x38a   : > { %v10574_v6 = vsel %vm3072_vm3, %v2986_v20, %v1620_v59  ;;  %v3244_v5 = vsel %vm3201_vm1, %v1620_v59, %v10492_v44  ;;  %v560_v44 = vld [vmem:[%s8364_s14 + $0x1a2] sm:$0xff]  ;;  %v8026_v59 = vunpack.i.h.bf16 %v10465_v62  ;;  %v3623_v62 = vld [vmem:[%s14376_s1 + $0x118] sm:$0xff] }
 0x38b   : > { %15062 = vst [vmem:[#allocation191_spill] sm:$0xff] %v10574_v6  ;;  %3826 = vmatmul.f32.gmra.mxu0 %v10574_v6  ;;  %v433_v6 = vld [vmem:[%s8364_s14 + $0x1a9] sm:$0xff] }
 0x38c   : > { %2655 = vrot.lane.b32.xlu1 %v815_v56, %s8276_s18  ;;  %v10600_v56 = vpop.f32.mrf.mxu1  ;;  %v8057_v47 = vpack.i.bf16 %v433_v6, %v495_v12  ;;  %5292 = vmatpush.msrb.mxu0 %v3623_v62 }
 0x38d   : > { %15065 = vst [vmem:[#allocation194_spill] sm:$0xff] %v10600_v56  ;;  %v298_v56 = vld [vmem:[%s8364_s14 + $0x168] sm:$0xff] }
 0x38e   : > { %2781 = vrot.lane.b32.xlu2 %v878_v43, %s8276_s18  ;;  %v2644_v20 = vpop.permute.xlu1 %2643  ;;  %v10625_v12 = vpop.f32.mrf.mxu0  ;;  %v2987_v6 = vsel %vm2943_vm0, %v298_v56, %v8026_v59  ;;  %v688_v59 = vld [vmem:[%s8364_s14 + $0x1a3] sm:$0xff] }
 0x38f   : > { %2269 = vrot.lane.b32.xlu0 %v750_v63, %s8273_s15  ;;  %v10594_v23 = vsel %vm3330_vm2, %v3244_v5, %v2644_v20  ;;  %v623_v5 = vld [vmem:[%s8364_s14 + $0x3ba] sm:$0xff]  ;;  %v10612_v20 = vpop.f32.mrf.mxu2  ;;  %15068 = vst [vmem:[#allocation197_spill] sm:$0xff] %v10625_v12 }
 0x390   : > { %15064 = vst [vmem:[#allocation193_spill] sm:$0xff] %v10594_v23  ;;  %v10598_v38 = vpop.permute.xlu2 %1623  ;;  %7395 = vmatmul.msk.f32.gmra.mxu1 %vm3459_vm4, %v10594_v23  ;;  %v751_v12 = vld [vmem:[%s8364_s14 + $0x3bb] sm:$0xff] }
 0x391   : > { %v2258_v46 = vpop.permute.xlu0 %2257  ;;  %15067 = vst [vmem:[#allocation196_spill] sm:$0xff] %v10612_v20  ;;  %v299_v20 = vld [vmem:[%s8364_s14 + $0x170] sm:$0xff] }
 0x392   : > { %v3307_v43 = vsel %vm3201_vm1, %v1746_v50, %v2258_v46 }
 0x393   : > { %v10609_v63 = vsel %vm3330_vm2, %v3307_v43, %v10514_v33  ;;  %v3671_v33 = vld [vmem:[%s14376_s1 + $0x298] sm:$0xff] }
 0x394   : > { %15066 = vst [vmem:[#allocation195_spill] sm:$0xff] %v10609_v63  ;;  %7458 = vmatmul.msk.f32.gmra.mxu2 %vm3459_vm4, %v10609_v63  ;;  %1633 = vrot.lane.b32.xlu1 %v560_v44, %s8274_s16 }
 0x395   : > { %5693 = vmatpush.msrb.mxu1 %v3671_v33 }
 0x396   : > { %1759 = vrot.lane.b32.xlu2 %v623_v5, %s8274_s16  ;;  %v1622_v50 = vpop.permute.xlu1 %1621  ;;  %v361_v5 = vld [vmem:[%s8364_s14 + $0x380] sm:$0xff] }
 0x397   : > { %8058 = vrot.lane.b32.xlu0 %v8057_v47, %s8275_s17  ;;  %v10630_v46 = vsel %vm3072_vm3, %v2987_v6, %v1622_v50  ;;  %v816_v47 = vld [vmem:[%s8364_s14 + $0x1a4] sm:$0xff]  ;;  %v10647_v6 = vpop.f32.mrf.mxu3 }
 0x398   : > { %15069 = vst [vmem:[#allocation198_spill] sm:$0xff] %v10630_v46  ;;  %v10632_v43 = vpop.permute.xlu2 %2261  ;;  %3829 = vmatmul.f32.gmra.mxu0 %v10630_v46  ;;  %v496_v46 = vld [vmem:[%s8364_s14 + $0x3c1] sm:$0xff] }
 0x399   : > { %v8029_v44 = vpop.permute.xlu0 %8028  ;;  %15071 = vst [vmem:[#allocation200_spill] sm:$0xff] %v10647_v6  ;;  %v561_v6 = vld [vmem:[%s8364_s14 + $0x1aa] sm:$0xff] }
 0x39a   : > { %v8031_v63 = vunpack.i.h.bf16 %v8029_v44  ;;  %v8030_v23 = vunpack.i.l.bf16 %v8029_v44  ;;  %v434_v44 = vld [vmem:[%s8364_s14 + $0x1b1] sm:$0xff] }
 0x39c   : > { %v3050_v56 = vsel %vm2943_vm0, %v361_v5, %v8030_v23  ;;  %2271 = vrot.lane.b32.xlu1 %v751_v12, %s8273_s15  ;;  %v2988_v33 = vsel %vm2943_vm0, %v299_v20, %v8031_v63  ;;  %v10660_v63 = vpop.f32.mrf.mxu0 }
 0x39d   : > { %v10644_v62 = vsel %vm3072_vm3, %v3050_v56, %v10538_v7  ;;  %v10656_v12 = vsel %vm3072_vm3, %v2988_v33, %v10598_v38  ;;  %15073 = vst [vmem:[#allocation202_spill] sm:$0xff] %v10660_v63  ;;  %v8062_v56 = vpack.i.bf16 %v434_v44, %v496_v46  ;;  %v879_v33 = vld [vmem:[%s8364_s14 + $0x3bc] sm:$0xff] }
 0x39e   : > { %15070 = vst [vmem:[#allocation199_spill] sm:$0xff] %v10644_v62  ;;  %4018 = vmatmul.f32.gmra.mxu3 %v10644_v62  ;;  %2657 = vrot.lane.b32.xlu2 %v816_v47, %s8276_s18  ;;  %v2260_v23 = vpop.permute.xlu1 %2259 }
 0x39f   : > { %2145 = vrot.lane.b32.xlu0 %v688_v59, %s8273_s15  ;;  %15072 = vst [vmem:[#allocation201_spill] sm:$0xff] %v10656_v12  ;;  %v10669_v59 = vpop.f32.mrf.mxu1  ;;  %v10713_v53 = vpop.f32.mrf.mxu3 }
 0x3a0   : > { %v10658_v5 = vpop.permute.xlu2 %8038  ;;  %3832 = vmatmul.f32.gmra.mxu0 %v10656_v12  ;;  %15075 = vst [vmem:[#allocation204_spill] sm:$0xff] %v10669_v59  ;;  %v10693_v12 = vpop.f32.mrf.mxu2  ;;  %v880_v59 = vld [vmem:[%s8364_s14 + $0x3c4] sm:$0xff] }
 0x3a1   : > { %v2134_v20 = vpop.permute.xlu0 %2133  ;;  %15077 = vst [vmem:[#allocation206_spill] sm:$0xff] %v10693_v12 }
 0x3a2   : > { %v3245_v62 = vsel %vm3201_vm1, %v1622_v50, %v2134_v20  ;;  %v3622_v50 = vld [vmem:[%s14376_s1 + $0x110] sm:$0xff]  ;;  %15079 = vst [vmem:[#allocation208_spill] sm:$0xff] %v10713_v53 }
 0x3a3   : > { %v10666_v47 = vsel %vm3330_vm2, %v3245_v62, %v10567_v10  ;;  %v3670_v10 = vld [vmem:[%s14376_s1 + $0x290] sm:$0xff]  ;;  %4490 = vmatpush.msrb.mxu2 %v3622_v50  ;;  %v624_v50 = vld [vmem:[%s8364_s14 + $0x3c2] sm:$0xff] }
 0x3a4   : > { %15074 = vst [vmem:[#allocation203_spill] sm:$0xff] %v10666_v47  ;;  %7396 = vmatmul.msk.f32.gmra.mxu1 %vm3459_vm4, %v10666_v47  ;;  %8063 = vrot.lane.b32.xlu1 %v8062_v56, %s8275_s17  ;;  %v689_v56 = vld [vmem:[%s8364_s14 + $0x1ab] sm:$0xff] }
 0x3a5   : > { %4891 = vmatpush.msrb.mxu3 %v3670_v10  ;;  %v362_v10 = vld [vmem:[%s8364_s14 + $0x388] sm:$0xff] }
 0x3a6   : > { %1635 = vrot.lane.b32.xlu2 %v561_v6, %s8274_s16  ;;  %v10682_v46 = vpop.permute.xlu1 %8033  ;;  %v3308_v6 = vsel %vm3201_vm1, %v10538_v7, %v2260_v23 }
 0x3a7   : > { %2783 = vrot.lane.b32.xlu0 %v879_v33, %s8276_s18  ;;  %v8035_v47 = vunpack.i.l.bf16 %v10682_v46  ;;  %v752_v33 = vld [vmem:[%s8364_s14 + $0x3c3] sm:$0xff] }
 0x3a8   : > { %v10685_v62 = vpop.permute.xlu2 %2137 }
 0x3a9   : > { %v2772_v44 = vpop.permute.xlu0 %2771  ;;  %v3051_v23 = vsel %vm2943_vm0, %v362_v10, %v8035_v47 }
 0x3aa   : > { %v10690_v20 = vsel %vm3330_vm2, %v3308_v6, %v2772_v44  ;;  %v435_v6 = vld [vmem:[%s8364_s14 + $0x1b9] sm:$0xff]  ;;  %v497_v44 = vld [vmem:[%s8364_s14 + $0x3c9] sm:$0xff] }
 0x3ab   : > { %15076 = vst [vmem:[#allocation205_spill] sm:$0xff] %v10690_v20  ;;  %7459 = vmatmul.msk.f32.gmra.mxu2 %vm3459_vm4, %v10690_v20  ;;  %v8067_v2 = vpack.i.bf16 %v435_v6, %v497_v44  ;;  %v8040_v6 = vunpack.i.l.bf16 %v10658_v5  ;;  %v363_v44 = vld [vmem:[%s8364_s14 + $0x390] sm:$0xff] }
 0x3ac   : > { %2147 = vrot.lane.b32.xlu1 %v689_v56, %s8273_s15  ;;  %v817_v56 = vld [vmem:[%s8364_s14 + $0x1ac] sm:$0xff] }
 0x3ae   : > { %2273 = vrot.lane.b32.xlu2 %v752_v33, %s8273_s15  ;;  %v2136_v7 = vpop.permute.xlu1 %2135 }
 0x3af   : > { %1761 = vrot.lane.b32.xlu0 %v624_v50, %s8274_s16 }
 0x3b0   : > { %v10707_v63 = vpop.permute.xlu2 %2775 }
 0x3b1   : > { %v1750_v12 = vpop.permute.xlu0 %1749 }
 0x3b2   : > { %v10710_v20 = vsel %vm3072_vm3, %v3051_v23, %v1750_v12  ;;  %v3309_v47 = vsel %vm3201_vm1, %v1750_v12, %v10632_v43  ;;  %v10727_v23 = vpop.f32.mrf.mxu2 }
 0x3b3   : > { %15078 = vst [vmem:[#allocation207_spill] sm:$0xff] %v10710_v20  ;;  %4021 = vmatmul.f32.gmra.mxu3 %v10710_v20  ;;  %v300_v20 = vld [vmem:[%s8364_s14 + $0x178] sm:$0xff] }
 0x3b4   : > { %2785 = vrot.lane.b32.xlu1 %v880_v59, %s8276_s18  ;;  %15081 = vst [vmem:[#allocation210_spill] sm:$0xff] %v10727_v23  ;;  %v625_v59 = vld [vmem:[%s8364_s14 + $0x3ca] sm:$0xff]  ;;  %v563_v23 = vld [vmem:[%s8364_s14 + $0x1ba] sm:$0xff] }
 0x3b6   : > { %8068 = vrot.lane.b32.xlu2 %v8067_v2, %s8275_s17  ;;  %v2774_v33 = vpop.permute.xlu1 %2773  ;;  %v3246_v2 = vsel %vm3201_vm1, %v10598_v38, %v2136_v7  ;;  %v3620_v38 = vld [vmem:[%s14376_s1 + $0x100] sm:$0xff] }
 0x3b7   : > { %2659 = vrot.lane.b32.xlu0 %v817_v56, %s8276_s18  ;;  %v10723_v50 = vsel %vm3330_vm2, %v3309_v47, %v2774_v33  ;;  %v10739_v56 = vpop.f32.mrf.mxu1  ;;  %v690_v47 = vld [vmem:[%s8364_s14 + $0x1b3] sm:$0xff]  ;;  %v3668_v7 = vld [vmem:[%s14376_s1 + $0x280] sm:$0xff]  ;;  %5293 = vmatpush.msrb.mxu0 %v3620_v38 }
 0x3b8   : > { %15080 = vst [vmem:[#allocation209_spill] sm:$0xff] %v10723_v50  ;;  %v10725_v10 = vpop.permute.xlu2 %1753  ;;  %7460 = vmatmul.msk.f32.gmra.mxu2 %vm3459_vm4, %v10723_v50  ;;  %v562_v33 = vld [vmem:[%s8364_s14 + $0x1b2] sm:$0xff]  ;;  %5694 = vmatpush.msrb.mxu1 %v3668_v7  ;;  %v10762_v7 = vpop.f32.mrf.mxu3 }
 0x3b9   : > { %v2648_v43 = vpop.permute.xlu0 %2647  ;;  %15083 = vst [vmem:[#allocation212_spill] sm:$0xff] %v10739_v56 }
 0x3ba   : > { %v10735_v12 = vsel %vm3330_vm2, %v3246_v2, %v2648_v43  ;;  %v8036_v2 = vunpack.i.h.bf16 %v10682_v46  ;;  %v3052_v43 = vsel %vm2943_vm0, %v363_v44, %v8040_v6  ;;  %15085 = vst [vmem:[#allocation214_spill] sm:$0xff] %v10762_v7  ;;  %v818_v44 = vld [vmem:[%s8364_s14 + $0x1b4] sm:$0xff]  ;;  %v10805_v53 = vpop.f32.mrf.mxu2 }
 0x3bb   : > { %15082 = vst [vmem:[#allocation211_spill] sm:$0xff] %v10735_v12  ;;  %7397 = vmatmul.msk.f32.gmra.mxu1 %vm3459_vm4, %v10735_v12 }
 0x3bc   : > { %1763 = vrot.lane.b32.xlu1 %v625_v59, %s8274_s16  ;;  %v2989_v59 = vsel %vm2943_vm0, %v300_v20, %v8036_v2  ;;  %v3619_v20 = vld [vmem:[%s14376_s1 + $0xf8] sm:$0xff]  ;;  %15091 = vst [vmem:[#allocation220_spill] sm:$0xff] %v10805_v53 }
 0x3bd   : > { %v3667_v2 = vld [vmem:[%s14376_s1 + $0x278] sm:$0xff]  ;;  %4491 = vmatpush.msrb.mxu2 %v3619_v20 }
 0x3be   : > { %2149 = vrot.lane.b32.xlu2 %v690_v47, %s8273_s15  ;;  %v1752_v50 = vpop.permute.xlu1 %1751  ;;  %v10770_v47 = vpop.f32.mrf.mxu0  ;;  %4892 = vmatpush.msrb.mxu3 %v3667_v2  ;;  %v301_v2 = vld [vmem:[%s8364_s14 + $0x180] sm:$0xff] }
 0x3bf   : > { %1637 = vrot.lane.b32.xlu0 %v562_v33, %s8274_s16  ;;  %v10758_v12 = vsel %vm3072_vm3, %v3052_v43, %v1752_v50  ;;  %15087 = vst [vmem:[#allocation216_spill] sm:$0xff] %v10770_v47  ;;  %v881_v33 = vld [vmem:[%s8364_s14 + $0x3cc] sm:$0xff]  ;;  %v10793_v47 = vpop.f32.mrf.mxu1  ;;  %v691_v53 = vld [vmem:[%s8364_s14 + $0x1bb] sm:$0xff] }
 0x3c0   : > { %15084 = vst [vmem:[#allocation213_spill] sm:$0xff] %v10758_v12  ;;  %v10760_v38 = vpop.permute.xlu2 %2651  ;;  %4024 = vmatmul.f32.gmra.mxu3 %v10758_v12  ;;  %v753_v43 = vld [vmem:[%s8364_s14 + $0x3cb] sm:$0xff] }
 0x3c1   : > { %v1626_v46 = vpop.permute.xlu0 %1625  ;;  %15089 = vst [vmem:[#allocation218_spill] sm:$0xff] %v10793_v47 }
 0x3c2   : > { %v10767_v6 = vsel %vm3072_vm3, %v2989_v59, %v1626_v46  ;;  %v3247_v59 = vsel %vm3201_vm1, %v1626_v46, %v10685_v62 }
 0x3c3   : > { %15086 = vst [vmem:[#allocation215_spill] sm:$0xff] %v10767_v6  ;;  %3835 = vmatmul.f32.gmra.mxu0 %v10767_v6  ;;  %v498_v6 = vld [vmem:[%s8364_s14 + $0x3d1] sm:$0xff] }
 0x3c4   : > { %2661 = vrot.lane.b32.xlu1 %v818_v44, %s8276_s18 }
 0x3c6   : > { %2787 = vrot.lane.b32.xlu2 %v881_v33, %s8276_s18  ;;  %v2650_v12 = vpop.permute.xlu1 %2649  ;;  %v436_v33 = vld [vmem:[%s8364_s14 + $0x1c1] sm:$0xff] }
 0x3c7   : > { %2275 = vrot.lane.b32.xlu0 %v753_v43, %s8273_s15  ;;  %v10787_v44 = vsel %vm3330_vm2, %v3247_v59, %v2650_v12  ;;  %v8041_v43 = vunpack.i.h.bf16 %v10658_v5  ;;  %v8072_v20 = vpack.i.bf16 %v436_v33, %v498_v6  ;;  %v626_v59 = vld [vmem:[%s8364_s14 + $0x3d2] sm:$0xff]  ;;  %v10812_v5 = vpop.f32.mrf.mxu0 }
 0x3c8   : > { %15088 = vst [vmem:[#allocation217_spill] sm:$0xff] %v10787_v44  ;;  %v10791_v7 = vpop.permute.xlu2 %1629  ;;  %7398 = vmatmul.msk.f32.gmra.mxu1 %vm3459_vm4, %v10787_v44  ;;  %v302_v44 = vld [vmem:[%s8364_s14 + $0x188] sm:$0xff] }
 0x3c9   : > { %v2264_v62 = vpop.permute.xlu0 %2263  ;;  %15092 = vst [vmem:[#allocation221_spill] sm:$0xff] %v10812_v5  ;;  %v819_v5 = vld [vmem:[%s8364_s14 + $0x1bc] sm:$0xff] }
 0x3ca   : > { %v3310_v46 = vsel %vm3201_vm1, %v1752_v50, %v2264_v62  ;;  %v2990_v50 = vsel %vm2943_vm0, %v301_v2, %v8041_v43 }
 0x3cb   : > { %v10802_v12 = vsel %vm3330_vm2, %v3310_v46, %v10707_v63 }
 0x3cc   : > { %15090 = vst [vmem:[#allocation219_spill] sm:$0xff] %v10802_v12  ;;  %7461 = vmatmul.msk.f32.gmra.mxu2 %vm3459_vm4, %v10802_v12  ;;  %1639 = vrot.lane.b32.xlu1 %v563_v23, %s8274_s16  ;;  %v364_v23 = vld [vmem:[%s8364_s14 + $0x398] sm:$0xff] }
 0x3cd   : > { %v754_v12 = vld [vmem:[%s8364_s14 + $0x3d3] sm:$0xff] }
 0x3ce   : > { %1765 = vrot.lane.b32.xlu2 %v626_v59, %s8274_s16  ;;  %v1628_v63 = vpop.permute.xlu1 %1627 }
 0x3cf   : > { %8073 = vrot.lane.b32.xlu0 %v8072_v20, %s8275_s17  ;;  %v10817_v6 = vsel %vm3072_vm3, %v2990_v50, %v1628_v63  ;;  %v10834_v50 = vpop.f32.mrf.mxu3 }
 0x3d0   : > { %15093 = vst [vmem:[#allocation222_spill] sm:$0xff] %v10817_v6  ;;  %v10819_v33 = vpop.permute.xlu2 %2267  ;;  %3838 = vmatmul.f32.gmra.mxu0 %v10817_v6  ;;  %v499_v6 = vld [vmem:[%s8364_s14 + $0x3d9] sm:$0xff] }
 0x3d1   : > { %v8044_v62 = vpop.permute.xlu0 %8043  ;;  %15095 = vst [vmem:[#allocation224_spill] sm:$0xff] %v10834_v50  ;;  %v564_v50 = vld [vmem:[%s8364_s14 + $0x1c2] sm:$0xff] }
 0x3d2   : > { %v8046_v46 = vunpack.i.h.bf16 %v8044_v62  ;;  %v8045_v59 = vunpack.i.l.bf16 %v8044_v62  ;;  %v437_v62 = vld [vmem:[%s8364_s14 + $0x1c9] sm:$0xff] }
 0x3d4   : > { %v3053_v20 = vsel %vm2943_vm0, %v364_v23, %v8045_v59  ;;  %2277 = vrot.lane.b32.xlu1 %v754_v12, %s8273_s15  ;;  %v2991_v2 = vsel %vm2943_vm0, %v302_v44, %v8046_v46  ;;  %v10847_v44 = vpop.f32.mrf.mxu0 }
 0x3d5   : > { %v10831_v43 = vsel %vm3072_vm3, %v3053_v20, %v10725_v10  ;;  %v10843_v12 = vsel %vm3072_vm3, %v2991_v2, %v10791_v7  ;;  %15097 = vst [vmem:[#allocation226_spill] sm:$0xff] %v10847_v44  ;;  %v8077_v20 = vpack.i.bf16 %v437_v62, %v499_v6  ;;  %v3665_v2 = vld [vmem:[%s14376_s1 + $0x268] sm:$0xff]  ;;  %v10862_v44 = vpop.f32.mrf.mxu1 }
 0x3d6   : > { %15094 = vst [vmem:[#allocation223_spill] sm:$0xff] %v10831_v43  ;;  %4027 = vmatmul.f32.gmra.mxu3 %v10831_v43  ;;  %2663 = vrot.lane.b32.xlu2 %v819_v5, %s8276_s18  ;;  %v2266_v23 = vpop.permute.xlu1 %2265 }
 0x3d7   : > { %2151 = vrot.lane.b32.xlu0 %v691_v53, %s8273_s15  ;;  %15096 = vst [vmem:[#allocation225_spill] sm:$0xff] %v10843_v12  ;;  %v3617_v53 = vld [vmem:[%s14376_s1 + $0xe8] sm:$0xff]  ;;  %5695 = vmatpush.msrb.mxu1 %v3665_v2  ;;  %v755_v2 = vld [vmem:[%s8364_s14 + $0x3db] sm:$0xff] }
 0x3d8   : > { %v10845_v59 = vpop.permute.xlu2 %8053  ;;  %3841 = vmatmul.f32.gmra.mxu0 %v10843_v12  ;;  %15099 = vst [vmem:[#allocation228_spill] sm:$0xff] %v10862_v44  ;;  %v365_v12 = vld [vmem:[%s8364_s14 + $0x3a0] sm:$0xff] }
 0x3d9   : > { %v2140_v46 = vpop.permute.xlu0 %2139  ;;  %5294 = vmatpush.msrb.mxu0 %v3617_v53  ;;  %v692_v53 = vld [vmem:[%s8364_s14 + $0x1c3] sm:$0xff] }
 0x3da   : > { %v3248_v43 = vsel %vm3201_vm1, %v1628_v63, %v2140_v46  ;;  %v882_v63 = vld [vmem:[%s8364_s14 + $0x3d4] sm:$0xff]  ;;  %v883_v44 = vld [vmem:[%s8364_s14 + $0x3dc] sm:$0xff] }
 0x3db   : > { %v10853_v5 = vsel %vm3330_vm2, %v3248_v43, %v10760_v38  ;;  %v3311_v43 = vsel %vm3201_vm1, %v10725_v10, %v2266_v23 }
 0x3dc   : > { %15098 = vst [vmem:[#allocation227_spill] sm:$0xff] %v10853_v5  ;;  %7399 = vmatmul.msk.f32.gmra.mxu1 %vm3459_vm4, %v10853_v5  ;;  %8078 = vrot.lane.b32.xlu1 %v8077_v20, %s8275_s17  ;;  %v10880_v20 = vpop.f32.mrf.mxu2 }
 0x3dd   : > { %15101 = vst [vmem:[#allocation230_spill] sm:$0xff] %v10880_v20 }
 0x3de   : > { %1641 = vrot.lane.b32.xlu2 %v564_v50, %s8274_s16  ;;  %v10869_v38 = vpop.permute.xlu1 %8048 }
 0x3df   : > { %2789 = vrot.lane.b32.xlu0 %v882_v63, %s8276_s18  ;;  %v8050_v50 = vunpack.i.l.bf16 %v10869_v38  ;;  %v627_v63 = vld [vmem:[%s8364_s14 + $0x3da] sm:$0xff] }
 0x3e0   : > { %v10872_v6 = vpop.permute.xlu2 %2143 }
 0x3e1   : > { %v2778_v62 = vpop.permute.xlu0 %2777  ;;  %v3054_v23 = vsel %vm2943_vm0, %v365_v12, %v8050_v50  ;;  %v10906_v12 = vpop.f32.mrf.mxu3  ;;  %v820_v50 = vld [vmem:[%s8364_s14 + $0x1c4] sm:$0xff] }
 0x3e2   : > { %v10877_v46 = vsel %vm3330_vm2, %v3311_v43, %v2778_v62  ;;  %v438_v43 = vld [vmem:[%s8364_s14 + $0x1d1] sm:$0xff]  ;;  %v500_v62 = vld [vmem:[%s8364_s14 + $0x3e1] sm:$0xff]  ;;  %15103 = vst [vmem:[#allocation232_spill] sm:$0xff] %v10906_v12 }
 0x3e3   : > { %15100 = vst [vmem:[#allocation229_spill] sm:$0xff] %v10877_v46  ;;  %7462 = vmatmul.msk.f32.gmra.mxu2 %vm3459_vm4, %v10877_v46  ;;  %v3616_v46 = vld [vmem:[%s14376_s1 + $0xe0] sm:$0xff] }
 0x3e4   : > { %2153 = vrot.lane.b32.xlu1 %v692_v53, %s8273_s15  ;;  %v3664_v53 = vld [vmem:[%s14376_s1 + $0x260] sm:$0xff]  ;;  %4492 = vmatpush.msrb.mxu2 %v3616_v46 }
 0x3e5   : > { %4893 = vmatpush.msrb.mxu3 %v3664_v53 }
 0x3e6   : > { %2279 = vrot.lane.b32.xlu2 %v755_v2, %s8273_s15  ;;  %v2142_v10 = vpop.permute.xlu1 %2141 }
 0x3e7   : > { %1767 = vrot.lane.b32.xlu0 %v627_v63, %s8274_s16  ;;  %v8082_v63 = vpack.i.bf16 %v438_v43, %v500_v62  ;;  %v10920_v62 = vpop.f32.mrf.mxu2  ;;  %v3249_v53 = vsel %vm3201_vm1, %v10791_v7, %v2142_v10  ;;  %v303_v10 = vld [vmem:[%s8364_s14 + $0x198] sm:$0xff] }
 0x3e8   : > { %v10894_v5 = vpop.permute.xlu2 %2781  ;;  %15105 = vst [vmem:[#allocation234_spill] sm:$0xff] %v10920_v62  ;;  %v8051_v62 = vunpack.i.h.bf16 %v10869_v38 }
 0x3e9   : > { %v1756_v20 = vpop.permute.xlu0 %1755 }
 0x3ea   : > { %v10903_v2 = vsel %vm3072_vm3, %v3054_v23, %v1756_v20  ;;  %v3312_v23 = vsel %vm3201_vm1, %v1756_v20, %v10819_v33 }
 0x3eb   : > { %15102 = vst [vmem:[#allocation231_spill] sm:$0xff] %v10903_v2  ;;  %4030 = vmatmul.f32.gmra.mxu3 %v10903_v2  ;;  %v565_v2 = vld [vmem:[%s8364_s14 + $0x1ca] sm:$0xff] }
 0x3ec   : > { %2791 = vrot.lane.b32.xlu1 %v883_v44, %s8276_s18  ;;  %v8055_v44 = vunpack.i.l.bf16 %v10845_v59 }
 0x3ee   : > { %8083 = vrot.lane.b32.xlu2 %v8082_v63, %s8275_s17  ;;  %v2780_v47 = vpop.permute.xlu1 %2779  ;;  %v628_v63 = vld [vmem:[%s8364_s14 + $0x3e2] sm:$0xff] }
 0x3ef   : > { %2665 = vrot.lane.b32.xlu0 %v820_v50, %s8276_s18  ;;  %v10916_v46 = vsel %vm3330_vm2, %v3312_v23, %v2780_v47  ;;  %v366_v47 = vld [vmem:[%s8364_s14 + $0x3a8] sm:$0xff]  ;;  %v10932_v50 = vpop.f32.mrf.mxu1 }
 0x3f0   : > { %15104 = vst [vmem:[#allocation233_spill] sm:$0xff] %v10916_v46  ;;  %v10918_v43 = vpop.permute.xlu2 %1759  ;;  %7463 = vmatmul.msk.f32.gmra.mxu2 %vm3459_vm4, %v10916_v46  ;;  %v693_v23 = vld [vmem:[%s8364_s14 + $0x1cb] sm:$0xff]  ;;  %v3055_v7 = vsel %vm2943_vm0, %v366_v47, %v8055_v44 }
 0x3f1   : > { %v2654_v33 = vpop.permute.xlu0 %2653  ;;  %15107 = vst [vmem:[#allocation236_spill] sm:$0xff] %v10932_v50  ;;  %v821_v47 = vld [vmem:[%s8364_s14 + $0x1cc] sm:$0xff]  ;;  %v886_v50 = vld [vmem:[%s8364_s14 + $0x3f4] sm:$0xff] }
 0x3f2   : > { %v10928_v20 = vsel %vm3330_vm2, %v3249_v53, %v2654_v33 }
 0x3f3   : > { %15106 = vst [vmem:[#allocation235_spill] sm:$0xff] %v10928_v20  ;;  %7400 = vmatmul.msk.f32.gmra.mxu1 %vm3459_vm4, %v10928_v20  ;;  %v10949_v20 = vpop.f32.mrf.mxu3 }
 0x3f4   : > { %1769 = vrot.lane.b32.xlu1 %v628_v63, %s8274_s16  ;;  %15109 = vst [vmem:[#allocation238_spill] sm:$0xff] %v10949_v20  ;;  %v2992_v63 = vsel %vm2943_vm0, %v303_v10, %v8051_v62  ;;  %v3614_v20 = vld [vmem:[%s14376_s1 + $0xd0] sm:$0xff] }
 0x3f5   : > { %v3662_v62 = vld [vmem:[%s14376_s1 + $0x250] sm:$0xff]  ;;  %5295 = vmatpush.msrb.mxu0 %v3614_v20 }
 0x3f6   : > { %2155 = vrot.lane.b32.xlu2 %v693_v23, %s8273_s15  ;;  %v1758_v53 = vpop.permute.xlu1 %1757  ;;  %v10957_v23 = vpop.f32.mrf.mxu0  ;;  %5696 = vmatpush.msrb.mxu1 %v3662_v62 }
 0x3f7   : > { %1643 = vrot.lane.b32.xlu0 %v565_v2, %s8274_s16  ;;  %v10945_v33 = vsel %vm3072_vm3, %v3055_v7, %v1758_v53  ;;  %15111 = vst [vmem:[#allocation240_spill] sm:$0xff] %v10957_v23  ;;  %v884_v2 = vld [vmem:[%s8364_s14 + $0x3e4] sm:$0xff] }
 0x3f8   : > { %15108 = vst [vmem:[#allocation237_spill] sm:$0xff] %v10945_v33  ;;  %v10947_v46 = vpop.permute.xlu2 %2657  ;;  %4033 = vmatmul.f32.gmra.mxu3 %v10945_v33  ;;  %v756_v7 = vld [vmem:[%s8364_s14 + $0x3e3] sm:$0xff] }
 0x3f9   : > { %v1632_v38 = vpop.permute.xlu0 %1631  ;;  %v501_v23 = vld [vmem:[%s8364_s14 + $0x3e9] sm:$0xff] }
 0x3fa   : > { %v10954_v44 = vsel %vm3072_vm3, %v2992_v63, %v1632_v38  ;;  %v3250_v10 = vsel %vm3201_vm1, %v1632_v38, %v10872_v6  ;;  %v566_v6 = vld [vmem:[%s8364_s14 + $0x1d2] sm:$0xff]  ;;  %v8056_v38 = vunpack.i.h.bf16 %v10845_v59  ;;  %v3613_v59 = vld [vmem:[%s14376_s1 + $0xc8] sm:$0xff] }
 0x3fb   : > { %15110 = vst [vmem:[#allocation239_spill] sm:$0xff] %v10954_v44  ;;  %3844 = vmatmul.f32.gmra.mxu0 %v10954_v44  ;;  %v439_v44 = vld [vmem:[%s8364_s14 + $0x1d9] sm:$0xff]  ;;  %4493 = vmatpush.msrb.mxu2 %v3613_v59 }
 0x3fc   : > { %2667 = vrot.lane.b32.xlu1 %v821_v47, %s8276_s18  ;;  %v10980_v47 = vpop.f32.mrf.mxu1  ;;  %v8087_v62 = vpack.i.bf16 %v439_v44, %v501_v23 }
 0x3fd   : > { %15113 = vst [vmem:[#allocation242_spill] sm:$0xff] %v10980_v47  ;;  %v304_v47 = vld [vmem:[%s8364_s14 + $0x1a0] sm:$0xff] }
 0x3fe   : > { %2793 = vrot.lane.b32.xlu2 %v884_v2, %s8276_s18  ;;  %v2656_v63 = vpop.permute.xlu1 %2655  ;;  %v2993_v23 = vsel %vm2943_vm0, %v304_v47, %v8056_v38  ;;  %v694_v38 = vld [vmem:[%s8364_s14 + $0x1d3] sm:$0xff] }
 0x3ff   : > { %2281 = vrot.lane.b32.xlu0 %v756_v7, %s8273_s15  ;;  %v10974_v33 = vsel %vm3330_vm2, %v3250_v10, %v2656_v63  ;;  %v629_v10 = vld [vmem:[%s8364_s14 + $0x3ea] sm:$0xff]  ;;  %v10992_v63 = vpop.f32.mrf.mxu2 }
 0x400   : > { %15112 = vst [vmem:[#allocation241_spill] sm:$0xff] %v10974_v33  ;;  %v10978_v12 = vpop.permute.xlu2 %1635  ;;  %7401 = vmatmul.msk.f32.gmra.mxu1 %vm3459_vm4, %v10974_v33 }
 0x401   : > { %v2270_v20 = vpop.permute.xlu0 %2269  ;;  %15115 = vst [vmem:[#allocation244_spill] sm:$0xff] %v10992_v63  ;;  %v305_v63 = vld [vmem:[%s8364_s14 + $0x1a8] sm:$0xff] }
 0x402   : > { %v3313_v2 = vsel %vm3201_vm1, %v1758_v53, %v2270_v20  ;;  %v11005_v53 = vpop.f32.mrf.mxu0 }
 0x403   : > { %v10989_v7 = vsel %vm3330_vm2, %v3313_v2, %v10894_v5  ;;  %v3661_v5 = vld [vmem:[%s14376_s1 + $0x248] sm:$0xff]  ;;  %15116 = vst [vmem:[#allocation245_spill] sm:$0xff] %v11005_v53 }
 0x404   : > { %15114 = vst [vmem:[#allocation243_spill] sm:$0xff] %v10989_v7  ;;  %7464 = vmatmul.msk.f32.gmra.mxu2 %vm3459_vm4, %v10989_v7  ;;  %1645 = vrot.lane.b32.xlu1 %v566_v6, %s8274_s16  ;;  %v757_v53 = vld [vmem:[%s8364_s14 + $0x3eb] sm:$0xff] }
 0x405   : > { %4894 = vmatpush.msrb.mxu3 %v3661_v5 }
 0x406   : > { %1771 = vrot.lane.b32.xlu2 %v629_v10, %s8274_s16  ;;  %v1634_v44 = vpop.permute.xlu1 %1633  ;;  %v367_v10 = vld [vmem:[%s8364_s14 + $0x3b8] sm:$0xff] }
 0x407   : > { %8088 = vrot.lane.b32.xlu0 %v8087_v62, %s8275_s17  ;;  %v11010_v20 = vsel %vm3072_vm3, %v2993_v23, %v1634_v44  ;;  %v822_v62 = vld [vmem:[%s8364_s14 + $0x1d4] sm:$0xff]  ;;  %v11027_v23 = vpop.f32.mrf.mxu3 }
 0x408   : > { %15117 = vst [vmem:[#allocation246_spill] sm:$0xff] %v11010_v20  ;;  %v11012_v2 = vpop.permute.xlu2 %2273  ;;  %3847 = vmatmul.f32.gmra.mxu0 %v11010_v20  ;;  %v502_v20 = vld [vmem:[%s8364_s14 + $0x3f1] sm:$0xff] }
 0x409   : > { %v8059_v6 = vpop.permute.xlu0 %8058  ;;  %15119 = vst [vmem:[#allocation248_spill] sm:$0xff] %v11027_v23  ;;  %v11049_v23 = vpop.f32.mrf.mxu1 }
 0x40a   : > { %v8061_v7 = vunpack.i.h.bf16 %v8059_v6  ;;  %v8060_v33 = vunpack.i.l.bf16 %v8059_v6  ;;  %v440_v6 = vld [vmem:[%s8364_s14 + $0x1e1] sm:$0xff]  ;;  %15123 = vst [vmem:[#allocation252_spill] sm:$0xff] %v11049_v23 }
 0x40c   : > { %v3056_v47 = vsel %vm2943_vm0, %v367_v10, %v8060_v33  ;;  %2283 = vrot.lane.b32.xlu1 %v757_v53, %s8273_s15  ;;  %v2994_v5 = vsel %vm2943_vm0, %v305_v63, %v8061_v7  ;;  %v11040_v7 = vpop.f32.mrf.mxu0 }
 0x40d   : > { %v11024_v59 = vsel %vm3072_vm3, %v3056_v47, %v10918_v43  ;;  %v11036_v53 = vsel %vm3072_vm3, %v2994_v5, %v10978_v12  ;;  %15121 = vst [vmem:[#allocation250_spill] sm:$0xff] %v11040_v7  ;;  %v8092_v47 = vpack.i.bf16 %v440_v6, %v502_v20  ;;  %v885_v5 = vld [vmem:[%s8364_s14 + $0x3ec] sm:$0xff]  ;;  %v503_v7 = vld [vmem:[%s8364_s14 + $0x3f9] sm:$0xff] }
 0x40e   : > { %15118 = vst [vmem:[#allocation247_spill] sm:$0xff] %v11024_v59  ;;  %4036 = vmatmul.f32.gmra.mxu3 %v11024_v59  ;;  %2669 = vrot.lane.b32.xlu2 %v822_v62, %s8276_s18  ;;  %v2272_v33 = vpop.permute.xlu1 %2271 }
 0x40f   : > { %2157 = vrot.lane.b32.xlu0 %v694_v38, %s8273_s15  ;;  %15120 = vst [vmem:[#allocation249_spill] sm:$0xff] %v11036_v53  ;;  %v567_v38 = vld [vmem:[%s8364_s14 + $0x1da] sm:$0xff] }
 0x410   : > { %v11038_v10 = vpop.permute.xlu2 %8068  ;;  %3850 = vmatmul.f32.gmra.mxu0 %v11036_v53  ;;  %v11067_v53 = vpop.f32.mrf.mxu2 }
 0x411   : > { %v2146_v63 = vpop.permute.xlu0 %2145  ;;  %15125 = vst [vmem:[#allocation254_spill] sm:$0xff] %v11067_v53 }
 0x412   : > { %v3251_v59 = vsel %vm3201_vm1, %v1634_v44, %v2146_v63  ;;  %v3314_v44 = vsel %vm3201_vm1, %v10918_v43, %v2272_v33  ;;  %v695_v63 = vld [vmem:[%s8364_s14 + $0x1db] sm:$0xff] }
 0x413   : > { %v11046_v62 = vsel %vm3330_vm2, %v3251_v59, %v10947_v46  ;;  %v3611_v43 = vld [vmem:[%s14376_s1 + $0xb8] sm:$0xff] }
 0x414   : > { %15122 = vst [vmem:[#allocation251_spill] sm:$0xff] %v11046_v62  ;;  %7402 = vmatmul.msk.f32.gmra.mxu1 %vm3459_vm4, %v11046_v62  ;;  %8093 = vrot.lane.b32.xlu1 %v8092_v47, %s8275_s17  ;;  %v368_v62 = vld [vmem:[%s8364_s14 + $0x3c0] sm:$0xff]  ;;  %v3659_v33 = vld [vmem:[%s14376_s1 + $0x238] sm:$0xff] }
 0x415   : > { %5296 = vmatpush.msrb.mxu0 %v3611_v43  ;;  %5697 = vmatpush.msrb.mxu1 %v3659_v33 }
 0x416   : > { %1647 = vrot.lane.b32.xlu2 %v567_v38, %s8274_s16  ;;  %v11056_v20 = vpop.permute.xlu1 %8063  ;;  %v758_v38 = vld [vmem:[%s8364_s14 + $0x3f3] sm:$0xff] }
 0x417   : > { %2795 = vrot.lane.b32.xlu0 %v885_v5, %s8276_s18  ;;  %v8065_v47 = vunpack.i.l.bf16 %v11056_v20  ;;  %v630_v5 = vld [vmem:[%s8364_s14 + $0x3f2] sm:$0xff] }
 0x418   : > { %v11059_v46 = vpop.permute.xlu2 %2149 }
 0x419   : > { %v2784_v59 = vpop.permute.xlu0 %2783 }
 0x41a   : > { %v11064_v6 = vsel %vm3330_vm2, %v3314_v44, %v2784_v59  ;;  %v3057_v59 = vsel %vm2943_vm0, %v368_v62, %v8065_v47  ;;  %v11099_v62 = vpop.f32.mrf.mxu3  ;;  %v823_v47 = vld [vmem:[%s8364_s14 + $0x1dc] sm:$0xff] }
 0x41b   : > { %15124 = vst [vmem:[#allocation253_spill] sm:$0xff] %v11064_v6  ;;  %7465 = vmatmul.msk.f32.gmra.mxu2 %vm3459_vm4, %v11064_v6  ;;  %v441_v6 = vld [vmem:[%s8364_s14 + $0x1e9] sm:$0xff] }
 0x41c   : > { %2159 = vrot.lane.b32.xlu1 %v695_v63, %s8273_s15  ;;  %v8097_v56 = vpack.i.bf16 %v441_v6, %v503_v7  ;;  %15127 = vst [vmem:[#allocation256_spill] sm:$0xff] %v11099_v62  ;;  %v443_v62 = vld [vmem:[%s8364_s14 + $0x1f9] sm:$0xff] }
 0x41e   : > { %2285 = vrot.lane.b32.xlu2 %v758_v38, %s8273_s15  ;;  %v2148_v44 = vpop.permute.xlu1 %2147  ;;  %v3610_v38 = vld [vmem:[%s14376_s1 + $0xb0] sm:$0xff] }
 0x41f   : > { %1773 = vrot.lane.b32.xlu0 %v630_v5, %s8274_s16  ;;  %v3658_v5 = vld [vmem:[%s14376_s1 + $0x230] sm:$0xff]  ;;  %4494 = vmatpush.msrb.mxu2 %v3610_v38  ;;  %v631_v38 = vld [vmem:[%s8364_s14 + $0x3fa] sm:$0xff] }
 0x420   : > { %v11087_v63 = vpop.permute.xlu2 %2787  ;;  %4895 = vmatpush.msrb.mxu3 %v3658_v5  ;;  %v369_v5 = vld [vmem:[%s8364_s14 + $0x3c8] sm:$0xff] }
 0x421   : > { %v1762_v53 = vpop.permute.xlu0 %1761 }
 0x422   : > { %v11090_v23 = vsel %vm3072_vm3, %v3057_v59, %v1762_v53  ;;  %v3315_v7 = vsel %vm3201_vm1, %v1762_v53, %v11012_v2  ;;  %v11113_v59 = vpop.f32.mrf.mxu2 }
 0x423   : > { %15126 = vst [vmem:[#allocation255_spill] sm:$0xff] %v11090_v23  ;;  %4039 = vmatmul.f32.gmra.mxu3 %v11090_v23  ;;  %v8066_v23 = vunpack.i.h.bf16 %v11056_v20 }
 0x424   : > { %2797 = vrot.lane.b32.xlu1 %v886_v50, %s8276_s18  ;;  %15129 = vst [vmem:[#allocation258_spill] sm:$0xff] %v11113_v59  ;;  %v8070_v50 = vunpack.i.l.bf16 %v11038_v10 }
 0x426   : > { %8098 = vrot.lane.b32.xlu2 %v8097_v56, %s8275_s17  ;;  %v2786_v6 = vpop.permute.xlu1 %2785  ;;  %v3252_v56 = vsel %vm3201_vm1, %v10978_v12, %v2148_v44  ;;  %v3058_v12 = vsel %vm2943_vm0, %v369_v5, %v8070_v50  ;;  %v306_v44 = vld [vmem:[%s8364_s14 + $0x1b0] sm:$0xff]  ;;  %v824_v5 = vld [vmem:[%s8364_s14 + $0x1e4] sm:$0xff] }
 0x427   : > { %2671 = vrot.lane.b32.xlu0 %v823_v47, %s8276_s18  ;;  %v11109_v43 = vsel %vm3330_vm2, %v3315_v7, %v2786_v6  ;;  %v11125_v47 = vpop.f32.mrf.mxu1  ;;  %v696_v7 = vld [vmem:[%s8364_s14 + $0x1e3] sm:$0xff] }
 0x428   : > { %15128 = vst [vmem:[#allocation257_spill] sm:$0xff] %v11109_v43  ;;  %v11111_v33 = vpop.permute.xlu2 %1765  ;;  %7466 = vmatmul.msk.f32.gmra.mxu2 %vm3459_vm4, %v11109_v43  ;;  %v568_v6 = vld [vmem:[%s8364_s14 + $0x1e2] sm:$0xff] }
 0x429   : > { %v2660_v2 = vpop.permute.xlu0 %2659  ;;  %15131 = vst [vmem:[#allocation260_spill] sm:$0xff] %v11125_v47 }
 0x42a   : > { %v11121_v53 = vsel %vm3330_vm2, %v3252_v56, %v2660_v2  ;;  %v11179_v59 = vpop.f32.mrf.mxu2 }
 0x42b   : > { %15130 = vst [vmem:[#allocation259_spill] sm:$0xff] %v11121_v53  ;;  %7403 = vmatmul.msk.f32.gmra.mxu1 %vm3459_vm4, %v11121_v53  ;;  %v11142_v53 = vpop.f32.mrf.mxu3 }
 0x42c   : > { %1775 = vrot.lane.b32.xlu1 %v631_v38, %s8274_s16  ;;  %15133 = vst [vmem:[#allocation262_spill] sm:$0xff] %v11142_v53  ;;  %v2995_v38 = vsel %vm2943_vm0, %v306_v44, %v8066_v23 }
 0x42d   : > { %15139 = vst [vmem:[#allocation268_spill] sm:$0xff] %v11179_v59 }
 0x42e   : > { %2161 = vrot.lane.b32.xlu2 %v696_v7, %s8273_s15  ;;  %v1764_v56 = vpop.permute.xlu1 %1763  ;;  %v11150_v7 = vpop.f32.mrf.mxu0 }
 0x42f   : > { %1649 = vrot.lane.b32.xlu0 %v568_v6, %s8274_s16  ;;  %v11138_v2 = vsel %vm3072_vm3, %v3058_v12, %v1764_v56  ;;  %15135 = vst [vmem:[#allocation264_spill] sm:$0xff] %v11150_v7  ;;  %v887_v6 = vld [vmem:[%s8364_s14 + $0x3fc] sm:$0xff]  ;;  %v11167_v7 = vpop.f32.mrf.mxu1 }
 0x430   : > { %15132 = vst [vmem:[#allocation261_spill] sm:$0xff] %v11138_v2  ;;  %v11140_v43 = vpop.permute.xlu2 %2663  ;;  %4042 = vmatmul.f32.gmra.mxu3 %v11138_v2  ;;  %v759_v12 = vld [vmem:[%s8364_s14 + $0x3fb] sm:$0xff]  ;;  %v442_v2 = vld [vmem:[%s8364_s14 + $0x1f1] sm:$0xff] }
 0x431   : > { %v1638_v20 = vpop.permute.xlu0 %1637  ;;  %15137 = vst [vmem:[#allocation266_spill] sm:$0xff] %v11167_v7  ;;  %v307_v7 = vld [vmem:[%s8364_s14 + $0x1b8] sm:$0xff] }
 0x432   : > { %v11147_v50 = vsel %vm3072_vm3, %v2995_v38, %v1638_v20  ;;  %v3253_v23 = vsel %vm3201_vm1, %v1638_v20, %v11059_v46  ;;  %v569_v46 = vld [vmem:[%s8364_s14 + $0x1ea] sm:$0xff]  ;;  %v8071_v20 = vunpack.i.h.bf16 %v11038_v10  ;;  %v3608_v10 = vld [vmem:[%s14376_s1 + $0xa0] sm:$0xff] }
 0x433   : > { %15134 = vst [vmem:[#allocation263_spill] sm:$0xff] %v11147_v50  ;;  %3853 = vmatmul.f32.gmra.mxu0 %v11147_v50  ;;  %v504_v50 = vld [vmem:[%s8364_s14 + $0x401] sm:$0xff]  ;;  %v11220_v59 = vpop.f32.mrf.mxu3 }
 0x434   : > { %2673 = vrot.lane.b32.xlu1 %v824_v5, %s8276_s18  ;;  %5297 = vmatpush.msrb.mxu0 %v3608_v10  ;;  %v825_v10 = vld [vmem:[%s8364_s14 + $0x1ec] sm:$0xff]  ;;  %15143 = vst [vmem:[#allocation272_spill] sm:$0xff] %v11220_v59 }
 0x435   : > { %v889_v59 = vld [vmem:[%s8364_s14 + $0x40c] sm:$0xff] }
 0x436   : > { %2799 = vrot.lane.b32.xlu2 %v887_v6, %s8276_s18  ;;  %v2662_v44 = vpop.permute.xlu1 %2661 }
 0x437   : > { %2287 = vrot.lane.b32.xlu0 %v759_v12, %s8273_s15  ;;  %v11161_v38 = vsel %vm3330_vm2, %v3253_v23, %v2662_v44  ;;  %v8102_v23 = vpack.i.bf16 %v442_v2, %v504_v50  ;;  %v632_v44 = vld [vmem:[%s8364_s14 + $0x402] sm:$0xff]  ;;  %v2996_v50 = vsel %vm2943_vm0, %v307_v7, %v8071_v20  ;;  %v3607_v7 = vld [vmem:[%s14376_s1 + $0x98] sm:$0xff] }
 0x438   : > { %15136 = vst [vmem:[#allocation265_spill] sm:$0xff] %v11161_v38  ;;  %v11165_v53 = vpop.permute.xlu2 %1641  ;;  %7404 = vmatmul.msk.f32.gmra.mxu1 %vm3459_vm4, %v11161_v38  ;;  %v3655_v20 = vld [vmem:[%s14376_s1 + $0x218] sm:$0xff]  ;;  %4495 = vmatpush.msrb.mxu2 %v3607_v7  ;;  %v505_v7 = vld [vmem:[%s8364_s14 + $0x409] sm:$0xff] }
 0x439   : > { %v2276_v5 = vpop.permute.xlu0 %2275  ;;  %4896 = vmatpush.msrb.mxu3 %v3655_v20  ;;  %v8107_v20 = vpack.i.bf16 %v443_v62, %v505_v7 }
 0x43a   : > { %v3316_v6 = vsel %vm3201_vm1, %v1764_v56, %v2276_v5  ;;  %v11192_v56 = vpop.f32.mrf.mxu0 }
 0x43b   : > { %v11176_v12 = vsel %vm3330_vm2, %v3316_v6, %v11087_v63  ;;  %v3656_v63 = vld [vmem:[%s14376_s1 + $0x220] sm:$0xff]  ;;  %15140 = vst [vmem:[#allocation269_spill] sm:$0xff] %v11192_v56  ;;  %v11280_v47 = vpop.f32.mrf.mxu3 }
 0x43c   : > { %15138 = vst [vmem:[#allocation267_spill] sm:$0xff] %v11176_v12  ;;  %7467 = vmatmul.msk.f32.gmra.mxu2 %vm3459_vm4, %v11176_v12  ;;  %1651 = vrot.lane.b32.xlu1 %v569_v46, %s8274_s16  ;;  %v370_v12 = vld [vmem:[%s8364_s14 + $0x3d0] sm:$0xff] }
 0x43d   : > { %5698 = vmatpush.msrb.mxu1 %v3656_v63  ;;  %15151 = vst [vmem:[#allocation280_spill] sm:$0xff] %v11280_v47 }
 0x43e   : > { %1777 = vrot.lane.b32.xlu2 %v632_v44, %s8274_s16  ;;  %v1640_v2 = vpop.permute.xlu1 %1639  ;;  %v760_v44 = vld [vmem:[%s8364_s14 + $0x403] sm:$0xff] }
 0x43f   : > { %8103 = vrot.lane.b32.xlu0 %v8102_v23, %s8275_s17  ;;  %v11197_v5 = vsel %vm3072_vm3, %v2996_v50, %v1640_v2  ;;  %v308_v23 = vld [vmem:[%s8364_s14 + $0x1c0] sm:$0xff]  ;;  %v697_v50 = vld [vmem:[%s8364_s14 + $0x1eb] sm:$0xff] }
 0x440   : > { %15141 = vst [vmem:[#allocation270_spill] sm:$0xff] %v11197_v5  ;;  %v11199_v6 = vpop.permute.xlu2 %2279  ;;  %3856 = vmatmul.f32.gmra.mxu0 %v11197_v5 }
 0x441   : > { %v8074_v46 = vpop.permute.xlu0 %8073 }
 0x442   : > { %v8076_v38 = vunpack.i.h.bf16 %v8074_v46  ;;  %v8075_v56 = vunpack.i.l.bf16 %v8074_v46 }
 0x444   : > { %v3059_v63 = vsel %vm2943_vm0, %v370_v12, %v8075_v56  ;;  %2289 = vrot.lane.b32.xlu1 %v760_v44, %s8273_s15  ;;  %v2997_v5 = vsel %vm2943_vm0, %v308_v23, %v8076_v38  ;;  %v11233_v38 = vpop.f32.mrf.mxu0 }
 0x445   : > { %v11217_v46 = vsel %vm3072_vm3, %v3059_v63, %v11111_v33  ;;  %v11229_v56 = vsel %vm3072_vm3, %v2997_v5, %v11165_v53  ;;  %15145 = vst [vmem:[#allocation274_spill] sm:$0xff] %v11233_v38  ;;  %v888_v5 = vld [vmem:[%s8364_s14 + $0x404] sm:$0xff] }
 0x446   : > { %15142 = vst [vmem:[#allocation271_spill] sm:$0xff] %v11217_v46  ;;  %4045 = vmatmul.f32.gmra.mxu3 %v11217_v46  ;;  %2675 = vrot.lane.b32.xlu2 %v825_v10, %s8276_s18  ;;  %v2278_v12 = vpop.permute.xlu1 %2277  ;;  %v11242_v46 = vpop.f32.mrf.mxu1 }
 0x447   : > { %2163 = vrot.lane.b32.xlu0 %v697_v50, %s8273_s15  ;;  %15144 = vst [vmem:[#allocation273_spill] sm:$0xff] %v11229_v56  ;;  %v570_v50 = vld [vmem:[%s8364_s14 + $0x1f2] sm:$0xff] }
 0x448   : > { %v11231_v44 = vpop.permute.xlu2 %8083  ;;  %3859 = vmatmul.f32.gmra.mxu0 %v11229_v56  ;;  %15147 = vst [vmem:[#allocation276_spill] sm:$0xff] %v11242_v46  ;;  %v11260_v56 = vpop.f32.mrf.mxu2 }
 0x449   : > { %v2152_v23 = vpop.permute.xlu0 %2151  ;;  %15149 = vst [vmem:[#allocation278_spill] sm:$0xff] %v11260_v56 }
 0x44a   : > { %v3254_v63 = vsel %vm3201_vm1, %v1640_v2, %v2152_v23  ;;  %v3317_v2 = vsel %vm3201_vm1, %v11111_v33, %v2278_v12 }
 0x44b   : > { %v11239_v10 = vsel %vm3330_vm2, %v3254_v63, %v11140_v43  ;;  %v698_v63 = vld [vmem:[%s8364_s14 + $0x1f3] sm:$0xff] }
 0x44c   : > { %15146 = vst [vmem:[#allocation275_spill] sm:$0xff] %v11239_v10  ;;  %7405 = vmatmul.msk.f32.gmra.mxu1 %vm3459_vm4, %v11239_v10  ;;  %8108 = vrot.lane.b32.xlu1 %v8107_v20, %s8275_s17  ;;  %v371_v10 = vld [vmem:[%s8364_s14 + $0x3d8] sm:$0xff] }
 0x44e   : > { %1653 = vrot.lane.b32.xlu2 %v570_v50, %s8274_s16  ;;  %v11249_v62 = vpop.permute.xlu1 %8078  ;;  %v761_v50 = vld [vmem:[%s8364_s14 + $0x40b] sm:$0xff] }
 0x44f   : > { %2801 = vrot.lane.b32.xlu0 %v888_v5, %s8276_s18  ;;  %v8080_v20 = vunpack.i.l.bf16 %v11249_v62  ;;  %v633_v5 = vld [vmem:[%s8364_s14 + $0x40a] sm:$0xff] }
 0x450   : > { %v11252_v43 = vpop.permute.xlu2 %2155 }
 0x451   : > { %v2790_v7 = vpop.permute.xlu0 %2789  ;;  %v3060_v12 = vsel %vm2943_vm0, %v371_v10, %v8080_v20 }
 0x452   : > { %v11257_v23 = vsel %vm3330_vm2, %v3317_v2, %v2790_v7  ;;  %v444_v2 = vld [vmem:[%s8364_s14 + $0x201] sm:$0xff]  ;;  %v506_v7 = vld [vmem:[%s8364_s14 + $0x411] sm:$0xff] }
 0x453   : > { %15148 = vst [vmem:[#allocation277_spill] sm:$0xff] %v11257_v23  ;;  %7468 = vmatmul.msk.f32.gmra.mxu2 %vm3459_vm4, %v11257_v23  ;;  %v8112_v46 = vpack.i.bf16 %v444_v2, %v506_v7  ;;  %v634_v2 = vld [vmem:[%s8364_s14 + $0x412] sm:$0xff]  ;;  %v372_v7 = vld [vmem:[%s8364_s14 + $0x3e0] sm:$0xff] }
 0x454   : > { %2165 = vrot.lane.b32.xlu1 %v698_v63, %s8273_s15  ;;  %v826_v63 = vld [vmem:[%s8364_s14 + $0x1f4] sm:$0xff] }
 0x456   : > { %2291 = vrot.lane.b32.xlu2 %v761_v50, %s8273_s15  ;;  %v2154_v33 = vpop.permute.xlu1 %2153 }
 0x457   : > { %1779 = vrot.lane.b32.xlu0 %v633_v5, %s8274_s16 }
 0x458   : > { %v11274_v38 = vpop.permute.xlu2 %2793 }
 0x459   : > { %v1768_v56 = vpop.permute.xlu0 %1767 }
 0x45a   : > { %v11277_v23 = vsel %vm3072_vm3, %v3060_v12, %v1768_v56  ;;  %v3318_v10 = vsel %vm3201_vm1, %v1768_v56, %v11199_v6  ;;  %v11294_v12 = vpop.f32.mrf.mxu2 }
 0x45b   : > { %15150 = vst [vmem:[#allocation279_spill] sm:$0xff] %v11277_v23  ;;  %4048 = vmatmul.f32.gmra.mxu3 %v11277_v23  ;;  %v8081_v23 = vunpack.i.h.bf16 %v11249_v62  ;;  %v3604_v62 = vld [vmem:[%s14376_s1 + $0x80] sm:$0xff] }
 0x45c   : > { %2803 = vrot.lane.b32.xlu1 %v889_v59, %s8276_s18  ;;  %15153 = vst [vmem:[#allocation282_spill] sm:$0xff] %v11294_v12  ;;  %v8085_v59 = vunpack.i.l.bf16 %v11231_v44  ;;  %4496 = vmatpush.msrb.mxu2 %v3604_v62  ;;  %v827_v12 = vld [vmem:[%s8364_s14 + $0x1fc] sm:$0xff]  ;;  %v445_v62 = vld [vmem:[%s8364_s14 + $0x209] sm:$0xff] }
 0x45e   : > { %8113 = vrot.lane.b32.xlu2 %v8112_v46, %s8275_s17  ;;  %v2792_v20 = vpop.permute.xlu1 %2791  ;;  %v3255_v46 = vsel %vm3201_vm1, %v11165_v53, %v2154_v33  ;;  %v3061_v53 = vsel %vm2943_vm0, %v372_v7, %v8085_v59  ;;  %v309_v33 = vld [vmem:[%s8364_s14 + $0x1c8] sm:$0xff]  ;;  %v3652_v7 = vld [vmem:[%s14376_s1 + $0x200] sm:$0xff] }
 0x45f   : > { %2677 = vrot.lane.b32.xlu0 %v826_v63, %s8276_s18  ;;  %v11290_v50 = vsel %vm3330_vm2, %v3318_v10, %v2792_v20  ;;  %v11306_v63 = vpop.f32.mrf.mxu1  ;;  %v699_v10 = vld [vmem:[%s8364_s14 + $0x1fb] sm:$0xff]  ;;  %4897 = vmatpush.msrb.mxu3 %v3652_v7 }
 0x460   : > { %15152 = vst [vmem:[#allocation281_spill] sm:$0xff] %v11290_v50  ;;  %v11292_v5 = vpop.permute.xlu2 %1771  ;;  %7469 = vmatmul.msk.f32.gmra.mxu2 %vm3459_vm4, %v11290_v50  ;;  %v571_v20 = vld [vmem:[%s8364_s14 + $0x1fa] sm:$0xff]  ;;  %v3653_v50 = vld [vmem:[%s14376_s1 + $0x208] sm:$0xff] }
 0x461   : > { %v2666_v6 = vpop.permute.xlu0 %2665  ;;  %15155 = vst [vmem:[#allocation284_spill] sm:$0xff] %v11306_v63  ;;  %5699 = vmatpush.msrb.mxu1 %v3653_v50  ;;  %v11343_v50 = vpop.f32.mrf.mxu0  ;;  %v507_v7 = vld [vmem:[%s8364_s14 + $0x419] sm:$0xff] }
 0x462   : > { %v11302_v56 = vsel %vm3330_vm2, %v3255_v46, %v2666_v6  ;;  %v3605_v6 = vld [vmem:[%s14376_s1 + $0x88] sm:$0xff]  ;;  %15159 = vst [vmem:[#allocation288_spill] sm:$0xff] %v11343_v50  ;;  %v11372_v50 = vpop.f32.mrf.mxu2 }
 0x463   : > { %15154 = vst [vmem:[#allocation283_spill] sm:$0xff] %v11302_v56  ;;  %7406 = vmatmul.msk.f32.gmra.mxu1 %vm3459_vm4, %v11302_v56  ;;  %5298 = vmatpush.msrb.mxu0 %v3605_v6  ;;  %v2998_v56 = vsel %vm2943_vm0, %v309_v33, %v8081_v23  ;;  %v890_v6 = vld [vmem:[%s8364_s14 + $0x414] sm:$0xff] }
 0x464   : > { %1781 = vrot.lane.b32.xlu1 %v634_v2, %s8274_s16  ;;  %15163 = vst [vmem:[#allocation292_spill] sm:$0xff] %v11372_v50  ;;  %v311_v50 = vld [vmem:[%s8364_s14 + $0x1d8] sm:$0xff] }
 0x466   : > { %2167 = vrot.lane.b32.xlu2 %v699_v10, %s8273_s15  ;;  %v1770_v46 = vpop.permute.xlu1 %1769  ;;  %v11335_v10 = vpop.f32.mrf.mxu3 }
 0x467   : > { %1655 = vrot.lane.b32.xlu0 %v571_v20, %s8274_s16  ;;  %v11328_v59 = vsel %vm3072_vm3, %v3061_v53, %v1770_v46  ;;  %15157 = vst [vmem:[#allocation286_spill] sm:$0xff] %v11335_v10  ;;  %v762_v10 = vld [vmem:[%s8364_s14 + $0x413] sm:$0xff] }
 0x468   : > { %15156 = vst [vmem:[#allocation285_spill] sm:$0xff] %v11328_v59  ;;  %v11330_v2 = vpop.permute.xlu2 %2669  ;;  %4051 = vmatmul.f32.gmra.mxu3 %v11328_v59 }
 0x469   : > { %v1644_v20 = vpop.permute.xlu0 %1643 }
 0x46a   : > { %v11340_v53 = vsel %vm3072_vm3, %v2998_v56, %v1644_v20  ;;  %v3256_v23 = vsel %vm3201_vm1, %v1644_v20, %v11252_v43  ;;  %v572_v43 = vld [vmem:[%s8364_s14 + $0x202] sm:$0xff]  ;;  %v8086_v20 = vunpack.i.h.bf16 %v11231_v44  ;;  %v11379_v44 = vpop.f32.mrf.mxu0 }
 0x46b   : > { %15158 = vst [vmem:[#allocation287_spill] sm:$0xff] %v11340_v53  ;;  %3862 = vmatmul.f32.gmra.mxu0 %v11340_v53  ;;  %v11360_v53 = vpop.f32.mrf.mxu1 }
 0x46c   : > { %2679 = vrot.lane.b32.xlu1 %v827_v12, %s8276_s18  ;;  %15161 = vst [vmem:[#allocation290_spill] sm:$0xff] %v11360_v53  ;;  %v700_v53 = vld [vmem:[%s8364_s14 + $0x203] sm:$0xff] }
 0x46d   : > { %15164 = vst [vmem:[#allocation293_spill] sm:$0xff] %v11379_v44  ;;  %v828_v44 = vld [vmem:[%s8364_s14 + $0x204] sm:$0xff] }
 0x46e   : > { %2805 = vrot.lane.b32.xlu2 %v890_v6, %s8276_s18  ;;  %v2668_v33 = vpop.permute.xlu1 %2667 }
 0x46f   : > { %2293 = vrot.lane.b32.xlu0 %v762_v10, %s8273_s15  ;;  %v11354_v56 = vsel %vm3330_vm2, %v3256_v23, %v2668_v33  ;;  %v8117_v23 = vpack.i.bf16 %v445_v62, %v507_v7  ;;  %v635_v33 = vld [vmem:[%s8364_s14 + $0x41a] sm:$0xff] }
 0x470   : > { %15160 = vst [vmem:[#allocation289_spill] sm:$0xff] %v11354_v56  ;;  %v11358_v59 = vpop.permute.xlu2 %1647  ;;  %7407 = vmatmul.msk.f32.gmra.mxu1 %vm3459_vm4, %v11354_v56  ;;  %v310_v56 = vld [vmem:[%s8364_s14 + $0x1d0] sm:$0xff] }
 0x471   : > { %v2282_v12 = vpop.permute.xlu0 %2281 }
 0x472   : > { %v3319_v6 = vsel %vm3201_vm1, %v1770_v46, %v2282_v12  ;;  %v2999_v46 = vsel %vm2943_vm0, %v310_v56, %v8086_v20 }
 0x473   : > { %v11369_v10 = vsel %vm3330_vm2, %v3319_v6, %v11274_v38  ;;  %v373_v6 = vld [vmem:[%s8364_s14 + $0x3e8] sm:$0xff] }
 0x474   : > { %15162 = vst [vmem:[#allocation291_spill] sm:$0xff] %v11369_v10  ;;  %7470 = vmatmul.msk.f32.gmra.mxu2 %vm3459_vm4, %v11369_v10  ;;  %1657 = vrot.lane.b32.xlu1 %v572_v43, %s8274_s16  ;;  %v763_v10 = vld [vmem:[%s8364_s14 + $0x41b] sm:$0xff] }
 0x476   : > { %1783 = vrot.lane.b32.xlu2 %v635_v33, %s8274_s16  ;;  %v1646_v38 = vpop.permute.xlu1 %1645 }
 0x477   : > { %8118 = vrot.lane.b32.xlu0 %v8117_v23, %s8275_s17  ;;  %v11384_v62 = vsel %vm3072_vm3, %v2999_v46, %v1646_v38  ;;  %v11401_v46 = vpop.f32.mrf.mxu3 }
 0x478   : > { %15165 = vst [vmem:[#allocation294_spill] sm:$0xff] %v11384_v62  ;;  %v11386_v7 = vpop.permute.xlu2 %2285  ;;  %3865 = vmatmul.f32.gmra.mxu0 %v11384_v62  ;;  %v446_v62 = vld [vmem:[%s8364_s14 + $0x211] sm:$0xff] }
 0x479   : > { %v8089_v12 = vpop.permute.xlu0 %8088  ;;  %15167 = vst [vmem:[#allocation296_spill] sm:$0xff] %v11401_v46 }
 0x47a   : > { %v8091_v43 = vunpack.i.h.bf16 %v8089_v12  ;;  %v8090_v33 = vunpack.i.l.bf16 %v8089_v12  ;;  %v508_v12 = vld [vmem:[%s8364_s14 + $0x421] sm:$0xff] }
 0x47c   : > { %v3062_v23 = vsel %vm2943_vm0, %v373_v6, %v8090_v33  ;;  %2295 = vrot.lane.b32.xlu1 %v763_v10, %s8273_s15  ;;  %v3000_v20 = vsel %vm2943_vm0, %v311_v50, %v8091_v43  ;;  %v11414_v33 = vpop.f32.mrf.mxu0  ;;  %v8122_v43 = vpack.i.bf16 %v446_v62, %v508_v12  ;;  %v3649_v62 = vld [vmem:[%s14376_s1 + $0x1e8] sm:$0xff] }
 0x47d   : > { %v11398_v56 = vsel %vm3072_vm3, %v3062_v23, %v11292_v5  ;;  %v11410_v10 = vsel %vm3072_vm3, %v3000_v20, %v11358_v59  ;;  %15169 = vst [vmem:[#allocation298_spill] sm:$0xff] %v11414_v33  ;;  %v3601_v23 = vld [vmem:[%s14376_s1 + $0x68] sm:$0xff]  ;;  %4898 = vmatpush.msrb.mxu3 %v3649_v62  ;;  %v11453_v62 = vpop.f32.mrf.mxu2 }
 0x47e   : > { %15166 = vst [vmem:[#allocation295_spill] sm:$0xff] %v11398_v56  ;;  %4054 = vmatmul.f32.gmra.mxu3 %v11398_v56  ;;  %2681 = vrot.lane.b32.xlu2 %v828_v44, %s8276_s18  ;;  %v2284_v47 = vpop.permute.xlu1 %2283  ;;  %v3602_v44 = vld [vmem:[%s14376_s1 + $0x70] sm:$0xff] }
 0x47f   : > { %2169 = vrot.lane.b32.xlu0 %v700_v53, %s8273_s15  ;;  %15168 = vst [vmem:[#allocation297_spill] sm:$0xff] %v11410_v10  ;;  %v3650_v53 = vld [vmem:[%s14376_s1 + $0x1f0] sm:$0xff]  ;;  %5299 = vmatpush.msrb.mxu0 %v3602_v44  ;;  %v3320_v44 = vsel %vm3201_vm1, %v11292_v5, %v2284_v47  ;;  %v11473_v63 = vpop.f32.mrf.mxu3 }
 0x480   : > { %v11412_v6 = vpop.permute.xlu2 %8098  ;;  %3868 = vmatmul.f32.gmra.mxu0 %v11410_v10  ;;  %5700 = vmatpush.msrb.mxu1 %v3650_v53  ;;  %v573_v56 = vld [vmem:[%s8364_s14 + $0x20a] sm:$0xff]  ;;  %v11435_v10 = vpop.f32.mrf.mxu1  ;;  %15173 = vst [vmem:[#allocation302_spill] sm:$0xff] %v11453_v62 }
 0x481   : > { %v2158_v50 = vpop.permute.xlu0 %2157  ;;  %4497 = vmatpush.msrb.mxu2 %v3601_v23  ;;  %15171 = vst [vmem:[#allocation300_spill] sm:$0xff] %v11435_v10  ;;  %v892_v10 = vld [vmem:[%s8364_s14 + $0x424] sm:$0xff] }
 0x482   : > { %v3257_v20 = vsel %vm3201_vm1, %v1646_v38, %v2158_v50  ;;  %v891_v38 = vld [vmem:[%s8364_s14 + $0x41c] sm:$0xff]  ;;  %15175 = vst [vmem:[#allocation304_spill] sm:$0xff] %v11473_v63 }
 0x483   : > { %v11432_v12 = vsel %vm3330_vm2, %v3257_v20, %v11330_v2  ;;  %v701_v20 = vld [vmem:[%s8364_s14 + $0x20b] sm:$0xff] }
 0x484   : > { %15170 = vst [vmem:[#allocation299_spill] sm:$0xff] %v11432_v12  ;;  %7408 = vmatmul.msk.f32.gmra.mxu1 %vm3459_vm4, %v11432_v12  ;;  %8123 = vrot.lane.b32.xlu1 %v8122_v43, %s8275_s17  ;;  %v764_v43 = vld [vmem:[%s8364_s14 + $0x423] sm:$0xff]  ;;  %v374_v12 = vld [vmem:[%s8364_s14 + $0x3f0] sm:$0xff] }
 0x486   : > { %1659 = vrot.lane.b32.xlu2 %v573_v56, %s8274_s16  ;;  %v11442_v50 = vpop.permute.xlu1 %8093 }
 0x487   : > { %2807 = vrot.lane.b32.xlu0 %v891_v38, %s8276_s18  ;;  %v8095_v56 = vunpack.i.l.bf16 %v11442_v50  ;;  %v636_v38 = vld [vmem:[%s8364_s14 + $0x422] sm:$0xff] }
 0x488   : > { %v11445_v2 = vpop.permute.xlu2 %2161 }
 0x489   : > { %v2796_v53 = vpop.permute.xlu0 %2795  ;;  %v3063_v5 = vsel %vm2943_vm0, %v374_v12, %v8095_v56 }
 0x48a   : > { %v11450_v23 = vsel %vm3330_vm2, %v3320_v44, %v2796_v53  ;;  %v447_v44 = vld [vmem:[%s8364_s14 + $0x221] sm:$0xff]  ;;  %v509_v53 = vld [vmem:[%s8364_s14 + $0x429] sm:$0xff] }
 0x48b   : > { %15172 = vst [vmem:[#allocation301_spill] sm:$0xff] %v11450_v23  ;;  %7471 = vmatmul.msk.f32.gmra.mxu2 %vm3459_vm4, %v11450_v23  ;;  %v8127_v33 = vpack.i.bf16 %v447_v44, %v509_v53  ;;  %v637_v53 = vld [vmem:[%s8364_s14 + $0x42a] sm:$0xff] }
 0x48c   : > { %2171 = vrot.lane.b32.xlu1 %v701_v20, %s8273_s15  ;;  %v829_v20 = vld [vmem:[%s8364_s14 + $0x20c] sm:$0xff] }
 0x48e   : > { %2297 = vrot.lane.b32.xlu2 %v764_v43, %s8273_s15  ;;  %v2160_v47 = vpop.permute.xlu1 %2159 }
 0x48f   : > { %1785 = vrot.lane.b32.xlu0 %v636_v38, %s8274_s16 }
 0x490   : > { %v11467_v62 = vpop.permute.xlu2 %2799 }
 0x491   : > { %v1774_v46 = vpop.permute.xlu0 %1773 }
 0x492   : > { %v11470_v23 = vsel %vm3072_vm3, %v3063_v5, %v1774_v46  ;;  %v3321_v12 = vsel %vm3201_vm1, %v1774_v46, %v11386_v7  ;;  %v11487_v5 = vpop.f32.mrf.mxu2  ;;  %v11494_v46 = vpop.f32.mrf.mxu0 }
 0x493   : > { %15174 = vst [vmem:[#allocation303_spill] sm:$0xff] %v11470_v23  ;;  %4057 = vmatmul.f32.gmra.mxu3 %v11470_v23  ;;  %v574_v23 = vld [vmem:[%s8364_s14 + $0x212] sm:$0xff] }
 0x494   : > { %2809 = vrot.lane.b32.xlu1 %v892_v10, %s8276_s18  ;;  %15177 = vst [vmem:[#allocation306_spill] sm:$0xff] %v11487_v5  ;;  %v8100_v10 = vunpack.i.l.bf16 %v11412_v6 }
 0x496   : > { %8128 = vrot.lane.b32.xlu2 %v8127_v33, %s8275_s17  ;;  %v2798_v56 = vpop.permute.xlu1 %2797  ;;  %v3258_v33 = vsel %vm3201_vm1, %v11358_v59, %v2160_v47  ;;  %v8096_v59 = vunpack.i.h.bf16 %v11442_v50  ;;  %v312_v47 = vld [vmem:[%s8364_s14 + $0x1e0] sm:$0xff] }
 0x497   : > { %2683 = vrot.lane.b32.xlu0 %v829_v20, %s8276_s18  ;;  %v11483_v43 = vsel %vm3330_vm2, %v3321_v12, %v2798_v56  ;;  %v375_v20 = vld [vmem:[%s8364_s14 + $0x3f8] sm:$0xff]  ;;  %v11501_v12 = vpop.f32.mrf.mxu1 }
 0x498   : > { %15176 = vst [vmem:[#allocation305_spill] sm:$0xff] %v11483_v43  ;;  %v11485_v38 = vpop.permute.xlu2 %1777  ;;  %7472 = vmatmul.msk.f32.gmra.mxu2 %vm3459_vm4, %v11483_v43  ;;  %v702_v56 = vld [vmem:[%s8364_s14 + $0x213] sm:$0xff]  ;;  %v3064_v43 = vsel %vm2943_vm0, %v375_v20, %v8100_v10 }
 0x499   : > { %v2672_v7 = vpop.permute.xlu0 %2671  ;;  %15179 = vst [vmem:[#allocation308_spill] sm:$0xff] %v11501_v12  ;;  %v3647_v10 = vld [vmem:[%s14376_s1 + $0x1d8] sm:$0xff] }
 0x49a   : > { %v11497_v44 = vsel %vm3330_vm2, %v3258_v33, %v2672_v7  ;;  %v3598_v33 = vld [vmem:[%s14376_s1 + $0x50] sm:$0xff]  ;;  %5701 = vmatpush.msrb.mxu1 %v3647_v10 }
 0x49b   : > { %15178 = vst [vmem:[#allocation307_spill] sm:$0xff] %v11497_v44  ;;  %7409 = vmatmul.msk.f32.gmra.mxu1 %vm3459_vm4, %v11497_v44  ;;  %v3646_v7 = vld [vmem:[%s14376_s1 + $0x1d0] sm:$0xff]  ;;  %v3599_v44 = vld [vmem:[%s14376_s1 + $0x58] sm:$0xff]  ;;  %4498 = vmatpush.msrb.mxu2 %v3598_v33  ;;  %v11534_v33 = vpop.f32.mrf.mxu0 }
 0x49c   : > { %1787 = vrot.lane.b32.xlu1 %v637_v53, %s8274_s16  ;;  %4899 = vmatpush.msrb.mxu3 %v3646_v7  ;;  %15182 = vst [vmem:[#allocation311_spill] sm:$0xff] %v11534_v33  ;;  %v765_v7 = vld [vmem:[%s8364_s14 + $0x42b] sm:$0xff]  ;;  %v11567_v33 = vpop.f32.mrf.mxu2 }
 0x49d   : > { %5300 = vmatpush.msrb.mxu0 %v3599_v44  ;;  %v893_v44 = vld [vmem:[%s8364_s14 + $0x42c] sm:$0xff]  ;;  %15186 = vst [vmem:[#allocation315_spill] sm:$0xff] %v11567_v33 }
 0x49e   : > { %2173 = vrot.lane.b32.xlu2 %v702_v56, %s8273_s15  ;;  %v1776_v50 = vpop.permute.xlu1 %1775  ;;  %v11530_v56 = vpop.f32.mrf.mxu3  ;;  %v314_v33 = vld [vmem:[%s8364_s14 + $0x1f0] sm:$0xff] }
 0x49f   : > { %1661 = vrot.lane.b32.xlu0 %v574_v23, %s8274_s16  ;;  %v11526_v53 = vsel %vm3072_vm3, %v3064_v43, %v1776_v50  ;;  %15181 = vst [vmem:[#allocation310_spill] sm:$0xff] %v11530_v56  ;;  %v3001_v23 = vsel %vm2943_vm0, %v312_v47, %v8096_v59  ;;  %v830_v43 = vld [vmem:[%s8364_s14 + $0x214] sm:$0xff]  ;;  %v11555_v56 = vpop.f32.mrf.mxu1 }
 0x4a0   : > { %15180 = vst [vmem:[#allocation309_spill] sm:$0xff] %v11526_v53  ;;  %v11528_v20 = vpop.permute.xlu2 %2675  ;;  %4060 = vmatmul.f32.gmra.mxu3 %v11526_v53  ;;  %v510_v53 = vld [vmem:[%s8364_s14 + $0x431] sm:$0xff] }
 0x4a1   : > { %v1650_v5 = vpop.permute.xlu0 %1649 }
 0x4a2   : > { %v11537_v63 = vsel %vm3072_vm3, %v3001_v23, %v1650_v5  ;;  %v3259_v59 = vsel %vm3201_vm1, %v1650_v5, %v11445_v2  ;;  %v448_v23 = vld [vmem:[%s8364_s14 + $0x229] sm:$0xff]  ;;  %v8101_v5 = vunpack.i.h.bf16 %v11412_v6 }
 0x4a3   : > { %15183 = vst [vmem:[#allocation312_spill] sm:$0xff] %v11537_v63  ;;  %3871 = vmatmul.f32.gmra.mxu0 %v11537_v63  ;;  %v575_v2 = vld [vmem:[%s8364_s14 + $0x222] sm:$0xff]  ;;  %v11569_v12 = vpop.f32.mrf.mxu0 }
 0x4a4   : > { %2685 = vrot.lane.b32.xlu1 %v830_v43, %s8276_s18  ;;  %15187 = vst [vmem:[#allocation316_spill] sm:$0xff] %v11569_v12 }
 0x4a6   : > { %2811 = vrot.lane.b32.xlu2 %v893_v44, %s8276_s18  ;;  %v2674_v47 = vpop.permute.xlu1 %2673 }
 0x4a7   : > { %2299 = vrot.lane.b32.xlu0 %v765_v7, %s8273_s15  ;;  %v11549_v10 = vsel %vm3330_vm2, %v3259_v59, %v2674_v47  ;;  %v8132_v59 = vpack.i.bf16 %v448_v23, %v510_v53  ;;  %v638_v47 = vld [vmem:[%s8364_s14 + $0x432] sm:$0xff] }
 0x4a8   : > { %15184 = vst [vmem:[#allocation313_spill] sm:$0xff] %v11549_v10  ;;  %v11553_v63 = vpop.permute.xlu2 %1653  ;;  %7410 = vmatmul.msk.f32.gmra.mxu1 %vm3459_vm4, %v11549_v10 }
 0x4a9   : > { %v2288_v43 = vpop.permute.xlu0 %2287 }
 0x4aa   : > { %v3322_v44 = vsel %vm3201_vm1, %v1776_v50, %v2288_v43  ;;  %v313_v50 = vld [vmem:[%s8364_s14 + $0x1e8] sm:$0xff]  ;;  %v376_v43 = vld [vmem:[%s8364_s14 + $0x400] sm:$0xff] }
 0x4ab   : > { %v11564_v7 = vsel %vm3330_vm2, %v3322_v44, %v11467_v62  ;;  %v3002_v62 = vsel %vm2943_vm0, %v313_v50, %v8101_v5  ;;  %v11588_v12 = vpop.f32.mrf.mxu0  ;;  %v703_v5 = vld [vmem:[%s8364_s14 + $0x223] sm:$0xff] }
 0x4ac   : > { %15185 = vst [vmem:[#allocation314_spill] sm:$0xff] %v11564_v7  ;;  %7473 = vmatmul.msk.f32.gmra.mxu2 %vm3459_vm4, %v11564_v7  ;;  %1663 = vrot.lane.b32.xlu1 %v575_v2, %s8274_s16  ;;  %v766_v2 = vld [vmem:[%s8364_s14 + $0x433] sm:$0xff] }
 0x4ad   : > { %15189 = vst [vmem:[#allocation318_spill] sm:$0xff] %v11588_v12  ;;  %v11642_v12 = vpop.f32.mrf.mxu2 }
 0x4ae   : > { %1789 = vrot.lane.b32.xlu2 %v638_v47, %s8274_s16  ;;  %v1652_v6 = vpop.permute.xlu1 %1651  ;;  %v831_v47 = vld [vmem:[%s8364_s14 + $0x224] sm:$0xff]  ;;  %15199 = vst [vmem:[#allocation328_spill] sm:$0xff] %v11642_v12 }
 0x4af   : > { %8133 = vrot.lane.b32.xlu0 %v8132_v59, %s8275_s17  ;;  %v11579_v53 = vsel %vm3072_vm3, %v3002_v62, %v1652_v6  ;;  %s8229_s17 = scalar_lea.hbm %s14381_s6, 16 }
 0x4b0   : > { %15188 = vst [vmem:[#allocation317_spill] sm:$0xff] %v11579_v53  ;;  %3874 = vmatmul.f32.gmra.mxu0 %v11579_v53  ;;  %v11583_v44 = vpop.permute.xlu2 %2291  ;;  %v11598_v53 = vpop.f32.mrf.mxu1 }
 0x4b1   : > { %v8104_v23 = vpop.permute.xlu0 %8103  ;;  %15191 = vst [vmem:[#allocation320_spill] sm:$0xff] %v11598_v53 }
 0x4b2   : > { %v8106_v7 = vunpack.i.h.bf16 %v8104_v23  ;;  %v8105_v10 = vunpack.i.l.bf16 %v8104_v23  ;;  %v11600_v23 = vpop.f32.mrf.mxu3 }
 0x4b3   : > { %15192 = vst [vmem:[#allocation321_spill] sm:$0xff] %v11600_v23 }
 0x4b4   : > { %v3065_v59 = vsel %vm2943_vm0, %v376_v43, %v8105_v10  ;;  %2301 = vrot.lane.b32.xlu1 %v766_v2, %s8273_s15  ;;  %v3003_v62 = vsel %vm2943_vm0, %v314_v33, %v8106_v7  ;;  %v576_v7 = vld [vmem:[%s8364_s14 + $0x22a] sm:$0xff] }
 0x4b5   : > { %v11595_v50 = vsel %vm3072_vm3, %v3065_v59, %v11485_v38  ;;  %v11607_v43 = vsel %vm3072_vm3, %v3003_v62, %v11553_v63  ;;  %v11624_v62 = vpop.f32.mrf.mxu0  ;;  %v11666_v53 = vpop.f32.mrf.mxu2 }
 0x4b6   : > { %15190 = vst [vmem:[#allocation319_spill] sm:$0xff] %v11595_v50  ;;  %4063 = vmatmul.f32.gmra.mxu3 %v11595_v50  ;;  %2687 = vrot.lane.b32.xlu2 %v831_v47, %s8276_s18  ;;  %v2290_v10 = vpop.permute.xlu1 %2289  ;;  %v3595_v47 = vld [vmem:[%s14376_s1 + $0x38] sm:$0xff] }
 0x4b7   : > { %2175 = vrot.lane.b32.xlu0 %v703_v5, %s8273_s15  ;;  %15193 = vst [vmem:[#allocation322_spill] sm:$0xff] %v11607_v43  ;;  %v3643_v5 = vld [vmem:[%s14376_s1 + $0x1b8] sm:$0xff]  ;;  %4499 = vmatpush.msrb.mxu2 %v3595_v47 }
 0x4b8   : > { %3877 = vmatmul.f32.gmra.mxu0 %v11607_v43  ;;  %v11616_v50 = vpop.permute.xlu2 %8113  ;;  %15195 = vst [vmem:[#allocation324_spill] sm:$0xff] %v11624_v62  ;;  %4900 = vmatpush.msrb.mxu3 %v3643_v5  ;;  %v832_v5 = vld [vmem:[%s8364_s14 + $0x22c] sm:$0xff] }
 0x4b9   : > { %v2164_v2 = vpop.permute.xlu0 %2163  ;;  %15204 = vst [vmem:[#allocation333_spill] sm:$0xff] %v11666_v53 }
 0x4ba   : > { %v3260_v33 = vsel %vm3201_vm1, %v1652_v6, %v2164_v2  ;;  %v894_v6 = vld [vmem:[%s8364_s14 + $0x434] sm:$0xff]  ;;  %v11631_v2 = vpop.f32.mrf.mxu1  ;;  %v11635_v43 = vpop.f32.mrf.mxu3 }
 0x4bb   : > { %v11614_v59 = vsel %vm3330_vm2, %v3260_v33, %v11528_v20  ;;  %v704_v20 = vld [vmem:[%s8364_s14 + $0x22b] sm:$0xff]  ;;  %15196 = vst [vmem:[#allocation325_spill] sm:$0xff] %v11631_v2 }
 0x4bc   : > { %15194 = vst [vmem:[#allocation323_spill] sm:$0xff] %v11614_v59  ;;  %7411 = vmatmul.msk.f32.gmra.mxu1 %vm3459_vm4, %v11614_v59  ;;  %1665 = vrot.lane.b32.xlu1 %v576_v7, %s8274_s16  ;;  %v3323_v59 = vsel %vm3201_vm1, %v11485_v38, %v2290_v10  ;;  %v3644_v38 = vld [vmem:[%s14376_s1 + $0x1c0] sm:$0xff] }
 0x4bd   : > { %15197 = vst [vmem:[#allocation326_spill] sm:$0xff] %v11635_v43  ;;  %5702 = vmatpush.msrb.mxu1 %v3644_v38 }
 0x4be   : > { %2177 = vrot.lane.b32.xlu2 %v704_v20, %s8273_s15  ;;  %v8109_v33 = vpop.permute.xlu1 %8108  ;;  %v377_v20 = vld [vmem:[%s8364_s14 + $0x408] sm:$0xff] }
 0x4bf   : > { %2813 = vrot.lane.b32.xlu0 %v894_v6, %s8276_s18  ;;  %v8110_v7 = vunpack.i.l.bf16 %v8109_v33  ;;  %v3596_v6 = vld [vmem:[%s14376_s1 + $0x40] sm:$0xff] }
 0x4c0   : > { %v2168_v2 = vpop.permute.xlu2 %2167  ;;  %5301 = vmatpush.msrb.mxu0 %v3596_v6 }
 0x4c1   : > { %v2802_v62 = vpop.permute.xlu0 %2801 }
 0x4c2   : > { %v11640_v47 = vsel %vm3330_vm2, %v3323_v59, %v2802_v62  ;;  %v11654_v10 = vpop.f32.mrf.mxu1  ;;  %v11656_v59 = vpop.f32.mrf.mxu0 }
 0x4c3   : > { %15198 = vst [vmem:[#allocation327_spill] sm:$0xff] %v11640_v47  ;;  %7474 = vmatmul.msk.f32.gmra.mxu2 %vm3459_vm4, %v11640_v47  ;;  %v3066_v47 = vsel %vm2943_vm0, %v377_v20, %v8110_v7  ;;  %v11660_v43 = vpop.f32.mrf.mxu3 }
 0x4c4   : > { %15200 = vst [vmem:[#allocation329_spill] sm:$0xff] %v11654_v10 }
 0x4c5   : > { %15201 = vst [vmem:[#allocation330_spill] sm:$0xff] %v11656_v59 }
 0x4c6   : > { %v2166_v62 = vpop.permute.xlu1 %2165  ;;  %15202 = vst [vmem:[#allocation331_spill] sm:$0xff] %v11660_v43  ;;  %v315_v43 = vld [vmem:[%s8364_s14 + $0x1f8] sm:$0xff] }
 0x4c7   : > { %2689 = vrot.lane.b32.xlu0 %v832_v5, %s8276_s18  ;;  %s247_s18 = scalar_lea.vmem [#allocation2], %s7350_s13 }
 0x4c8   : > { %v2806_v20 = vpop.permute.xlu2 %2805  ;;  %s7284_s26 = sshll.u32 %s247_s18, 4  ;;  %s7285_s26 = int_to_ptr.vmem [resolvable:$true] %s7284_s26 }
 0x4c9   : > { %v1780_v12 = vpop.permute.xlu0 %1779 }
 0x4ca   : > { %v11663_v23 = vsel %vm3072_vm3, %v3066_v47, %v1780_v12  ;;  %v11668_v10 = vpop.f32.mrf.mxu1  ;;  %v11670_v6 = vpop.f32.mrf.mxu0  ;;  %v3324_v5 = vsel %vm3201_vm1, %v1780_v12, %v11583_v44  ;;  %v8115_v47 = vunpack.i.l.bf16 %v11616_v50  ;;  %v378_v12 = vld [vmem:[%s8364_s14 + $0x410] sm:$0xff]  ;;  %v8111_v44 = vunpack.i.h.bf16 %v8109_v33 }
 0x4cb   : > { %15203 = vst [vmem:[#allocation332_spill] sm:$0xff] %v11663_v23  ;;  %4066 = vmatmul.f32.gmra.mxu3 %v11663_v23  ;;  %v11674_v38 = vpop.f32.mrf.mxu3  ;;  %v3261_v23 = vsel %vm3201_vm1, %v11553_v63, %v2166_v62 }
 0x4cc   : > { %15205 = vst [vmem:[#allocation334_spill] sm:$0xff] %v11668_v10  ;;  %v3004_v53 = vsel %vm2943_vm0, %v315_v43, %v8111_v44 }
 0x4cd   : > { %15206 = vst [vmem:[#allocation335_spill] sm:$0xff] %v11670_v6 }
 0x4ce   : > { %v2804_v7 = vpop.permute.xlu1 %2803  ;;  %15207 = vst [vmem:[#allocation336_spill] sm:$0xff] %v11674_v38 }
 0x4cf   : > { %v11677_v59 = vsel %vm3330_vm2, %v3324_v5, %v2804_v7  ;;  %v3067_v5 = vsel %vm2943_vm0, %v378_v12, %v8115_v47  ;;  %v11691_v7 = vpop.f32.mrf.mxu2  ;;  %v3592_v47 = vld [vmem:[%s14376_s1 + $0x20] sm:$0xff] }
 0x4d0   : > { %15208 = vst [vmem:[#allocation337_spill] sm:$0xff] %v11677_v59  ;;  %7475 = vmatmul.msk.f32.gmra.mxu2 %vm3459_vm4, %v11677_v59  ;;  %v3640_v12 = vld [vmem:[%s14376_s1 + $0x1a0] sm:$0xff] }
 0x4d1   : > { %v2678_v6 = vpop.permute.xlu0 %2677  ;;  %4500 = vmatpush.msrb.mxu2 %v3592_v47  ;;  %4901 = vmatpush.msrb.mxu3 %v3640_v12  ;;  %v3641_v47 = vld [vmem:[%s14376_s1 + $0x1a8] sm:$0xff] }
 0x4d2   : > { %v11685_v10 = vsel %vm3330_vm2, %v3261_v23, %v2678_v6  ;;  %v11693_v38 = vpop.f32.mrf.mxu0  ;;  %v11696_v63 = vpop.f32.mrf.mxu1  ;;  %5703 = vmatpush.msrb.mxu1 %v3641_v47 }
 0x4d3   : > { %15209 = vst [vmem:[#allocation338_spill] sm:$0xff] %v11685_v10  ;;  %7412 = vmatmul.msk.f32.gmra.mxu1 %vm3459_vm4, %v11685_v10  ;;  %v11698_v59 = vpop.f32.mrf.mxu3  ;;  %v1784_v10 = vpop.permute.xlu2 %1783 }
 0x4d4   : > { %15210 = vst [vmem:[#allocation339_spill] sm:$0xff] %v11693_v38  ;;  %v3593_v38 = vld [vmem:[%s14376_s1 + $0x28] sm:$0xff] }
 0x4d5   : > { %15211 = vst [vmem:[#allocation340_spill] sm:$0xff] %v11696_v63  ;;  %5302 = vmatpush.msrb.mxu0 %v3593_v38  ;;  %v317_v63 = vld [vmem:[%s8364_s14 + $0x208] sm:$0xff] }
 0x4d6   : > { %v1782_v62 = vpop.permute.xlu1 %1781  ;;  %15212 = vst [vmem:[#allocation341_spill] sm:$0xff] %v11698_v59 }
 0x4d7   : > { %v11701_v23 = vsel %vm3072_vm3, %v3067_v5, %v1782_v62  ;;  %v11715_v5 = vpop.f32.mrf.mxu2 }
 0x4d8   : > { %15213 = vst [vmem:[#allocation342_spill] sm:$0xff] %v11701_v23  ;;  %4069 = vmatmul.f32.gmra.mxu3 %v11701_v23 }
 0x4d9   : > { %v1656_v6 = vpop.permute.xlu0 %1655  ;;  %15215 = vst [vmem:[#allocation344_spill] sm:$0xff] %v11715_v5 }
 0x4da   : > { %v11706_v33 = vsel %vm3072_vm3, %v3004_v53, %v1656_v6  ;;  %v11717_v43 = vpop.f32.mrf.mxu1  ;;  %v3262_v44 = vsel %vm3201_vm1, %v1656_v6, %v2168_v2  ;;  %v11720_v23 = vpop.f32.mrf.mxu0 }
 0x4db   : > { %15214 = vst [vmem:[#allocation343_spill] sm:$0xff] %v11706_v33  ;;  %3880 = vmatmul.f32.gmra.mxu0 %v11706_v33  ;;  %v11731_v12 = vpop.f32.mrf.mxu3 }
 0x4dc   : > { %15216 = vst [vmem:[#allocation345_spill] sm:$0xff] %v11717_v43 }
 0x4dd   : > { %15217 = vst [vmem:[#allocation346_spill] sm:$0xff] %v11720_v23 }
 0x4de   : > { %v2680_v53 = vpop.permute.xlu1 %2679  ;;  %15219 = vst [vmem:[#allocation348_spill] sm:$0xff] %v11731_v12  ;;  %v316_v12 = vld [vmem:[%s8364_s14 + $0x200] sm:$0xff] }
 0x4df   : > { %v11723_v33 = vsel %vm3330_vm2, %v3262_v44, %v2680_v53  ;;  %v8116_v44 = vunpack.i.h.bf16 %v11616_v50  ;;  %v2682_v53 = vpop.permute.xlu2 %2681  ;;  %v11743_v43 = vpop.f32.mrf.mxu2 }
 0x4e0   : > { %15218 = vst [vmem:[#allocation347_spill] sm:$0xff] %v11723_v33  ;;  %7413 = vmatmul.msk.f32.gmra.mxu1 %vm3459_vm4, %v11723_v33 }
 0x4e1   : > { %v2294_v2 = vpop.permute.xlu0 %2293  ;;  %15221 = vst [vmem:[#allocation350_spill] sm:$0xff] %v11743_v43 }
 0x4e2   : > { %v3325_v6 = vsel %vm3201_vm1, %v1782_v62, %v2294_v2  ;;  %v11745_v33 = vpop.f32.mrf.mxu1  ;;  %v3005_v62 = vsel %vm2943_vm0, %v316_v12, %v8116_v44  ;;  %v11748_v2 = vpop.f32.mrf.mxu0 }
 0x4e3   : > { %v11738_v23 = vsel %vm3330_vm2, %v3325_v6, %v2806_v20  ;;  %15222 = vst [vmem:[#allocation351_spill] sm:$0xff] %v11745_v33  ;;  %v11753_v47 = vpop.f32.mrf.mxu3  ;;  %v379_v6 = vld [vmem:[%s8364_s14 + $0x418] sm:$0xff] }
 0x4e4   : > { %15220 = vst [vmem:[#allocation349_spill] sm:$0xff] %v11738_v23  ;;  %7476 = vmatmul.msk.f32.gmra.mxu2 %vm3459_vm4, %v11738_v23 }
 0x4e5   : > { %15223 = vst [vmem:[#allocation352_spill] sm:$0xff] %v11748_v2 }
 0x4e6   : > { %v1658_v38 = vpop.permute.xlu1 %1657  ;;  %15225 = vst [vmem:[#allocation354_spill] sm:$0xff] %v11753_v47 }
 0x4e7   : > { %v11751_v50 = vsel %vm3072_vm3, %v3005_v62, %v1658_v38  ;;  %v1660_v33 = vpop.permute.xlu2 %1659  ;;  %v11763_v44 = vpop.f32.mrf.mxu2 }
 0x4e8   : > { %15224 = vst [vmem:[#allocation353_spill] sm:$0xff] %v11751_v50  ;;  %3883 = vmatmul.f32.gmra.mxu0 %v11751_v50 }
 0x4e9   : > { %v8119_v20 = vpop.permute.xlu0 %8118  ;;  %15227 = vst [vmem:[#allocation356_spill] sm:$0xff] %v11763_v44 }
 0x4ea   : > { %v8121_v23 = vunpack.i.h.bf16 %v8119_v20  ;;  %v8120_v59 = vunpack.i.l.bf16 %v8119_v20  ;;  %v11766_v62 = vpop.f32.mrf.mxu1  ;;  %v11768_v50 = vpop.f32.mrf.mxu0 }
 0x4eb   : > { %15228 = vst [vmem:[#allocation357_spill] sm:$0xff] %v11766_v62  ;;  %v11773_v47 = vpop.f32.mrf.mxu3 }
 0x4ec   : > { %v3068_v43 = vsel %vm2943_vm0, %v379_v6, %v8120_v59  ;;  %v3006_v12 = vsel %vm2943_vm0, %v317_v63, %v8121_v23  ;;  %15229 = vst [vmem:[#allocation358_spill] sm:$0xff] %v11768_v50 }
 0x4ed   : > { %v11760_v5 = vsel %vm3072_vm3, %v3068_v43, %v1784_v10  ;;  %v11771_v20 = vsel %vm3072_vm3, %v3006_v12, %v1660_v33  ;;  %15231 = vst [vmem:[#allocation360_spill] sm:$0xff] %v11773_v47 }
 0x4ee   : > { %15226 = vst [vmem:[#allocation355_spill] sm:$0xff] %v11760_v5  ;;  %4072 = vmatmul.f32.gmra.mxu3 %v11760_v5  ;;  %v2296_v2 = vpop.permute.xlu1 %2295 }
 0x4ef   : > { %15230 = vst [vmem:[#allocation359_spill] sm:$0xff] %v11771_v20  ;;  %v11782_v43 = vpop.f32.mrf.mxu2  ;;  %v2298_v6 = vpop.permute.xlu2 %2297  ;;  %v3326_v47 = vsel %vm3201_vm1, %v1784_v10, %v2296_v2 }
 0x4f0   : > { %3886 = vmatmul.f32.gmra.mxu0 %v11771_v20  ;;  %15233 = vst [vmem:[#allocation362_spill] sm:$0xff] %v11782_v43 }
 0x4f1   : > { %v2170_v59 = vpop.permute.xlu0 %2169 }
 0x4f2   : > { %v3263_v63 = vsel %vm3201_vm1, %v1658_v38, %v2170_v59  ;;  %v11784_v5 = vpop.f32.mrf.mxu1  ;;  %v11789_v20 = vpop.f32.mrf.mxu0  ;;  %v380_v59 = vld [vmem:[%s8364_s14 + $0x420] sm:$0xff] }
 0x4f3   : > { %v11778_v23 = vsel %vm3330_vm2, %v3263_v63, %v2682_v53  ;;  %15234 = vst [vmem:[#allocation363_spill] sm:$0xff] %v11784_v5  ;;  %v11786_v50 = vpop.f32.mrf.mxu3 }
 0x4f4   : > { %15232 = vst [vmem:[#allocation361_spill] sm:$0xff] %v11778_v23  ;;  %7414 = vmatmul.msk.f32.gmra.mxu1 %vm3459_vm4, %v11778_v23 }
 0x4f5   : > { %15235 = vst [vmem:[#allocation364_spill] sm:$0xff] %v11786_v50 }
 0x4f6   : > { %v8124_v12 = vpop.permute.xlu1 %8123  ;;  %15236 = vst [vmem:[#allocation365_spill] sm:$0xff] %v11789_v20 }
 0x4f7   : > { %v8125_v53 = vunpack.i.l.bf16 %v8124_v12  ;;  %v11797_v63 = vpop.f32.mrf.mxu2  ;;  %v11802_v43 = vpop.permute.xlu2 %8128 }
 0x4f8   : > { %15238 = vst [vmem:[#allocation367_spill] sm:$0xff] %v11797_v63 }
 0x4f9   : > { %v2808_v62 = vpop.permute.xlu0 %2807  ;;  %v3069_v50 = vsel %vm2943_vm0, %v380_v59, %v8125_v53  ;;  %v3590_v53 = vld [vmem:[%s14376_s1 + $0x10] sm:$0xff] }
 0x4fa   : > { %v11792_v38 = vsel %vm3330_vm2, %v3326_v47, %v2808_v62  ;;  %v11799_v23 = vpop.f32.mrf.mxu1  ;;  %v3589_v47 = vld [vmem:[%s14376_s1 + $0x8] sm:$0xff]  ;;  %v3638_v59 = vld [vmem:[%s14376_s1 + $0x190] sm:$0xff]  ;;  %5303 = vmatpush.msrb.mxu0 %v3590_v53 }
 0x4fb   : > { %15237 = vst [vmem:[#allocation366_spill] sm:$0xff] %v11792_v38  ;;  %7477 = vmatmul.msk.f32.gmra.mxu2 %vm3459_vm4, %v11792_v38  ;;  %v11804_v10 = vpop.f32.mrf.mxu3  ;;  %v3637_v62 = vld [vmem:[%s14376_s1 + $0x188] sm:$0xff]  ;;  %v11812_v38 = vpop.f32.mrf.mxu0  ;;  %5704 = vmatpush.msrb.mxu1 %v3638_v59 }
 0x4fc   : > { %15239 = vst [vmem:[#allocation368_spill] sm:$0xff] %v11799_v23  ;;  %4501 = vmatpush.msrb.mxu2 %v3589_v47  ;;  %4902 = vmatpush.msrb.mxu3 %v3637_v62 }
 0x4fd   : > { %15240 = vst [vmem:[#allocation369_spill] sm:$0xff] %v11804_v10 }
 0x4fe   : > { %v2172_v5 = vpop.permute.xlu1 %2171  ;;  %15241 = vst [vmem:[#allocation370_spill] sm:$0xff] %v11812_v38 }
 0x4ff   : > { %v11824_v10 = vpop.f32.mrf.mxu2  ;;  %v3264_v63 = vsel %vm3201_vm1, %v1660_v33, %v2172_v5  ;;  %v318_v5 = vld [vmem:[%s8364_s14 + $0x210] sm:$0xff] }
 0x500   : > { %15243 = vst [vmem:[#allocation372_spill] sm:$0xff] %v11824_v10 }
 0x501   : > { %v1786_v2 = vpop.permute.xlu0 %1785 }
 0x502   : > { %v11815_v20 = vsel %vm3072_vm3, %v3069_v50, %v1786_v2  ;;  %v11826_v38 = vpop.f32.mrf.mxu1  ;;  %v3327_v50 = vsel %vm3201_vm1, %v1786_v2, %v2298_v6  ;;  %v2174_v6 = vpop.permute.xlu2 %2173  ;;  %v381_v2 = vld [vmem:[%s8364_s14 + $0x428] sm:$0xff] }
 0x503   : > { %15242 = vst [vmem:[#allocation371_spill] sm:$0xff] %v11815_v20  ;;  %4075 = vmatmul.f32.gmra.mxu3 %v11815_v20  ;;  %v11832_v23 = vpop.f32.mrf.mxu3  ;;  %v8130_v20 = vunpack.i.l.bf16 %v11802_v43  ;;  %v11838_v59 = vpop.f32.mrf.mxu0 }
 0x504   : > { %15244 = vst [vmem:[#allocation373_spill] sm:$0xff] %v11826_v38 }
 0x505   : > { %15246 = vst [vmem:[#allocation375_spill] sm:$0xff] %v11832_v23 }
 0x506   : > { %v2810_v47 = vpop.permute.xlu1 %2809  ;;  %15247 = vst [vmem:[#allocation376_spill] sm:$0xff] %v11838_v59 }
 0x507   : > { %v11830_v62 = vsel %vm3330_vm2, %v3327_v50, %v2810_v47  ;;  %v8126_v50 = vunpack.i.h.bf16 %v8124_v12  ;;  %v3070_v47 = vsel %vm2943_vm0, %v381_v2, %v8130_v20  ;;  %v11847_v33 = vpop.f32.mrf.mxu2 }
 0x508   : > { %15245 = vst [vmem:[#allocation374_spill] sm:$0xff] %v11830_v62  ;;  %7478 = vmatmul.msk.f32.gmra.mxu2 %vm3459_vm4, %v11830_v62 }
 0x509   : > { %v2684_v53 = vpop.permute.xlu0 %2683  ;;  %15249 = vst [vmem:[#allocation378_spill] sm:$0xff] %v11847_v33 }
 0x50a   : > { %v11841_v38 = vsel %vm3330_vm2, %v3264_v63, %v2684_v53  ;;  %v11850_v23 = vpop.f32.mrf.mxu1  ;;  %v3007_v53 = vsel %vm2943_vm0, %v318_v5, %v8126_v50  ;;  %v2812_v2 = vpop.permute.xlu2 %2811 }
 0x50b   : > { %15248 = vst [vmem:[#allocation377_spill] sm:$0xff] %v11841_v38  ;;  %7415 = vmatmul.msk.f32.gmra.mxu1 %vm3459_vm4, %v11841_v38  ;;  %v11855_v59 = vpop.f32.mrf.mxu3  ;;  %v11863_v20 = vpop.f32.mrf.mxu0 }
 0x50c   : > { %15250 = vst [vmem:[#allocation379_spill] sm:$0xff] %v11850_v23 }
 0x50d   : > { %15252 = vst [vmem:[#allocation381_spill] sm:$0xff] %v11855_v59 }
 0x50e   : > { %v1788_v62 = vpop.permute.xlu1 %1787  ;;  %15254 = vst [vmem:[#allocation383_spill] sm:$0xff] %v11863_v20 }
 0x50f   : > { %v11853_v10 = vsel %vm3072_vm3, %v3070_v47, %v1788_v62  ;;  %v11865_v38 = vpop.f32.mrf.mxu2 }
 0x510   : > { %15251 = vst [vmem:[#allocation380_spill] sm:$0xff] %v11853_v10  ;;  %4078 = vmatmul.f32.gmra.mxu3 %v11853_v10 }
 0x511   : > { %v1662_v63 = vpop.permute.xlu0 %1661  ;;  %15255 = vst [vmem:[#allocation384_spill] sm:$0xff] %v11865_v38 }
 0x512   : > { %v11860_v12 = vsel %vm3072_vm3, %v3007_v53, %v1662_v63  ;;  %v11867_v47 = vpop.f32.mrf.mxu1  ;;  %v3265_v59 = vsel %vm3201_vm1, %v1662_v63, %v2174_v6  ;;  %v1790_v6 = vpop.permute.xlu2 %1789 }
 0x513   : > { %15253 = vst [vmem:[#allocation382_spill] sm:$0xff] %v11860_v12  ;;  %3889 = vmatmul.f32.gmra.mxu0 %v11860_v12  ;;  %v11873_v5 = vpop.f32.mrf.mxu3  ;;  %v8131_v12 = vunpack.i.h.bf16 %v11802_v43 }
 0x514   : > { %15256 = vst [vmem:[#allocation385_spill] sm:$0xff] %v11867_v47  ;;  %v11882_v47 = vpop.f32.mrf.mxu0 }
 0x515   : > { %15258 = vst [vmem:[#allocation387_spill] sm:$0xff] %v11873_v5 }
 0x516   : > { %v2686_v23 = vpop.permute.xlu1 %2685  ;;  %15260 = vst [vmem:[#allocation389_spill] sm:$0xff] %v11882_v47 }
 0x517   : > { %v11871_v50 = vsel %vm3330_vm2, %v3265_v59, %v2686_v23  ;;  %v319_v23 = vld [vmem:[%s8364_s14 + $0x220] sm:$0xff]  ;;  %v11887_v59 = vpop.f32.mrf.mxu2 }
 0x518   : > { %15257 = vst [vmem:[#allocation386_spill] sm:$0xff] %v11871_v50  ;;  %7416 = vmatmul.msk.f32.gmra.mxu1 %vm3459_vm4, %v11871_v50  ;;  %v3008_v5 = vsel %vm2943_vm0, %v319_v23, %v8131_v12 }
 0x519   : > { %v2300_v53 = vpop.permute.xlu0 %2299  ;;  %15261 = vst [vmem:[#allocation390_spill] sm:$0xff] %v11887_v59 }
 0x51a   : > { %v3328_v10 = vsel %vm3201_vm1, %v1788_v62, %v2300_v53  ;;  %v11889_v63 = vpop.f32.mrf.mxu1  ;;  %v2688_v23 = vpop.permute.xlu2 %2687 }
 0x51b   : > { %v11880_v20 = vsel %vm3330_vm2, %v3328_v10, %v2812_v2  ;;  %15262 = vst [vmem:[#allocation391_spill] sm:$0xff] %v11889_v63  ;;  %v11895_v43 = vpop.f32.mrf.mxu3  ;;  %v382_v2 = vld [vmem:[%s8364_s14 + $0x430] sm:$0xff] }
 0x51c   : > { %15259 = vst [vmem:[#allocation388_spill] sm:$0xff] %v11880_v20  ;;  %7479 = vmatmul.msk.f32.gmra.mxu2 %vm3459_vm4, %v11880_v20  ;;  %v11899_v20 = vpop.f32.mrf.mxu0 }
 0x51d   : > { %15264 = vst [vmem:[#allocation393_spill] sm:$0xff] %v11895_v43 }
 0x51e   : > { %v1664_v50 = vpop.permute.xlu1 %1663 }
 0x51f   : > { %v11893_v62 = vsel %vm3072_vm3, %v3008_v5, %v1664_v50  ;;  %v11905_v38 = vpop.f32.mrf.mxu2 }
 0x520   : > { %15263 = vst [vmem:[#allocation392_spill] sm:$0xff] %v11893_v62  ;;  %3892 = vmatmul.f32.gmra.mxu0 %v11893_v62 }
 0x521   : > { %v8134_v10 = vpop.permute.xlu0 %8133  ;;  %15266 = vst [vmem:[#allocation395_spill] sm:$0xff] %v11905_v38 }
 0x522   : > { %v8135_v53 = vunpack.i.l.bf16 %v8134_v10  ;;  %v11908_v12 = vpop.f32.mrf.mxu1  ;;  %v8136_v47 = vunpack.i.h.bf16 %v8134_v10 }
 0x523   : > { %v11910_v43 = vpop.f32.mrf.mxu3 }
 0x524   : > { %v3071_v59 = vsel %vm2943_vm0, %v382_v2, %v8135_v53  ;;  %15267 = vst [vmem:[#allocation396_spill] sm:$0xff] %v11910_v43  ;;  %v11921_v53 = vpop.f32.mrf.mxu0 }
 0x525   : > { %v11903_v63 = vsel %vm3072_vm3, %v3071_v59, %v1790_v6  ;;  %v320_v59 = vld [vmem:[%s8364_s14 + $0x228] sm:$0xff]  ;;  %s7286_s14 = sshll.u32 %s7282_s25, 4  ;;  %s7287_s14 = int_to_ptr.hbm [resolvable:$true] %s7286_s14 }
 0x526   : > { %15265 = vst [vmem:[#allocation394_spill] sm:$0xff] %v11903_v63  ;;  %4081 = vmatmul.f32.gmra.mxu3 %v11903_v63  ;;  %v2302_v5 = vpop.permute.xlu1 %2301  ;;  %s8223_s29 = sshra.s32 %s7287_s14, 4  ;;  %s8224_s29 = int_to_ptr.hbm [resolvable:$true] %s8223_s29 }
 0x527   : > { %v11919_v2 = vpop.f32.mrf.mxu2  ;;  %v3329_v10 = vsel %vm3201_vm1, %v1790_v6, %v2302_v5  ;;  %s8225_s10 = scalar_lea.hbm %s8224_s29, 8  ;;  %p8230_p0 = scmp.lt.s32.totalorder %s8224_s29, %s14381_s6 }
 0x528   : > { %15269 = vst [vmem:[#allocation398_spill] sm:$0xff] %v11919_v2  ;;  %v2178_v2 = vpop.permute.xlu2 %2177  ;;  %p8226_p11 = scmp.ne.s32.totalorder %s8224_s29, %s8225_s10  ;;  %p8231_p1 = scmp.lt.s32.totalorder %s8229_s17, %s8225_s10 }
 0x529   : > { %v2176_v62 = vpop.permute.xlu0 %2175 }
 0x52a   : > { %v3266_v33 = vsel %vm3201_vm1, %v1664_v50, %v2176_v62  ;;  %v11925_v63 = vpop.f32.mrf.mxu1  ;;  %v3009_v50 = vsel %vm2943_vm0, %v320_v59, %v8136_v47  ;;  %p8227_p12 = pnand %p8226_p11, %p8347_p5  ;;  %p8232_p2 = por %p8231_p1, %p8230_p0 }
 0x52b   : > { %v11914_v44 = vsel %vm3330_vm2, %v3266_v33, %v2688_v23  ;;  %v11931_v33 = vpop.f32.mrf.mxu3 }
 0x52c   : > { %15268 = vst [vmem:[#allocation397_spill] sm:$0xff] %v11914_v44  ;;  %7417 = vmatmul.msk.f32.gmra.mxu1 %vm3459_vm4, %v11914_v44  ;;  %v11942_v47 = vpop.f32.mrf.mxu0  ;;  %p8228_p13 = pneg %p8227_p12 }
 0x52d   : > { %15271 = vst [vmem:[#allocation400_spill] sm:$0xff] %v11931_v33 }
 0x52e   : > { %7481 = vmatmul.msk.f32.vlgmr.msrb.gmra.mxu3 %vm3459_vm4, %v8583_v48  ;;  %v1666_v43 = vpop.permute.xlu1 %1665  ;;  %p8233_p3 = pnand %p8232_p2, %p8228_p13 }
 0x52f   : > { %v11929_v62 = vsel %vm3072_vm3, %v3009_v50, %v1666_v43  ;;  %v11940_v38 = vpop.f32.mrf.mxu2  ;;  %v3267_v6 = vsel %vm3201_vm1, %v1666_v43, %v2178_v2 }
 0x530   : > { %15270 = vst [vmem:[#allocation399_spill] sm:$0xff] %v11929_v62  ;;  %3895 = vmatmul.f32.gmra.mxu0 %v11929_v62 }
 0x531   : > { %v2814_v23 = vpop.permute.xlu0 %2813  ;;  %15273 = vst [vmem:[#allocation402_spill] sm:$0xff] %v11940_v38  ;;  %v4109_v38 = vadd.f32 %v9681_v52, %v9619_v9 }
 0x532   : > { %v11936_v44 = vsel %vm3330_vm2, %v3329_v10, %v2814_v23  ;;  %v11946_v59 = vpop.f32.mrf.mxu1 }
 0x533   : > { %15272 = vst [vmem:[#allocation401_spill] sm:$0xff] %v11936_v44  ;;  %7480 = vmatmul.msk.f32.gmra.mxu2 %vm3459_vm4, %v11936_v44  ;;  %v11949_v5 = vpop.f32.mrf.mxu3 }
 0x534   : > { %15274 = vst [vmem:[#allocation403_spill] sm:$0xff] %v11949_v5  ;;  %v11960_v44 = vpop.f32.mrf.mxu0  ;;  %v15328_v5 = vld [vmem:[#allocation230_spill] sm:$0xff] }
 0x536   : > { %7482 = vmatmul.msk.f32.gmra.mxu3 %vm3459_vm4, %v8603_v61 }
 0x537   : > { %v11958_v23 = vpop.f32.mrf.mxu2 }
 0x538   : > { %5304 = vmatmul.f32.vlgmr.msrb.gmra.mxu0 %v8578_v45  ;;  %15276 = vst [vmem:[#allocation405_spill] sm:$0xff] %v11958_v23  ;;  %v15326_v23 = vld [vmem:[#allocation135_spill] sm:$0xff] }
 0x539   : > { %v2690_v50 = vpop.permute.xlu0 %2689 }
 0x53a   : > { %v11953_v10 = vsel %vm3330_vm2, %v3267_v6, %v2690_v50  ;;  %v11964_v43 = vpop.f32.mrf.mxu1 }
 0x53b   : > { %15275 = vst [vmem:[#allocation404_spill] sm:$0xff] %v11953_v10  ;;  %7418 = vmatmul.msk.f32.gmra.mxu1 %vm3459_vm4, %v11953_v10  ;;  %4502 = vmatmul.f32.vlgmr.msrb.gmra.mxu2 %v8578_v45  ;;  %v11966_v2 = vpop.f32.mrf.mxu3  ;;  %v4103_v10 = vadd.f32 %v9570_v13, %v9554_v27  ;;  %v4112_v27 = vadd.f32 %v9722_v26, %v9705_v34  ;;  %v12033_v26 = vld [vmem:[%s14377_s2 + $0x60] sm:$0xff] }
 0x53c   : > { %15277 = vst [vmem:[#allocation406_spill] sm:$0xff] %v11966_v2  ;;  %v11978_v50 = vpop.f32.mrf.mxu0  ;;  %v4304_v34 = vadd.f32 %v9800_v51, %v9762_v1  ;;  %v4121_v51 = vadd.f32 %v9884_v14, %v9867_v58  ;;  %v4310_v14 = vadd.f32 %v9895_v24, %v9859_v39  ;;  %v4127_v39 = vadd.f32 %v10005_v57, %v9937_v25 }
 0x53d   : > { %v4130_v25 = vadd.f32 %v10046_v21, %v10029_v16  ;;  %v15290_v21 = vld [vmem:[#allocation125_spill] sm:$0xff] }
 0x53e   : > { %7483 = vmatmul.msk.f32.gmra.mxu3 %vm3459_vm4, %v8628_v11 }
 0x53f   : > { %v11972_v6 = vpop.f32.mrf.mxu2 }
 0x540   : > { %5307 = vmatmul.f32.gmra.mxu0 %v8600_v60  ;;  %15278 = vst [vmem:[#allocation407_spill] sm:$0xff] %v11972_v6 }
 0x542   : > { %v11976_v45 = vpop.f32.mrf.mxu1 }
 0x543   : > { %4505 = vmatmul.f32.gmra.mxu2 %v8600_v60  ;;  %7609 = vmatmul.msk.f32.vlgmr.msrb.gmra.mxu1 %vm3459_vm4, %v8583_v48  ;;  %v11980_v62 = vpop.f32.mrf.mxu3  ;;  %v4106_v48 = vadd.f32 %v9628_v30, %v9586_v35  ;;  %v11991_v60 = vld [vmem:[%s14377_s2 + $0x18] sm:$0xff]  ;;  %v12021_v30 = vld [vmem:[%s14377_s2 + $0x48] sm:$0xff] }
 0x544   : > { %15279 = vst [vmem:[#allocation408_spill] sm:$0xff] %v11980_v62  ;;  %v12016_v9 = vpop.f32.mrf.mxu0 }
 0x545   : > { %v6141_v13 = vadd.f32 %v11991_v60, %v4106_v48  ;;  %v4115_v48 = vadd.f32 %v9784_v17, %v9740_v55  ;;  %v4301_v17 = vadd.f32 %v9733_v54, %v9697_v37  ;;  %v12048_v55 = vld [vmem:[%s14377_s2 + $0x78] sm:$0xff]  ;;  %v6339_v54 = vadd.f32 %v12021_v30, %v4304_v34  ;;  %v12063_v37 = vld [vmem:[%s14377_s2 + $0x90] sm:$0xff]  ;;  %v12092_v34 = vld [vmem:[%s14377_s2 + $0xc0] sm:$0xff] }
 0x546   : > { %7484 = vmatmul.msk.f32.gmra.mxu3 %vm3459_vm4, %v8657_v28  ;;  %v6156_v24 = vadd.f32 %v12063_v37, %v4121_v51 }
 0x547   : > { %v11997_v62 = vpop.f32.mrf.mxu2 }
 0x548   : > { %5310 = vmatmul.f32.gmra.mxu0 %v8617_v4  ;;  %15280 = vst [vmem:[#allocation409_spill] sm:$0xff] %v11997_v62 }
 0x54a   : > { %v12011_v35 = vpop.f32.mrf.mxu1 }
 0x54b   : > { %4508 = vmatmul.f32.gmra.mxu2 %v8617_v4  ;;  %7610 = vmatmul.msk.f32.gmra.mxu1 %vm3459_vm4, %v8603_v61  ;;  %v12004_v61 = vld [vmem:[%s14377_s2] sm:$0xff]  ;;  %v12009_v4 = vld [vmem:[%s14377_s2 + $0x30] sm:$0xff]  ;;  %v12023_v52 = vpop.f32.mrf.mxu3 }
 0x54c   : > { %15281 = vst [vmem:[#allocation410_spill] sm:$0xff] %v12023_v52  ;;  %v6138_v62 = vadd.f32 %v12004_v61, %v4103_v10  ;;  %v6144_v2 = vadd.f32 %v12009_v4, %v4109_v38  ;;  %v6147_v10 = vadd.f32 %v12021_v30, %v4112_v27  ;;  %v4118_v38 = vadd.f32 %v9843_v29, %v9775_v40  ;;  %v12072_v58 = vpop.f32.mrf.mxu0  ;;  %v12079_v27 = vld [vmem:[%s14377_s2 + $0xa8] sm:$0xff] }
 0x54d   : > { %v4124_v29 = vadd.f32 %v9946_v19, %v9902_v0  ;;  %15284 = vst [vmem:[#allocation413_spill] sm:$0xff] %v12072_v58  ;;  %v4313_v19 = vadd.f32 %v9962_v8, %v9924_v31  ;;  %v4316_v8 = vadd.f32 %v9993_v15, %v9979_v36  ;;  %v15289_v36 = vld [vmem:[#allocation121_spill] sm:$0xff] }
 0x54e   : > { %7485 = vmatmul.msk.f32.gmra.mxu3 %vm3459_vm4, %v8709_v3  ;;  %v6522_v52 = vmax.f32 %v6138_v62, %v6141_v13  ;;  %v4319_v15 = vadd.f32 %v15290_v21, %v15289_v36  ;;  %v15299_v36 = vld [vmem:[#allocation8_spill] sm:$0xff] }
 0x54f   : > { %v12055_v62 = vpop.f32.mrf.mxu2 }
 0x550   : > { %5313 = vmatmul.f32.gmra.mxu0 %v8645_v22  ;;  %v6523_v1 = vmax.f32 %v6522_v52, %v6144_v2  ;;  %15282 = vst [vmem:[#allocation411_spill] sm:$0xff] %v12055_v62  ;;  %v6336_v2 = vadd.f32 %v12009_v4, %v4301_v17  ;;  %v6159_v17 = vadd.f32 %v12079_v27, %v4124_v29  ;;  %v15293_v29 = vld [vmem:[#allocation180_spill] sm:$0xff] }
 0x551   : > { %v15315_v62 = vld [vmem:[#allocation216_spill] sm:$0xff] }
 0x552   : > { %v12065_v40 = vpop.f32.mrf.mxu1  ;;  %v6775_v0 = vmax.f32 %v6339_v54, %v6336_v2  ;;  %v15288_v54 = vld [vmem:[#allocation14_spill] sm:$0xff] }
 0x553   : > { %4511 = vmatmul.f32.gmra.mxu2 %v8645_v22  ;;  %7611 = vmatmul.msk.f32.gmra.mxu1 %vm3459_vm4, %v8628_v11  ;;  %v4307_v22 = vadd.f32 %v9831_v18, %v9817_v32  ;;  %v6150_v11 = vadd.f32 %v12033_v26, %v4115_v48  ;;  %15283 = vst [vmem:[#allocation412_spill] sm:$0xff] %v12065_v40  ;;  %v12081_v52 = vpop.f32.mrf.mxu3 }
 0x554   : > { %v6524_v32 = vmax.f32 %v6523_v1, %v6147_v10  ;;  %v6153_v18 = vadd.f32 %v12048_v55, %v4118_v38  ;;  %15285 = vst [vmem:[#allocation414_spill] sm:$0xff] %v12081_v52  ;;  %v6345_v38 = vadd.f32 %v12048_v55, %v4310_v14  ;;  %v15286_v1 = vld [vmem:[#allocation188_spill] sm:$0xff]  ;;  %v15292_v14 = vld [vmem:[#allocation174_spill] sm:$0xff] }
 0x555   : > { %v6342_v13 = vadd.f32 %v12033_v26, %v4307_v22  ;;  %v6348_v22 = vadd.f32 %v12063_v37, %v4313_v19  ;;  %v4151_v2 = vadd.f32 %v15293_v29, %v15292_v14  ;;  %v12134_v29 = vpop.f32.mrf.mxu0  ;;  %v15305_v52 = vld [vmem:[#allocation200_spill] sm:$0xff] }
 0x556   : > { %7486 = vmatmul.msk.f32.gmra.mxu3 %vm3459_vm4, %v8756_v41  ;;  %v6525_v48 = vmax.f32 %v6524_v32, %v6150_v11  ;;  %v4154_v11 = vadd.f32 %v15286_v1, %v10467_v49  ;;  %v6351_v49 = vadd.f32 %v12079_v27, %v4316_v8  ;;  %15302 = vst [vmem:[#allocation125_spill] sm:$0xff] %v12134_v29 }
 0x557   : > { %v6776_v31 = vmax.f32 %v6775_v0, %v6342_v13  ;;  %v12112_v51 = vpop.f32.mrf.mxu2  ;;  %v15294_v13 = vld [vmem:[#allocation192_spill] sm:$0xff]  ;;  %v6354_v8 = vadd.f32 %v12092_v34, %v4319_v15 }
 0x558   : > { %5316 = vmatmul.f32.gmra.mxu0 %v8680_v42  ;;  %v6526_v10 = vmax.f32 %v6525_v48, %v6153_v18  ;;  %15287 = vst [vmem:[#allocation188_spill] sm:$0xff] %v12112_v51  ;;  %v15295_v48 = vld [vmem:[#allocation194_spill] sm:$0xff]  ;;  %v15297_v0 = vld [vmem:[#allocation196_spill] sm:$0xff] }
 0x559   : > { %v6777_v32 = vmax.f32 %v6776_v31, %v6345_v38  ;;  %v15300_v31 = vld [vmem:[#allocation197_spill] sm:$0xff]  ;;  %v15310_v15 = vld [vmem:[#allocation212_spill] sm:$0xff] }
 0x55a   : > { %v6527_v57 = vmax.f32 %v6526_v10, %v6156_v24  ;;  %v12118_v16 = vpop.f32.mrf.mxu1  ;;  %v4157_v24 = vadd.f32 %v15295_v48, %v15294_v13  ;;  %v15303_v13 = vld [vmem:[#allocation184_spill] sm:$0xff] }
 0x55b   : > { %4514 = vmatmul.f32.gmra.mxu2 %v8680_v42  ;;  %7612 = vmatmul.msk.f32.gmra.mxu1 %vm3459_vm4, %v8657_v28  ;;  %v6162_v42 = vadd.f32 %v12092_v34, %v4127_v39  ;;  %v12108_v28 = vld [vmem:[%s14377_s2 + $0xd8] sm:$0xff]  ;;  %15291 = vst [vmem:[#allocation14_spill] sm:$0xff] %v12118_v16  ;;  %v12128_v1 = vpop.f32.mrf.mxu3  ;;  %v6778_v21 = vmax.f32 %v6777_v32, %v6348_v22  ;;  %v15357_v16 = vld [vmem:[#allocation16_spill] sm:$0xff] }
 0x55c   : > { %v6528_v18 = vmax.f32 %v6527_v57, %v6159_v17  ;;  %v6165_v19 = vadd.f32 %v12108_v28, %v4130_v25  ;;  %v15296_v39 = vld [vmem:[#allocation190_spill] sm:$0xff]  ;;  %15298 = vst [vmem:[#allocation121_spill] sm:$0xff] %v12128_v1  ;;  %v6189_v17 = vadd.f32 %v11991_v60, %v4154_v11  ;;  %v15301_v57 = vld [vmem:[#allocation204_spill] sm:$0xff]  ;;  %v6186_v32 = vadd.f32 %v12004_v61, %v4151_v2 }
 0x55d   : > { %v4346_v10 = vadd.f32 %v15297_v0, %v15296_v39  ;;  %v4160_v14 = vadd.f32 %v15301_v57, %v15300_v31  ;;  %v15304_v25 = vld [vmem:[#allocation186_spill] sm:$0xff]  ;;  %v6779_v1 = vmax.f32 %v6778_v21, %v6351_v49  ;;  %v15318_v21 = vld [vmem:[#allocation19_spill] sm:$0xff] }
 0x55e   : > { %7487 = vmatmul.msk.f32.gmra.mxu3 %vm3459_vm4, %v15288_v54  ;;  %v6529_v38 = vmax.f32 %v6528_v18, %v6162_v42  ;;  %v4343_v48 = vadd.f32 %v15304_v25, %v15303_v13  ;;  %v15306_v39 = vld [vmem:[#allocation206_spill] sm:$0xff]  ;;  %v15308_v42 = vld [vmem:[#allocation133_spill] sm:$0xff]  ;;  %v6192_v18 = vadd.f32 %v12009_v4, %v4157_v24  ;;  %v6585_v51 = vmax.f32 %v6186_v32, %v6189_v17  ;;  %v15321_v32 = vld [vmem:[#allocation220_spill] sm:$0xff] }
 0x55f   : > { %v4349_v0 = vadd.f32 %v15306_v39, %v15305_v52  ;;  %v15307_v22 = vld [vmem:[#allocation126_spill] sm:$0xff]  ;;  %v12153_v52 = vld [vmem:[%s14377_s2 + $0xf0] sm:$0xff]  ;;  %v6195_v24 = vadd.f32 %v12021_v30, %v4160_v14 }
 0x560   : > { %5319 = vmatmul.f32.gmra.mxu0 %v15299_v36  ;;  %v4133_v11 = vadd.f32 %v15308_v42, %v15307_v22  ;;  %v15309_v31 = vld [vmem:[#allocation202_spill] sm:$0xff]  ;;  %v6530_v13 = vmax.f32 %v6529_v38, %v6165_v19  ;;  %v15313_v22 = vld [vmem:[#allocation131_spill] sm:$0xff]  ;;  %v15314_v42 = vld [vmem:[#allocation141_spill] sm:$0xff]  ;;  %v12163_v19 = vpop.f32.mrf.mxu2  ;;  %v12167_v38 = vmax.f32 %v6779_v1, %v6354_v8 }
 0x561   : > { %v4163_v57 = vadd.f32 %v15310_v15, %v15309_v31  ;;  %v15312_v25 = vld [vmem:[#allocation210_spill] sm:$0xff]  ;;  %v4136_v2 = vadd.f32 %v15314_v42, %v15313_v22  ;;  %15317 = vst [vmem:[#allocation174_spill] sm:$0xff] %v12163_v19  ;;  %v6378_v15 = vadd.f32 %v12004_v61, %v4343_v48  ;;  %v6384_v17 = vadd.f32 %v12009_v4, %v4349_v0  ;;  %v15323_v8 = vld [vmem:[#allocation221_spill] sm:$0xff]  ;;  %v15324_v42 = vld [vmem:[#allocation228_spill] sm:$0xff] }
 0x562   : > { %v15316_v31 = vld [vmem:[#allocation218_spill] sm:$0xff]  ;;  %15319 = vst [vmem:[#allocation180_spill] sm:$0xff] %v12167_v38  ;;  %v6586_v22 = vmax.f32 %v6585_v51, %v6192_v18  ;;  %v15325_v19 = vld [vmem:[#allocation129_spill] sm:$0xff]  ;;  %v15327_v0 = vld [vmem:[#allocation224_spill] sm:$0xff] }
 0x563   : > { %4517 = vmatmul.f32.gmra.mxu2 %v15299_v36  ;;  %7613 = vmatmul.msk.f32.gmra.mxu1 %vm3459_vm4, %v8709_v3  ;;  %v6381_v36 = vadd.f32 %v11991_v60, %v4346_v10  ;;  %v15311_v3 = vld [vmem:[#allocation208_spill] sm:$0xff]  ;;  %v4166_v49 = vadd.f32 %v15316_v31, %v15315_v62  ;;  %v15320_v14 = vld [vmem:[#allocation214_spill] sm:$0xff]  ;;  %v12178_v62 = vpop.f32.mrf.mxu1  ;;  %v6198_v1 = vadd.f32 %v12033_v26, %v4163_v57 }
 0x564   : > { %v4352_v39 = vadd.f32 %v15312_v25, %v15311_v3  ;;  %v12172_v10 = vld [vmem:[%s14377_s2 + $0x108] sm:$0xff]  ;;  %v4355_v3 = vadd.f32 %v15321_v32, %v15320_v14  ;;  %15322 = vst [vmem:[#allocation192_spill] sm:$0xff] %v12178_v62  ;;  %v6168_v25 = vadd.f32 %v12153_v52, %v4133_v11  ;;  %v4169_v31 = vadd.f32 %v15324_v42, %v15323_v8  ;;  %v12189_v14 = vpop.f32.mrf.mxu3  ;;  %v15330_v32 = vld [vmem:[#allocation13_spill] sm:$0xff]  ;;  %v15331_v57 = vld [vmem:[#allocation226_spill] sm:$0xff]  ;;  %v12196_v62 = vpop.f32.mrf.mxu0 }
 0x565   : > { %v4322_v33 = vadd.f32 %v15326_v23, %v15325_v19  ;;  %v6837_v6 = vmax.f32 %v6378_v15, %v6381_v36  ;;  %v4358_v29 = vadd.f32 %v15328_v5, %v15327_v0  ;;  %15329 = vst [vmem:[#allocation194_spill] sm:$0xff] %v12189_v14  ;;  %v6171_v51 = vadd.f32 %v12172_v10, %v4136_v2  ;;  %v15332_v8 = vld [vmem:[#allocation236_spill] sm:$0xff]  ;;  %v15335_v19 = vld [vmem:[#allocation234_spill] sm:$0xff] }
 0x566   : > { %7488 = vmatmul.msk.f32.gmra.mxu3 %vm3459_vm4, %v15318_v21  ;;  %v6387_v48 = vadd.f32 %v12021_v30, %v4352_v39  ;;  %v6587_v11 = vmax.f32 %v6586_v22, %v6195_v24  ;;  %v6201_v18 = vadd.f32 %v12048_v55, %v4166_v49  ;;  %v4172_v42 = vadd.f32 %v15332_v8, %v15331_v57  ;;  %v15334_v39 = vld [vmem:[#allocation232_spill] sm:$0xff]  ;;  %v15337_v22 = vld [vmem:[#allocation242_spill] sm:$0xff]  ;;  %v15338_v57 = vld [vmem:[#allocation145_spill] sm:$0xff] }
 0x567   : > { %15333 = vst [vmem:[#allocation190_spill] sm:$0xff] %v12196_v62  ;;  %v6838_v23 = vmax.f32 %v6837_v6, %v6384_v17  ;;  %v6390_v36 = vadd.f32 %v12033_v26, %v4355_v3  ;;  %v4361_v5 = vadd.f32 %v15335_v19, %v15334_v39  ;;  %v6531_v2 = vmax.f32 %v6530_v13, %v6168_v25  ;;  %v15336_v15 = vld [vmem:[#allocation240_spill] sm:$0xff]  ;;  %v15339_v8 = vld [vmem:[#allocation147_spill] sm:$0xff]  ;;  %v15340_v14 = vld [vmem:[#allocation238_spill] sm:$0xff] }
 0x568   : > { %5322 = vmatmul.f32.gmra.mxu0 %v15330_v32  ;;  %v6588_v24 = vmax.f32 %v6587_v11, %v6198_v1  ;;  %v6204_v49 = vadd.f32 %v12063_v37, %v4169_v31  ;;  %v4175_v0 = vadd.f32 %v15337_v22, %v15336_v15  ;;  %v4139_v6 = vadd.f32 %v15339_v8, %v15338_v57  ;;  %v15341_v39 = vld [vmem:[#allocation244_spill] sm:$0xff]  ;;  %v15343_v1 = vld [vmem:[#allocation245_spill] sm:$0xff] }
 0x569   : > { %v6839_v17 = vmax.f32 %v6838_v23, %v6387_v48  ;;  %v6393_v3 = vadd.f32 %v12048_v55, %v4358_v29  ;;  %v4364_v19 = vadd.f32 %v15341_v39, %v15340_v14  ;;  %v6207_v25 = vadd.f32 %v12079_v27, %v4172_v42  ;;  %v15344_v31 = vld [vmem:[#allocation252_spill] sm:$0xff]  ;;  %v12223_v48 = vpop.f32.mrf.mxu2  ;;  %v15346_v29 = vld [vmem:[#allocation23_spill] sm:$0xff]  ;;  %v15347_v23 = vld [vmem:[#allocation150_spill] sm:$0xff] }
 0x56a   : > { %v6589_v13 = vmax.f32 %v6588_v24, %v6201_v18  ;;  %v4178_v11 = vadd.f32 %v15344_v31, %v15343_v1  ;;  %15345 = vst [vmem:[#allocation8_spill] sm:$0xff] %v12223_v48  ;;  %v6532_v14 = vmax.f32 %v6531_v2, %v6171_v51  ;;  %v6396_v57 = vadd.f32 %v12063_v37, %v4361_v5  ;;  %v12235_v18 = vld [vmem:[%s14377_s2 + $0x138] sm:$0xff]  ;;  %v15350_v39 = vld [vmem:[#allocation248_spill] sm:$0xff]  ;;  %v15355_v5 = vld [vmem:[#allocation165_spill] sm:$0xff] }
 0x56b   : > { %4520 = vmatmul.f32.gmra.mxu2 %v15330_v32  ;;  %7614 = vmatmul.msk.f32.gmra.mxu1 %vm3459_vm4, %v8756_v41  ;;  %v12213_v32 = vadd.f32 %v12108_v28, %v4322_v33  ;;  %v12218_v41 = vld [vmem:[%s14377_s2 + $0x120] sm:$0xff]  ;;  %v15348_v33 = vld [vmem:[#allocation157_spill] sm:$0xff]  ;;  %v6840_v22 = vmax.f32 %v6839_v17, %v6390_v36  ;;  %v12230_v8 = vpop.f32.mrf.mxu1  ;;  %v6210_v24 = vadd.f32 %v12092_v34, %v4175_v0  ;;  %v15351_v1 = vld [vmem:[#allocation254_spill] sm:$0xff] }
 0x56c   : > { %v4142_v15 = vadd.f32 %v15348_v33, %v15347_v23  ;;  %15349 = vst [vmem:[#allocation197_spill] sm:$0xff] %v12230_v8  ;;  %v6590_v42 = vmax.f32 %v6589_v13, %v6204_v49  ;;  %v4367_v31 = vadd.f32 %v15351_v1, %v15350_v39  ;;  %v15352_v51 = vld [vmem:[#allocation250_spill] sm:$0xff]  ;;  %v15353_v2 = vld [vmem:[#allocation260_spill] sm:$0xff]  ;;  %v6174_v36 = vadd.f32 %v12218_v41, %v4139_v6  ;;  %v15354_v17 = vld [vmem:[#allocation155_spill] sm:$0xff]  ;;  %v12246_v62 = vpop.f32.mrf.mxu3 }
 0x56d   : > { %15342 = vst [vmem:[#allocation196_spill] sm:$0xff] %v12213_v32  ;;  %v4181_v48 = vadd.f32 %v15353_v2, %v15352_v51  ;;  %v4145_v23 = vadd.f32 %v15355_v5, %v15354_v17  ;;  %v6841_v33 = vmax.f32 %v6840_v22, %v6393_v3  ;;  %v6399_v8 = vadd.f32 %v12079_v27, %v4364_v19  ;;  %v12252_v49 = vld [vmem:[%s14377_s2 + $0x150] sm:$0xff]  ;;  %v15358_v39 = vld [vmem:[#allocation256_spill] sm:$0xff]  ;;  %v15359_v6 = vld [vmem:[#allocation258_spill] sm:$0xff]  ;;  %v12259_v22 = vpop.f32.mrf.mxu0 }
 0x56e   : > { %7489 = vmatmul.msk.f32.gmra.mxu3 %vm3459_vm4, %v15346_v29  ;;  %15356 = vst [vmem:[#allocation204_spill] sm:$0xff] %v12246_v62  ;;  %v6591_v0 = vmax.f32 %v6590_v42, %v6207_v25  ;;  %v6213_v13 = vadd.f32 %v12108_v28, %v4178_v11  ;;  %v4370_v1 = vadd.f32 %v15359_v6, %v15358_v39  ;;  %v15360_v51 = vld [vmem:[#allocation264_spill] sm:$0xff]  ;;  %v15361_v2 = vld [vmem:[#allocation266_spill] sm:$0xff]  ;;  %v15363_v19 = vld [vmem:[#allocation137_spill] sm:$0xff] }
 0x56f   : > { %v4184_v3 = vadd.f32 %v15361_v2, %v15360_v51  ;;  %15362 = vst [vmem:[#allocation184_spill] sm:$0xff] %v12259_v22  ;;  %v15364_v17 = vld [vmem:[#allocation139_spill] sm:$0xff]  ;;  %v6177_v62 = vadd.f32 %v12235_v18, %v4142_v15  ;;  %v6842_v58 = vmax.f32 %v6841_v33, %v6396_v57  ;;  %v6402_v11 = vadd.f32 %v12092_v34, %v4367_v31  ;;  %v15365_v39 = vld [vmem:[#allocation262_spill] sm:$0xff]  ;;  %v15366_v6 = vld [vmem:[#allocation268_spill] sm:$0xff] }
 0x570   : > { %5325 = vmatmul.f32.gmra.mxu0 %v15357_v16  ;;  %v4325_v5 = vadd.f32 %v15364_v17, %v15363_v19  ;;  %v6592_v25 = vmax.f32 %v6591_v0, %v6210_v24  ;;  %v6216_v42 = vadd.f32 %v12153_v52, %v4181_v48  ;;  %v4373_v51 = vadd.f32 %v15366_v6, %v15365_v39  ;;  %v15367_v17 = vld [vmem:[#allocation269_spill] sm:$0xff]  ;;  %v15368_v15 = vld [vmem:[#allocation276_spill] sm:$0xff]  ;;  %v15370_v0 = vld [vmem:[#allocation278_spill] sm:$0xff] }
 0x571   : > { %v6533_v2 = vmax.f32 %v6532_v14, %v6174_v36  ;;  %v6180_v22 = vadd.f32 %v12252_v49, %v4145_v23  ;;  %v6843_v19 = vmax.f32 %v6842_v58, %v6399_v8  ;;  %v4187_v57 = vadd.f32 %v15368_v15, %v15367_v17  ;;  %v15369_v24 = vld [vmem:[#allocation272_spill] sm:$0xff]  ;;  %v12278_v40 = vpop.f32.mrf.mxu2  ;;  %v15372_v48 = vld [vmem:[#allocation26_spill] sm:$0xff]  ;;  %v15376_v6 = vld [vmem:[#allocation143_spill] sm:$0xff] }
 0x572   : > { %v6593_v33 = vmax.f32 %v6592_v25, %v6213_v13  ;;  %v4376_v31 = vadd.f32 %v15370_v0, %v15369_v24  ;;  %15371 = vst [vmem:[#allocation186_spill] sm:$0xff] %v12278_v40  ;;  %v12285_v58 = vadd.f32 %v12153_v52, %v4325_v5  ;;  %v15374_v8 = vld [vmem:[#allocation274_spill] sm:$0xff]  ;;  %v15375_v36 = vld [vmem:[#allocation284_spill] sm:$0xff]  ;;  %v6408_v39 = vadd.f32 %v12153_v52, %v4373_v51  ;;  %v15377_v17 = vld [vmem:[#allocation149_spill] sm:$0xff] }
 0x573   : > { %4523 = vmatmul.f32.gmra.mxu2 %v15357_v16  ;;  %7615 = vmatmul.msk.f32.gmra.mxu1 %vm3459_vm4, %v15288_v54  ;;  %v6405_v16 = vadd.f32 %v12108_v28, %v4370_v1  ;;  %v6219_v54 = vadd.f32 %v12172_v10, %v4184_v3  ;;  %v4190_v23 = vadd.f32 %v15375_v36, %v15374_v8  ;;  %v12289_v13 = vpop.f32.mrf.mxu1  ;;  %v15379_v24 = vld [vmem:[#allocation169_spill] sm:$0xff]  ;;  %v15380_v0 = vld [vmem:[#allocation171_spill] sm:$0xff]  ;;  %v15382_v36 = vld [vmem:[#allocation18_spill] sm:$0xff] }
 0x574   : > { %15373 = vst [vmem:[#allocation200_spill] sm:$0xff] %v12285_v58  ;;  %v6534_v1 = vmax.f32 %v6533_v2, %v6177_v62  ;;  %v6844_v3 = vmax.f32 %v6843_v19, %v6402_v11  ;;  %v6594_v25 = vmax.f32 %v6593_v33, %v6216_v42  ;;  %v12294_v15 = vadd.f32 %v15377_v17, %v15376_v6  ;;  %v12301_v8 = vpop.f32.mrf.mxu3  ;;  %v12309_v11 = vld [vmem:[%s14377_s2 + $0x168] sm:$0xff]  ;;  %v15399_v58 = vld [vmem:[#allocation310_spill] sm:$0xff] }
 0x575   : > { %v4148_v14 = vadd.f32 %v15380_v0, %v15379_v24  ;;  %v6222_v5 = vadd.f32 %v12218_v41, %v4187_v57  ;;  %v4202_v32 = vadd.f32 %v11555_v56, %v11494_v46  ;;  %15381 = vst [vmem:[#allocation126_spill] sm:$0xff] %v12301_v8  ;;  %v6411_v2 = vadd.f32 %v12172_v10, %v4376_v31  ;;  %v15384_v57 = vld [vmem:[#allocation298_spill] sm:$0xff]  ;;  %v15385_v33 = vld [vmem:[#allocation308_spill] sm:$0xff]  ;;  %v15386_v56 = vld [vmem:[#allocation311_spill] sm:$0xff]  ;;  %v12326_v38 = vpop.f32.mrf.mxu0 }
 0x576   : > { %7490 = vmatmul.msk.f32.gmra.mxu3 %vm3459_vm4, %v15372_v48  ;;  %15378 = vst [vmem:[#allocation206_spill] sm:$0xff] %v12294_v15  ;;  %v12304_v62 = vmax.f32 %v6534_v1, %v6180_v22  ;;  %v6845_v42 = vmax.f32 %v6844_v3, %v6405_v16  ;;  %v6595_v51 = vmax.f32 %v6594_v25, %v6219_v54  ;;  %v15387_v6 = vld [vmem:[#allocation320_spill] sm:$0xff]  ;;  %v15389_v24 = vld [vmem:[#allocation282_spill] sm:$0xff]  ;;  %v15392_v25 = vld [vmem:[#allocation321_spill] sm:$0xff] }
 0x577   : > { %v6225_v19 = vadd.f32 %v12235_v18, %v4190_v23  ;;  %v4199_v46 = vadd.f32 %v15385_v33, %v15384_v57  ;;  %v4205_v17 = vadd.f32 %v15387_v6, %v15386_v56  ;;  %v15388_v1 = vld [vmem:[#allocation280_spill] sm:$0xff]  ;;  %v15391_v3 = vld [vmem:[#allocation290_spill] sm:$0xff]  ;;  %v12329_v57 = vadd.f32 %v12309_v11, %v4148_v14  ;;  %v15397_v6 = vld [vmem:[#allocation293_spill] sm:$0xff] }
 0x578   : > { %5328 = vmatmul.f32.gmra.mxu0 %v15382_v36  ;;  %15383 = vst [vmem:[#allocation133_spill] sm:$0xff] %v12304_v62  ;;  %v6846_v22 = vmax.f32 %v6845_v42, %v6408_v39  ;;  %v4379_v16 = vadd.f32 %v15389_v24, %v15388_v1  ;;  %v15390_v54 = vld [vmem:[#allocation288_spill] sm:$0xff]  ;;  %v6596_v33 = vmax.f32 %v6595_v51, %v6222_v5  ;;  %v15401_v15 = vld [vmem:[#allocation326_spill] sm:$0xff]  ;;  %v15404_v14 = vld [vmem:[#allocation31_spill] sm:$0xff] }
 0x579   : > { %v4193_v31 = vadd.f32 %v15391_v3, %v15390_v54  ;;  %v15393_v23 = vld [vmem:[#allocation328_spill] sm:$0xff]  ;;  %15394 = vst [vmem:[#allocation202_spill] sm:$0xff] %v12329_v57  ;;  %v15400_v54 = vld [vmem:[#allocation315_spill] sm:$0xff]  ;;  %v12340_v62 = vpop.f32.mrf.mxu2  ;;  %v6240_v51 = vadd.f32 %v12009_v4, %v4205_v17  ;;  %v15411_v8 = vld [vmem:[#allocation334_spill] sm:$0xff] }
 0x57a   : > { %v4394_v0 = vadd.f32 %v15393_v23, %v15392_v25  ;;  %v15395_v56 = vld [vmem:[#allocation316_spill] sm:$0xff]  ;;  %v6847_v42 = vmax.f32 %v6846_v22, %v6411_v2  ;;  %v4391_v3 = vadd.f32 %v15400_v54, %v15399_v58  ;;  %v15402_v25 = vld [vmem:[#allocation333_spill] sm:$0xff]  ;;  %15403 = vst [vmem:[#allocation212_spill] sm:$0xff] %v12340_v62  ;;  %v6597_v5 = vmax.f32 %v6596_v33, %v6225_v19  ;;  %v15405_v2 = vld [vmem:[#allocation318_spill] sm:$0xff] }
 0x57b   : > { %4526 = vmatmul.f32.gmra.mxu2 %v15382_v36  ;;  %7616 = vmatmul.msk.f32.gmra.mxu1 %vm3459_vm4, %v15318_v21  ;;  %v6237_v36 = vadd.f32 %v11991_v60, %v4202_v32  ;;  %v15396_v21 = vld [vmem:[#allocation325_spill] sm:$0xff]  ;;  %v15398_v1 = vld [vmem:[#allocation300_spill] sm:$0xff]  ;;  %v4397_v23 = vadd.f32 %v15402_v25, %v15401_v15  ;;  %v6234_v32 = vadd.f32 %v12004_v61, %v4199_v46  ;;  %v15408_v25 = vld [vmem:[#allocation286_spill] sm:$0xff] }
 0x57c   : > { %v4208_v39 = vadd.f32 %v15396_v21, %v15395_v56  ;;  %v4196_v24 = vadd.f32 %v15398_v1, %v15397_v6  ;;  %v15406_v22 = vld [vmem:[#allocation329_spill] sm:$0xff]  ;;  %v12348_v21 = vpop.f32.mrf.mxu1  ;;  %v6414_v58 = vadd.f32 %v12218_v41, %v4379_v16  ;;  %v6228_v6 = vadd.f32 %v12252_v49, %v4193_v31  ;;  %v15407_v1 = vld [vmem:[#allocation331_spill] sm:$0xff]  ;;  %v15409_v19 = vld [vmem:[#allocation292_spill] sm:$0xff] }
 0x57d   : > { %v4211_v56 = vadd.f32 %v15406_v22, %v15405_v2  ;;  %v6429_v15 = vadd.f32 %v11991_v60, %v4394_v0  ;;  %v4400_v54 = vadd.f32 %v11691_v7, %v15407_v1  ;;  %v4382_v33 = vadd.f32 %v15409_v19, %v15408_v25  ;;  %v15410_v57 = vld [vmem:[#allocation324_spill] sm:$0xff]  ;;  %v12360_v22 = vpop.f32.mrf.mxu3  ;;  %v15413_v62 = vld [vmem:[#allocation25_spill] sm:$0xff] }
 0x57e   : > { %7491 = vmatmul.msk.f32.gmra.mxu3 %vm3459_vm4, %v15404_v14  ;;  %v6648_v46 = vmax.f32 %v6234_v32, %v6237_v36  ;;  %v6243_v17 = vadd.f32 %v12021_v30, %v4208_v39  ;;  %v4214_v2 = vadd.f32 %v15411_v8, %v15410_v57  ;;  %15412 = vst [vmem:[#allocation208_spill] sm:$0xff] %v12360_v22  ;;  %v15414_v7 = vld [vmem:[#allocation336_spill] sm:$0xff]  ;;  %v15416_v39 = vld [vmem:[#allocation330_spill] sm:$0xff] }
 0x57f   : > { %v6231_v16 = vadd.f32 %v12309_v11, %v4196_v24  ;;  %v6426_v31 = vadd.f32 %v12004_v61, %v4391_v3  ;;  %v6432_v0 = vadd.f32 %v12009_v4, %v4397_v23  ;;  %v15415_v1 = vld [vmem:[#allocation344_spill] sm:$0xff]  ;;  %v6246_v36 = vadd.f32 %v12033_v26, %v4211_v56  ;;  %v12377_v23 = vpop.f32.mrf.mxu0  ;;  %v15418_v56 = vld [vmem:[#allocation341_spill] sm:$0xff] }
 0x580   : > { %5331 = vmatmul.f32.gmra.mxu0 %v15413_v62  ;;  %v4403_v40 = vadd.f32 %v15415_v1, %v15414_v7  ;;  %v6649_v25 = vmax.f32 %v6648_v46, %v6240_v51  ;;  %v15417_v32 = vld [vmem:[#allocation340_spill] sm:$0xff]  ;;  %v12374_v8 = vmax.f32 %v6847_v42, %v6414_v58  ;;  %v6598_v57 = vmax.f32 %v6597_v5, %v6228_v6  ;;  %v15419_v46 = vld [vmem:[#allocation350_spill] sm:$0xff]  ;;  %v15422_v6 = vld [vmem:[#allocation35_spill] sm:$0xff] }
 0x581   : > { %v4217_v19 = vadd.f32 %v15417_v32, %v15416_v39  ;;  %v6900_v24 = vmax.f32 %v6426_v31, %v6429_v15  ;;  %v6435_v3 = vadd.f32 %v12021_v30, %v4400_v54  ;;  %v6249_v51 = vadd.f32 %v12048_v55, %v4214_v2  ;;  %v15420_v39 = vld [vmem:[#allocation335_spill] sm:$0xff]  ;;  %v15421_v32 = vld [vmem:[#allocation345_spill] sm:$0xff]  ;;  %v12390_v58 = vpop.f32.mrf.mxu2  ;;  %v15423_v2 = vld [vmem:[#allocation348_spill] sm:$0xff] }
 0x582   : > { %v6650_v7 = vmax.f32 %v6649_v25, %v6243_v17  ;;  %v4406_v1 = vadd.f32 %v15419_v46, %v15418_v56  ;;  %v12385_v22 = vadd.f32 %v12235_v18, %v4382_v33  ;;  %v6438_v42 = vadd.f32 %v12033_v26, %v4403_v40  ;;  %v15424_v31 = vld [vmem:[#allocation356_spill] sm:$0xff]  ;;  %v15425_v40 = vld [vmem:[#allocation339_spill] sm:$0xff] }
 0x583   : > { %4529 = vmatmul.f32.gmra.mxu2 %v15413_v62  ;;  %7617 = vmatmul.msk.f32.gmra.mxu1 %vm3459_vm4, %v15346_v29  ;;  %v4220_v62 = vadd.f32 %v15421_v32, %v15420_v39  ;;  %v6901_v29 = vmax.f32 %v6900_v24, %v6432_v0  ;;  %v4250_v5 = vadd.f32 %v11925_v63, %v11899_v20  ;;  %v15426_v24 = vld [vmem:[#allocation351_spill] sm:$0xff]  ;;  %v15427_v20 = vld [vmem:[#allocation389_spill] sm:$0xff] }
 0x584   : > { %v12394_v15 = vmax.f32 %v6598_v57, %v6231_v16  ;;  %v6651_v54 = vmax.f32 %v6650_v7, %v6246_v36  ;;  %v6252_v17 = vadd.f32 %v12063_v37, %v4217_v19  ;;  %v4409_v33 = vadd.f32 %v15424_v31, %v15423_v2  ;;  %v12399_v25 = vpop.f32.mrf.mxu1  ;;  %v15428_v16 = vld [vmem:[#allocation296_spill] sm:$0xff]  ;;  %v15429_v57 = vld [vmem:[#allocation302_spill] sm:$0xff] }
 0x585   : > { %v6902_v0 = vmax.f32 %v6901_v29, %v6435_v3  ;;  %v4223_v56 = vadd.f32 %v15426_v24, %v15425_v40  ;;  %v4247_v63 = vadd.f32 %v11908_v12, %v15427_v20  ;;  %v4253_v46 = vadd.f32 %v11946_v59, %v11921_v53  ;;  %v12413_v32 = vpop.f32.mrf.mxu3  ;;  %v15430_v3 = vld [vmem:[#allocation28_spill] sm:$0xff]  ;;  %v15431_v2 = vld [vmem:[#allocation354_spill] sm:$0xff]  ;;  %v15436_v20 = vld [vmem:[#allocation367_spill] sm:$0xff] }
 0x586   : > { %7492 = vmatmul.msk.f32.gmra.mxu3 %vm3459_vm4, %v15422_v6  ;;  %v12409_v36 = vadd.f32 %v15429_v57, %v15428_v16  ;;  %v6652_v19 = vmax.f32 %v6651_v54, %v6249_v51  ;;  %v6441_v7 = vadd.f32 %v12048_v55, %v4406_v1  ;;  %v6255_v39 = vadd.f32 %v12079_v27, %v4220_v62  ;;  %v15432_v31 = vld [vmem:[#allocation362_spill] sm:$0xff]  ;;  %v15434_v1 = vld [vmem:[#allocation357_spill] sm:$0xff]  ;;  %v15437_v57 = vld [vmem:[#allocation352_spill] sm:$0xff] }
 0x587   : > { %v6903_v29 = vmax.f32 %v6902_v0, %v6438_v42  ;;  %v4412_v12 = vadd.f32 %v15432_v31, %v15431_v2  ;;  %v6285_v40 = vadd.f32 %v11991_v60, %v4250_v5  ;;  %v4256_v53 = vadd.f32 %v11964_v43, %v11942_v47  ;;  %v15433_v54 = vld [vmem:[#allocation346_spill] sm:$0xff]  ;;  %v12432_v43 = vpop.f32.mrf.mxu0  ;;  %v15435_v0 = vld [vmem:[#allocation360_spill] sm:$0xff] }
 0x588   : > { %5334 = vmatmul.f32.gmra.mxu0 %v15430_v3  ;;  %v6653_v59 = vmax.f32 %v6652_v19, %v6252_v17  ;;  %v6444_v51 = vadd.f32 %v12063_v37, %v4409_v33  ;;  %v4226_v24 = vadd.f32 %v15434_v1, %v15433_v54  ;;  %v6258_v62 = vadd.f32 %v12092_v34, %v4223_v56  ;;  %v15438_v19 = vld [vmem:[#allocation363_spill] sm:$0xff]  ;;  %v15443_v54 = vld [vmem:[#allocation368_spill] sm:$0xff] }
 0x589   : > { %v6282_v42 = vadd.f32 %v12004_v61, %v4247_v63  ;;  %v6288_v5 = vadd.f32 %v12009_v4, %v4253_v46  ;;  %v4259_v47 = vadd.f32 %v11976_v45, %v11960_v44  ;;  %v6904_v17 = vmax.f32 %v6903_v29, %v6441_v7  ;;  %v12442_v2 = vpop.f32.mrf.mxu2  ;;  %v15439_v44 = vld [vmem:[#allocation38_spill] sm:$0xff]  ;;  %v15441_v29 = vld [vmem:[#allocation372_spill] sm:$0xff] }
 0x58a   : > { %v6654_v33 = vmax.f32 %v6653_v59, %v6255_v39  ;;  %v4415_v16 = vadd.f32 %v15436_v20, %v15435_v0  ;;  %v6291_v63 = vadd.f32 %v12021_v30, %v4256_v53  ;;  %v4262_v46 = vadd.f32 %v12011_v35, %v11978_v50  ;;  %v15440_v39 = vld [vmem:[#allocation364_spill] sm:$0xff]  ;;  %v15442_v59 = vld [vmem:[#allocation358_spill] sm:$0xff] }
 0x58b   : > { %4532 = vmatmul.f32.gmra.mxu2 %v15430_v3  ;;  %7618 = vmatmul.msk.f32.gmra.mxu1 %vm3459_vm4, %v15372_v48  ;;  %v4229_v3 = vadd.f32 %v15438_v19, %v15437_v57  ;;  %v6447_v48 = vadd.f32 %v12079_v27, %v4412_v12  ;;  %v6711_v56 = vmax.f32 %v6282_v42, %v6285_v40  ;;  %v15444_v35 = vld [vmem:[#allocation412_spill] sm:$0xff]  ;;  %v15447_v57 = vld [vmem:[#allocation365_spill] sm:$0xff] }
 0x58c   : > { %v6905_v45 = vmax.f32 %v6904_v17, %v6444_v51  ;;  %v6261_v7 = vadd.f32 %v12108_v28, %v4226_v24  ;;  %v4418_v31 = vadd.f32 %v15441_v29, %v15440_v39  ;;  %v4232_v12 = vadd.f32 %v15443_v54, %v15442_v59  ;;  %v12451_v40 = vpop.f32.mrf.mxu1  ;;  %v15445_v24 = vld [vmem:[#allocation369_spill] sm:$0xff]  ;;  %v15446_v17 = vld [vmem:[#allocation378_spill] sm:$0xff] }
 0x58d   : > { %v6655_v53 = vmax.f32 %v6654_v33, %v6258_v62  ;;  %v6712_v1 = vmax.f32 %v6711_v56, %v6288_v5  ;;  %v6294_v50 = vadd.f32 %v12033_v26, %v4259_v47  ;;  %v4265_v42 = vadd.f32 %v15444_v35, %v12016_v9  ;;  %v15448_v19 = vld [vmem:[#allocation373_spill] sm:$0xff]  ;;  %v12462_v29 = vpop.f32.mrf.mxu3  ;;  %v15450_v59 = vld [vmem:[#allocation30_spill] sm:$0xff]  ;;  %v15453_v35 = vld [vmem:[#allocation375_spill] sm:$0xff] }
 0x58e   : > { %7493 = vmatmul.msk.f32.gmra.mxu3 %vm3459_vm4, %v15439_v44  ;;  %v6450_v0 = vadd.f32 %v12092_v34, %v4415_v16  ;;  %v6264_v51 = vadd.f32 %v12153_v52, %v4229_v3  ;;  %v4421_v20 = vadd.f32 %v15446_v17, %v15445_v24  ;;  %v4235_v39 = vadd.f32 %v15448_v19, %v15447_v57  ;;  %v15451_v33 = vld [vmem:[#allocation413_spill] sm:$0xff]  ;;  %v15452_v9 = vld [vmem:[#allocation14_spill] sm:$0xff]  ;;  %v15454_v24 = vld [vmem:[#allocation384_spill] sm:$0xff] }
 0x58f   : > { %15449 = vst [vmem:[#allocation210_spill] sm:$0xff] %v12462_v29  ;;  %v6906_v62 = vmax.f32 %v6905_v45, %v6447_v48  ;;  %v6713_v5 = vmax.f32 %v6712_v1, %v6291_v63  ;;  %v6297_v47 = vadd.f32 %v12048_v55, %v4262_v46  ;;  %v4268_v56 = vadd.f32 %v15452_v9, %v15451_v33  ;;  %v15455_v46 = vld [vmem:[#allocation125_spill] sm:$0xff]  ;;  %v15456_v45 = vld [vmem:[#allocation192_spill] sm:$0xff]  ;;  %v15458_v19 = vld [vmem:[#allocation379_spill] sm:$0xff] }
 0x590   : > { %5337 = vmatmul.f32.gmra.mxu0 %v15450_v59  ;;  %v6656_v16 = vmax.f32 %v6655_v53, %v6261_v7  ;;  %v6453_v3 = vadd.f32 %v12108_v28, %v4418_v31  ;;  %v6267_v54 = vadd.f32 %v12172_v10, %v4232_v12  ;;  %v4424_v17 = vadd.f32 %v15454_v24, %v15453_v35  ;;  %v15457_v53 = vld [vmem:[#allocation370_spill] sm:$0xff]  ;;  %v15460_v35 = vld [vmem:[#allocation197_spill] sm:$0xff]  ;;  %v15461_v24 = vld [vmem:[#allocation43_spill] sm:$0xff] }
 0x591   : > { %v6714_v48 = vmax.f32 %v6713_v5, %v6294_v50  ;;  %v6300_v63 = vadd.f32 %v12063_v37, %v4265_v42  ;;  %v4271_v1 = vadd.f32 %v15456_v45, %v15455_v46  ;;  %v6907_v57 = vmax.f32 %v6906_v62, %v6450_v0  ;;  %v15459_v9 = vld [vmem:[#allocation190_spill] sm:$0xff]  ;;  %v12485_v5 = vpop.f32.mrf.mxu2  ;;  %v3887_v42 = vpop.f32.mrf.mxu0  ;;  %v15462_v0 = vld [vmem:[#allocation304_spill] sm:$0xff]  ;;  %v15465_v46 = vld [vmem:[#allocation407_spill] sm:$0xff] }
 0x592   : > { %v6657_v7 = vmax.f32 %v6656_v16, %v6264_v51  ;;  %v6456_v31 = vadd.f32 %v12153_v52, %v4421_v20  ;;  %v6270_v12 = vadd.f32 %v12218_v41, %v4235_v39  ;;  %v4274_v50 = vadd.f32 %v15460_v35, %v15459_v9  ;;  %v15463_v51 = vld [vmem:[#allocation306_spill] sm:$0xff]  ;;  %v15464_v16 = vld [vmem:[#allocation403_spill] sm:$0xff] }
 0x593   : > { %4535 = vmatmul.f32.gmra.mxu2 %v15450_v59  ;;  %7619 = vmatmul.msk.f32.gmra.mxu1 %vm3459_vm4, %v15404_v14  ;;  %v4238_v59 = vadd.f32 %v15458_v19, %v15457_v53  ;;  %v6715_v33 = vmax.f32 %v6714_v48, %v6297_v47  ;;  %v6303_v14 = vadd.f32 %v12079_v27, %v4268_v56  ;;  %v15466_v19 = vld [vmem:[#allocation184_spill] sm:$0xff] }
 0x594   : > { %v12491_v20 = vadd.f32 %v15463_v51, %v15462_v0  ;;  %v6908_v39 = vmax.f32 %v6907_v57, %v6453_v3  ;;  %v6658_v62 = vmax.f32 %v6657_v7, %v6267_v54  ;;  %v4442_v47 = vadd.f32 %v15465_v46, %v15464_v16  ;;  %v4288_v48 = vpop.f32.mrf.mxu1  ;;  %v15467_v0 = vld [vmem:[#allocation400_spill] sm:$0xff]  ;;  %v15468_v51 = vld [vmem:[#allocation405_spill] sm:$0xff]  ;;  %v15469_v54 = vld [vmem:[#allocation406_spill] sm:$0xff] }
 0x595   : > { %v12496_v56 = vadd.f32 %v12172_v10, %v4424_v17  ;;  %v6716_v45 = vmax.f32 %v6715_v33, %v6300_v63  ;;  %v6306_v53 = vadd.f32 %v12092_v34, %v4271_v1  ;;  %v4277_v9 = vadd.f32 %v12289_v13, %v15466_v19  ;;  %v15470_v57 = vld [vmem:[#allocation409_spill] sm:$0xff]  ;;  %v12507_v16 = vpop.f32.mrf.mxu3  ;;  %v15475_v19 = vld [vmem:[#allocation411_spill] sm:$0xff] }
 0x596   : > { %7494 = vmatmul.msk.f32.gmra.mxu3 %vm3459_vm4, %v15461_v24  ;;  %v12501_v35 = vmax.f32 %v6908_v39, %v6456_v31  ;;  %v6659_v29 = vmax.f32 %v6658_v62, %v6270_v12  ;;  %v4439_v3 = vadd.f32 %v15468_v51, %v15467_v0  ;;  %v4445_v7 = vadd.f32 %v15470_v57, %v15469_v54  ;;  %v15471_v46 = vld [vmem:[#allocation37_spill] sm:$0xff]  ;;  %v15473_v12 = vld [vmem:[#allocation390_spill] sm:$0xff]  ;;  %v15474_v62 = vld [vmem:[#allocation408_spill] sm:$0xff] }
 0x597   : > { %v6273_v17 = vadd.f32 %v12235_v18, %v4238_v59  ;;  %v6717_v63 = vmax.f32 %v6716_v45, %v6303_v14  ;;  %v6309_v1 = vadd.f32 %v12108_v28, %v4274_v50  ;;  %v4280_v13 = vadd.f32 %v12348_v21, %v12326_v38  ;;  %v15472_v31 = vld [vmem:[#allocation381_spill] sm:$0xff]  ;;  %v15476_v21 = vld [vmem:[#allocation376_spill] sm:$0xff]  ;;  %v15478_v54 = vld [vmem:[#allocation410_spill] sm:$0xff] }
 0x598   : > { %5340 = vmatmul.f32.gmra.mxu0 %v15471_v46  ;;  %v4427_v33 = vadd.f32 %v15473_v12, %v15472_v31  ;;  %v6477_v39 = vadd.f32 %v11991_v60, %v4442_v47  ;;  %v4448_v0 = vadd.f32 %v15475_v19, %v15474_v62  ;;  %v6910_v59 = vmax.f32 %v12501_v35, %v12496_v56  ;;  %v15477_v45 = vld [vmem:[#allocation385_spill] sm:$0xff]  ;;  %v15479_v57 = vld [vmem:[#allocation188_spill] sm:$0xff] }
 0x599   : > { %v6718_v14 = vmax.f32 %v6717_v63, %v6306_v53  ;;  %v6312_v50 = vadd.f32 %v12153_v52, %v4277_v9  ;;  %v4283_v38 = vadd.f32 %v12399_v25, %v12377_v23  ;;  %v4241_v60 = vadd.f32 %v15477_v45, %v15476_v21  ;;  %v12536_v9 = vpop.f32.mrf.mxu2  ;;  %v3890_v23 = vpop.f32.mrf.mxu0  ;;  %v15480_v25 = vld [vmem:[#allocation47_spill] sm:$0xff] }
 0x59a   : > { %v6474_v47 = vadd.f32 %v12004_v61, %v4439_v3  ;;  %v6480_v51 = vadd.f32 %v12009_v4, %v4445_v7  ;;  %v6315_v56 = vadd.f32 %v12172_v10, %v4280_v13  ;;  %v4286_v53 = vadd.f32 %v12451_v40, %v12432_v43  ;;  %v15481_v3 = vld [vmem:[#allocation414_spill] sm:$0xff]  ;;  %v15483_v63 = vld [vmem:[#allocation383_spill] sm:$0xff] }
 0x59b   : > { %4538 = vmatmul.f32.gmra.mxu2 %v15471_v46  ;;  %7620 = vmatmul.msk.f32.gmra.mxu1 %vm3459_vm4, %v15422_v6  ;;  %v4451_v46 = vadd.f32 %v15479_v57, %v15478_v54  ;;  %v6660_v6 = vmax.f32 %v6659_v29, %v6273_v17  ;;  %v6719_v31 = vmax.f32 %v6718_v14, %v6309_v1  ;;  %v15482_v7 = vld [vmem:[#allocation174_spill] sm:$0xff]  ;;  %v15484_v1 = vld [vmem:[#allocation391_spill] sm:$0xff] }
 0x59c   : > { %v6462_v61 = vadd.f32 %v12218_v41, %v4427_v33  ;;  %v6963_v35 = vmax.f32 %v6474_v47, %v6477_v39  ;;  %v6483_v4 = vadd.f32 %v12021_v30, %v4448_v0  ;;  %v4454_v29 = vadd.f32 %v15482_v7, %v15481_v3  ;;  %v4291_v17 = vpop.f32.mrf.mxu1  ;;  %v15485_v33 = vld [vmem:[#allocation121_spill] sm:$0xff]  ;;  %v15486_v39 = vld [vmem:[#allocation8_spill] sm:$0xff]  ;;  %v15488_v45 = vld [vmem:[#allocation387_spill] sm:$0xff] }
 0x59d   : > { %v4244_v13 = vadd.f32 %v15484_v1, %v15483_v63  ;;  %v6720_v12 = vmax.f32 %v6719_v31, %v6312_v50  ;;  %v6318_v43 = vadd.f32 %v12218_v41, %v4283_v38  ;;  %v4289_v40 = vadd.f32 %v4288_v48, %v3887_v42  ;;  %v12551_v30 = vpop.f32.mrf.mxu3  ;;  %v15487_v0 = vld [vmem:[#allocation40_spill] sm:$0xff]  ;;  %v15489_v47 = vld [vmem:[#allocation395_spill] sm:$0xff]  ;;  %v15492_v31 = vld [vmem:[#allocation393_spill] sm:$0xff] }
 0x59e   : > { %7495 = vmatmul.msk.f32.gmra.mxu3 %vm3459_vm4, %v15480_v25  ;;  %v6276_v62 = vadd.f32 %v12252_v49, %v4241_v60  ;;  %v6964_v19 = vmax.f32 %v6963_v35, %v6480_v51  ;;  %v6486_v14 = vadd.f32 %v12033_v26, %v4451_v46  ;;  %v4457_v21 = vadd.f32 %v15486_v39, %v15485_v33  ;;  %v15490_v60 = vld [vmem:[#allocation194_spill] sm:$0xff]  ;;  %v15494_v7 = vld [vmem:[#allocation204_spill] sm:$0xff] }
 0x59f   : > { %v4430_v54 = vadd.f32 %v15489_v47, %v15488_v45  ;;  %v6721_v57 = vmax.f32 %v6720_v12, %v6315_v56  ;;  %v6321_v50 = vadd.f32 %v12235_v18, %v4286_v53  ;;  %v4292_v38 = vadd.f32 %v4291_v17, %v3890_v23  ;;  %v15491_v51 = vld [vmem:[#allocation186_spill] sm:$0xff]  ;;  %v15496_v1 = vld [vmem:[#allocation396_spill] sm:$0xff] }
 0x5a0   : > { %5343 = vmatmul.f32.gmra.mxu0 %v15487_v0  ;;  %v6965_v42 = vmax.f32 %v6964_v19, %v6483_v4  ;;  %v6489_v48 = vadd.f32 %v12048_v55, %v4454_v29  ;;  %v4460_v26 = vadd.f32 %v15491_v51, %v15490_v60  ;;  %v6279_v46 = vadd.f32 %v12309_v11, %v4244_v13  ;;  %v15493_v35 = vld [vmem:[#allocation398_spill] sm:$0xff]  ;;  %v15495_v29 = vld [vmem:[#allocation212_spill] sm:$0xff]  ;;  %v15503_v51 = vld [vmem:[#allocation133_spill] sm:$0xff] }
 0x5a1   : > { %v4433_v3 = vadd.f32 %v15493_v35, %v15492_v31  ;;  %v6722_v56 = vmax.f32 %v6721_v57, %v6318_v43  ;;  %v6324_v53 = vadd.f32 %v12252_v49, %v4289_v40  ;;  %v6661_v23 = vmax.f32 %v6660_v6, %v6276_v62  ;;  %v15497_v12 = vld [vmem:[#allocation402_spill] sm:$0xff]  ;;  %v4477_v13 = vpop.f32.mrf.mxu2  ;;  %v12574_v39 = vpop.f32.mrf.mxu0  ;;  %v15504_v35 = vld [vmem:[#allocation153_spill] sm:$0xff] }
 0x5a2   : > { %v6966_v4 = vmax.f32 %v6965_v42, %v6486_v14  ;;  %v6492_v55 = vadd.f32 %v12063_v37, %v4457_v21  ;;  %v4463_v17 = vadd.f32 %v15495_v29, %v15494_v7  ;;  %v6465_v63 = vadd.f32 %v12235_v18, %v4430_v54  ;;  %v15498_v43 = vld [vmem:[#allocation50_spill] sm:$0xff] }
 0x5a3   : > { %4541 = vmatmul.f32.gmra.mxu2 %v15487_v0  ;;  %7621 = vmatmul.msk.f32.gmra.mxu1 %vm3459_vm4, %v15439_v44  ;;  %v4436_v44 = vadd.f32 %v15497_v12, %v15496_v1  ;;  %v6723_v19 = vmax.f32 %v6722_v56, %v6321_v50  ;;  %v6327_v33 = vadd.f32 %v12309_v11, %v4292_v38  ;;  %v15499_v62 = vld [vmem:[#allocation126_spill] sm:$0xff]  ;;  %v15500_v38 = vld [vmem:[#allocation208_spill] sm:$0xff]  ;;  %v6600_v60 = vrot.slane %v12394_v15, 4  ;;  %v15508_v1 = vld [vmem:[#allocation55_spill] sm:$0xff] }
 0x5a4   : > { %v6420_v37 = vadd.f32 %v12252_v49, %v12409_v36  ;;  %v6967_v6 = vmax.f32 %v6966_v4, %v6489_v48  ;;  %v6495_v40 = vadd.f32 %v12079_v27, %v4460_v26  ;;  %v4466_v14 = vadd.f32 %v12390_v58, %v15499_v62  ;;  %v15501_v27 = vld [vmem:[#allocation42_spill] sm:$0xff]  ;;  %v15513_v62 = vld [vmem:[#allocation161_spill] sm:$0xff] }
 0x5a5   : > { %v6911_v21 = vmax.f32 %v6910_v59, %v6462_v61  ;;  %v6662_v0 = vmax.f32 %v6661_v23, %v6279_v46  ;;  %v6468_v45 = vadd.f32 %v12252_v49, %v4433_v3  ;;  %v6724_v47 = vmax.f32 %v6723_v19, %v6324_v53  ;;  %v15505_v3 = vld [vmem:[#allocation159_spill] sm:$0xff]  ;;  %v15506_v23 = vld [vmem:[#allocation210_spill] sm:$0xff]  ;;  %v15509_v19 = vld [vmem:[#allocation200_spill] sm:$0xff] }
 0x5a6   : > { %7496 = vmatmul.msk.f32.gmra.mxu3 %vm3459_vm4, %v15498_v43  ;;  %v6849_v54 = vmax.f32 %v12374_v8, %v12385_v22  ;;  %v6968_v57 = vmax.f32 %v6967_v6, %v6492_v55  ;;  %v6498_v50 = vadd.f32 %v12092_v34, %v4463_v17  ;;  %v4469_v36 = vadd.f32 %v12442_v2, %v15500_v38  ;;  %v15502_v2 = vld [vmem:[#allocation202_spill] sm:$0xff] }
 0x5a7   : > { %v6423_v58 = vadd.f32 %v12309_v11, %v12491_v20  ;;  %v6912_v59 = vmax.f32 %v6911_v21, %v6465_v63  ;;  %v6471_v61 = vadd.f32 %v12309_v11, %v4436_v44  ;;  %v6725_v48 = vmax.f32 %v6724_v47, %v6327_v33  ;;  %v15510_v33 = vld [vmem:[#allocation180_spill] sm:$0xff] }
 0x5a8   : > { %5346 = vmatmul.f32.gmra.mxu0 %v15501_v27  ;;  %v6969_v22 = vmax.f32 %v6968_v57, %v6495_v40  ;;  %v6501_v8 = vadd.f32 %v12108_v28, %v4466_v14  ;;  %v4472_v34 = vadd.f32 %v12485_v5, %v12413_v32  ;;  %v6536_v20 = vmax.f32 %v15503_v51, %v15502_v2  ;;  %v7097_v5 = vld [vmem:[%s14379_s4 + $0x78] sm:$0xff]  ;;  %v15514_v14 = vld [vmem:[#allocation163_spill] sm:$0xff]  ;;  %v15518_v51 = vld [vmem:[#allocation177_spill] sm:$0xff] }
 0x5a9   : > { %v12589_v42 = vpop.f32.mrf.mxu3  ;;  %v6850_v26 = vmax.f32 %v6849_v54, %v6420_v37  ;;  %v6663_v46 = vrot.slane %v6662_v0, 4  ;;  %v6913_v31 = vmax.f32 %v6912_v59, %v6468_v45  ;;  %v4331_v56 = vadd.f32 %v15505_v3, %v15504_v35  ;;  %v4480_v17 = vpop.f32.mrf.mxu2  ;;  %7210 = vmatpush.msra.mxu2 %v7097_v5  ;;  %v15511_v37 = vld [vmem:[#allocation196_spill] sm:$0xff]  ;;  %v7113_v35 = vld [vmem:[%s14379_s4 + $0xf8] sm:$0xff] }
 0x5aa   : > { %v6970_v53 = vmax.f32 %v6969_v22, %v6498_v50  ;;  %v6504_v28 = vadd.f32 %v12153_v52, %v4469_v36  ;;  %v4475_v32 = vadd.f32 %v12536_v9, %v15506_v23  ;;  %v6726_v29 = vrot.slane %v6725_v48, 4  ;;  %v4294_v54 = vpop.f32.mrf.mxu1  ;;  %v15517_v36 = vld [vmem:[#allocation173_spill] sm:$0xff]  ;;  %7230 = vmatpush.msra.mxu3 %v7113_v35 }
 0x5ab   : > { %4544 = vmatmul.f32.gmra.mxu2 %v15501_v27  ;;  %7622 = vmatmul.msk.f32.gmra.mxu1 %vm3459_vm4, %v15461_v24  ;;  %v15507_v24 = vld [vmem:[#allocation206_spill] sm:$0xff]  ;;  %v6851_v55 = vmax.f32 %v6850_v26, %v6423_v58  ;;  %v6914_v7 = vmax.f32 %v6913_v31, %v6471_v61  ;;  %v6601_v52 = vmax.f32 %v12394_v15, %v6600_v60  ;;  %v6537_v45 = vrot.slane %v6536_v20, 4 }
 0x5ac   : > { %v6363_v4 = vadd.f32 %v12172_v10, %v15507_v24  ;;  %v6971_v12 = vmax.f32 %v6970_v53, %v6501_v8  ;;  %v6507_v9 = vadd.f32 %v12172_v10, %v4472_v34  ;;  %v4478_v44 = vadd.f32 %v4477_v13, %v12507_v16  ;;  %v15515_v16 = vld [vmem:[#allocation49_spill] sm:$0xff]  ;;  %v15516_v13 = vld [vmem:[#allocation167_spill] sm:$0xff]  ;;  %v15519_v26 = vld [vmem:[#allocation182_spill] sm:$0xff] }
 0x5ad   : > { %v3896_v63 = vpop.f32.mrf.mxu0  ;;  %v15512_v6 = vmax.f32 %v15510_v33, %v15511_v37  ;;  %v4334_v21 = vadd.f32 %v15514_v14, %v15513_v62  ;;  %v6664_v47 = vmax.f32 %v6662_v0, %v6663_v46  ;;  %v6366_v57 = vadd.f32 %v12218_v41, %v4331_v56  ;;  %v8139_v14 = vld [vmem:[%s14377_s2 + $0x18] sm:$0xff] }
 0x5ae   : > { %7497 = vmatmul.msk.f32.gmra.mxu3 %vm3459_vm4, %v15508_v1  ;;  %v6972_v50 = vmax.f32 %v6971_v12, %v6504_v28  ;;  %v6510_v15 = vadd.f32 %v12218_v41, %v4475_v32  ;;  %v4481_v10 = vadd.f32 %v4480_v17, %v12551_v30  ;;  %v4337_v27 = vadd.f32 %v15517_v36, %v15516_v13  ;;  %v15522_v13 = vld [vmem:[#allocation62_spill] sm:$0xff] }
 0x5af   : > { %v6782_v40 = vmax.f32 %v15512_v6, %v15509_v19  ;;  %v6852_v58 = vrot.slane %v6851_v55, 4  ;;  %v6915_v59 = vrot.slane %v6914_v7, 4  ;;  %v6727_v61 = vmax.f32 %v6725_v48, %v6726_v29  ;;  %v15521_v19 = vld [vmem:[#allocation52_spill] sm:$0xff] }
 0x5b0   : > { %5349 = vmatmul.f32.gmra.mxu0 %v15515_v16  ;;  %v6602_v0 = vrot.slane %v6601_v52, 2  ;;  %v6973_v22 = vmax.f32 %v6972_v50, %v6507_v9  ;;  %v6513_v8 = vadd.f32 %v12235_v18, %v4478_v44  ;;  %v6369_v41 = vadd.f32 %v12235_v18, %v4334_v21  ;;  %v15520_v18 = vld [vmem:[#allocation59_spill] sm:$0xff] }
 0x5b1   : > { %v12628_v38 = vpop.f32.mrf.mxu3  ;;  %v6783_v60 = vmax.f32 %v6782_v40, %v6363_v4  ;;  %v6538_v30 = vmax.f32 %v6536_v20, %v6537_v45  ;;  %v6665_v34 = vrot.slane %v6664_v47, 2  ;;  %v4340_v46 = vadd.f32 %v15519_v26, %v15518_v51 }
 0x5b2   : > { %v6974_v31 = vmax.f32 %v6973_v22, %v6510_v15  ;;  %v6516_v48 = vadd.f32 %v12252_v49, %v4481_v10  ;;  %v6372_v3 = vadd.f32 %v12252_v49, %v4337_v27  ;;  %v6853_v56 = vmax.f32 %v6851_v55, %v6852_v58 }
 0x5b3   : > { %4547 = vmatmul.f32.gmra.mxu2 %v15515_v16  ;;  %7623 = vmatmul.msk.f32.gmra.mxu1 %vm3459_vm4, %v15480_v25  ;;  %v6784_v2 = vmax.f32 %v6783_v60, %v6366_v57  ;;  %v6916_v53 = vmax.f32 %v6914_v7, %v6915_v59  ;;  %v6728_v25 = vrot.slane %v6727_v61, 2  ;;  %v6603_v23 = vmax.f32 %v6601_v52, %v6602_v0  ;;  %v7026_v57 = vld [vmem:[%s14378_s3] sm:$0x7] }
 0x5b4   : > { %v6975_v32 = vmax.f32 %v6974_v31, %v6513_v8  ;;  %v4295_v5 = vadd.f32 %v4294_v54, %v12574_v39  ;;  %v6539_v29 = vrot.slane %v6538_v30, 2  ;;  %v6666_v17 = vmax.f32 %v6664_v47, %v6665_v34 }
 0x5b5   : > { %v12647_v20 = vpop.f32.mrf.mxu0  ;;  %v6785_v4 = vmax.f32 %v6784_v2, %v6369_v41  ;;  %v6375_v55 = vadd.f32 %v12309_v11, %v4340_v46  ;;  %v6854_v33 = vrot.slane %v6853_v56, 2  ;;  %v6917_v37 = vrot.slane %v6916_v53, 2 }
 0x5b6   : > { %v4483_v28 = vpop.f32.mrf.mxu2  ;;  %7498 = vmatmul.msk.f32.gmra.mxu3 %vm3459_vm4, %v15520_v18  ;;  %v6976_v7 = vmax.f32 %v6975_v32, %v6516_v48  ;;  %v6729_v39 = vmax.f32 %v6727_v61, %v6728_v25  ;;  %v6604_v6 = vrot.slane %v6603_v23, 1  ;;  %v6667_v21 = vrot.slane %v6666_v17, 1 }
 0x5b7   : > { %v4484_v24 = vadd.f32 %v4483_v28, %v12589_v42  ;;  %v6786_v52 = vmax.f32 %v6785_v4, %v6372_v3  ;;  %v8138_v42 = vld [vmem:[%s14377_s2] sm:$0xff]  ;;  %v6855_v50 = vmax.f32 %v6853_v56, %v6854_v33  ;;  %v6918_v15 = vmax.f32 %v6916_v53, %v6917_v37 }
 0x5b8   : > { %v4297_v49 = vpop.f32.mrf.mxu1  ;;  %5352 = vmatmul.f32.gmra.mxu0 %v15521_v19  ;;  %v6330_v40 = vadd.f32 %v8138_v42, %v4295_v5  ;;  %v6730_v10 = vrot.slane %v6729_v39, 1  ;;  %v6605_v27 = vmax.f32 %v6603_v23, %v6604_v6  ;;  %v6668_v60 = vmax.f32 %v6666_v17, %v6667_v21  ;;  %v12678_v23 = vld [vmem:[%s14377_s2 + $0x8] sm:$0xff]  ;;  %v12691_v17 = vld [vmem:[%s14377_s2 + $0x10] sm:$0xff] }
 0x5b9   : > { %v6519_v12 = vadd.f32 %v12309_v11, %v4484_v24  ;;  %v4298_v9 = vadd.f32 %v4297_v49, %v3896_v63  ;;  %v4907_v44 = vpop.f32.mrf.mxu3  ;;  %v6540_v63 = vmax.f32 %v6538_v30, %v6539_v29  ;;  %v6787_v45 = vmax.f32 %v6786_v52, %v6375_v55  ;;  %v15523_v30 = vld [vmem:[#allocation54_spill] sm:$0xff]  ;;  %v15524_v24 = vld [vmem:[#allocation67_spill] sm:$0xff]  ;;  %v15525_v6 = vld [vmem:[#allocation61_spill] sm:$0xff] }
 0x5ba   : > { %v7028_v22 = vperm.slane %v7026_v57, 0  ;;  %v6856_v2 = vrot.slane %v6855_v50, 1  ;;  %v6919_v51 = vrot.slane %v6918_v15, 1  ;;  %v6731_v26 = vmax.f32 %v6729_v39, %v6730_v10 }
 0x5bb   : > { %v6977_v62 = vmax.f32 %v6976_v7, %v6519_v12  ;;  %v6333_v11 = vadd.f32 %v8139_v14, %v4298_v9  ;;  %4550 = vmatmul.f32.gmra.mxu2 %v15521_v19  ;;  %7624 = vmatmul.msk.f32.gmra.mxu1 %vm3459_vm4, %v15498_v43  ;;  %v6541_v61 = vrot.slane %v6540_v63, 1  ;;  %v12696_v19 = vld [vmem:[%s14377_s2 + $0x28] sm:$0xff] }
 0x5bc   : > { %v7037_v46 = vadd.f32 %v7028_v22, %v6605_v27  ;;  %v7040_v35 = vadd.f32 %v7028_v22, %v6668_v60  ;;  %v6857_v53 = vmax.f32 %v6855_v50, %v6856_v2  ;;  %v6920_v25 = vmax.f32 %v6918_v15, %v6919_v51  ;;  %v12709_v27 = vld [vmem:[%s14377_s2 + $0x38] sm:$0xff] }
 0x5bd   : > { %v6978_v47 = vrot.slane %v6977_v62, 4  ;;  %v6774_v54 = vmax.f32 %v6330_v40, %v6333_v11  ;;  %v5308_v36 = vpop.f32.mrf.mxu0  ;;  %v6542_v48 = vmax.f32 %v6540_v63, %v6541_v61  ;;  %v7043_v28 = vadd.f32 %v7028_v22, %v6731_v26  ;;  %v15527_v26 = vld [vmem:[#allocation64_spill] sm:$0xff] }
 0x5be   : > { %v4503_v16 = vpop.f32.mrf.mxu2  ;;  %7499 = vmatmul.msk.f32.gmra.mxu3 %vm3459_vm4, %v15522_v13  ;;  %v7061_v29 = vmax.f32 %v7037_v46, 0.0  ;;  %v7052_v14 = vadd.f32 %v7028_v22, %v6920_v25 }
 0x5bf   : > { %v6979_v58 = vmax.f32 %v6977_v62, %v6978_v47  ;;  %v6788_v43 = vmax.f32 %v6787_v45, %v6774_v54  ;;  %v4905_v59 = vadd.f32 %v12628_v38, %v4503_v16  ;;  %v7034_v7 = vadd.f32 %v7028_v22, %v6542_v48 }
 0x5c0   : > { %v5706_v0 = vpop.f32.mrf.mxu1  ;;  %5355 = vmatmul.f32.gmra.mxu0 %v15523_v30  ;;  %v7067_v40 = vmax.f32 %v7043_v28, 0.0  ;;  %v7158_v11 = vrot.slane %v7061_v29, 7 }
 0x5c1   : > { %v6980_v8 = vrot.slane %v6979_v58, 2  ;;  %v12669_v41 = vpop.f32.mrf.mxu3  ;;  %v6789_v34 = vrot.slane %v6788_v43, 4  ;;  %v5707_v32 = vadd.f32 %v5706_v0, %v12647_v20  ;;  %v7064_v20 = vmax.f32 %v7040_v35, 0.0 }
 0x5c2   : > { %v6139_v52 = vadd.f32 %v12678_v23, %v4905_v59  ;;  %v7058_v57 = vmax.f32 %v7034_v7, 0.0  ;;  %v7164_v16 = vrot.slane %v7067_v40, 5  ;;  %v12744_v7 = vld [vmem:[%s14377_s2 + $0x58] sm:$0xff] }
 0x5c3   : > { %v6981_v31 = vmax.f32 %v6979_v58, %v6980_v8  ;;  %4553 = vmatmul.f32.gmra.mxu2 %v15523_v30  ;;  %7625 = vmatmul.msk.f32.gmra.mxu1 %vm3459_vm4, %v15508_v1  ;;  %v6790_v38 = vmax.f32 %v6788_v43, %v6789_v34  ;;  %v12684_v1 = vld [vmem:[%s14377_s2 + $0x20] sm:$0xff]  ;;  %v6140_v62 = vadd.f32 %v12691_v17, %v5707_v32  ;;  %v7161_v47 = vrot.slane %v7064_v20, 6 }
 0x5c4   : > { %v15526_v58 = vld [vmem:[#allocation71_spill] sm:$0xff]  ;;  %v7076_v43 = vmax.f32 %v7052_v14, 0.0  ;;  %v7160_v60 = vsel %vm7159_vm5, %v7158_v11, %v7058_v57  ;;  %v12762_v11 = vld [vmem:[%s14377_s2 + $0x70] sm:$0xff] }
 0x5c5   : > { %v6982_v3 = vrot.slane %v6981_v31, 1  ;;  %v6791_v56 = vrot.slane %v6790_v38, 2  ;;  %v5311_v4 = vpop.f32.mrf.mxu0  ;;  %v7163_v30 = vsel %vm7162_vm6, %v7161_v47, %v7160_v60  ;;  %v15533_v60 = vld [vmem:[#allocation76_spill] sm:$0xff] }
 0x5c6   : > { %v4506_v5 = vpop.f32.mrf.mxu2  ;;  %7500 = vmatmul.msk.f32.gmra.mxu3 %vm3459_vm4, %v15524_v24  ;;  %v7166_v46 = vsel %vm7165_vm7, %v7164_v16, %v7163_v30 }
 0x5c7   : > { %v4908_v49 = vadd.f32 %v4907_v44, %v4506_v5  ;;  %v6792_v55 = vmax.f32 %v6790_v38, %v6791_v56  ;;  %v6983_v12 = vmax.f32 %v6981_v31, %v6982_v3  ;;  %v7049_v44 = vadd.f32 %v7028_v22, %v6857_v53  ;;  %v12734_v5 = vld [vmem:[%s14377_s2 + $0x50] sm:$0xff] }
 0x5c8   : > { %v5709_v9 = vpop.f32.mrf.mxu1  ;;  %5358 = vmatmul.f32.gmra.mxu0 %v15525_v6  ;;  %v7173_v38 = vrot.slane %v7076_v43, 2  ;;  %v12780_v43 = vld [vmem:[%s14377_s2 + $0x88] sm:$0xff] }
 0x5c9   : > { %v6142_v33 = vadd.f32 %v12684_v1, %v4908_v49  ;;  %v5710_v37 = vadd.f32 %v5709_v9, %v5308_v36  ;;  %v4913_v39 = vpop.f32.mrf.mxu3  ;;  %v6793_v42 = vrot.slane %v6792_v55, 1  ;;  %v7055_v54 = vadd.f32 %v7028_v22, %v6983_v12 }
 0x5ca   : > { %v7073_v10 = vmax.f32 %v7049_v44, 0.0  ;;  %v15530_v44 = vld [vmem:[#allocation79_spill] sm:$0xff] }
 0x5cb   : > { %v6543_v63 = vmax.f32 %v6139_v52, %v6142_v33  ;;  %v6143_v21 = vadd.f32 %v12696_v19, %v5710_v37  ;;  %4556 = vmatmul.f32.gmra.mxu2 %v15525_v6  ;;  %7626 = vmatmul.msk.f32.gmra.mxu1 %vm3459_vm4, %v15520_v18  ;;  %v6794_v45 = vmax.f32 %v6792_v55, %v6793_v42  ;;  %v7079_v8 = vmax.f32 %v7055_v54, 0.0  ;;  %v15529_v52 = vld [vmem:[#allocation66_spill] sm:$0xff]  ;;  %v12755_v42 = vld [vmem:[%s14377_s2 + $0x68] sm:$0xff] }
 0x5cc   : > { %v7170_v31 = vrot.slane %v7073_v10, 3  ;;  %v15532_v10 = vld [vmem:[#allocation83_spill] sm:$0xff] }
 0x5cd   : > { %v6564_v50 = vmax.f32 %v6140_v62, %v6143_v21  ;;  %v7046_v15 = vadd.f32 %v7028_v22, %v6794_v45  ;;  %v5314_v18 = vpop.f32.mrf.mxu0  ;;  %v12718_v22 = vld [vmem:[%s14377_s2 + $0x40] sm:$0xff]  ;;  %v7176_v53 = vrot.slane %v7079_v8, 1  ;;  %v15531_v45 = vld [vmem:[#allocation73_spill] sm:$0xff] }
 0x5ce   : > { %v4509_v36 = vpop.f32.mrf.mxu2  ;;  %7501 = vmatmul.msk.f32.gmra.mxu3 %vm3459_vm4, %v15526_v58 }
 0x5cf   : > { %v4911_v59 = vadd.f32 %v12669_v41, %v4509_v36  ;;  %v7070_v61 = vmax.f32 %v7046_v15, 0.0  ;;  %v12773_v15 = vld [vmem:[%s14377_s2 + $0x80] sm:$0xff] }
 0x5d0   : > { %v5712_v0 = vpop.f32.mrf.mxu1  ;;  %5361 = vmatmul.f32.gmra.mxu0 %v15527_v26 }
 0x5d1   : > { %v6145_v34 = vadd.f32 %v12709_v27, %v4911_v59  ;;  %v5713_v2 = vadd.f32 %v5712_v0, %v5311_v4  ;;  %v4916_v51 = vpop.f32.mrf.mxu3  ;;  %v7167_v41 = vrot.slane %v7070_v61, 4  ;;  %v15528_v4 = vld [vmem:[#allocation74_spill] sm:$0xff] }
 0x5d3   : > { %v6544_v48 = vmax.f32 %v6543_v63, %v6145_v34  ;;  %v6146_v35 = vadd.f32 %v12718_v22, %v5713_v2  ;;  %4559 = vmatmul.f32.gmra.mxu2 %v15527_v26  ;;  %7627 = vmatmul.msk.f32.gmra.mxu1 %vm3459_vm4, %v15522_v13  ;;  %v7169_v3 = vsel %vm7168_vm8, %v7167_v41, %v7166_v46  ;;  %v7096_v34 = vld [vmem:[%s14379_s4 + $0x70] sm:$0xff]  ;;  %v15534_v26 = vld [vmem:[#allocation86_spill] sm:$0xff] }
 0x5d4   : > { %v7172_v56 = vsel %vm7171_vm9, %v7170_v31, %v7169_v3  ;;  %7211 = vmatpush.msra.mxu2 %v7096_v34 }
 0x5d5   : > { %v6565_v25 = vmax.f32 %v6564_v50, %v6146_v35  ;;  %v7175_v28 = vsel %vm7174_vm10, %v7173_v38, %v7172_v56  ;;  %v5317_v29 = vpop.f32.mrf.mxu0  ;;  %v12801_v38 = vld [vmem:[%s14377_s2 + $0xa0] sm:$0xff]  ;;  %v15535_v56 = vld [vmem:[#allocation78_spill] sm:$0xff] }
 0x5d6   : > { %v4512_v32 = vpop.f32.mrf.mxu2  ;;  %7502 = vmatmul.msk.f32.gmra.mxu3 %vm3459_vm4, %v15528_v4  ;;  %v12739_v13 = vsel %vm7177_vm11, %v7176_v53, %v7175_v28 }
 0x5d7   : > { %v4914_v49 = vadd.f32 %v4913_v39, %v4512_v32  ;;  %v7112_v32 = vld [vmem:[%s14379_s4 + $0xf0] sm:$0xff] }
 0x5d8   : > { %v5715_v55 = vpop.f32.mrf.mxu1  ;;  %5364 = vmatmul.f32.gmra.mxu0 %v15529_v52  ;;  %7231 = vmatpush.msra.mxu3 %v7112_v32  ;;  %v12876_v32 = vld [vmem:[%s14377_s2 + $0x100] sm:$0xff] }
 0x5d9   : > { %v6148_v20 = vadd.f32 %v12734_v5, %v4914_v49  ;;  %v5716_v12 = vadd.f32 %v5715_v55, %v5314_v18  ;;  %v4919_v9 = vpop.f32.mrf.mxu3  ;;  %v15536_v49 = vld [vmem:[#allocation91_spill] sm:$0xff] }
 0x5db   : > { %v6545_v33 = vmax.f32 %v6544_v48, %v6148_v20  ;;  %v6149_v37 = vadd.f32 %v12744_v7, %v5716_v12  ;;  %4562 = vmatmul.f32.gmra.mxu2 %v15529_v52  ;;  %7628 = vmatmul.msk.f32.gmra.mxu1 %vm3459_vm4, %v15524_v24 }
 0x5dd   : > { %v6566_v39 = vmax.f32 %v6565_v25, %v6149_v37  ;;  %v5320_v40 = vpop.f32.mrf.mxu0 }
 0x5de   : > { %v4515_v6 = vpop.f32.mrf.mxu2  ;;  %7503 = vmatmul.msk.f32.gmra.mxu3 %vm3459_vm4, %v15530_v44 }
 0x5df   : > { %v4917_v62 = vadd.f32 %v4916_v51, %v4515_v6  ;;  %v12794_v51 = vld [vmem:[%s14377_s2 + $0x98] sm:$0xff] }
 0x5e0   : > { %v5718_v14 = vpop.f32.mrf.mxu1  ;;  %5367 = vmatmul.f32.gmra.mxu0 %v15531_v45 }
 0x5e1   : > { %v6151_v24 = vadd.f32 %v12755_v42, %v4917_v62  ;;  %v5719_v63 = vadd.f32 %v5718_v14, %v5317_v29  ;;  %v4922_v21 = vpop.f32.mrf.mxu3  ;;  %v12815_v29 = vld [vmem:[%s14377_s2 + $0xb0] sm:$0xff]  ;;  %v12833_v14 = vld [vmem:[%s14377_s2 + $0xc8] sm:$0xff] }
 0x5e3   : > { %v6546_v47 = vmax.f32 %v6545_v33, %v6151_v24  ;;  %v6152_v54 = vadd.f32 %v12762_v11, %v5719_v63  ;;  %4565 = vmatmul.f32.gmra.mxu2 %v15531_v45  ;;  %7629 = vmatmul.msk.f32.gmra.mxu1 %vm3459_vm4, %v15526_v58  ;;  %v15538_v24 = vld [vmem:[#allocation95_spill] sm:$0xff] }
 0x5e5   : > { %v6567_v57 = vmax.f32 %v6566_v39, %v6152_v54  ;;  %v5323_v16 = vpop.f32.mrf.mxu0  ;;  %v15537_v39 = vld [vmem:[#allocation85_spill] sm:$0xff] }
 0x5e6   : > { %v4518_v50 = vpop.f32.mrf.mxu2  ;;  %7504 = vmatmul.msk.f32.gmra.mxu3 %vm3459_vm4, %v15532_v10 }
 0x5e7   : > { %v4920_v36 = vadd.f32 %v4919_v9, %v4518_v50  ;;  %v12822_v9 = vld [vmem:[%s14377_s2 + $0xb8] sm:$0xff] }
 0x5e8   : > { %v5721_v18 = vpop.f32.mrf.mxu1  ;;  %5370 = vmatmul.f32.gmra.mxu0 %v15533_v60 }
 0x5e9   : > { %v6154_v58 = vadd.f32 %v12773_v15, %v4920_v36  ;;  %v5722_v59 = vadd.f32 %v5721_v18, %v5320_v40  ;;  %v4925_v61 = vpop.f32.mrf.mxu3 }
 0x5eb   : > { %v6547_v0 = vmax.f32 %v6546_v47, %v6154_v58  ;;  %v6155_v8 = vadd.f32 %v12780_v43, %v5722_v59  ;;  %4568 = vmatmul.f32.gmra.mxu2 %v15533_v60  ;;  %7630 = vmatmul.msk.f32.gmra.mxu1 %vm3459_vm4, %v15528_v4  ;;  %v12840_v47 = vld [vmem:[%s14377_s2 + $0xd0] sm:$0xff]  ;;  %v12851_v59 = vld [vmem:[%s14377_s2 + $0xe0] sm:$0xff] }
 0x5ed   : > { %v6568_v30 = vmax.f32 %v6567_v57, %v6155_v8  ;;  %v5326_v41 = vpop.f32.mrf.mxu0 }
 0x5ee   : > { %v4521_v2 = vpop.f32.mrf.mxu2  ;;  %7505 = vmatmul.msk.f32.gmra.mxu3 %vm3459_vm4, %v15534_v26 }
 0x5ef   : > { %v4923_v46 = vadd.f32 %v4922_v21, %v4521_v2 }
 0x5f0   : > { %v5724_v31 = vpop.f32.mrf.mxu1  ;;  %5373 = vmatmul.f32.gmra.mxu0 %v15535_v56 }
 0x5f1   : > { %v6157_v48 = vadd.f32 %v12794_v51, %v4923_v46  ;;  %v5725_v35 = vadd.f32 %v5724_v31, %v5323_v16  ;;  %v4928_v3 = vpop.f32.mrf.mxu3 }
 0x5f3   : > { %v6548_v53 = vmax.f32 %v6547_v0, %v6157_v48  ;;  %v6158_v25 = vadd.f32 %v12801_v38, %v5725_v35  ;;  %4571 = vmatmul.f32.gmra.mxu2 %v15535_v56  ;;  %7631 = vmatmul.msk.f32.gmra.mxu1 %vm3459_vm4, %v15530_v44  ;;  %v15542_v56 = vld [vmem:[#allocation103_spill] sm:$0xff] }
 0x5f5   : > { %v6569_v28 = vmax.f32 %v6568_v30, %v6158_v25  ;;  %v5329_v55 = vpop.f32.mrf.mxu0  ;;  %v12858_v30 = vld [vmem:[%s14377_s2 + $0xe8] sm:$0xff] }
 0x5f6   : > { %v4524_v4 = vpop.f32.mrf.mxu2  ;;  %7506 = vmatmul.msk.f32.gmra.mxu3 %vm3459_vm4, %v15536_v49 }
 0x5f7   : > { %v4926_v20 = vadd.f32 %v4925_v61, %v4524_v4  ;;  %v15540_v61 = vld [vmem:[#allocation98_spill] sm:$0xff] }
 0x5f8   : > { %v5727_v12 = vpop.f32.mrf.mxu1  ;;  %5376 = vmatmul.f32.gmra.mxu0 %v15537_v39 }
 0x5f9   : > { %v6160_v52 = vadd.f32 %v12815_v29, %v4926_v20  ;;  %v5728_v33 = vadd.f32 %v5727_v12, %v5326_v41  ;;  %v4931_v37 = vpop.f32.mrf.mxu3  ;;  %v15541_v41 = vld [vmem:[#allocation90_spill] sm:$0xff]  ;;  %v15543_v20 = vld [vmem:[#allocation97_spill] sm:$0xff] }
 0x5fb   : > { %v6549_v6 = vmax.f32 %v6548_v53, %v6160_v52  ;;  %v6161_v44 = vadd.f32 %v12822_v9, %v5728_v33  ;;  %4574 = vmatmul.f32.gmra.mxu2 %v15537_v39  ;;  %7632 = vmatmul.msk.f32.gmra.mxu1 %vm3459_vm4, %v15532_v10  ;;  %v15539_v10 = vld [vmem:[#allocation88_spill] sm:$0xff]  ;;  %v12887_v39 = vld [vmem:[%s14377_s2 + $0x110] sm:$0xff] }
 0x5fd   : > { %v6570_v40 = vmax.f32 %v6569_v28, %v6161_v44  ;;  %v5332_v63 = vpop.f32.mrf.mxu0 }
 0x5fe   : > { %v4527_v62 = vpop.f32.mrf.mxu2  ;;  %7507 = vmatmul.msk.f32.gmra.mxu3 %vm3459_vm4, %v15538_v24 }
 0x5ff   : > { %v4929_v21 = vadd.f32 %v4928_v3, %v4527_v62  ;;  %v12869_v3 = vld [vmem:[%s14377_s2 + $0xf8] sm:$0xff] }
 0x600   : > { %v5730_v45 = vpop.f32.mrf.mxu1  ;;  %5379 = vmatmul.f32.gmra.mxu0 %v15539_v10 }
 0x601   : > { %v6163_v54 = vadd.f32 %v12833_v14, %v4929_v21  ;;  %v5731_v57 = vadd.f32 %v5730_v45, %v5329_v55  ;;  %v4934_v50 = vpop.f32.mrf.mxu3 }
 0x603   : > { %v6550_v16 = vmax.f32 %v6549_v6, %v6163_v54  ;;  %v6164_v36 = vadd.f32 %v12840_v47, %v5731_v57  ;;  %4577 = vmatmul.f32.gmra.mxu2 %v15539_v10  ;;  %7633 = vmatmul.msk.f32.gmra.mxu1 %vm3459_vm4, %v15534_v26  ;;  %v15544_v6 = vld [vmem:[#allocation107_spill] sm:$0xff]  ;;  %v15545_v54 = vld [vmem:[#allocation100_spill] sm:$0xff] }
 0x605   : > { %v6571_v18 = vmax.f32 %v6570_v40, %v6164_v36  ;;  %v5335_v60 = vpop.f32.mrf.mxu0  ;;  %v12905_v36 = vld [vmem:[%s14377_s2 + $0x128] sm:$0xff] }
 0x606   : > { %v4530_v58 = vpop.f32.mrf.mxu2  ;;  %7508 = vmatmul.msk.f32.gmra.mxu3 %vm3459_vm4, %v15540_v61 }
 0x607   : > { %v4932_v0 = vadd.f32 %v4931_v37, %v4530_v58 }
 0x608   : > { %v5733_v8 = vpop.f32.mrf.mxu1  ;;  %5382 = vmatmul.f32.gmra.mxu0 %v15541_v41 }
 0x609   : > { %v6166_v34 = vadd.f32 %v12851_v59, %v4932_v0  ;;  %v5734_v2 = vadd.f32 %v5733_v8, %v5332_v63  ;;  %v4937_v26 = vpop.f32.mrf.mxu3  ;;  %v12894_v63 = vld [vmem:[%s14377_s2 + $0x118] sm:$0xff]  ;;  %v12912_v8 = vld [vmem:[%s14377_s2 + $0x130] sm:$0xff] }
 0x60b   : > { %v6551_v46 = vmax.f32 %v6550_v16, %v6166_v34  ;;  %v6167_v31 = vadd.f32 %v12858_v30, %v5734_v2  ;;  %4580 = vmatmul.f32.gmra.mxu2 %v15541_v41  ;;  %7634 = vmatmul.msk.f32.gmra.mxu1 %vm3459_vm4, %v15536_v49 }
 0x60d   : > { %v6572_v48 = vmax.f32 %v6571_v18, %v6167_v31  ;;  %v5338_v53 = vpop.f32.mrf.mxu0  ;;  %v15546_v18 = vld [vmem:[#allocation110_spill] sm:$0xff] }
 0x60e   : > { %v4533_v35 = vpop.f32.mrf.mxu2  ;;  %7509 = vmatmul.msk.f32.gmra.mxu3 %vm3459_vm4, %v15542_v56 }
 0x60f   : > { %v4935_v25 = vadd.f32 %v4934_v50, %v4533_v35  ;;  %v12923_v35 = vld [vmem:[%s14377_s2 + $0x140] sm:$0xff] }
 0x610   : > { %v5736_v28 = vpop.f32.mrf.mxu1  ;;  %5385 = vmatmul.f32.gmra.mxu0 %v15543_v20 }
 0x611   : > { %v6169_v4 = vadd.f32 %v12869_v3, %v4935_v25  ;;  %v5737_v49 = vadd.f32 %v5736_v28, %v5335_v60  ;;  %v4940_v55 = vpop.f32.mrf.mxu3 }
 0x613   : > { %v6552_v12 = vmax.f32 %v6551_v46, %v6169_v4  ;;  %v6170_v52 = vadd.f32 %v12876_v32, %v5737_v49  ;;  %4583 = vmatmul.f32.gmra.mxu2 %v15543_v20  ;;  %7635 = vmatmul.msk.f32.gmra.mxu1 %vm3459_vm4, %v15538_v24  ;;  %v12930_v49 = vld [vmem:[%s14377_s2 + $0x148] sm:$0xff] }
 0x615   : > { %v6573_v33 = vmax.f32 %v6572_v48, %v6170_v52  ;;  %v5341_v44 = vpop.f32.mrf.mxu0 }
 0x616   : > { %v4536_v37 = vpop.f32.mrf.mxu2  ;;  %7510 = vmatmul.msk.f32.gmra.mxu3 %vm3459_vm4, %v15544_v6 }
 0x617   : > { %v4938_v40 = vadd.f32 %v4937_v26, %v4536_v37  ;;  %v15547_v26 = vld [vmem:[#allocation102_spill] sm:$0xff] }
 0x618   : > { %v5739_v62 = vpop.f32.mrf.mxu1  ;;  %5388 = vmatmul.f32.gmra.mxu0 %v15545_v54 }
 0x619   : > { %v6172_v24 = vadd.f32 %v12887_v39, %v4938_v40  ;;  %v5740_v21 = vadd.f32 %v5739_v62, %v5338_v53  ;;  %v4943_v45 = vpop.f32.mrf.mxu3  ;;  %v15548_v53 = vld [vmem:[#allocation115_spill] sm:$0xff]  ;;  %v12944_v62 = vld [vmem:[%s14377_s2 + $0x158] sm:$0xff] }
 0x61b   : > { %v6553_v57 = vmax.f32 %v6552_v12, %v6172_v24  ;;  %v6173_v50 = vadd.f32 %v12894_v63, %v5740_v21  ;;  %4586 = vmatmul.f32.gmra.mxu2 %v15545_v54  ;;  %7636 = vmatmul.msk.f32.gmra.mxu1 %vm3459_vm4, %v15540_v61  ;;  %v15549_v12 = vld [vmem:[#allocation109_spill] sm:$0xff]  ;;  %v15550_v24 = vld [vmem:[#allocation119_spill] sm:$0xff] }
 0x61d   : > { %v6574_v10 = vmax.f32 %v6573_v33, %v6173_v50  ;;  %v5344_v58 = vpop.f32.mrf.mxu0 }
 0x61e   : > { %v4539_v16 = vpop.f32.mrf.mxu2  ;;  %7511 = vmatmul.msk.f32.gmra.mxu3 %vm3459_vm4, %v15546_v18 }
 0x61f   : > { %v4941_v60 = vadd.f32 %v4940_v55, %v4539_v16  ;;  %v15551_v16 = vld [vmem:[#allocation112_spill] sm:$0xff] }
 0x620   : > { %v5742_v0 = vpop.f32.mrf.mxu1  ;;  %5391 = vmatmul.f32.gmra.mxu0 %v15547_v26 }
 0x621   : > { %v6175_v61 = vadd.f32 %v12905_v36, %v4941_v60  ;;  %v5743_v34 = vadd.f32 %v5742_v0, %v5341_v44  ;;  %v4946_v2 = vpop.f32.mrf.mxu3  ;;  %v7095_v44 = vld [vmem:[%s14379_s4 + $0x68] sm:$0xff] }
 0x622   : > { %7212 = vmatpush.msra.mxu2 %v7095_v44 }
 0x623   : > { %v6554_v41 = vmax.f32 %v6553_v57, %v6175_v61  ;;  %v6176_v46 = vadd.f32 %v12912_v8, %v5743_v34  ;;  %4589 = vmatmul.f32.gmra.mxu2 %v15547_v26  ;;  %7637 = vmatmul.msk.f32.gmra.mxu1 %vm3459_vm4, %v15542_v56  ;;  %v7111_v61 = vld [vmem:[%s14379_s4 + $0xe8] sm:$0xff]  ;;  %v15552_v26 = vld [vmem:[#allocation123_spill] sm:$0xff] }
 0x624   : > { %7232 = vmatpush.msra.mxu3 %v7111_v61  ;;  %v15557_v61 = vld [vmem:[#allocation127_spill] sm:$0xff] }
 0x625   : > { %v6575_v31 = vmax.f32 %v6574_v10, %v6176_v46  ;;  %v5347_v25 = vpop.f32.mrf.mxu0 }
 0x626   : > { %v4542_v48 = vpop.f32.mrf.mxu2  ;;  %7512 = vmatmul.msk.f32.gmra.mxu3 %vm3459_vm4, %v15548_v53 }
 0x627   : > { %v4944_v28 = vadd.f32 %v4943_v45, %v4542_v48 }
 0x628   : > { %v5745_v4 = vpop.f32.mrf.mxu1  ;;  %5394 = vmatmul.f32.gmra.mxu0 %v15549_v12 }
 0x629   : > { %v6178_v56 = vadd.f32 %v12923_v35, %v4944_v28  ;;  %v5746_v55 = vadd.f32 %v5745_v4, %v5344_v58  ;;  %v4949_v20 = vpop.f32.mrf.mxu3  ;;  %v15553_v4 = vld [vmem:[#allocation114_spill] sm:$0xff] }
 0x62b   : > { %v6555_v52 = vmax.f32 %v6554_v41, %v6178_v56  ;;  %v6179_v33 = vadd.f32 %v12930_v49, %v5746_v55  ;;  %4592 = vmatmul.f32.gmra.mxu2 %v15549_v12  ;;  %7638 = vmatmul.msk.f32.gmra.mxu1 %vm3459_vm4, %v15544_v6  ;;  %v12951_v6 = vld [vmem:[%s14377_s2 + $0x160] sm:$0xff] }
 0x62d   : > { %v6576_v37 = vmax.f32 %v6575_v31, %v6179_v33  ;;  %v5350_v21 = vpop.f32.mrf.mxu0 }
 0x62e   : > { %v4545_v40 = vpop.f32.mrf.mxu2  ;;  %7513 = vmatmul.msk.f32.gmra.mxu3 %vm3459_vm4, %v15550_v24 }
 0x62f   : > { %v4947_v45 = vadd.f32 %v4946_v2, %v4545_v40  ;;  %v12965_v2 = vld [vmem:[%s14377_s2 + $0x170] sm:$0xff] }
 0x630   : > { %v5748_v54 = vpop.f32.mrf.mxu1  ;;  %5397 = vmatmul.f32.gmra.mxu0 %v15551_v16 }
 0x631   : > { %v6181_v57 = vadd.f32 %v12944_v62, %v4947_v45  ;;  %v5749_v50 = vadd.f32 %v5748_v54, %v5347_v25  ;;  %v4952_v10 = vpop.f32.mrf.mxu3  ;;  %v15556_v54 = vld [vmem:[#allocation140_spill] sm:$0xff] }
 0x633   : > { %v6556_v58 = vmax.f32 %v6555_v52, %v6181_v57  ;;  %v6182_v60 = vadd.f32 %v12951_v6, %v5749_v50  ;;  %4595 = vmatmul.f32.gmra.mxu2 %v15551_v16  ;;  %7639 = vmatmul.msk.f32.gmra.mxu1 %vm3459_vm4, %v15546_v18  ;;  %v12972_v18 = vld [vmem:[%s14377_s2 + $0x178] sm:$0xff]  ;;  %v15554_v52 = vld [vmem:[#allocation132_spill] sm:$0xff] }
 0x635   : > { %v6577_v0 = vmax.f32 %v6576_v37, %v6182_v60  ;;  %v5353_v41 = vpop.f32.mrf.mxu0 }
 0x636   : > { %v4548_v34 = vpop.f32.mrf.mxu2  ;;  %7514 = vmatmul.msk.f32.gmra.mxu3 %vm3459_vm4, %v15552_v26 }
 0x637   : > { %v4950_v46 = vadd.f32 %v4949_v20, %v4548_v34 }
 0x638   : > { %v5751_v31 = vpop.f32.mrf.mxu1  ;;  %5400 = vmatmul.f32.gmra.mxu0 %v15553_v4 }
 0x639   : > { %v6184_v48 = vadd.f32 %v12965_v2, %v4950_v46  ;;  %v5752_v25 = vadd.f32 %v5751_v31, %v5350_v21  ;;  %v4955_v28 = vpop.f32.mrf.mxu3  ;;  %v15555_v21 = vld [vmem:[#allocation122_spill] sm:$0xff] }
 0x63b   : > { %v12976_v56 = vmax.f32 %v6556_v58, %v6184_v48  ;;  %v6185_v55 = vadd.f32 %v12972_v18, %v5752_v25  ;;  %4598 = vmatmul.f32.gmra.mxu2 %v15553_v4  ;;  %7640 = vmatmul.msk.f32.gmra.mxu1 %vm3459_vm4, %v15548_v53  ;;  %v15558_v48 = vld [vmem:[#allocation146_spill] sm:$0xff] }
 0x63d   : > { %v12982_v20 = vmax.f32 %v6577_v0, %v6185_v55  ;;  %v5356_v33 = vpop.f32.mrf.mxu0  ;;  %v15559_v55 = vld [vmem:[#allocation130_spill] sm:$0xff] }
 0x63e   : > { %v4551_v12 = vpop.f32.mrf.mxu2  ;;  %7515 = vmatmul.msk.f32.gmra.mxu3 %vm3459_vm4, %v15554_v52 }
 0x63f   : > { %v4953_v37 = vadd.f32 %v4952_v10, %v4551_v12 }
 0x640   : > { %v5754_v44 = vpop.f32.mrf.mxu1  ;;  %5403 = vmatmul.f32.gmra.mxu0 %v15555_v21 }
 0x641   : > { %v4958_v40 = vpop.f32.mrf.mxu3  ;;  %v5755_v57 = vadd.f32 %v5754_v44, %v5353_v41  ;;  %v6187_v58 = vadd.f32 %v12678_v23, %v4953_v37  ;;  %v15560_v37 = vld [vmem:[#allocation156_spill] sm:$0xff] }
 0x643   : > { %4601 = vmatmul.f32.gmra.mxu2 %v15555_v21  ;;  %7641 = vmatmul.msk.f32.gmra.mxu1 %vm3459_vm4, %v15550_v24  ;;  %v6188_v34 = vadd.f32 %v12691_v17, %v5755_v57  ;;  %v15561_v57 = vld [vmem:[#allocation144_spill] sm:$0xff] }
 0x645   : > { %v5359_v53 = vpop.f32.mrf.mxu0 }
 0x646   : > { %v4554_v45 = vpop.f32.mrf.mxu2  ;;  %7516 = vmatmul.msk.f32.gmra.mxu3 %vm3459_vm4, %v15556_v54 }
 0x647   : > { %v4956_v50 = vadd.f32 %v4955_v28, %v4554_v45 }
 0x648   : > { %v5757_v16 = vpop.f32.mrf.mxu1  ;;  %5406 = vmatmul.f32.gmra.mxu0 %v15557_v61 }
 0x649   : > { %v6190_v10 = vadd.f32 %v12684_v1, %v4956_v50  ;;  %v5758_v60 = vadd.f32 %v5757_v16, %v5356_v33  ;;  %v4961_v0 = vpop.f32.mrf.mxu3 }
 0x64b   : > { %v6606_v46 = vmax.f32 %v6187_v58, %v6190_v10  ;;  %v6191_v24 = vadd.f32 %v12696_v19, %v5758_v60  ;;  %4604 = vmatmul.f32.gmra.mxu2 %v15557_v61  ;;  %7642 = vmatmul.msk.f32.gmra.mxu1 %vm3459_vm4, %v15552_v26  ;;  %v15562_v58 = vld [vmem:[#allocation164_spill] sm:$0xff] }
 0x64d   : > { %v6627_v41 = vmax.f32 %v6188_v34, %v6191_v24  ;;  %v5362_v23 = vpop.f32.mrf.mxu0 }
 0x64e   : > { %v4557_v31 = vpop.f32.mrf.mxu2  ;;  %7517 = vmatmul.msk.f32.gmra.mxu3 %vm3459_vm4, %v15558_v48 }
 0x64f   : > { %v4959_v1 = vadd.f32 %v4958_v40, %v4557_v31  ;;  %v15564_v31 = vld [vmem:[#allocation170_spill] sm:$0xff] }
 0x650   : > { %v5760_v25 = vpop.f32.mrf.mxu1  ;;  %5409 = vmatmul.f32.gmra.mxu0 %v15559_v55 }
 0x651   : > { %v6193_v28 = vadd.f32 %v12709_v27, %v4959_v1  ;;  %v5761_v4 = vadd.f32 %v5760_v25, %v5359_v53  ;;  %v4964_v17 = vpop.f32.mrf.mxu3 }
 0x653   : > { %v6607_v19 = vmax.f32 %v6606_v46, %v6193_v28  ;;  %v6194_v12 = vadd.f32 %v12718_v22, %v5761_v4  ;;  %4607 = vmatmul.f32.gmra.mxu2 %v15559_v55  ;;  %7643 = vmatmul.msk.f32.gmra.mxu1 %vm3459_vm4, %v15554_v52  ;;  %v15563_v46 = vld [vmem:[#allocation151_spill] sm:$0xff] }
 0x655   : > { %v6628_v26 = vmax.f32 %v6627_v41, %v6194_v12  ;;  %v5365_v44 = vpop.f32.mrf.mxu0 }
 0x656   : > { %v4560_v33 = vpop.f32.mrf.mxu2  ;;  %7518 = vmatmul.msk.f32.gmra.mxu3 %vm3459_vm4, %v15560_v37 }
 0x657   : > { %v4962_v40 = vadd.f32 %v4961_v0, %v4560_v33 }
 0x658   : > { %v5763_v27 = vpop.f32.mrf.mxu1  ;;  %5412 = vmatmul.f32.gmra.mxu0 %v15561_v57 }
 0x659   : > { %v6196_v21 = vadd.f32 %v12734_v5, %v4962_v40  ;;  %v5764_v45 = vadd.f32 %v5763_v27, %v5362_v23  ;;  %v4967_v53 = vpop.f32.mrf.mxu3 }
 0x65b   : > { %v6608_v22 = vmax.f32 %v6607_v19, %v6196_v21  ;;  %v6197_v50 = vadd.f32 %v12744_v7, %v5764_v45  ;;  %4610 = vmatmul.f32.gmra.mxu2 %v15561_v57  ;;  %7644 = vmatmul.msk.f32.gmra.mxu1 %vm3459_vm4, %v15556_v54  ;;  %v7094_v19 = vld [vmem:[%s14379_s4 + $0x60] sm:$0xff]  ;;  %v15567_v21 = vld [vmem:[#allocation168_spill] sm:$0xff] }
 0x65c   : > { %7213 = vmatpush.msra.mxu2 %v7094_v19  ;;  %v7110_v57 = vld [vmem:[%s14379_s4 + $0xe0] sm:$0xff] }
 0x65d   : > { %v6629_v52 = vmax.f32 %v6628_v26, %v6197_v50  ;;  %v5368_v10 = vpop.f32.mrf.mxu0  ;;  %v15566_v26 = vld [vmem:[#allocation179_spill] sm:$0xff]  ;;  %7233 = vmatpush.msra.mxu3 %v7110_v57 }
 0x65e   : > { %v4563_v16 = vpop.f32.mrf.mxu2  ;;  %7519 = vmatmul.msk.f32.gmra.mxu3 %vm3459_vm4, %v15562_v58  ;;  %v15568_v50 = vld [vmem:[#allocation187_spill] sm:$0xff] }
 0x65f   : > { %v4965_v60 = vadd.f32 %v4964_v17, %v4563_v16  ;;  %v15565_v17 = vld [vmem:[#allocation154_spill] sm:$0xff]  ;;  %v15573_v19 = vld [vmem:[#allocation191_spill] sm:$0xff] }
 0x660   : > { %v5766_v5 = vpop.f32.mrf.mxu1  ;;  %5415 = vmatmul.f32.gmra.mxu0 %v15563_v46 }
 0x661   : > { %v6199_v0 = vadd.f32 %v12755_v42, %v4965_v60  ;;  %v5767_v61 = vadd.f32 %v5766_v5, %v5365_v44  ;;  %v4970_v34 = vpop.f32.mrf.mxu3  ;;  %v15569_v5 = vld [vmem:[#allocation175_spill] sm:$0xff] }
 0x663   : > { %v6609_v7 = vmax.f32 %v6608_v22, %v6199_v0  ;;  %v6200_v24 = vadd.f32 %v12762_v11, %v5767_v61  ;;  %4613 = vmatmul.f32.gmra.mxu2 %v15563_v46  ;;  %7645 = vmatmul.msk.f32.gmra.mxu1 %vm3459_vm4, %v15558_v48  ;;  %v15570_v46 = vld [vmem:[#allocation193_spill] sm:$0xff] }
 0x665   : > { %v6630_v54 = vmax.f32 %v6629_v52, %v6200_v24  ;;  %v5371_v23 = vpop.f32.mrf.mxu0 }
 0x666   : > { %v4566_v41 = vpop.f32.mrf.mxu2  ;;  %7520 = vmatmul.msk.f32.gmra.mxu3 %vm3459_vm4, %v15564_v31 }
 0x667   : > { %v4968_v1 = vadd.f32 %v4967_v53, %v4566_v41 }
 0x668   : > { %v5769_v42 = vpop.f32.mrf.mxu1  ;;  %5418 = vmatmul.f32.gmra.mxu0 %v15565_v17 }
 0x669   : > { %v6202_v25 = vadd.f32 %v12773_v15, %v4968_v1  ;;  %v5770_v28 = vadd.f32 %v5769_v42, %v5368_v10  ;;  %v4973_v4 = vpop.f32.mrf.mxu3  ;;  %v15571_v1 = vld [vmem:[#allocation178_spill] sm:$0xff] }
 0x66b   : > { %v6610_v11 = vmax.f32 %v6609_v7, %v6202_v25  ;;  %v6203_v55 = vadd.f32 %v12780_v43, %v5770_v28  ;;  %4616 = vmatmul.f32.gmra.mxu2 %v15565_v17  ;;  %7646 = vmatmul.msk.f32.gmra.mxu1 %vm3459_vm4, %v15560_v37  ;;  %v15572_v28 = vld [vmem:[#allocation203_spill] sm:$0xff] }
 0x66d   : > { %v6631_v48 = vmax.f32 %v6630_v54, %v6203_v55  ;;  %v5374_v15 = vpop.f32.mrf.mxu0 }
 0x66e   : > { %v4569_v12 = vpop.f32.mrf.mxu2  ;;  %7521 = vmatmul.msk.f32.gmra.mxu3 %vm3459_vm4, %v15566_v26 }
 0x66f   : > { %v4971_v33 = vadd.f32 %v4970_v34, %v4569_v12 }
 0x670   : > { %v5772_v44 = vpop.f32.mrf.mxu1  ;;  %5421 = vmatmul.f32.gmra.mxu0 %v15567_v21 }
 0x671   : > { %v6205_v43 = vadd.f32 %v12794_v51, %v4971_v33  ;;  %v5773_v40 = vadd.f32 %v5772_v44, %v5371_v23  ;;  %v4976_v27 = vpop.f32.mrf.mxu3  ;;  %v15574_v33 = vld [vmem:[#allocation211_spill] sm:$0xff] }
 0x673   : > { %v6611_v37 = vmax.f32 %v6610_v11, %v6205_v43  ;;  %v6206_v45 = vadd.f32 %v12801_v38, %v5773_v40  ;;  %4619 = vmatmul.f32.gmra.mxu2 %v15567_v21  ;;  %7647 = vmatmul.msk.f32.gmra.mxu1 %vm3459_vm4, %v15562_v58 }
 0x675   : > { %v6632_v53 = vmax.f32 %v6631_v48, %v6206_v45  ;;  %v5377_v51 = vpop.f32.mrf.mxu0 }
 0x676   : > { %v4572_v22 = vpop.f32.mrf.mxu2  ;;  %7522 = vmatmul.msk.f32.gmra.mxu3 %vm3459_vm4, %v15568_v50 }
 0x677   : > { %v4974_v52 = vadd.f32 %v4973_v4, %v4572_v22  ;;  %v15576_v22 = vld [vmem:[#allocation217_spill] sm:$0xff] }
 0x678   : > { %v5775_v16 = vpop.f32.mrf.mxu1  ;;  %5424 = vmatmul.f32.gmra.mxu0 %v15569_v5 }
 0x679   : > { %v6208_v38 = vadd.f32 %v12815_v29, %v4974_v52  ;;  %v5776_v10 = vadd.f32 %v5775_v16, %v5374_v15  ;;  %v4979_v60 = vpop.f32.mrf.mxu3 }
 0x67b   : > { %v6612_v58 = vmax.f32 %v6611_v37, %v6208_v38  ;;  %v6209_v0 = vadd.f32 %v12822_v9, %v5776_v10  ;;  %4622 = vmatmul.f32.gmra.mxu2 %v15569_v5  ;;  %7648 = vmatmul.msk.f32.gmra.mxu1 %vm3459_vm4, %v15564_v31  ;;  %v15575_v37 = vld [vmem:[#allocation198_spill] sm:$0xff]  ;;  %v15577_v10 = vld [vmem:[#allocation201_spill] sm:$0xff] }
 0x67d   : > { %v6633_v61 = vmax.f32 %v6632_v53, %v6209_v0  ;;  %v5380_v7 = vpop.f32.mrf.mxu0  ;;  %v15578_v0 = vld [vmem:[#allocation227_spill] sm:$0xff] }
 0x67e   : > { %v4575_v34 = vpop.f32.mrf.mxu2  ;;  %7523 = vmatmul.msk.f32.gmra.mxu3 %vm3459_vm4, %v15570_v46 }
 0x67f   : > { %v4977_v24 = vadd.f32 %v4976_v27, %v4575_v34 }
 0x680   : > { %v5778_v29 = vpop.f32.mrf.mxu1  ;;  %5427 = vmatmul.f32.gmra.mxu0 %v15571_v1 }
 0x681   : > { %v6211_v54 = vadd.f32 %v12833_v14, %v4977_v24  ;;  %v5779_v41 = vadd.f32 %v5778_v29, %v5377_v51  ;;  %v4982_v23 = vpop.f32.mrf.mxu3  ;;  %v15579_v29 = vld [vmem:[#allocation215_spill] sm:$0xff] }
 0x683   : > { %v6613_v9 = vmax.f32 %v6612_v58, %v6211_v54  ;;  %v6212_v42 = vadd.f32 %v12840_v47, %v5779_v41  ;;  %4625 = vmatmul.f32.gmra.mxu2 %v15571_v1  ;;  %7649 = vmatmul.msk.f32.gmra.mxu1 %vm3459_vm4, %v15566_v26  ;;  %v15580_v1 = vld [vmem:[#allocation235_spill] sm:$0xff] }
 0x685   : > { %v6634_v31 = vmax.f32 %v6633_v61, %v6212_v42  ;;  %v5383_v4 = vpop.f32.mrf.mxu0 }
 0x686   : > { %v4578_v25 = vpop.f32.mrf.mxu2  ;;  %7524 = vmatmul.msk.f32.gmra.mxu3 %vm3459_vm4, %v15572_v28 }
 0x687   : > { %v4980_v17 = vadd.f32 %v4979_v60, %v4578_v25 }
 0x688   : > { %v5781_v14 = vpop.f32.mrf.mxu1  ;;  %5430 = vmatmul.f32.gmra.mxu0 %v15573_v19 }
 0x689   : > { %v6214_v11 = vadd.f32 %v12851_v59, %v4980_v17  ;;  %v5782_v55 = vadd.f32 %v5781_v14, %v5380_v7  ;;  %v4985_v48 = vpop.f32.mrf.mxu3  ;;  %v15581_v17 = vld [vmem:[#allocation222_spill] sm:$0xff] }
 0x68b   : > { %v6614_v47 = vmax.f32 %v6613_v9, %v6214_v11  ;;  %v6215_v12 = vadd.f32 %v12858_v30, %v5782_v55  ;;  %4628 = vmatmul.f32.gmra.mxu2 %v15573_v19  ;;  %7650 = vmatmul.msk.f32.gmra.mxu1 %vm3459_vm4, %v15568_v50  ;;  %v15582_v19 = vld [vmem:[#allocation241_spill] sm:$0xff] }
 0x68d   : > { %v6635_v26 = vmax.f32 %v6634_v31, %v6215_v12  ;;  %v5386_v44 = vpop.f32.mrf.mxu0 }
 0x68e   : > { %v4581_v15 = vpop.f32.mrf.mxu2  ;;  %7525 = vmatmul.msk.f32.gmra.mxu3 %vm3459_vm4, %v15574_v33 }
 0x68f   : > { %v4983_v43 = vadd.f32 %v4982_v23, %v4581_v15  ;;  %v6558_v15 = vrot.slane %v12976_v56, 4 }
 0x690   : > { %v5784_v59 = vpop.f32.mrf.mxu1  ;;  %5433 = vmatmul.f32.gmra.mxu0 %v15575_v37 }
 0x691   : > { %v6217_v40 = vadd.f32 %v12869_v3, %v4983_v43  ;;  %v5785_v27 = vadd.f32 %v5784_v59, %v5383_v4  ;;  %v4988_v21 = vpop.f32.mrf.mxu3 }
 0x693   : > { %v6615_v30 = vmax.f32 %v6614_v47, %v6217_v40  ;;  %v6218_v45 = vadd.f32 %v12876_v32, %v5785_v27  ;;  %4631 = vmatmul.f32.gmra.mxu2 %v15575_v37  ;;  %7651 = vmatmul.msk.f32.gmra.mxu1 %vm3459_vm4, %v15570_v46  ;;  %v15583_v40 = vld [vmem:[#allocation225_spill] sm:$0xff]  ;;  %v6579_v27 = vrot.slane %v12982_v20, 4 }
 0x695   : > { %v6636_v53 = vmax.f32 %v6635_v26, %v6218_v45  ;;  %v5389_v50 = vpop.f32.mrf.mxu0  ;;  %v7093_v26 = vld [vmem:[%s14379_s4 + $0x58] sm:$0xff] }
 0x696   : > { %v4584_v57 = vpop.f32.mrf.mxu2  ;;  %7526 = vmatmul.msk.f32.gmra.mxu3 %vm3459_vm4, %v15576_v22  ;;  %7214 = vmatpush.msra.mxu2 %v7093_v26 }
 0x697   : > { %v4986_v51 = vadd.f32 %v4985_v48, %v4584_v57  ;;  %v6580_v57 = vmax.f32 %v12982_v20, %v6579_v27 }
 0x698   : > { %v5787_v3 = vpop.f32.mrf.mxu1  ;;  %5436 = vmatmul.f32.gmra.mxu0 %v15577_v10 }
 0x699   : > { %v6220_v52 = vadd.f32 %v12887_v39, %v4986_v51  ;;  %v5788_v16 = vadd.f32 %v5787_v3, %v5386_v44  ;;  %v4991_v38 = vpop.f32.mrf.mxu3 }
 0x69b   : > { %v6616_v32 = vmax.f32 %v6615_v30, %v6220_v52  ;;  %v6221_v60 = vadd.f32 %v12894_v63, %v5788_v16  ;;  %4634 = vmatmul.f32.gmra.mxu2 %v15577_v10  ;;  %7652 = vmatmul.msk.f32.gmra.mxu1 %vm3459_vm4, %v15572_v28  ;;  %v6559_v30 = vmax.f32 %v12976_v56, %v6558_v15  ;;  %v15588_v15 = vld [vmem:[#allocation265_spill] sm:$0xff] }
 0x69d   : > { %v6637_v5 = vmax.f32 %v6636_v53, %v6221_v60  ;;  %v5392_v61 = vpop.f32.mrf.mxu0  ;;  %v7109_v53 = vld [vmem:[%s14379_s4 + $0xd8] sm:$0xff]  ;;  %v6560_v52 = vrot.slane %v6559_v30, 2  ;;  %v6581_v60 = vrot.slane %v6580_v57, 2 }
 0x69e   : > { %v4587_v58 = vpop.f32.mrf.mxu2  ;;  %7527 = vmatmul.msk.f32.gmra.mxu3 %vm3459_vm4, %v15578_v0 }
 0x69f   : > { %v4989_v34 = vadd.f32 %v4988_v21, %v4587_v58  ;;  %7234 = vmatpush.msra.mxu3 %v7109_v53  ;;  %v6561_v20 = vmax.f32 %v6559_v30, %v6560_v52  ;;  %v13162_v52 = vld [vmem:[%s14377_s2 + $0x10] sm:$0xff] }
 0x6a0   : > { %v5790_v39 = vpop.f32.mrf.mxu1  ;;  %5439 = vmatmul.f32.gmra.mxu0 %v15579_v29 }
 0x6a1   : > { %v6223_v46 = vadd.f32 %v12905_v36, %v4989_v34  ;;  %v5791_v7 = vadd.f32 %v5790_v39, %v5389_v50  ;;  %v4994_v24 = vpop.f32.mrf.mxu3  ;;  %v15584_v50 = vld [vmem:[#allocation251_spill] sm:$0xff]  ;;  %v6582_v34 = vmax.f32 %v6580_v57, %v6581_v60 }
 0x6a3   : > { %v6617_v63 = vmax.f32 %v6616_v32, %v6223_v46  ;;  %v6224_v54 = vadd.f32 %v12912_v8, %v5791_v7  ;;  %4637 = vmatmul.f32.gmra.mxu2 %v15579_v29  ;;  %7653 = vmatmul.msk.f32.gmra.mxu1 %vm3459_vm4, %v15574_v33  ;;  %v15585_v32 = vld [vmem:[#allocation239_spill] sm:$0xff] }
 0x6a4   : > { %v15586_v46 = vld [vmem:[#allocation259_spill] sm:$0xff] }
 0x6a5   : > { %v6638_v41 = vmax.f32 %v6637_v5, %v6224_v54  ;;  %v5395_v9 = vpop.f32.mrf.mxu0  ;;  %v6562_v54 = vrot.slane %v6561_v20, 1 }
 0x6a6   : > { %v4590_v23 = vpop.f32.mrf.mxu2  ;;  %7528 = vmatmul.msk.f32.gmra.mxu3 %vm3459_vm4, %v15580_v1 }
 0x6a7   : > { %v4992_v42 = vadd.f32 %v4991_v38, %v4590_v23 }
 0x6a8   : > { %v5793_v31 = vpop.f32.mrf.mxu1  ;;  %5442 = vmatmul.f32.gmra.mxu0 %v15581_v17 }
 0x6a9   : > { %v6226_v25 = vadd.f32 %v12923_v35, %v4992_v42  ;;  %v5794_v28 = vadd.f32 %v5793_v31, %v5392_v61  ;;  %v4997_v4 = vpop.f32.mrf.mxu3  ;;  %v15587_v31 = vld [vmem:[#allocation246_spill] sm:$0xff] }
 0x6ab   : > { %v6618_v14 = vmax.f32 %v6617_v63, %v6226_v25  ;;  %v6227_v11 = vadd.f32 %v12930_v49, %v5794_v28  ;;  %4640 = vmatmul.f32.gmra.mxu2 %v15581_v17  ;;  %7654 = vmatmul.msk.f32.gmra.mxu1 %vm3459_vm4, %v15576_v22  ;;  %v8140_v17 = vld [vmem:[%s14378_s3] sm:$0x7] }
 0x6ad   : > { %v6639_v55 = vmax.f32 %v6638_v41, %v6227_v11  ;;  %v5398_v47 = vpop.f32.mrf.mxu0 }
 0x6ae   : > { %v4593_v48 = vpop.f32.mrf.mxu2  ;;  %7529 = vmatmul.msk.f32.gmra.mxu3 %vm3459_vm4, %v15582_v19 }
 0x6af   : > { %v4995_v12 = vadd.f32 %v4994_v24, %v4593_v48 }
 0x6b0   : > { %v5796_v33 = vpop.f32.mrf.mxu1  ;;  %5445 = vmatmul.f32.gmra.mxu0 %v15583_v40 }
 0x6b1   : > { %v6229_v44 = vadd.f32 %v12944_v62, %v4995_v12  ;;  %v5797_v43 = vadd.f32 %v5796_v33, %v5395_v9  ;;  %v5000_v59 = vpop.f32.mrf.mxu3 }
 0x6b3   : > { %v6619_v21 = vmax.f32 %v6618_v14, %v6229_v44  ;;  %v6230_v37 = vadd.f32 %v12951_v6, %v5797_v43  ;;  %4643 = vmatmul.f32.gmra.mxu2 %v15583_v40  ;;  %7655 = vmatmul.msk.f32.gmra.mxu1 %vm3459_vm4, %v15578_v0  ;;  %v13137_v14 = vperm.slane %v8140_v17, 1  ;;  %v13147_v40 = vld [vmem:[%s14377_s2 + $0x8] sm:$0xff] }
 0x6b5   : > { %v6640_v45 = vmax.f32 %v6639_v55, %v6230_v37  ;;  %v5401_v51 = vpop.f32.mrf.mxu0 }
 0x6b6   : > { %v4596_v22 = vpop.f32.mrf.mxu2  ;;  %7530 = vmatmul.msk.f32.gmra.mxu3 %vm3459_vm4, %v15584_v50 }
 0x6b7   : > { %v4998_v3 = vadd.f32 %v4997_v4, %v4596_v22  ;;  %v6563_v4 = vmax.f32 %v6561_v20, %v6562_v54 }
 0x6b8   : > { %v5799_v16 = vpop.f32.mrf.mxu1  ;;  %5448 = vmatmul.f32.gmra.mxu0 %v15585_v32 }
 0x6b9   : > { %v6232_v38 = vadd.f32 %v12965_v2, %v4998_v3  ;;  %v5800_v10 = vadd.f32 %v5799_v16, %v5398_v47  ;;  %v5003_v56 = vpop.f32.mrf.mxu3  ;;  %v13139_v47 = vperm.slane %v8140_v17, 2 }
 0x6bb   : > { %v6620_v5 = vmax.f32 %v6619_v21, %v6232_v38  ;;  %v6233_v58 = vadd.f32 %v12972_v18, %v5800_v10  ;;  %4646 = vmatmul.f32.gmra.mxu2 %v15585_v32  ;;  %7656 = vmatmul.msk.f32.gmra.mxu1 %vm3459_vm4, %v15580_v1  ;;  %v6583_v1 = vrot.slane %v6582_v34, 1  ;;  %v13169_v32 = vld [vmem:[%s14377_s2 + $0x28] sm:$0xff] }
 0x6bd   : > { %v6621_v0 = vrot.slane %v6620_v5, 4  ;;  %v6641_v61 = vmax.f32 %v6640_v45, %v6233_v58  ;;  %v5404_v7 = vpop.f32.mrf.mxu0  ;;  %v6584_v48 = vmax.f32 %v6582_v34, %v6583_v1  ;;  %v13154_v45 = vld [vmem:[%s14377_s2 + $0x20] sm:$0xff] }
 0x6be   : > { %v4599_v39 = vpop.f32.mrf.mxu2  ;;  %7531 = vmatmul.msk.f32.gmra.mxu3 %vm3459_vm4, %v15586_v46  ;;  %v15590_v34 = vld [vmem:[#allocation275_spill] sm:$0xff] }
 0x6bf   : > { %v6622_v24 = vmax.f32 %v6620_v5, %v6621_v0  ;;  %v6642_v29 = vrot.slane %v6641_v61, 4  ;;  %v5001_v63 = vadd.f32 %v5000_v59, %v4599_v39  ;;  %v7035_v59 = vadd.f32 %v13137_v14, %v6563_v4 }
 0x6c0   : > { %v5802_v41 = vpop.f32.mrf.mxu1  ;;  %5451 = vmatmul.f32.gmra.mxu0 %v15587_v31  ;;  %v7036_v3 = vadd.f32 %v13139_v47, %v6584_v48 }
 0x6c1   : > { %v6623_v23 = vrot.slane %v6622_v24, 2  ;;  %v6643_v9 = vmax.f32 %v6641_v61, %v6642_v29  ;;  %v5006_v42 = vpop.f32.mrf.mxu3  ;;  %v5803_v12 = vadd.f32 %v5802_v41, %v5401_v51  ;;  %v6235_v27 = vadd.f32 %v13147_v40, %v5001_v63  ;;  %v15589_v51 = vld [vmem:[#allocation249_spill] sm:$0xff] }
 0x6c2   : > { %v7059_v5 = vmax.f32 %v7035_v59, 0.0  ;;  %v13211_v59 = vld [vmem:[%s14377_s2 + $0x58] sm:$0xff] }
 0x6c3   : > { %v6624_v25 = vmax.f32 %v6622_v24, %v6623_v23  ;;  %v6644_v28 = vrot.slane %v6643_v9, 2  ;;  %4649 = vmatmul.f32.gmra.mxu2 %v15587_v31  ;;  %7657 = vmatmul.msk.f32.gmra.mxu1 %vm3459_vm4, %v15582_v19  ;;  %v6236_v16 = vadd.f32 %v13162_v52, %v5803_v12  ;;  %v15591_v31 = vld [vmem:[#allocation263_spill] sm:$0xff] }
 0x6c5   : > { %v6625_v11 = vrot.slane %v6624_v25, 1  ;;  %v6645_v55 = vmax.f32 %v6643_v9, %v6644_v28  ;;  %v5407_v33 = vpop.f32.mrf.mxu0 }
 0x6c6   : > { %v4602_v26 = vpop.f32.mrf.mxu2  ;;  %7532 = vmatmul.msk.f32.gmra.mxu3 %vm3459_vm4, %v15588_v15 }
 0x6c7   : > { %v6626_v44 = vmax.f32 %v6624_v25, %v6625_v11  ;;  %v6646_v19 = vrot.slane %v6645_v55, 1  ;;  %v5004_v43 = vadd.f32 %v5003_v56, %v4602_v26  ;;  %v15592_v11 = vld [vmem:[#allocation283_spill] sm:$0xff]  ;;  %v13204_v26 = vld [vmem:[%s14377_s2 + $0x50] sm:$0xff] }
 0x6c8   : > { %v5805_v21 = vpop.f32.mrf.mxu1  ;;  %5454 = vmatmul.f32.gmra.mxu0 %v15589_v51 }
 0x6c9   : > { %v7038_v37 = vadd.f32 %v13137_v14, %v6626_v44  ;;  %v6647_v30 = vmax.f32 %v6645_v55, %v6646_v19  ;;  %v6238_v53 = vadd.f32 %v13154_v45, %v5004_v43  ;;  %v5806_v57 = vadd.f32 %v5805_v21, %v5404_v7  ;;  %v5009_v22 = vpop.f32.mrf.mxu3  ;;  %v15593_v43 = vld [vmem:[#allocation270_spill] sm:$0xff] }
 0x6ca   : > { %v7060_v7 = vmax.f32 %v7036_v3, 0.0 }
 0x6cb   : > { %v7062_v38 = vmax.f32 %v7038_v37, 0.0  ;;  %v7039_v10 = vadd.f32 %v13139_v47, %v6647_v30  ;;  %v6669_v56 = vmax.f32 %v6235_v27, %v6238_v53  ;;  %v6239_v60 = vadd.f32 %v13169_v32, %v5806_v57  ;;  %4652 = vmatmul.f32.gmra.mxu2 %v15589_v51  ;;  %7658 = vmatmul.msk.f32.gmra.mxu1 %vm3459_vm4, %v15584_v50  ;;  %v13183_v50 = vld [vmem:[%s14377_s2 + $0x38] sm:$0xff]  ;;  %v15594_v30 = vld [vmem:[#allocation289_spill] sm:$0xff]  ;;  %v13222_v51 = vld [vmem:[%s14377_s2 + $0x68] sm:$0xff] }
 0x6cd   : > { %v7179_v58 = vrot.slane %v7062_v38, 7  ;;  %v7063_v20 = vmax.f32 %v7039_v10, 0.0  ;;  %v6690_v0 = vmax.f32 %v6236_v16, %v6239_v60  ;;  %v5410_v39 = vpop.f32.mrf.mxu0  ;;  %v15595_v10 = vld [vmem:[#allocation273_spill] sm:$0xff] }
 0x6ce   : > { %v4605_v61 = vpop.f32.mrf.mxu2  ;;  %7533 = vmatmul.msk.f32.gmra.mxu3 %vm3459_vm4, %v15590_v34 }
 0x6cf   : > { %v7193_v24 = vrot.slane %v7063_v20, 7  ;;  %v5007_v29 = vadd.f32 %v5006_v42, %v4605_v61  ;;  %v13178_v63 = vsel %vm7159_vm5, %v7179_v58, %v7059_v5  ;;  %v13193_v42 = vld [vmem:[%s14377_s2 + $0x40] sm:$0xff] }
 0x6d0   : > { %v5808_v54 = vpop.f32.mrf.mxu1  ;;  %5457 = vmatmul.f32.gmra.mxu0 %v15591_v31  ;;  %v15596_v20 = vld [vmem:[#allocation299_spill] sm:$0xff] }
 0x6d1   : > { %v6241_v41 = vadd.f32 %v13183_v50, %v5007_v29  ;;  %v5809_v23 = vadd.f32 %v5808_v54, %v5407_v33  ;;  %v5012_v9 = vpop.f32.mrf.mxu3  ;;  %v13188_v1 = vsel %vm7159_vm5, %v7193_v24, %v7060_v7  ;;  %v13240_v7 = vld [vmem:[%s14377_s2 + $0x80] sm:$0xff] }
 0x6d3   : > { %v6670_v25 = vmax.f32 %v6669_v56, %v6241_v41  ;;  %v6242_v28 = vadd.f32 %v13193_v42, %v5809_v23  ;;  %4655 = vmatmul.f32.gmra.mxu2 %v15591_v31  ;;  %7659 = vmatmul.msk.f32.gmra.mxu1 %vm3459_vm4, %v15586_v46  ;;  %v13229_v56 = vld [vmem:[%s14377_s2 + $0x70] sm:$0xff]  ;;  %v15597_v41 = vld [vmem:[#allocation287_spill] sm:$0xff]  ;;  %v13247_v23 = vld [vmem:[%s14377_s2 + $0x88] sm:$0xff] }
 0x6d5   : > { %v6691_v4 = vmax.f32 %v6690_v0, %v6242_v28  ;;  %v5413_v55 = vpop.f32.mrf.mxu0 }
 0x6d6   : > { %v4608_v17 = vpop.f32.mrf.mxu2  ;;  %7534 = vmatmul.msk.f32.gmra.mxu3 %vm3459_vm4, %v15592_v11 }
 0x6d7   : > { %v5010_v48 = vadd.f32 %v5009_v22, %v4608_v17 }
 0x6d8   : > { %v5811_v12 = vpop.f32.mrf.mxu1  ;;  %5460 = vmatmul.f32.gmra.mxu0 %v15593_v43 }
 0x6d9   : > { %v6244_v33 = vadd.f32 %v13204_v26, %v5010_v48  ;;  %v5812_v44 = vadd.f32 %v5811_v12, %v5410_v39  ;;  %v5015_v19 = vpop.f32.mrf.mxu3  ;;  %v13261_v12 = vld [vmem:[%s14377_s2 + $0x98] sm:$0xff] }
 0x6db   : > { %v6671_v46 = vmax.f32 %v6670_v25, %v6244_v33  ;;  %v6245_v27 = vadd.f32 %v13211_v59, %v5812_v44  ;;  %4658 = vmatmul.f32.gmra.mxu2 %v15593_v43  ;;  %7660 = vmatmul.msk.f32.gmra.mxu1 %vm3459_vm4, %v15588_v15  ;;  %v7092_v25 = vld [vmem:[%s14379_s4 + $0x50] sm:$0xff] }
 0x6dc   : > { %7215 = vmatpush.msra.mxu2 %v7092_v25 }
 0x6dd   : > { %v6692_v21 = vmax.f32 %v6691_v4, %v6245_v27  ;;  %v5416_v53 = vpop.f32.mrf.mxu0  ;;  %v15598_v4 = vld [vmem:[#allocation307_spill] sm:$0xff] }
 0x6de   : > { %v4611_v37 = vpop.f32.mrf.mxu2  ;;  %7535 = vmatmul.msk.f32.gmra.mxu3 %vm3459_vm4, %v15594_v30 }
 0x6df   : > { %v5013_v57 = vadd.f32 %v5012_v9, %v4611_v37  ;;  %v7108_v37 = vld [vmem:[%s14379_s4 + $0xd0] sm:$0xff] }
 0x6e0   : > { %v5814_v22 = vpop.f32.mrf.mxu1  ;;  %5463 = vmatmul.f32.gmra.mxu0 %v15595_v10  ;;  %7235 = vmatpush.msra.mxu3 %v7108_v37 }
 0x6e1   : > { %v6247_v3 = vadd.f32 %v13222_v51, %v5013_v57  ;;  %v5815_v16 = vadd.f32 %v5814_v22, %v5413_v55  ;;  %v5018_v38 = vpop.f32.mrf.mxu3  ;;  %v15600_v57 = vld [vmem:[#allocation313_spill] sm:$0xff] }
 0x6e3   : > { %v6672_v15 = vmax.f32 %v6671_v46, %v6247_v3  ;;  %v6248_v60 = vadd.f32 %v13229_v56, %v5815_v16  ;;  %4661 = vmatmul.f32.gmra.mxu2 %v15595_v10  ;;  %7661 = vmatmul.msk.f32.gmra.mxu1 %vm3459_vm4, %v15590_v34  ;;  %v13268_v46 = vld [vmem:[%s14377_s2 + $0xa0] sm:$0xff] }
 0x6e5   : > { %v6693_v5 = vmax.f32 %v6692_v21, %v6248_v60  ;;  %v5419_v0 = vpop.f32.mrf.mxu0  ;;  %v15601_v60 = vld [vmem:[#allocation297_spill] sm:$0xff] }
 0x6e6   : > { %v4614_v58 = vpop.f32.mrf.mxu2  ;;  %7536 = vmatmul.msk.f32.gmra.mxu3 %vm3459_vm4, %v15596_v20 }
 0x6e7   : > { %v5016_v61 = vadd.f32 %v5015_v19, %v4614_v58  ;;  %v15599_v19 = vld [vmem:[#allocation294_spill] sm:$0xff] }
 0x6e8   : > { %v5817_v39 = vpop.f32.mrf.mxu1  ;;  %5466 = vmatmul.f32.gmra.mxu0 %v15597_v41  ;;  %v13289_v58 = vld [vmem:[%s14377_s2 + $0xb8] sm:$0xff] }
 0x6e9   : > { %v6250_v24 = vadd.f32 %v13240_v7, %v5016_v61  ;;  %v5818_v29 = vadd.f32 %v5817_v39, %v5416_v53  ;;  %v5021_v54 = vpop.f32.mrf.mxu3 }
 0x6eb   : > { %v6673_v34 = vmax.f32 %v6672_v15, %v6250_v24  ;;  %v6251_v9 = vadd.f32 %v13247_v23, %v5818_v29  ;;  %4664 = vmatmul.f32.gmra.mxu2 %v15597_v41  ;;  %7662 = vmatmul.msk.f32.gmra.mxu1 %vm3459_vm4, %v15592_v11  ;;  %v15602_v24 = vld [vmem:[#allocation323_spill] sm:$0xff] }
 0x6ed   : > { %v6694_v31 = vmax.f32 %v6693_v5, %v6251_v9  ;;  %v5422_v17 = vpop.f32.mrf.mxu0 }
 0x6ee   : > { %v4617_v28 = vpop.f32.mrf.mxu2  ;;  %7537 = vmatmul.msk.f32.gmra.mxu3 %vm3459_vm4, %v15598_v4 }
 0x6ef   : > { %v5019_v55 = vadd.f32 %v5018_v38, %v4617_v28  ;;  %v13282_v38 = vld [vmem:[%s14377_s2 + $0xb0] sm:$0xff]  ;;  %v15603_v28 = vld [vmem:[#allocation312_spill] sm:$0xff] }
 0x6f0   : > { %v5820_v48 = vpop.f32.mrf.mxu1  ;;  %5469 = vmatmul.f32.gmra.mxu0 %v15599_v19 }
 0x6f1   : > { %v6253_v11 = vadd.f32 %v13261_v12, %v5019_v55  ;;  %v5821_v33 = vadd.f32 %v5820_v48, %v5419_v0  ;;  %v5024_v44 = vpop.f32.mrf.mxu3 }
 0x6f3   : > { %v6674_v43 = vmax.f32 %v6673_v34, %v6253_v11  ;;  %v6254_v27 = vadd.f32 %v13268_v46, %v5821_v33  ;;  %4667 = vmatmul.f32.gmra.mxu2 %v15599_v19  ;;  %7663 = vmatmul.msk.f32.gmra.mxu1 %vm3459_vm4, %v15594_v30  ;;  %v13300_v34 = vld [vmem:[%s14377_s2 + $0xc8] sm:$0xff]  ;;  %v15604_v33 = vld [vmem:[#allocation338_spill] sm:$0xff] }
 0x6f5   : > { %v6695_v21 = vmax.f32 %v6694_v31, %v6254_v27  ;;  %v5425_v22 = vpop.f32.mrf.mxu0  ;;  %v13318_v27 = vld [vmem:[%s14377_s2 + $0xe0] sm:$0xff] }
 0x6f6   : > { %v4620_v53 = vpop.f32.mrf.mxu2  ;;  %7538 = vmatmul.msk.f32.gmra.mxu3 %vm3459_vm4, %v15600_v57 }
 0x6f7   : > { %v5022_v3 = vadd.f32 %v5021_v54, %v4620_v53 }
 0x6f8   : > { %v5823_v16 = vpop.f32.mrf.mxu1  ;;  %5472 = vmatmul.f32.gmra.mxu0 %v15601_v60 }
 0x6f9   : > { %v6256_v30 = vadd.f32 %v13282_v38, %v5022_v3  ;;  %v5824_v10 = vadd.f32 %v5823_v16, %v5422_v17  ;;  %v5027_v15 = vpop.f32.mrf.mxu3  ;;  %v13307_v17 = vld [vmem:[%s14377_s2 + $0xd0] sm:$0xff]  ;;  %v13325_v3 = vld [vmem:[%s14377_s2 + $0xe8] sm:$0xff] }
 0x6fb   : > { %v6675_v5 = vmax.f32 %v6674_v43, %v6256_v30  ;;  %v6257_v0 = vadd.f32 %v13289_v58, %v5824_v10  ;;  %4670 = vmatmul.f32.gmra.mxu2 %v15601_v60  ;;  %7664 = vmatmul.msk.f32.gmra.mxu1 %vm3459_vm4, %v15596_v20 }
 0x6fd   : > { %v6696_v61 = vmax.f32 %v6695_v21, %v6257_v0  ;;  %v5428_v29 = vpop.f32.mrf.mxu0 }
 0x6fe   : > { %v4623_v39 = vpop.f32.mrf.mxu2  ;;  %7539 = vmatmul.msk.f32.gmra.mxu3 %vm3459_vm4, %v15602_v24 }
 0x6ff   : > { %v5025_v54 = vadd.f32 %v5024_v44, %v4623_v39 }
 0x700   : > { %v5826_v41 = vpop.f32.mrf.mxu1  ;;  %5475 = vmatmul.f32.gmra.mxu0 %v15603_v28 }
 0x701   : > { %v6259_v9 = vadd.f32 %v13300_v34, %v5025_v54  ;;  %v5827_v31 = vadd.f32 %v5826_v41, %v5425_v22  ;;  %v5030_v25 = vpop.f32.mrf.mxu3  ;;  %v15605_v22 = vld [vmem:[#allocation317_spill] sm:$0xff]  ;;  %v15607_v41 = vld [vmem:[#allocation322_spill] sm:$0xff] }
 0x703   : > { %v6676_v20 = vmax.f32 %v6675_v5, %v6259_v9  ;;  %v6260_v55 = vadd.f32 %v13307_v17, %v5827_v31  ;;  %4673 = vmatmul.f32.gmra.mxu2 %v15603_v28  ;;  %7665 = vmatmul.msk.f32.gmra.mxu1 %vm3459_vm4, %v15598_v4  ;;  %v13343_v9 = vld [vmem:[%s14377_s2 + $0x100] sm:$0xff] }
 0x705   : > { %v6697_v48 = vmax.f32 %v6696_v61, %v6260_v55  ;;  %v5431_v44 = vpop.f32.mrf.mxu0  ;;  %v13336_v61 = vld [vmem:[%s14377_s2 + $0xf8] sm:$0xff] }
 0x706   : > { %v4626_v11 = vpop.f32.mrf.mxu2  ;;  %7540 = vmatmul.msk.f32.gmra.mxu3 %vm3459_vm4, %v15604_v33 }
 0x707   : > { %v5028_v19 = vadd.f32 %v5027_v15, %v4626_v11  ;;  %v15606_v15 = vld [vmem:[#allocation347_spill] sm:$0xff] }
 0x708   : > { %v5829_v43 = vpop.f32.mrf.mxu1  ;;  %5478 = vmatmul.f32.gmra.mxu0 %v15605_v22 }
 0x709   : > { %v6262_v21 = vadd.f32 %v13318_v27, %v5028_v19  ;;  %v5830_v37 = vadd.f32 %v5829_v43, %v5428_v29  ;;  %v5033_v53 = vpop.f32.mrf.mxu3 }
 0x70b   : > { %v6677_v4 = vmax.f32 %v6676_v20, %v6262_v21  ;;  %v6263_v16 = vadd.f32 %v13325_v3, %v5830_v37  ;;  %4676 = vmatmul.f32.gmra.mxu2 %v15605_v22  ;;  %7666 = vmatmul.msk.f32.gmra.mxu1 %vm3459_vm4, %v15600_v57  ;;  %v15608_v20 = vld [vmem:[#allocation361_spill] sm:$0xff]  ;;  %v15609_v37 = vld [vmem:[#allocation343_spill] sm:$0xff]  ;;  %v13361_v22 = vld [vmem:[%s14377_s2 + $0x118] sm:$0xff] }
 0x70d   : > { %v6698_v30 = vmax.f32 %v6697_v48, %v6263_v16  ;;  %v5434_v60 = vpop.f32.mrf.mxu0 }
 0x70e   : > { %v4629_v10 = vpop.f32.mrf.mxu2  ;;  %7541 = vmatmul.msk.f32.gmra.mxu3 %vm3459_vm4, %v15606_v15 }
 0x70f   : > { %v5031_v5 = vadd.f32 %v5030_v25, %v4629_v10 }
 0x710   : > { %v5832_v0 = vpop.f32.mrf.mxu1  ;;  %5481 = vmatmul.f32.gmra.mxu0 %v15607_v41 }
 0x711   : > { %v6265_v39 = vadd.f32 %v13336_v61, %v5031_v5  ;;  %v5833_v29 = vadd.f32 %v5832_v0, %v5431_v44  ;;  %v5036_v54 = vpop.f32.mrf.mxu3  ;;  %v13354_v44 = vld [vmem:[%s14377_s2 + $0x110] sm:$0xff] }
 0x713   : > { %v6678_v57 = vmax.f32 %v6677_v4, %v6265_v39  ;;  %v6266_v31 = vadd.f32 %v13343_v9, %v5833_v29  ;;  %4679 = vmatmul.f32.gmra.mxu2 %v15607_v41  ;;  %7667 = vmatmul.msk.f32.gmra.mxu1 %vm3459_vm4, %v15602_v24  ;;  %v15611_v41 = vld [vmem:[#allocation353_spill] sm:$0xff] }
 0x715   : > { %v6699_v25 = vmax.f32 %v6698_v30, %v6266_v31  ;;  %v5437_v55 = vpop.f32.mrf.mxu0  ;;  %v15610_v30 = vld [vmem:[#allocation377_spill] sm:$0xff] }
 0x716   : > { %v4632_v28 = vpop.f32.mrf.mxu2  ;;  %7542 = vmatmul.msk.f32.gmra.mxu3 %vm3459_vm4, %v15608_v20 }
 0x717   : > { %v5034_v48 = vadd.f32 %v5033_v53, %v4632_v28  ;;  %v15612_v28 = vld [vmem:[#allocation386_spill] sm:$0xff] }
 0x718   : > { %v5835_v11 = vpop.f32.mrf.mxu1  ;;  %5484 = vmatmul.f32.gmra.mxu0 %v15609_v37 }
 0x719   : > { %v6268_v19 = vadd.f32 %v13354_v44, %v5034_v48  ;;  %v5836_v43 = vadd.f32 %v5835_v11, %v5434_v60  ;;  %v5039_v21 = vpop.f32.mrf.mxu3 }
 0x71b   : > { %v6679_v24 = vmax.f32 %v6678_v57, %v6268_v19  ;;  %v6269_v53 = vadd.f32 %v13361_v22, %v5836_v43  ;;  %4682 = vmatmul.f32.gmra.mxu2 %v15609_v37  ;;  %7668 = vmatmul.msk.f32.gmra.mxu1 %vm3459_vm4, %v15604_v33  ;;  %v15613_v43 = vld [vmem:[#allocation359_spill] sm:$0xff] }
 0x71d   : > { %v6700_v4 = vmax.f32 %v6699_v25, %v6269_v53  ;;  %v5440_v10 = vpop.f32.mrf.mxu0  ;;  %v15614_v53 = vld [vmem:[#allocation397_spill] sm:$0xff] }
 0x71e   : > { %v4635_v16 = vpop.f32.mrf.mxu2  ;;  %7543 = vmatmul.msk.f32.gmra.mxu3 %vm3459_vm4, %v15610_v30 }
 0x71f   : > { %v5037_v60 = vadd.f32 %v5036_v54, %v4635_v16 }
 0x720   : > { %v5838_v5 = vpop.f32.mrf.mxu1  ;;  %5487 = vmatmul.f32.gmra.mxu0 %v15611_v41 }
 0x721   : > { %v6271_v0 = vadd.f32 %v12905_v36, %v5037_v60  ;;  %v5839_v39 = vadd.f32 %v5838_v5, %v5437_v55  ;;  %v5042_v29 = vpop.f32.mrf.mxu3  ;;  %v15615_v5 = vld [vmem:[#allocation382_spill] sm:$0xff] }
 0x723   : > { %v6680_v57 = vmax.f32 %v6679_v24, %v6271_v0  ;;  %v6272_v31 = vadd.f32 %v12912_v8, %v5839_v39  ;;  %4685 = vmatmul.f32.gmra.mxu2 %v15611_v41  ;;  %7669 = vmatmul.msk.f32.gmra.mxu1 %vm3459_vm4, %v15606_v15 }
 0x725   : > { %v6701_v33 = vmax.f32 %v6700_v4, %v6272_v31  ;;  %v5443_v54 = vpop.f32.mrf.mxu0 }
 0x726   : > { %v4638_v25 = vpop.f32.mrf.mxu2  ;;  %7544 = vmatmul.msk.f32.gmra.mxu3 %vm3459_vm4, %v15612_v28 }
 0x727   : > { %v5040_v48 = vadd.f32 %v5039_v21, %v4638_v25 }
 0x728   : > { %v5841_v36 = vpop.f32.mrf.mxu1  ;;  %5490 = vmatmul.f32.gmra.mxu0 %v15613_v43 }
 0x729   : > { %v6274_v55 = vadd.f32 %v12923_v35, %v5040_v48  ;;  %v5842_v11 = vadd.f32 %v5841_v36, %v5440_v10  ;;  %v5045_v19 = vpop.f32.mrf.mxu3  ;;  %v7091_v35 = vld [vmem:[%s14379_s4 + $0x48] sm:$0xff] }
 0x72a   : > { %7216 = vmatpush.msra.mxu2 %v7091_v35  ;;  %v15617_v48 = vld [vmem:[#allocation392_spill] sm:$0xff] }
 0x72b   : > { %v6681_v8 = vmax.f32 %v6680_v57, %v6274_v55  ;;  %v6275_v37 = vadd.f32 %v12930_v49, %v5842_v11  ;;  %4688 = vmatmul.f32.gmra.mxu2 %v15613_v43  ;;  %7670 = vmatmul.msk.f32.gmra.mxu1 %vm3459_vm4, %v15608_v20  ;;  %v15616_v57 = vld [vmem:[#allocation404_spill] sm:$0xff] }
 0x72d   : > { %v6702_v15 = vmax.f32 %v6701_v33, %v6275_v37  ;;  %v5446_v21 = vpop.f32.mrf.mxu0 }
 0x72e   : > { %v4641_v24 = vpop.f32.mrf.mxu2  ;;  %7545 = vmatmul.msk.f32.gmra.mxu3 %vm3459_vm4, %v15614_v53 }
 0x72f   : > { %v5043_v4 = vadd.f32 %v5042_v29, %v4641_v24  ;;  %v7107_v29 = vld [vmem:[%s14379_s4 + $0xc8] sm:$0xff] }
 0x730   : > { %v5844_v16 = vpop.f32.mrf.mxu1  ;;  %5493 = vmatmul.f32.gmra.mxu0 %v15615_v5  ;;  %7236 = vmatpush.msra.mxu3 %v7107_v29 }
 0x731   : > { %v6277_v49 = vadd.f32 %v12944_v62, %v5043_v4  ;;  %v5845_v10 = vadd.f32 %v5844_v16, %v5443_v54  ;;  %v5048_v60 = vpop.f32.mrf.mxu3 }
 0x733   : > { %v6682_v20 = vmax.f32 %v6681_v8, %v6277_v49  ;;  %v6278_v0 = vadd.f32 %v12951_v6, %v5845_v10  ;;  %4691 = vmatmul.f32.gmra.mxu2 %v15615_v5  ;;  %7671 = vmatmul.msk.f32.gmra.mxu1 %vm3459_vm4, %v15610_v30 }
 0x735   : > { %v6703_v39 = vmax.f32 %v6702_v15, %v6278_v0  ;;  %v5449_v62 = vpop.f32.mrf.mxu0  ;;  %v15620_v0 = vld [vmem:[#allocation9_spill] sm:$0xff] }
 0x736   : > { %v4644_v41 = vpop.f32.mrf.mxu2  ;;  %7546 = vmatmul.msk.f32.gmra.mxu3 %vm3459_vm4, %v15616_v57 }
 0x737   : > { %v5046_v31 = vadd.f32 %v5045_v19, %v4644_v41  ;;  %v15618_v19 = vld [vmem:[#allocation6_spill] sm:$0xff] }
 0x738   : > { %v5847_v33 = vpop.f32.mrf.mxu1  ;;  %5496 = vmatmul.f32.gmra.mxu0 %v15617_v48 }
 0x739   : > { %v6280_v6 = vadd.f32 %v12965_v2, %v5046_v31  ;;  %v5848_v25 = vadd.f32 %v5847_v33, %v5446_v21  ;;  %v5051_v54 = vpop.f32.mrf.mxu3 }
 0x73b   : > { %v6683_v30 = vmax.f32 %v6682_v20, %v6280_v6  ;;  %v6281_v36 = vadd.f32 %v12972_v18, %v5848_v25  ;;  %4694 = vmatmul.f32.gmra.mxu2 %v15617_v48  ;;  %7672 = vmatmul.msk.f32.gmra.mxu1 %vm3459_vm4, %v15612_v28  ;;  %v15619_v18 = vld [vmem:[#allocation399_spill] sm:$0xff] }
 0x73d   : > { %v6684_v55 = vrot.slane %v6683_v30, 4  ;;  %v6704_v11 = vmax.f32 %v6703_v39, %v6281_v36  ;;  %v5452_v8 = vpop.f32.mrf.mxu0  ;;  %v15621_v36 = vld [vmem:[#allocation5_spill] sm:$0xff] }
 0x73e   : > { %v4647_v43 = vpop.f32.mrf.mxu2  ;;  %7547 = vmatmul.msk.f32.gmra.mxu3 %vm3459_vm4, %v15618_v19 }
 0x73f   : > { %v6685_v2 = vmax.f32 %v6683_v30, %v6684_v55  ;;  %v6705_v37 = vrot.slane %v6704_v11, 4  ;;  %v5049_v15 = vadd.f32 %v5048_v60, %v4647_v43 }
 0x740   : > { %v5850_v24 = vpop.f32.mrf.mxu1  ;;  %5499 = vmatmul.f32.gmra.mxu0 %v15619_v18 }
 0x741   : > { %v6686_v21 = vrot.slane %v6685_v2, 2  ;;  %v6706_v4 = vmax.f32 %v6704_v11, %v6705_v37  ;;  %v5054_v35 = vpop.f32.mrf.mxu3  ;;  %v5851_v5 = vadd.f32 %v5850_v24, %v5449_v62  ;;  %v6283_v31 = vadd.f32 %v13147_v40, %v5049_v15  ;;  %v15622_v24 = vld [vmem:[#allocation11_spill] sm:$0xff] }
 0x743   : > { %v6687_v16 = vmax.f32 %v6685_v2, %v6686_v21  ;;  %v6707_v49 = vrot.slane %v6706_v4, 2  ;;  %4697 = vmatmul.f32.gmra.mxu2 %v15619_v18  ;;  %7673 = vmatmul.msk.f32.gmra.mxu1 %vm3459_vm4, %v15614_v53  ;;  %v6284_v62 = vadd.f32 %v13162_v52, %v5851_v5 }
 0x745   : > { %v6688_v28 = vrot.slane %v6687_v16, 1  ;;  %v6708_v10 = vmax.f32 %v6706_v4, %v6707_v49  ;;  %v5455_v60 = vpop.f32.mrf.mxu0 }
 0x746   : > { %v4650_v20 = vpop.f32.mrf.mxu2  ;;  %7548 = vmatmul.msk.f32.gmra.mxu3 %vm3459_vm4, %v15620_v0 }
 0x747   : > { %v6689_v39 = vmax.f32 %v6687_v16, %v6688_v28  ;;  %v6709_v29 = vrot.slane %v6708_v10, 1  ;;  %v5052_v41 = vadd.f32 %v5051_v54, %v4650_v20 }
 0x748   : > { %v5853_v33 = vpop.f32.mrf.mxu1  ;;  %5502 = vmatmul.f32.gmra.mxu0 %v15621_v36 }
 0x749   : > { %v7041_v6 = vadd.f32 %v13137_v14, %v6689_v39  ;;  %v6710_v25 = vmax.f32 %v6708_v10, %v6709_v29  ;;  %v6286_v48 = vadd.f32 %v13154_v45, %v5052_v41  ;;  %v5854_v53 = vadd.f32 %v5853_v33, %v5452_v8  ;;  %v5057_v30 = vpop.f32.mrf.mxu3  ;;  %v15624_v41 = vld [vmem:[#allocation15_spill] sm:$0xff] }
 0x74b   : > { %v7065_v55 = vmax.f32 %v7041_v6, 0.0  ;;  %v7042_v11 = vadd.f32 %v13139_v47, %v6710_v25  ;;  %v6732_v43 = vmax.f32 %v6283_v31, %v6286_v48  ;;  %v6287_v54 = vadd.f32 %v13169_v32, %v5854_v53  ;;  %4700 = vmatmul.f32.gmra.mxu2 %v15621_v36  ;;  %7674 = vmatmul.msk.f32.gmra.mxu1 %vm3459_vm4, %v15616_v57  ;;  %v15623_v57 = vld [vmem:[#allocation7_spill] sm:$0xff]  ;;  %v15625_v48 = vld [vmem:[#allocation10_spill] sm:$0xff] }
 0x74d   : > { %v7181_v2 = vrot.slane %v7065_v55, 6  ;;  %v7066_v37 = vmax.f32 %v7042_v11, 0.0  ;;  %v6753_v15 = vmax.f32 %v6284_v62, %v6287_v54  ;;  %v5458_v21 = vpop.f32.mrf.mxu0  ;;  %v15626_v55 = vld [vmem:[#allocation20_spill] sm:$0xff] }
 0x74e   : > { %v4653_v8 = vpop.f32.mrf.mxu2  ;;  %7549 = vmatmul.msk.f32.gmra.mxu3 %vm3459_vm4, %v15622_v24 }
 0x74f   : > { %v7195_v4 = vrot.slane %v7066_v37, 6  ;;  %v5055_v18 = vadd.f32 %v5054_v35, %v4653_v8  ;;  %v13427_v16 = vsel %vm7162_vm6, %v7181_v2, %v13178_v63 }
 0x750   : > { %v5856_v49 = vpop.f32.mrf.mxu1  ;;  %5505 = vmatmul.f32.gmra.mxu0 %v15623_v57 }
 0x751   : > { %v6289_v28 = vadd.f32 %v13183_v50, %v5055_v18  ;;  %v5857_v10 = vadd.f32 %v5856_v49, %v5455_v60  ;;  %v5060_v5 = vpop.f32.mrf.mxu3  ;;  %v13433_v20 = vsel %vm7162_vm6, %v7195_v4, %v13188_v1  ;;  %v15628_v18 = vld [vmem:[#allocation22_spill] sm:$0xff] }
 0x753   : > { %v6733_v39 = vmax.f32 %v6732_v43, %v6289_v28  ;;  %v6290_v29 = vadd.f32 %v13193_v42, %v5857_v10  ;;  %4703 = vmatmul.f32.gmra.mxu2 %v15623_v57  ;;  %7675 = vmatmul.msk.f32.gmra.mxu1 %vm3459_vm4, %v15618_v19 }
 0x755   : > { %v6754_v63 = vmax.f32 %v6753_v15, %v6290_v29  ;;  %v5461_v60 = vpop.f32.mrf.mxu0  ;;  %v15627_v15 = vld [vmem:[#allocation12_spill] sm:$0xff]  ;;  %v15629_v29 = vld [vmem:[#allocation17_spill] sm:$0xff] }
 0x756   : > { %v4656_v35 = vpop.f32.mrf.mxu2  ;;  %7550 = vmatmul.msk.f32.gmra.mxu3 %vm3459_vm4, %v15624_v41 }
 0x757   : > { %v5058_v31 = vadd.f32 %v5057_v30, %v4656_v35 }
 0x758   : > { %v5859_v33 = vpop.f32.mrf.mxu1  ;;  %5508 = vmatmul.f32.gmra.mxu0 %v15625_v48 }
 0x759   : > { %v6292_v6 = vadd.f32 %v13204_v26, %v5058_v31  ;;  %v5860_v1 = vadd.f32 %v5859_v33, %v5458_v21  ;;  %v5063_v25 = vpop.f32.mrf.mxu3  ;;  %v15630_v33 = vld [vmem:[#allocation27_spill] sm:$0xff] }
 0x75b   : > { %v6734_v53 = vmax.f32 %v6733_v39, %v6292_v6  ;;  %v6293_v36 = vadd.f32 %v13211_v59, %v5860_v1  ;;  %4706 = vmatmul.f32.gmra.mxu2 %v15625_v48  ;;  %7676 = vmatmul.msk.f32.gmra.mxu1 %vm3459_vm4, %v15620_v0 }
 0x75d   : > { %v6755_v19 = vmax.f32 %v6754_v63, %v6293_v36  ;;  %v5464_v30 = vpop.f32.mrf.mxu0 }
 0x75e   : > { %v4659_v62 = vpop.f32.mrf.mxu2  ;;  %7551 = vmatmul.msk.f32.gmra.mxu3 %vm3459_vm4, %v15626_v55 }
 0x75f   : > { %v5061_v11 = vadd.f32 %v5060_v5, %v4659_v62 }
 0x760   : > { %v5862_v43 = vpop.f32.mrf.mxu1  ;;  %5511 = vmatmul.f32.gmra.mxu0 %v15627_v15 }
 0x761   : > { %v6295_v54 = vadd.f32 %v13222_v51, %v5061_v11  ;;  %v5863_v2 = vadd.f32 %v5862_v43, %v5461_v60  ;;  %v5066_v37 = vpop.f32.mrf.mxu3  ;;  %v7090_v60 = vld [vmem:[%s14379_s4 + $0x40] sm:$0xff] }
 0x762   : > { %7217 = vmatpush.msra.mxu2 %v7090_v60  ;;  %v7106_v11 = vld [vmem:[%s14379_s4 + $0xc0] sm:$0xff]  ;;  %v15635_v60 = vld [vmem:[#allocation29_spill] sm:$0xff] }
 0x763   : > { %v6735_v8 = vmax.f32 %v6734_v53, %v6295_v54  ;;  %v6296_v21 = vadd.f32 %v13229_v56, %v5863_v2  ;;  %4709 = vmatmul.f32.gmra.mxu2 %v15627_v15  ;;  %7677 = vmatmul.msk.f32.gmra.mxu1 %vm3459_vm4, %v15622_v24  ;;  %v15632_v54 = vld [vmem:[#allocation32_spill] sm:$0xff] }
 0x764   : > { %7237 = vmatpush.msra.mxu3 %v7106_v11 }
 0x765   : > { %v6756_v0 = vmax.f32 %v6755_v19, %v6296_v21  ;;  %v5467_v49 = vpop.f32.mrf.mxu0  ;;  %v15631_v19 = vld [vmem:[#allocation21_spill] sm:$0xff] }
 0x766   : > { %v4662_v4 = vpop.f32.mrf.mxu2  ;;  %7552 = vmatmul.msk.f32.gmra.mxu3 %vm3459_vm4, %v15628_v18 }
 0x767   : > { %v5064_v28 = vadd.f32 %v5063_v25, %v4662_v4  ;;  %v15633_v4 = vld [vmem:[#allocation24_spill] sm:$0xff] }
 0x768   : > { %v5865_v10 = vpop.f32.mrf.mxu1  ;;  %5514 = vmatmul.f32.gmra.mxu0 %v15629_v29 }
 0x769   : > { %v6298_v5 = vadd.f32 %v13240_v7, %v5064_v28  ;;  %v5866_v57 = vadd.f32 %v5865_v10, %v5464_v30  ;;  %v5069_v39 = vpop.f32.mrf.mxu3 }
 0x76b   : > { %v6736_v63 = vmax.f32 %v6735_v8, %v6298_v5  ;;  %v6299_v35 = vadd.f32 %v13247_v23, %v5866_v57  ;;  %4712 = vmatmul.f32.gmra.mxu2 %v15629_v29  ;;  %7678 = vmatmul.msk.f32.gmra.mxu1 %vm3459_vm4, %v15624_v41  ;;  %v15634_v5 = vld [vmem:[#allocation34_spill] sm:$0xff] }
 0x76d   : > { %v6757_v24 = vmax.f32 %v6756_v0, %v6299_v35  ;;  %v5470_v6 = vpop.f32.mrf.mxu0 }
 0x76e   : > { %v4665_v31 = vpop.f32.mrf.mxu2  ;;  %7553 = vmatmul.msk.f32.gmra.mxu3 %vm3459_vm4, %v15630_v33 }
 0x76f   : > { %v5067_v1 = vadd.f32 %v5066_v37, %v4665_v31 }
 0x770   : > { %v5868_v25 = vpop.f32.mrf.mxu1  ;;  %5517 = vmatmul.f32.gmra.mxu0 %v15631_v19 }
 0x771   : > { %v6301_v48 = vadd.f32 %v13261_v12, %v5067_v1  ;;  %v5869_v53 = vadd.f32 %v5868_v25, %v5467_v49  ;;  %v5072_v36 = vpop.f32.mrf.mxu3  ;;  %v15636_v25 = vld [vmem:[#allocation39_spill] sm:$0xff] }
 0x773   : > { %v6737_v41 = vmax.f32 %v6736_v63, %v6301_v48  ;;  %v6302_v62 = vadd.f32 %v13268_v46, %v5869_v53  ;;  %4715 = vmatmul.f32.gmra.mxu2 %v15631_v19  ;;  %7679 = vmatmul.msk.f32.gmra.mxu1 %vm3459_vm4, %v15626_v55 }
 0x775   : > { %v6758_v30 = vmax.f32 %v6757_v24, %v6302_v62  ;;  %v5473_v2 = vpop.f32.mrf.mxu0 }
 0x776   : > { %v4668_v43 = vpop.f32.mrf.mxu2  ;;  %7554 = vmatmul.msk.f32.gmra.mxu3 %vm3459_vm4, %v15632_v54 }
 0x777   : > { %v5070_v37 = vadd.f32 %v5069_v39, %v4668_v43 }
 0x778   : > { %v5871_v15 = vpop.f32.mrf.mxu1  ;;  %5520 = vmatmul.f32.gmra.mxu0 %v15633_v4 }
 0x779   : > { %v6304_v8 = vadd.f32 %v13282_v38, %v5070_v37  ;;  %v5872_v21 = vadd.f32 %v5871_v15, %v5470_v6  ;;  %v5075_v0 = vpop.f32.mrf.mxu3  ;;  %v15638_v37 = vld [vmem:[#allocation44_spill] sm:$0xff] }
 0x77b   : > { %v6738_v55 = vmax.f32 %v6737_v41, %v6304_v8  ;;  %v6305_v49 = vadd.f32 %v13289_v58, %v5872_v21  ;;  %4718 = vmatmul.f32.gmra.mxu2 %v15633_v4  ;;  %7680 = vmatmul.msk.f32.gmra.mxu1 %vm3459_vm4, %v15628_v18 }
 0x77d   : > { %v6759_v28 = vmax.f32 %v6758_v30, %v6305_v49  ;;  %v5476_v57 = vpop.f32.mrf.mxu0  ;;  %v15637_v30 = vld [vmem:[#allocation33_spill] sm:$0xff]  ;;  %v15639_v49 = vld [vmem:[#allocation36_spill] sm:$0xff] }
 0x77e   : > { %v4671_v10 = vpop.f32.mrf.mxu2  ;;  %7555 = vmatmul.msk.f32.gmra.mxu3 %vm3459_vm4, %v15634_v5 }
 0x77f   : > { %v5073_v39 = vadd.f32 %v5072_v36, %v4671_v10 }
 0x780   : > { %v5874_v29 = vpop.f32.mrf.mxu1  ;;  %5523 = vmatmul.f32.gmra.mxu0 %v15635_v60 }
 0x781   : > { %v6307_v63 = vadd.f32 %v13300_v34, %v5073_v39  ;;  %v5875_v35 = vadd.f32 %v5874_v29, %v5473_v2  ;;  %v5078_v24 = vpop.f32.mrf.mxu3  ;;  %v15640_v39 = vld [vmem:[#allocation46_spill] sm:$0xff] }
 0x783   : > { %v6739_v31 = vmax.f32 %v6738_v55, %v6307_v63  ;;  %v6308_v6 = vadd.f32 %v13307_v17, %v5875_v35  ;;  %4721 = vmatmul.f32.gmra.mxu2 %v15635_v60  ;;  %7681 = vmatmul.msk.f32.gmra.mxu1 %vm3459_vm4, %v15630_v33 }
 0x785   : > { %v6760_v18 = vmax.f32 %v6759_v28, %v6308_v6  ;;  %v5479_v48 = vpop.f32.mrf.mxu0  ;;  %v15641_v6 = vld [vmem:[#allocation41_spill] sm:$0xff] }
 0x786   : > { %v4674_v1 = vpop.f32.mrf.mxu2  ;;  %7556 = vmatmul.msk.f32.gmra.mxu3 %vm3459_vm4, %v15636_v25 }
 0x787   : > { %v5076_v53 = vadd.f32 %v5075_v0, %v4674_v1 }
 0x788   : > { %v5877_v36 = vpop.f32.mrf.mxu1  ;;  %5526 = vmatmul.f32.gmra.mxu0 %v15637_v30 }
 0x789   : > { %v6310_v19 = vadd.f32 %v13318_v27, %v5076_v53  ;;  %v5878_v41 = vadd.f32 %v5877_v36, %v5476_v57  ;;  %v5081_v62 = vpop.f32.mrf.mxu3  ;;  %v15642_v53 = vld [vmem:[#allocation51_spill] sm:$0xff] }
 0x78b   : > { %v6740_v11 = vmax.f32 %v6739_v31, %v6310_v19  ;;  %v6311_v43 = vadd.f32 %v13325_v3, %v5878_v41  ;;  %4724 = vmatmul.f32.gmra.mxu2 %v15637_v30  ;;  %7682 = vmatmul.msk.f32.gmra.mxu1 %vm3459_vm4, %v15632_v54 }
 0x78d   : > { %v6761_v33 = vmax.f32 %v6760_v18, %v6311_v43  ;;  %v5482_v15 = vpop.f32.mrf.mxu0 }
 0x78e   : > { %v4677_v2 = vpop.f32.mrf.mxu2  ;;  %7557 = vmatmul.msk.f32.gmra.mxu3 %vm3459_vm4, %v15638_v37 }
 0x78f   : > { %v5079_v8 = vadd.f32 %v5078_v24, %v4677_v2  ;;  %v13529_v2 = vld [vmem:[%s14377_s2 + $0x130] sm:$0xff] }
 0x790   : > { %v5880_v21 = vpop.f32.mrf.mxu1  ;;  %5529 = vmatmul.f32.gmra.mxu0 %v15639_v49 }
 0x791   : > { %v6313_v0 = vadd.f32 %v13336_v61, %v5079_v8  ;;  %v5881_v4 = vadd.f32 %v5880_v21, %v5479_v48  ;;  %v5084_v55 = vpop.f32.mrf.mxu3 }
 0x793   : > { %v6741_v28 = vmax.f32 %v6740_v11, %v6313_v0  ;;  %v6314_v10 = vadd.f32 %v13343_v9, %v5881_v4  ;;  %4727 = vmatmul.f32.gmra.mxu2 %v15639_v49  ;;  %7683 = vmatmul.msk.f32.gmra.mxu1 %vm3459_vm4, %v15634_v5  ;;  %v15644_v0 = vld [vmem:[#allocation56_spill] sm:$0xff] }
 0x795   : > { %v6762_v54 = vmax.f32 %v6761_v33, %v6314_v10  ;;  %v5485_v29 = vpop.f32.mrf.mxu0  ;;  %v15643_v33 = vld [vmem:[#allocation45_spill] sm:$0xff] }
 0x796   : > { %v4680_v57 = vpop.f32.mrf.mxu2  ;;  %7558 = vmatmul.msk.f32.gmra.mxu3 %vm3459_vm4, %v15640_v39 }
 0x797   : > { %v5082_v63 = vadd.f32 %v5081_v62, %v4680_v57  ;;  %v13522_v62 = vld [vmem:[%s14377_s2 + $0x128] sm:$0xff] }
 0x798   : > { %v5883_v35 = vpop.f32.mrf.mxu1  ;;  %5532 = vmatmul.f32.gmra.mxu0 %v15641_v6 }
 0x799   : > { %v6316_v24 = vadd.f32 %v13354_v44, %v5082_v63  ;;  %v5884_v60 = vadd.f32 %v5883_v35, %v5482_v15  ;;  %v5087_v31 = vpop.f32.mrf.mxu3  ;;  %v13547_v63 = vld [vmem:[%s14377_s2 + $0x148] sm:$0xff] }
 0x79b   : > { %v6742_v18 = vmax.f32 %v6741_v28, %v6316_v24  ;;  %v6317_v1 = vadd.f32 %v13361_v22, %v5884_v60  ;;  %4730 = vmatmul.f32.gmra.mxu2 %v15641_v6  ;;  %7684 = vmatmul.msk.f32.gmra.mxu1 %vm3459_vm4, %v15636_v25  ;;  %v13540_v28 = vld [vmem:[%s14377_s2 + $0x140] sm:$0xff] }
 0x79d   : > { %v6763_v5 = vmax.f32 %v6762_v54, %v6317_v1  ;;  %v5488_v36 = vpop.f32.mrf.mxu0  ;;  %v7089_v1 = vld [vmem:[%s14379_s4 + $0x38] sm:$0xff] }
 0x79e   : > { %v4683_v48 = vpop.f32.mrf.mxu2  ;;  %7559 = vmatmul.msk.f32.gmra.mxu3 %vm3459_vm4, %v15642_v53  ;;  %7218 = vmatpush.msra.mxu2 %v7089_v1 }
 0x79f   : > { %v5085_v19 = vadd.f32 %v5084_v55, %v4683_v48  ;;  %v13561_v48 = vld [vmem:[%s14377_s2 + $0x158] sm:$0xff] }
 0x7a0   : > { %v5886_v41 = vpop.f32.mrf.mxu1  ;;  %5535 = vmatmul.f32.gmra.mxu0 %v15643_v33 }
 0x7a1   : > { %v6319_v30 = vadd.f32 %v13522_v62, %v5085_v19  ;;  %v5887_v11 = vadd.f32 %v5886_v41, %v5485_v29  ;;  %v5090_v43 = vpop.f32.mrf.mxu3  ;;  %v15645_v29 = vld [vmem:[#allocation48_spill] sm:$0xff]  ;;  %v15647_v41 = vld [vmem:[#allocation53_spill] sm:$0xff] }
 0x7a3   : > { %v6743_v25 = vmax.f32 %v6742_v18, %v6319_v30  ;;  %v6320_v15 = vadd.f32 %v13529_v2, %v5887_v11  ;;  %4733 = vmatmul.f32.gmra.mxu2 %v15643_v33  ;;  %7685 = vmatmul.msk.f32.gmra.mxu1 %vm3459_vm4, %v15638_v37  ;;  %v13568_v11 = vld [vmem:[%s14377_s2 + $0x160] sm:$0xff] }
 0x7a5   : > { %v6764_v8 = vmax.f32 %v6763_v5, %v6320_v15  ;;  %v5491_v4 = vpop.f32.mrf.mxu0 }
 0x7a6   : > { %v4686_v21 = vpop.f32.mrf.mxu2  ;;  %7560 = vmatmul.msk.f32.gmra.mxu3 %vm3459_vm4, %v15644_v0 }
 0x7a7   : > { %v5088_v55 = vadd.f32 %v5087_v31, %v4686_v21  ;;  %v15646_v31 = vld [vmem:[#allocation58_spill] sm:$0xff] }
 0x7a8   : > { %v5889_v49 = vpop.f32.mrf.mxu1  ;;  %5538 = vmatmul.f32.gmra.mxu0 %v15645_v29 }
 0x7a9   : > { %v6322_v10 = vadd.f32 %v13540_v28, %v5088_v55  ;;  %v5890_v54 = vadd.f32 %v5889_v49, %v5488_v36  ;;  %v5093_v57 = vpop.f32.mrf.mxu3  ;;  %v13582_v49 = vld [vmem:[%s14377_s2 + $0x170] sm:$0xff] }
 0x7ab   : > { %v6744_v37 = vmax.f32 %v6743_v25, %v6322_v10  ;;  %v6323_v35 = vadd.f32 %v13547_v63, %v5890_v54  ;;  %4736 = vmatmul.f32.gmra.mxu2 %v15645_v29  ;;  %7686 = vmatmul.msk.f32.gmra.mxu1 %vm3459_vm4, %v15640_v39  ;;  %v7105_v25 = vld [vmem:[%s14379_s4 + $0xb8] sm:$0xff]  ;;  %v15649_v29 = vld [vmem:[#allocation57_spill] sm:$0xff] }
 0x7ac   : > { %7238 = vmatpush.msra.mxu3 %v7105_v25 }
 0x7ad   : > { %v6765_v24 = vmax.f32 %v6764_v8, %v6323_v35  ;;  %v5494_v6 = vpop.f32.mrf.mxu0  ;;  %v15648_v8 = vld [vmem:[#allocation63_spill] sm:$0xff]  ;;  %v13589_v35 = vld [vmem:[%s14377_s2 + $0x178] sm:$0xff] }
 0x7ae   : > { %v4689_v60 = vpop.f32.mrf.mxu2  ;;  %7561 = vmatmul.msk.f32.gmra.mxu3 %vm3459_vm4, %v15646_v31 }
 0x7af   : > { %v5091_v18 = vadd.f32 %v5090_v43, %v4689_v60 }
 0x7b0   : > { %v5892_v5 = vpop.f32.mrf.mxu1  ;;  %5541 = vmatmul.f32.gmra.mxu0 %v15647_v41 }
 0x7b1   : > { %v6325_v39 = vadd.f32 %v13561_v48, %v5091_v18  ;;  %v5893_v36 = vadd.f32 %v5892_v5, %v5491_v4  ;;  %v5096_v19 = vpop.f32.mrf.mxu3 }
 0x7b3   : > { %v6745_v30 = vmax.f32 %v6744_v37, %v6325_v39  ;;  %v6326_v43 = vadd.f32 %v13568_v11, %v5893_v36  ;;  %4739 = vmatmul.f32.gmra.mxu2 %v15647_v41  ;;  %7687 = vmatmul.msk.f32.gmra.mxu1 %vm3459_vm4, %v15642_v53 }
 0x7b5   : > { %v6766_v33 = vmax.f32 %v6765_v24, %v6326_v43  ;;  %v5497_v21 = vpop.f32.mrf.mxu0 }
 0x7b6   : > { %v4692_v15 = vpop.f32.mrf.mxu2  ;;  %7562 = vmatmul.msk.f32.gmra.mxu3 %vm3459_vm4, %v15648_v8 }
 0x7b7   : > { %v5094_v4 = vadd.f32 %v5093_v57, %v4692_v15  ;;  %v15651_v15 = vld [vmem:[#allocation60_spill] sm:$0xff] }
 0x7b8   : > { %v5895_v55 = vpop.f32.mrf.mxu1  ;;  %5544 = vmatmul.f32.gmra.mxu0 %v15649_v29 }
 0x7b9   : > { %v6328_v53 = vadd.f32 %v13582_v49, %v5094_v4  ;;  %v5896_v10 = vadd.f32 %v5895_v55, %v5494_v6  ;;  %v5099_v54 = vpop.f32.mrf.mxu3  ;;  %v15650_v6 = vld [vmem:[#allocation68_spill] sm:$0xff] }
 0x7bb   : > { %v6746_v37 = vmax.f32 %v6745_v30, %v6328_v53  ;;  %v6329_v57 = vadd.f32 %v13589_v35, %v5896_v10  ;;  %4742 = vmatmul.f32.gmra.mxu2 %v15649_v29  ;;  %7688 = vmatmul.msk.f32.gmra.mxu1 %vm3459_vm4, %v15644_v0  ;;  %v15652_v29 = vld [vmem:[#allocation70_spill] sm:$0xff] }
 0x7bd   : > { %v6747_v24 = vrot.slane %v6746_v37, 4  ;;  %v6767_v60 = vmax.f32 %v6766_v33, %v6329_v57  ;;  %v5500_v1 = vpop.f32.mrf.mxu0 }
 0x7be   : > { %v4695_v18 = vpop.f32.mrf.mxu2  ;;  %7563 = vmatmul.msk.f32.gmra.mxu3 %vm3459_vm4, %v15650_v6 }
 0x7bf   : > { %v6748_v5 = vmax.f32 %v6746_v37, %v6747_v24  ;;  %v6768_v39 = vrot.slane %v6767_v60, 4  ;;  %v5097_v36 = vadd.f32 %v5096_v19, %v4695_v18 }
 0x7c0   : > { %v5898_v41 = vpop.f32.mrf.mxu1  ;;  %5547 = vmatmul.f32.gmra.mxu0 %v15651_v15 }
 0x7c1   : > { %v6749_v30 = vrot.slane %v6748_v5, 2  ;;  %v6769_v43 = vmax.f32 %v6767_v60, %v6768_v39  ;;  %v5102_v25 = vpop.f32.mrf.mxu3  ;;  %v5899_v53 = vadd.f32 %v5898_v41, %v5497_v21  ;;  %v6331_v60 = vadd.f32 %v13147_v40, %v5097_v36 }
 0x7c3   : > { %v6750_v4 = vmax.f32 %v6748_v5, %v6749_v30  ;;  %v6770_v55 = vrot.slane %v6769_v43, 2  ;;  %4745 = vmatmul.f32.gmra.mxu2 %v15651_v15  ;;  %7689 = vmatmul.msk.f32.gmra.mxu1 %vm3459_vm4, %v15646_v31  ;;  %v6332_v21 = vadd.f32 %v13162_v52, %v5899_v53 }
 0x7c5   : > { %v6751_v0 = vrot.slane %v6750_v4, 1  ;;  %v6771_v33 = vmax.f32 %v6769_v43, %v6770_v55  ;;  %v5503_v19 = vpop.f32.mrf.mxu0  ;;  %v15653_v43 = vld [vmem:[#allocation65_spill] sm:$0xff] }
 0x7c6   : > { %v4698_v10 = vpop.f32.mrf.mxu2  ;;  %7564 = vmatmul.msk.f32.gmra.mxu3 %vm3459_vm4, %v15652_v29 }
 0x7c7   : > { %v6752_v37 = vmax.f32 %v6750_v4, %v6751_v0  ;;  %v6772_v57 = vrot.slane %v6771_v33, 1  ;;  %v5100_v24 = vadd.f32 %v5099_v54, %v4698_v10  ;;  %v15654_v0 = vld [vmem:[#allocation75_spill] sm:$0xff] }
 0x7c8   : > { %v5901_v18 = vpop.f32.mrf.mxu1  ;;  %5550 = vmatmul.f32.gmra.mxu0 %v15653_v43 }
 0x7c9   : > { %v7044_v5 = vadd.f32 %v13137_v14, %v6752_v37  ;;  %v6773_v39 = vmax.f32 %v6771_v33, %v6772_v57  ;;  %v6334_v30 = vadd.f32 %v13154_v45, %v5100_v24  ;;  %v5902_v31 = vadd.f32 %v5901_v18, %v5500_v1  ;;  %v5105_v15 = vpop.f32.mrf.mxu3 }
 0x7cb   : > { %v7068_v41 = vmax.f32 %v7044_v5, 0.0  ;;  %v7045_v55 = vadd.f32 %v13139_v47, %v6773_v39  ;;  %v6795_v4 = vmax.f32 %v6331_v60, %v6334_v30  ;;  %v6335_v54 = vadd.f32 %v13169_v32, %v5902_v31  ;;  %4748 = vmatmul.f32.gmra.mxu2 %v15653_v43  ;;  %7690 = vmatmul.msk.f32.gmra.mxu1 %vm3459_vm4, %v15648_v8  ;;  %v15655_v8 = vld [vmem:[#allocation69_spill] sm:$0xff]  ;;  %v15656_v39 = vld [vmem:[#allocation80_spill] sm:$0xff] }
 0x7cd   : > { %v7183_v40 = vrot.slane %v7068_v41, 5  ;;  %v7069_v36 = vmax.f32 %v7045_v55, 0.0  ;;  %v6816_v45 = vmax.f32 %v6332_v21, %v6335_v54  ;;  %v5506_v33 = vpop.f32.mrf.mxu0  ;;  %v15657_v21 = vld [vmem:[#allocation72_spill] sm:$0xff] }
 0x7ce   : > { %v4701_v1 = vpop.f32.mrf.mxu2  ;;  %7565 = vmatmul.msk.f32.gmra.mxu3 %vm3459_vm4, %v15654_v0 }
 0x7cf   : > { %v7197_v52 = vrot.slane %v7069_v36, 5  ;;  %v5103_v53 = vadd.f32 %v5102_v25, %v4701_v1  ;;  %v13617_v10 = vsel %vm7165_vm7, %v7183_v40, %v13427_v16  ;;  %v15659_v1 = vld [vmem:[#allocation77_spill] sm:$0xff] }
 0x7d0   : > { %v5904_v32 = vpop.f32.mrf.mxu1  ;;  %5553 = vmatmul.f32.gmra.mxu0 %v15655_v8 }
 0x7d1   : > { %v6337_v37 = vadd.f32 %v13183_v50, %v5103_v53  ;;  %v5905_v57 = vadd.f32 %v5904_v32, %v5503_v19  ;;  %v5108_v24 = vpop.f32.mrf.mxu3  ;;  %v13623_v60 = vsel %vm7165_vm7, %v7197_v52, %v13433_v20  ;;  %v15660_v53 = vld [vmem:[#allocation87_spill] sm:$0xff] }
 0x7d3   : > { %v6796_v18 = vmax.f32 %v6795_v4, %v6337_v37  ;;  %v6338_v5 = vadd.f32 %v13193_v42, %v5905_v57  ;;  %4751 = vmatmul.f32.gmra.mxu2 %v15655_v8  ;;  %7691 = vmatmul.msk.f32.gmra.mxu1 %vm3459_vm4, %v15650_v6  ;;  %v15658_v4 = vld [vmem:[#allocation82_spill] sm:$0xff] }
 0x7d5   : > { %v6817_v16 = vmax.f32 %v6816_v45, %v6338_v5  ;;  %v5509_v50 = vpop.f32.mrf.mxu0 }
 0x7d6   : > { %v4704_v25 = vpop.f32.mrf.mxu2  ;;  %7566 = vmatmul.msk.f32.gmra.mxu3 %vm3459_vm4, %v15656_v39 }
 0x7d7   : > { %v5106_v19 = vadd.f32 %v5105_v15, %v4704_v25 }
 0x7d8   : > { %v5907_v30 = vpop.f32.mrf.mxu1  ;;  %5556 = vmatmul.f32.gmra.mxu0 %v15657_v21 }
 0x7d9   : > { %v6340_v31 = vadd.f32 %v13204_v26, %v5106_v19  ;;  %v5908_v20 = vadd.f32 %v5907_v30, %v5506_v33  ;;  %v5111_v43 = vpop.f32.mrf.mxu3 }
 0x7db   : > { %v6797_v42 = vmax.f32 %v6796_v18, %v6340_v31  ;;  %v6341_v41 = vadd.f32 %v13211_v59, %v5908_v20  ;;  %4754 = vmatmul.f32.gmra.mxu2 %v15657_v21  ;;  %7692 = vmatmul.msk.f32.gmra.mxu1 %vm3459_vm4, %v15652_v29  ;;  %v15661_v18 = vld [vmem:[#allocation81_spill] sm:$0xff] }
 0x7dd   : > { %v6818_v6 = vmax.f32 %v6817_v16, %v6341_v41  ;;  %v5512_v15 = vpop.f32.mrf.mxu0  ;;  %v7088_v16 = vld [vmem:[%s14379_s4 + $0x30] sm:$0xff] }
 0x7de   : > { %v4707_v55 = vpop.f32.mrf.mxu2  ;;  %7567 = vmatmul.msk.f32.gmra.mxu3 %vm3459_vm4, %v15658_v4  ;;  %7219 = vmatpush.msra.mxu2 %v7088_v16  ;;  %v7104_v41 = vld [vmem:[%s14379_s4 + $0xb0] sm:$0xff] }
 0x7df   : > { %v5109_v54 = vadd.f32 %v5108_v24, %v4707_v55  ;;  %v15664_v55 = vld [vmem:[#allocation94_spill] sm:$0xff]  ;;  %7239 = vmatpush.msra.mxu3 %v7104_v41 }
 0x7e0   : > { %v5910_v26 = vpop.f32.mrf.mxu1  ;;  %5559 = vmatmul.f32.gmra.mxu0 %v15659_v1 }
 0x7e1   : > { %v6343_v40 = vadd.f32 %v13222_v51, %v5109_v54  ;;  %v5911_v36 = vadd.f32 %v5910_v26, %v5509_v50  ;;  %v5114_v45 = vpop.f32.mrf.mxu3  ;;  %v15662_v50 = vld [vmem:[#allocation92_spill] sm:$0xff] }
 0x7e3   : > { %v6798_v59 = vmax.f32 %v6797_v42, %v6343_v40  ;;  %v6344_v33 = vadd.f32 %v13229_v56, %v5911_v36  ;;  %4757 = vmatmul.f32.gmra.mxu2 %v15659_v1  ;;  %7693 = vmatmul.msk.f32.gmra.mxu1 %vm3459_vm4, %v15654_v0  ;;  %v15665_v36 = vld [vmem:[#allocation89_spill] sm:$0xff] }
 0x7e5   : > { %v6819_v29 = vmax.f32 %v6818_v6, %v6344_v33  ;;  %v5515_v32 = vpop.f32.mrf.mxu0  ;;  %v15666_v33 = vld [vmem:[#allocation99_spill] sm:$0xff] }
 0x7e6   : > { %v4710_v52 = vpop.f32.mrf.mxu2  ;;  %7568 = vmatmul.msk.f32.gmra.mxu3 %vm3459_vm4, %v15660_v53 }
 0x7e7   : > { %v5112_v37 = vadd.f32 %v5111_v43, %v4710_v52  ;;  %v15663_v43 = vld [vmem:[#allocation84_spill] sm:$0xff] }
 0x7e8   : > { %v5913_v51 = vpop.f32.mrf.mxu1  ;;  %5562 = vmatmul.f32.gmra.mxu0 %v15661_v18 }
 0x7e9   : > { %v6346_v57 = vadd.f32 %v13240_v7, %v5112_v37  ;;  %v5914_v24 = vadd.f32 %v5913_v51, %v5512_v15  ;;  %v5117_v8 = vpop.f32.mrf.mxu3 }
 0x7eb   : > { %v6799_v56 = vmax.f32 %v6798_v59, %v6346_v57  ;;  %v6347_v5 = vadd.f32 %v13247_v23, %v5914_v24  ;;  %4760 = vmatmul.f32.gmra.mxu2 %v15661_v18  ;;  %7694 = vmatmul.msk.f32.gmra.mxu1 %vm3459_vm4, %v15656_v39  ;;  %v15667_v57 = vld [vmem:[#allocation93_spill] sm:$0xff]  ;;  %v15668_v18 = vld [vmem:[#allocation104_spill] sm:$0xff] }
 0x7ed   : > { %v6820_v0 = vmax.f32 %v6819_v29, %v6347_v5  ;;  %v5518_v7 = vpop.f32.mrf.mxu0 }
 0x7ee   : > { %v4713_v25 = vpop.f32.mrf.mxu2  ;;  %7569 = vmatmul.msk.f32.gmra.mxu3 %vm3459_vm4, %v15662_v50 }
 0x7ef   : > { %v5115_v19 = vadd.f32 %v5114_v45, %v4713_v25 }
 0x7f0   : > { %v5916_v30 = vpop.f32.mrf.mxu1  ;;  %5565 = vmatmul.f32.gmra.mxu0 %v15663_v43 }
 0x7f1   : > { %v6349_v23 = vadd.f32 %v13261_v12, %v5115_v19  ;;  %v5917_v31 = vadd.f32 %v5916_v30, %v5515_v32  ;;  %v5120_v20 = vpop.f32.mrf.mxu3 }
 0x7f3   : > { %v6800_v39 = vmax.f32 %v6799_v56, %v6349_v23  ;;  %v6350_v21 = vadd.f32 %v13268_v46, %v5917_v31  ;;  %4763 = vmatmul.f32.gmra.mxu2 %v15663_v43  ;;  %7695 = vmatmul.msk.f32.gmra.mxu1 %vm3459_vm4, %v15658_v4  ;;  %v15670_v23 = vld [vmem:[#allocation106_spill] sm:$0xff] }
 0x7f5   : > { %v6821_v42 = vmax.f32 %v6820_v0, %v6350_v21  ;;  %v5521_v12 = vpop.f32.mrf.mxu0 }
 0x7f6   : > { %v4716_v6 = vpop.f32.mrf.mxu2  ;;  %7570 = vmatmul.msk.f32.gmra.mxu3 %vm3459_vm4, %v15664_v55 }
 0x7f7   : > { %v5118_v15 = vadd.f32 %v5117_v8, %v4716_v6 }
 0x7f8   : > { %v5919_v54 = vpop.f32.mrf.mxu1  ;;  %5568 = vmatmul.f32.gmra.mxu0 %v15665_v36 }
 0x7f9   : > { %v6352_v46 = vadd.f32 %v13282_v38, %v5118_v15  ;;  %v5920_v26 = vadd.f32 %v5919_v54, %v5518_v7  ;;  %v5123_v40 = vpop.f32.mrf.mxu3  ;;  %v15669_v7 = vld [vmem:[#allocation96_spill] sm:$0xff] }
 0x7fb   : > { %v6801_v4 = vmax.f32 %v6800_v39, %v6352_v46  ;;  %v6353_v45 = vadd.f32 %v13289_v58, %v5920_v26  ;;  %4766 = vmatmul.f32.gmra.mxu2 %v15665_v36  ;;  %7696 = vmatmul.msk.f32.gmra.mxu1 %vm3459_vm4, %v15660_v53  ;;  %v15673_v36 = vld [vmem:[#allocation105_spill] sm:$0xff] }
 0x7fd   : > { %v6822_v1 = vmax.f32 %v6821_v42, %v6353_v45  ;;  %v5524_v29 = vpop.f32.mrf.mxu0  ;;  %v15671_v42 = vld [vmem:[#allocation101_spill] sm:$0xff] }
 0x7fe   : > { %v4719_v59 = vpop.f32.mrf.mxu2  ;;  %7571 = vmatmul.msk.f32.gmra.mxu3 %vm3459_vm4, %v15666_v33 }
 0x7ff   : > { %v5121_v52 = vadd.f32 %v5120_v20, %v4719_v59  ;;  %v15674_v59 = vld [vmem:[#allocation116_spill] sm:$0xff] }
 0x800   : > { %v5922_v38 = vpop.f32.mrf.mxu1  ;;  %5571 = vmatmul.f32.gmra.mxu0 %v15667_v57 }
 0x801   : > { %v6355_v32 = vadd.f32 %v13300_v34, %v5121_v52  ;;  %v5923_v37 = vadd.f32 %v5922_v38, %v5521_v12  ;;  %v5126_v51 = vpop.f32.mrf.mxu3  ;;  %v15672_v12 = vld [vmem:[#allocation111_spill] sm:$0xff] }
 0x803   : > { %v6802_v58 = vmax.f32 %v6801_v4, %v6355_v32  ;;  %v6356_v24 = vadd.f32 %v13307_v17, %v5923_v37  ;;  %4769 = vmatmul.f32.gmra.mxu2 %v15667_v57  ;;  %7697 = vmatmul.msk.f32.gmra.mxu1 %vm3459_vm4, %v15662_v50  ;;  %v15675_v37 = vld [vmem:[#allocation108_spill] sm:$0xff] }
 0x805   : > { %v6823_v53 = vmax.f32 %v6822_v1, %v6356_v24  ;;  %v5527_v56 = vpop.f32.mrf.mxu0  ;;  %v15676_v24 = vld [vmem:[#allocation118_spill] sm:$0xff] }
 0x806   : > { %v4722_v8 = vpop.f32.mrf.mxu2  ;;  %7572 = vmatmul.msk.f32.gmra.mxu3 %vm3459_vm4, %v15668_v18 }
 0x807   : > { %v5124_v5 = vadd.f32 %v5123_v40, %v4722_v8 }
 0x808   : > { %v5925_v34 = vpop.f32.mrf.mxu1  ;;  %5574 = vmatmul.f32.gmra.mxu0 %v15669_v7 }
 0x809   : > { %v6358_v0 = vadd.f32 %v13318_v27, %v5124_v5  ;;  %v5926_v16 = vadd.f32 %v5925_v34, %v5524_v29  ;;  %v5129_v25 = vpop.f32.mrf.mxu3 }
 0x80b   : > { %v6803_v17 = vmax.f32 %v6802_v58, %v6358_v0  ;;  %v6359_v19 = vadd.f32 %v13325_v3, %v5926_v16  ;;  %4772 = vmatmul.f32.gmra.mxu2 %v15669_v7  ;;  %7698 = vmatmul.msk.f32.gmra.mxu1 %vm3459_vm4, %v15664_v55  ;;  %v15677_v0 = vld [vmem:[#allocation113_spill] sm:$0xff] }
 0x80d   : > { %v6824_v50 = vmax.f32 %v6823_v53, %v6359_v19  ;;  %v5530_v31 = vpop.f32.mrf.mxu0  ;;  %v15678_v19 = vld [vmem:[#allocation124_spill] sm:$0xff] }
 0x80e   : > { %v4725_v30 = vpop.f32.mrf.mxu2  ;;  %7573 = vmatmul.msk.f32.gmra.mxu3 %vm3459_vm4, %v15670_v23 }
 0x80f   : > { %v5127_v20 = vadd.f32 %v5126_v51, %v4725_v30 }
 0x810   : > { %v5928_v27 = vpop.f32.mrf.mxu1  ;;  %5577 = vmatmul.f32.gmra.mxu0 %v15671_v42 }
 0x811   : > { %v6361_v43 = vadd.f32 %v13336_v61, %v5127_v20  ;;  %v5929_v39 = vadd.f32 %v5928_v27, %v5527_v56  ;;  %v5132_v21 = vpop.f32.mrf.mxu3 }
 0x813   : > { %v6804_v3 = vmax.f32 %v6803_v17, %v6361_v43  ;;  %v6362_v41 = vadd.f32 %v13343_v9, %v5929_v39  ;;  %4775 = vmatmul.f32.gmra.mxu2 %v15671_v42  ;;  %7699 = vmatmul.msk.f32.gmra.mxu1 %vm3459_vm4, %v15666_v33  ;;  %v15679_v39 = vld [vmem:[#allocation117_spill] sm:$0xff] }
 0x815   : > { %v6825_v6 = vmax.f32 %v6824_v50, %v6362_v41  ;;  %v5533_v15 = vpop.f32.mrf.mxu0  ;;  %v7103_v41 = vld [vmem:[%s14379_s4 + $0xa8] sm:$0xff] }
 0x816   : > { %v4728_v55 = vpop.f32.mrf.mxu2  ;;  %7574 = vmatmul.msk.f32.gmra.mxu3 %vm3459_vm4, %v15672_v12 }
 0x817   : > { %v5130_v54 = vadd.f32 %v5129_v25, %v4728_v55  ;;  %v15680_v55 = vld [vmem:[#allocation134_spill] sm:$0xff]  ;;  %7240 = vmatpush.msra.mxu3 %v7103_v41  ;;  %v13777_v41 = vld [vmem:[%s14377_s2 + $0x28] sm:$0xff] }
 0x818   : > { %v5931_v61 = vpop.f32.mrf.mxu1  ;;  %5580 = vmatmul.f32.gmra.mxu0 %v15673_v36 }
 0x819   : > { %v6364_v46 = vadd.f32 %v13354_v44, %v5130_v54  ;;  %v5932_v26 = vadd.f32 %v5931_v61, %v5530_v31  ;;  %v5135_v40 = vpop.f32.mrf.mxu3 }
 0x81b   : > { %v6805_v9 = vmax.f32 %v6804_v3, %v6364_v46  ;;  %v6365_v4 = vadd.f32 %v13361_v22, %v5932_v26  ;;  %4778 = vmatmul.f32.gmra.mxu2 %v15673_v36  ;;  %7700 = vmatmul.msk.f32.gmra.mxu1 %vm3459_vm4, %v15668_v18 }
 0x81d   : > { %v6826_v45 = vmax.f32 %v6825_v6, %v6365_v4  ;;  %v5536_v33 = vpop.f32.mrf.mxu0 }
 0x81e   : > { %v4731_v1 = vpop.f32.mrf.mxu2  ;;  %7575 = vmatmul.msk.f32.gmra.mxu3 %vm3459_vm4, %v15674_v59 }
 0x81f   : > { %v5133_v29 = vadd.f32 %v5132_v21, %v4731_v1 }
 0x820   : > { %v5934_v44 = vpop.f32.mrf.mxu1  ;;  %5583 = vmatmul.f32.gmra.mxu0 %v15675_v37 }
 0x821   : > { %v6367_v52 = vadd.f32 %v13522_v62, %v5133_v29  ;;  %v5935_v38 = vadd.f32 %v5934_v44, %v5533_v15  ;;  %v5138_v32 = vpop.f32.mrf.mxu3 }
 0x823   : > { %v6806_v22 = vmax.f32 %v6805_v9, %v6367_v52  ;;  %v6368_v51 = vadd.f32 %v13529_v2, %v5935_v38  ;;  %4781 = vmatmul.f32.gmra.mxu2 %v15675_v37  ;;  %7701 = vmatmul.msk.f32.gmra.mxu1 %vm3459_vm4, %v15670_v23  ;;  %v7087_v23 = vld [vmem:[%s14379_s4 + $0x28] sm:$0xff] }
 0x824   : > { %7220 = vmatpush.msra.mxu2 %v7087_v23 }
 0x825   : > { %v6827_v57 = vmax.f32 %v6826_v45, %v6368_v51  ;;  %v5539_v53 = vpop.f32.mrf.mxu0  ;;  %v15683_v51 = vld [vmem:[#allocation128_spill] sm:$0xff] }
 0x826   : > { %v4734_v58 = vpop.f32.mrf.mxu2  ;;  %7576 = vmatmul.msk.f32.gmra.mxu3 %vm3459_vm4, %v15676_v24 }
 0x827   : > { %v5136_v8 = vadd.f32 %v5135_v40, %v4734_v58  ;;  %v15681_v40 = vld [vmem:[#allocation120_spill] sm:$0xff] }
 0x828   : > { %v5937_v18 = vpop.f32.mrf.mxu1  ;;  %5586 = vmatmul.f32.gmra.mxu0 %v15677_v0 }
 0x829   : > { %v6370_v56 = vadd.f32 %v13540_v28, %v5136_v8  ;;  %v5938_v5 = vadd.f32 %v5937_v18, %v5536_v33  ;;  %v5141_v34 = vpop.f32.mrf.mxu3 }
 0x82b   : > { %v6807_v16 = vmax.f32 %v6806_v22, %v6370_v56  ;;  %v6371_v25 = vadd.f32 %v13547_v63, %v5938_v5  ;;  %4784 = vmatmul.f32.gmra.mxu2 %v15677_v0  ;;  %7702 = vmatmul.msk.f32.gmra.mxu1 %vm3459_vm4, %v15672_v12  ;;  %v15684_v56 = vld [vmem:[#allocation148_spill] sm:$0xff] }
 0x82d   : > { %v6828_v7 = vmax.f32 %v6827_v57, %v6371_v25  ;;  %v5542_v50 = vpop.f32.mrf.mxu0  ;;  %v13756_v25 = vld [vmem:[%s14377_s2 + $0x8] sm:$0xff] }
 0x82e   : > { %v4737_v17 = vpop.f32.mrf.mxu2  ;;  %7577 = vmatmul.msk.f32.gmra.mxu3 %vm3459_vm4, %v15678_v19 }
 0x82f   : > { %v5139_v30 = vadd.f32 %v5138_v32, %v4737_v17 }
 0x830   : > { %v5940_v31 = vpop.f32.mrf.mxu1  ;;  %5589 = vmatmul.f32.gmra.mxu0 %v15679_v39 }
 0x831   : > { %v6373_v20 = vadd.f32 %v13561_v48, %v5139_v30  ;;  %v5941_v27 = vadd.f32 %v5940_v31, %v5539_v53  ;;  %v5144_v43 = vpop.f32.mrf.mxu3  ;;  %v13763_v30 = vld [vmem:[%s14377_s2 + $0x20] sm:$0xff] }
 0x833   : > { %v6808_v21 = vmax.f32 %v6807_v16, %v6373_v20  ;;  %v6374_v42 = vadd.f32 %v13568_v11, %v5941_v27  ;;  %4787 = vmatmul.f32.gmra.mxu2 %v15679_v39  ;;  %7703 = vmatmul.msk.f32.gmra.mxu1 %vm3459_vm4, %v15674_v59  ;;  %v15682_v59 = vld [vmem:[#allocation138_spill] sm:$0xff]  ;;  %v15685_v27 = vld [vmem:[#allocation136_spill] sm:$0xff] }
 0x835   : > { %v6829_v3 = vmax.f32 %v6828_v7, %v6374_v42  ;;  %v5545_v12 = vpop.f32.mrf.mxu0 }
 0x836   : > { %v4740_v6 = vpop.f32.mrf.mxu2  ;;  %7578 = vmatmul.msk.f32.gmra.mxu3 %vm3459_vm4, %v15680_v55 }
 0x837   : > { %v5142_v15 = vadd.f32 %v5141_v34, %v4740_v6 }
 0x838   : > { %v5943_v54 = vpop.f32.mrf.mxu1  ;;  %5592 = vmatmul.f32.gmra.mxu0 %v15681_v40 }
 0x839   : > { %v6376_v61 = vadd.f32 %v13582_v49, %v5142_v15  ;;  %v5944_v46 = vadd.f32 %v5943_v54, %v5542_v50  ;;  %v5147_v26 = vpop.f32.mrf.mxu3 }
 0x83b   : > { %v6809_v36 = vmax.f32 %v6808_v21, %v6376_v61  ;;  %v6377_v9 = vadd.f32 %v13589_v35, %v5944_v46  ;;  %4790 = vmatmul.f32.gmra.mxu2 %v15681_v40  ;;  %7704 = vmatmul.msk.f32.gmra.mxu1 %vm3459_vm4, %v15676_v24  ;;  %v15686_v46 = vld [vmem:[#allocation158_spill] sm:$0xff] }
 0x83d   : > { %v6810_v4 = vrot.slane %v6809_v36, 4  ;;  %v6830_v45 = vmax.f32 %v6829_v3, %v6377_v9  ;;  %v5548_v33 = vpop.f32.mrf.mxu0 }
 0x83e   : > { %v4743_v1 = vpop.f32.mrf.mxu2  ;;  %7579 = vmatmul.msk.f32.gmra.mxu3 %vm3459_vm4, %v15682_v59 }
 0x83f   : > { %v6811_v29 = vmax.f32 %v6809_v36, %v6810_v4  ;;  %v6831_v44 = vrot.slane %v6830_v45, 4  ;;  %v5145_v52 = vadd.f32 %v5144_v43, %v4743_v1  ;;  %v13770_v43 = vld [vmem:[%s14377_s2 + $0x10] sm:$0xff] }
 0x840   : > { %v5946_v38 = vpop.f32.mrf.mxu1  ;;  %5595 = vmatmul.f32.gmra.mxu0 %v15683_v51 }
 0x841   : > { %v6812_v32 = vrot.slane %v6811_v29, 2  ;;  %v6832_v37 = vmax.f32 %v6830_v45, %v6831_v44  ;;  %v5150_v22 = vpop.f32.mrf.mxu3  ;;  %v5947_v8 = vadd.f32 %v5946_v38, %v5545_v12  ;;  %v6379_v7 = vadd.f32 %v13756_v25, %v5145_v52  ;;  %v13792_v45 = vld [vmem:[%s14377_s2 + $0x38] sm:$0xff] }
 0x843   : > { %v6813_v57 = vmax.f32 %v6811_v29, %v6812_v32  ;;  %v6833_v58 = vrot.slane %v6832_v37, 2  ;;  %4793 = vmatmul.f32.gmra.mxu2 %v15683_v51  ;;  %7705 = vmatmul.msk.f32.gmra.mxu1 %vm3459_vm4, %v15678_v19  ;;  %v6380_v39 = vadd.f32 %v13770_v43, %v5947_v8  ;;  %v15687_v29 = vld [vmem:[#allocation142_spill] sm:$0xff] }
 0x845   : > { %v6814_v24 = vrot.slane %v6813_v57, 1  ;;  %v6834_v53 = vmax.f32 %v6832_v37, %v6833_v58  ;;  %v5551_v5 = vpop.f32.mrf.mxu0  ;;  %v13814_v58 = vld [vmem:[%s14377_s2 + $0x50] sm:$0xff] }
 0x846   : > { %v4746_v18 = vpop.f32.mrf.mxu2  ;;  %7580 = vmatmul.msk.f32.gmra.mxu3 %vm3459_vm4, %v15684_v56 }
 0x847   : > { %v6815_v34 = vmax.f32 %v6813_v57, %v6814_v24  ;;  %v6835_v0 = vrot.slane %v6834_v53, 1  ;;  %v5148_v16 = vadd.f32 %v5147_v26, %v4746_v18  ;;  %v15689_v18 = vld [vmem:[#allocation152_spill] sm:$0xff] }
 0x848   : > { %v5949_v17 = vpop.f32.mrf.mxu1  ;;  %5598 = vmatmul.f32.gmra.mxu0 %v15685_v27 }
 0x849   : > { %v7047_v19 = vadd.f32 %v13137_v14, %v6815_v34  ;;  %v6836_v50 = vmax.f32 %v6834_v53, %v6835_v0  ;;  %v6382_v23 = vadd.f32 %v13763_v30, %v5148_v16  ;;  %v5950_v31 = vadd.f32 %v5949_v17, %v5548_v33  ;;  %v5153_v20 = vpop.f32.mrf.mxu3 }
 0x84b   : > { %v7071_v21 = vmax.f32 %v7047_v19, 0.0  ;;  %v7048_v42 = vadd.f32 %v13139_v47, %v6836_v50  ;;  %v6858_v3 = vmax.f32 %v6379_v7, %v6382_v23  ;;  %v6383_v6 = vadd.f32 %v13777_v41, %v5950_v31  ;;  %4796 = vmatmul.f32.gmra.mxu2 %v15685_v27  ;;  %7706 = vmatmul.msk.f32.gmra.mxu1 %vm3459_vm4, %v15680_v55  ;;  %v15690_v7 = vld [vmem:[#allocation172_spill] sm:$0xff] }
 0x84c   : > { %v13832_v23 = vld [vmem:[%s14377_s2 + $0x68] sm:$0xff] }
 0x84d   : > { %v7185_v12 = vrot.slane %v7071_v21, 4  ;;  %v7072_v15 = vmax.f32 %v7048_v42, 0.0  ;;  %v6879_v54 = vmax.f32 %v6380_v39, %v6383_v6  ;;  %v5554_v26 = vpop.f32.mrf.mxu0  ;;  %v15691_v39 = vld [vmem:[#allocation160_spill] sm:$0xff]  ;;  %v13839_v21 = vld [vmem:[%s14377_s2 + $0x70] sm:$0xff] }
 0x84e   : > { %v4749_v61 = vpop.f32.mrf.mxu2  ;;  %7581 = vmatmul.msk.f32.gmra.mxu3 %vm3459_vm4, %v15686_v46 }
 0x84f   : > { %v7199_v40 = vrot.slane %v7072_v15, 4  ;;  %v5151_v36 = vadd.f32 %v5150_v22, %v4749_v61  ;;  %v13787_v9 = vsel %vm7168_vm8, %v7185_v12, %v13617_v10  ;;  %v13803_v10 = vld [vmem:[%s14377_s2 + $0x40] sm:$0xff]  ;;  %v15688_v22 = vld [vmem:[#allocation162_spill] sm:$0xff]  ;;  %v15692_v12 = vld [vmem:[#allocation181_spill] sm:$0xff] }
 0x850   : > { %v5952_v4 = vpop.f32.mrf.mxu1  ;;  %5601 = vmatmul.f32.gmra.mxu0 %v15687_v29 }
 0x851   : > { %v6385_v55 = vadd.f32 %v13792_v45, %v5151_v36  ;;  %v5953_v1 = vadd.f32 %v5952_v4, %v5551_v5  ;;  %v5156_v33 = vpop.f32.mrf.mxu3  ;;  %v13798_v44 = vsel %vm7168_vm8, %v7199_v40, %v13623_v60  ;;  %v13821_v5 = vld [vmem:[%s14377_s2 + $0x58] sm:$0xff] }
 0x853   : > { %v6859_v52 = vmax.f32 %v6858_v3, %v6385_v55  ;;  %v6386_v38 = vadd.f32 %v13803_v10, %v5953_v1  ;;  %4799 = vmatmul.f32.gmra.mxu2 %v15687_v29  ;;  %7707 = vmatmul.msk.f32.gmra.mxu1 %vm3459_vm4, %v15682_v59  ;;  %v15693_v55 = vld [vmem:[#allocation166_spill] sm:$0xff]  ;;  %v13857_v1 = vld [vmem:[%s14377_s2 + $0x88] sm:$0xff] }
 0x855   : > { %v6880_v32 = vmax.f32 %v6879_v54, %v6386_v38  ;;  %v5557_v60 = vpop.f32.mrf.mxu0 }
 0x856   : > { %v4752_v37 = vpop.f32.mrf.mxu2  ;;  %7582 = vmatmul.msk.f32.gmra.mxu3 %vm3459_vm4, %v15688_v22 }
 0x857   : > { %v5154_v51 = vadd.f32 %v5153_v20, %v4752_v37 }
 0x858   : > { %v5955_v57 = vpop.f32.mrf.mxu1  ;;  %5604 = vmatmul.f32.gmra.mxu0 %v15689_v18 }
 0x859   : > { %v6388_v24 = vadd.f32 %v13814_v58, %v5154_v51  ;;  %v5956_v53 = vadd.f32 %v5955_v57, %v5554_v26  ;;  %v5159_v8 = vpop.f32.mrf.mxu3  ;;  %v13850_v26 = vld [vmem:[%s14377_s2 + $0x80] sm:$0xff]  ;;  %v13871_v57 = vld [vmem:[%s14377_s2 + $0x98] sm:$0xff] }
 0x85b   : > { %v6860_v59 = vmax.f32 %v6859_v52, %v6388_v24  ;;  %v6389_v34 = vadd.f32 %v13821_v5, %v5956_v53  ;;  %4802 = vmatmul.f32.gmra.mxu2 %v15689_v18  ;;  %7708 = vmatmul.msk.f32.gmra.mxu1 %vm3459_vm4, %v15684_v56  ;;  %v7086_v52 = vld [vmem:[%s14379_s4 + $0x20] sm:$0xff] }
 0x85c   : > { %7221 = vmatpush.msra.mxu2 %v7086_v52 }
 0x85d   : > { %v6881_v0 = vmax.f32 %v6880_v32, %v6389_v34  ;;  %v5560_v17 = vpop.f32.mrf.mxu0  ;;  %v15694_v32 = vld [vmem:[#allocation185_spill] sm:$0xff] }
 0x85e   : > { %v4755_v16 = vpop.f32.mrf.mxu2  ;;  %7583 = vmatmul.msk.f32.gmra.mxu3 %vm3459_vm4, %v15690_v7 }
 0x85f   : > { %v5157_v19 = vadd.f32 %v5156_v33, %v4755_v16  ;;  %v7102_v16 = vld [vmem:[%s14379_s4 + $0xa0] sm:$0xff] }
 0x860   : > { %v5958_v50 = vpop.f32.mrf.mxu1  ;;  %5607 = vmatmul.f32.gmra.mxu0 %v15691_v39  ;;  %7241 = vmatpush.msra.mxu3 %v7102_v16 }
 0x861   : > { %v6391_v31 = vadd.f32 %v13832_v23, %v5157_v19  ;;  %v5959_v20 = vadd.f32 %v5958_v50, %v5557_v60  ;;  %v5162_v27 = vpop.f32.mrf.mxu3  ;;  %v15696_v19 = vld [vmem:[#allocation195_spill] sm:$0xff] }
 0x863   : > { %v6861_v56 = vmax.f32 %v6860_v59, %v6391_v31  ;;  %v6392_v42 = vadd.f32 %v13839_v21, %v5959_v20  ;;  %4805 = vmatmul.f32.gmra.mxu2 %v15691_v39  ;;  %7709 = vmatmul.msk.f32.gmra.mxu1 %vm3459_vm4, %v15686_v46  ;;  %v13878_v59 = vld [vmem:[%s14377_s2 + $0xa0] sm:$0xff] }
 0x865   : > { %v6882_v3 = vmax.f32 %v6881_v0, %v6392_v42  ;;  %v5563_v15 = vpop.f32.mrf.mxu0  ;;  %v15697_v42 = vld [vmem:[#allocation183_spill] sm:$0xff] }
 0x866   : > { %v4758_v6 = vpop.f32.mrf.mxu2  ;;  %7584 = vmatmul.msk.f32.gmra.mxu3 %vm3459_vm4, %v15692_v12 }
 0x867   : > { %v5160_v54 = vadd.f32 %v5159_v8, %v4758_v6  ;;  %v15695_v8 = vld [vmem:[#allocation176_spill] sm:$0xff]  ;;  %v13899_v6 = vld [vmem:[%s14377_s2 + $0xb8] sm:$0xff] }
 0x868   : > { %v5961_v61 = vpop.f32.mrf.mxu1  ;;  %5610 = vmatmul.f32.gmra.mxu0 %v15693_v55 }
 0x869   : > { %v6394_v40 = vadd.f32 %v13850_v26, %v5160_v54  ;;  %v5962_v36 = vadd.f32 %v5961_v61, %v5560_v17  ;;  %v5165_v4 = vpop.f32.mrf.mxu3 }
 0x86b   : > { %v6862_v46 = vmax.f32 %v6861_v56, %v6394_v40  ;;  %v6395_v33 = vadd.f32 %v13857_v1, %v5962_v36  ;;  %4808 = vmatmul.f32.gmra.mxu2 %v15693_v55  ;;  %7710 = vmatmul.msk.f32.gmra.mxu1 %vm3459_vm4, %v15688_v22  ;;  %v15698_v40 = vld [vmem:[#allocation205_spill] sm:$0xff] }
 0x86d   : > { %v6883_v29 = vmax.f32 %v6882_v3, %v6395_v33  ;;  %v5566_v37 = vpop.f32.mrf.mxu0 }
 0x86e   : > { %v4761_v38 = vpop.f32.mrf.mxu2  ;;  %7585 = vmatmul.msk.f32.gmra.mxu3 %vm3459_vm4, %v15694_v32 }
 0x86f   : > { %v5163_v60 = vadd.f32 %v5162_v27, %v4761_v38  ;;  %v13892_v27 = vld [vmem:[%s14377_s2 + $0xb0] sm:$0xff] }
 0x870   : > { %v5964_v51 = vpop.f32.mrf.mxu1  ;;  %5613 = vmatmul.f32.gmra.mxu0 %v15695_v8  ;;  %v15699_v38 = vld [vmem:[#allocation189_spill] sm:$0xff] }
 0x871   : > { %v6397_v22 = vadd.f32 %v13871_v57, %v5163_v60  ;;  %v5965_v24 = vadd.f32 %v5964_v51, %v5563_v15  ;;  %v5168_v53 = vpop.f32.mrf.mxu3 }
 0x873   : > { %v6863_v18 = vmax.f32 %v6862_v46, %v6397_v22  ;;  %v6398_v34 = vadd.f32 %v13878_v59, %v5965_v24  ;;  %4811 = vmatmul.f32.gmra.mxu2 %v15695_v8  ;;  %7711 = vmatmul.msk.f32.gmra.mxu1 %vm3459_vm4, %v15690_v7  ;;  %v13910_v46 = vld [vmem:[%s14377_s2 + $0xc8] sm:$0xff]  ;;  %v15700_v24 = vld [vmem:[#allocation209_spill] sm:$0xff] }
 0x875   : > { %v6884_v0 = vmax.f32 %v6883_v29, %v6398_v34  ;;  %v5569_v50 = vpop.f32.mrf.mxu0  ;;  %v13928_v34 = vld [vmem:[%s14377_s2 + $0xe0] sm:$0xff] }
 0x876   : > { %v4764_v17 = vpop.f32.mrf.mxu2  ;;  %7586 = vmatmul.msk.f32.gmra.mxu3 %vm3459_vm4, %v15696_v19 }
 0x877   : > { %v5166_v31 = vadd.f32 %v5165_v4, %v4764_v17 }
 0x878   : > { %v5967_v20 = vpop.f32.mrf.mxu1  ;;  %5616 = vmatmul.f32.gmra.mxu0 %v15697_v42 }
 0x879   : > { %v6400_v7 = vadd.f32 %v13892_v27, %v5166_v31  ;;  %v5968_v39 = vadd.f32 %v5967_v20, %v5566_v37  ;;  %v5171_v56 = vpop.f32.mrf.mxu3  ;;  %v13917_v37 = vld [vmem:[%s14377_s2 + $0xd0] sm:$0xff]  ;;  %v13935_v31 = vld [vmem:[%s14377_s2 + $0xe8] sm:$0xff] }
 0x87b   : > { %v6864_v3 = vmax.f32 %v6863_v18, %v6400_v7  ;;  %v6401_v15 = vadd.f32 %v13899_v6, %v5968_v39  ;;  %4814 = vmatmul.f32.gmra.mxu2 %v15697_v42  ;;  %7712 = vmatmul.msk.f32.gmra.mxu1 %vm3459_vm4, %v15692_v12 }
 0x87d   : > { %v6885_v54 = vmax.f32 %v6884_v0, %v6401_v15  ;;  %v5572_v36 = vpop.f32.mrf.mxu0 }
 0x87e   : > { %v4767_v61 = vpop.f32.mrf.mxu2  ;;  %7587 = vmatmul.msk.f32.gmra.mxu3 %vm3459_vm4, %v15698_v40 }
 0x87f   : > { %v5169_v4 = vadd.f32 %v5168_v53, %v4767_v61 }
 0x880   : > { %v5970_v55 = vpop.f32.mrf.mxu1  ;;  %5619 = vmatmul.f32.gmra.mxu0 %v15699_v38 }
 0x881   : > { %v6403_v33 = vadd.f32 %v13910_v46, %v5169_v4  ;;  %v5971_v29 = vadd.f32 %v5970_v55, %v5569_v50  ;;  %v5174_v52 = vpop.f32.mrf.mxu3  ;;  %v15701_v50 = vld [vmem:[#allocation199_spill] sm:$0xff] }
 0x882   : > { %v15703_v55 = vld [vmem:[#allocation207_spill] sm:$0xff] }
 0x883   : > { %v6865_v12 = vmax.f32 %v6864_v3, %v6403_v33  ;;  %v6404_v60 = vadd.f32 %v13917_v37, %v5971_v29  ;;  %4817 = vmatmul.f32.gmra.mxu2 %v15699_v38  ;;  %7713 = vmatmul.msk.f32.gmra.mxu1 %vm3459_vm4, %v15694_v32  ;;  %v13953_v33 = vld [vmem:[%s14377_s2 + $0x100] sm:$0xff] }
 0x885   : > { %v6886_v51 = vmax.f32 %v6885_v54, %v6404_v60  ;;  %v5575_v53 = vpop.f32.mrf.mxu0  ;;  %v13946_v54 = vld [vmem:[%s14377_s2 + $0xf8] sm:$0xff] }
 0x886   : > { %v4770_v22 = vpop.f32.mrf.mxu2  ;;  %7588 = vmatmul.msk.f32.gmra.mxu3 %vm3459_vm4, %v15700_v24 }
 0x887   : > { %v5172_v8 = vadd.f32 %v5171_v56, %v4770_v22  ;;  %v15702_v56 = vld [vmem:[#allocation219_spill] sm:$0xff] }
 0x888   : > { %v5973_v18 = vpop.f32.mrf.mxu1  ;;  %5622 = vmatmul.f32.gmra.mxu0 %v15701_v50 }
 0x889   : > { %v6406_v0 = vadd.f32 %v13928_v34, %v5172_v8  ;;  %v5974_v16 = vadd.f32 %v5973_v18, %v5572_v36  ;;  %v5177_v17 = vpop.f32.mrf.mxu3 }
 0x88b   : > { %v6866_v32 = vmax.f32 %v6865_v12, %v6406_v0  ;;  %v6407_v20 = vadd.f32 %v13935_v31, %v5974_v16  ;;  %4820 = vmatmul.f32.gmra.mxu2 %v15701_v50  ;;  %7714 = vmatmul.msk.f32.gmra.mxu1 %vm3459_vm4, %v15696_v19  ;;  %v15704_v12 = vld [vmem:[#allocation229_spill] sm:$0xff]  ;;  %v13971_v50 = vld [vmem:[%s14377_s2 + $0x118] sm:$0xff] }
 0x88c   : > { %v15705_v16 = vld [vmem:[#allocation213_spill] sm:$0xff] }
 0x88d   : > { %v6887_v7 = vmax.f32 %v6886_v51, %v6407_v20  ;;  %v5578_v42 = vpop.f32.mrf.mxu0 }
 0x88e   : > { %v4773_v39 = vpop.f32.mrf.mxu2  ;;  %7589 = vmatmul.msk.f32.gmra.mxu3 %vm3459_vm4, %v15702_v56 }
 0x88f   : > { %v5175_v3 = vadd.f32 %v5174_v52, %v4773_v39 }
 0x890   : > { %v5976_v15 = vpop.f32.mrf.mxu1  ;;  %5625 = vmatmul.f32.gmra.mxu0 %v15703_v55 }
 0x891   : > { %v6409_v61 = vadd.f32 %v13946_v54, %v5175_v3  ;;  %v5977_v36 = vadd.f32 %v5976_v15, %v5575_v53  ;;  %v5180_v4 = vpop.f32.mrf.mxu3  ;;  %v13964_v53 = vld [vmem:[%s14377_s2 + $0x110] sm:$0xff] }
 0x893   : > { %v6867_v19 = vmax.f32 %v6866_v32, %v6409_v61  ;;  %v6410_v29 = vadd.f32 %v13953_v33, %v5977_v36  ;;  %4823 = vmatmul.f32.gmra.mxu2 %v15703_v55  ;;  %7715 = vmatmul.msk.f32.gmra.mxu1 %vm3459_vm4, %v15698_v40  ;;  %v15707_v55 = vld [vmem:[#allocation223_spill] sm:$0xff] }
 0x895   : > { %v6888_v52 = vmax.f32 %v6887_v7, %v6410_v29  ;;  %v5581_v60 = vpop.f32.mrf.mxu0  ;;  %v15706_v7 = vld [vmem:[#allocation233_spill] sm:$0xff] }
 0x896   : > { %v4776_v38 = vpop.f32.mrf.mxu2  ;;  %7590 = vmatmul.msk.f32.gmra.mxu3 %vm3459_vm4, %v15704_v12 }
 0x897   : > { %v5178_v51 = vadd.f32 %v5177_v17, %v4776_v38  ;;  %v15708_v38 = vld [vmem:[#allocation243_spill] sm:$0xff] }
 0x898   : > { %v5979_v22 = vpop.f32.mrf.mxu1  ;;  %5628 = vmatmul.f32.gmra.mxu0 %v15705_v16 }
 0x899   : > { %v6412_v8 = vadd.f32 %v13964_v53, %v5178_v51  ;;  %v5980_v18 = vadd.f32 %v5979_v22, %v5578_v42  ;;  %v5183_v0 = vpop.f32.mrf.mxu3 }
 0x89b   : > { %v6868_v40 = vmax.f32 %v6867_v19, %v6412_v8  ;;  %v6413_v17 = vadd.f32 %v13971_v50, %v5980_v18  ;;  %4826 = vmatmul.f32.gmra.mxu2 %v15705_v16  ;;  %7716 = vmatmul.msk.f32.gmra.mxu1 %vm3459_vm4, %v15700_v24  ;;  %v15709_v18 = vld [vmem:[#allocation231_spill] sm:$0xff] }
 0x89d   : > { %v6889_v32 = vmax.f32 %v6888_v52, %v6413_v17  ;;  %v5584_v39 = vpop.f32.mrf.mxu0  ;;  %v15710_v17 = vld [vmem:[#allocation253_spill] sm:$0xff] }
 0x89e   : > { %v4779_v20 = vpop.f32.mrf.mxu2  ;;  %7591 = vmatmul.msk.f32.gmra.mxu3 %vm3459_vm4, %v15706_v7 }
 0x89f   : > { %v5181_v42 = vadd.f32 %v5180_v4, %v4779_v20 }
 0x8a0   : > { %v5982_v3 = vpop.f32.mrf.mxu1  ;;  %5631 = vmatmul.f32.gmra.mxu0 %v15707_v55 }
 0x8a1   : > { %v6415_v15 = vadd.f32 %v13522_v62, %v5181_v42  ;;  %v5983_v61 = vadd.f32 %v5982_v3, %v5581_v60  ;;  %v5186_v36 = vpop.f32.mrf.mxu3  ;;  %v15711_v3 = vld [vmem:[#allocation237_spill] sm:$0xff] }
 0x8a3   : > { %v6869_v19 = vmax.f32 %v6868_v40, %v6415_v15  ;;  %v6416_v29 = vadd.f32 %v13529_v2, %v5983_v61  ;;  %4829 = vmatmul.f32.gmra.mxu2 %v15707_v55  ;;  %7717 = vmatmul.msk.f32.gmra.mxu1 %vm3459_vm4, %v15702_v56 }
 0x8a5   : > { %v6890_v24 = vmax.f32 %v6889_v32, %v6416_v29  ;;  %v5587_v4 = vpop.f32.mrf.mxu0 }
 0x8a6   : > { %v4782_v52 = vpop.f32.mrf.mxu2  ;;  %7592 = vmatmul.msk.f32.gmra.mxu3 %vm3459_vm4, %v15708_v38 }
 0x8a7   : > { %v5184_v51 = vadd.f32 %v5183_v0, %v4782_v52  ;;  %v7085_v0 = vld [vmem:[%s14379_s4 + $0x18] sm:$0xff] }
 0x8a8   : > { %v5985_v62 = vpop.f32.mrf.mxu1  ;;  %5634 = vmatmul.f32.gmra.mxu0 %v15709_v18  ;;  %7222 = vmatpush.msra.mxu2 %v7085_v0 }
 0x8a9   : > { %v6418_v60 = vadd.f32 %v13540_v28, %v5184_v51  ;;  %v5986_v22 = vadd.f32 %v5985_v62, %v5584_v39  ;;  %v5189_v8 = vpop.f32.mrf.mxu3  ;;  %v15713_v51 = vld [vmem:[#allocation247_spill] sm:$0xff] }
 0x8ab   : > { %v6870_v2 = vmax.f32 %v6869_v19, %v6418_v60  ;;  %v6419_v16 = vadd.f32 %v13547_v63, %v5986_v22  ;;  %4832 = vmatmul.f32.gmra.mxu2 %v15709_v18  ;;  %7718 = vmatmul.msk.f32.gmra.mxu1 %vm3459_vm4, %v15704_v12  ;;  %v15712_v19 = vld [vmem:[#allocation257_spill] sm:$0xff] }
 0x8ad   : > { %v6891_v56 = vmax.f32 %v6890_v24, %v6419_v16  ;;  %v5590_v28 = vpop.f32.mrf.mxu0 }
 0x8ae   : > { %v4785_v40 = vpop.f32.mrf.mxu2  ;;  %7593 = vmatmul.msk.f32.gmra.mxu3 %vm3459_vm4, %v15710_v17 }
 0x8af   : > { %v5187_v32 = vadd.f32 %v5186_v36, %v4785_v40  ;;  %v7101_v36 = vld [vmem:[%s14379_s4 + $0x98] sm:$0xff] }
 0x8b0   : > { %v5988_v20 = vpop.f32.mrf.mxu1  ;;  %5637 = vmatmul.f32.gmra.mxu0 %v15711_v3  ;;  %7242 = vmatpush.msra.mxu3 %v7101_v36 }
 0x8b1   : > { %v6421_v63 = vadd.f32 %v13561_v48, %v5187_v32  ;;  %v5989_v39 = vadd.f32 %v5988_v20, %v5587_v4  ;;  %v5192_v42 = vpop.f32.mrf.mxu3 }
 0x8b3   : > { %v6871_v12 = vmax.f32 %v6870_v2, %v6421_v63  ;;  %v6422_v15 = vadd.f32 %v13568_v11, %v5989_v39  ;;  %4835 = vmatmul.f32.gmra.mxu2 %v15711_v3  ;;  %7719 = vmatmul.msk.f32.gmra.mxu1 %vm3459_vm4, %v15706_v7 }
 0x8b5   : > { %v6892_v61 = vmax.f32 %v6891_v56, %v6422_v15  ;;  %v5593_v48 = vpop.f32.mrf.mxu0  ;;  %v15716_v15 = vld [vmem:[#allocation277_spill] sm:$0xff] }
 0x8b6   : > { %v4788_v55 = vpop.f32.mrf.mxu2  ;;  %7594 = vmatmul.msk.f32.gmra.mxu3 %vm3459_vm4, %v15712_v19 }
 0x8b7   : > { %v5190_v29 = vadd.f32 %v5189_v8, %v4788_v55  ;;  %v15714_v8 = vld [vmem:[#allocation267_spill] sm:$0xff] }
 0x8b8   : > { %v5991_v24 = vpop.f32.mrf.mxu1  ;;  %5640 = vmatmul.f32.gmra.mxu0 %v15713_v51 }
 0x8b9   : > { %v6424_v11 = vadd.f32 %v13582_v49, %v5190_v29  ;;  %v5992_v52 = vadd.f32 %v5991_v24, %v5590_v28  ;;  %v5195_v4 = vpop.f32.mrf.mxu3 }
 0x8bb   : > { %v6872_v7 = vmax.f32 %v6871_v12, %v6424_v11  ;;  %v6425_v62 = vadd.f32 %v13589_v35, %v5992_v52  ;;  %4838 = vmatmul.f32.gmra.mxu2 %v15713_v51  ;;  %7720 = vmatmul.msk.f32.gmra.mxu1 %vm3459_vm4, %v15708_v38  ;;  %v15715_v35 = vld [vmem:[#allocation255_spill] sm:$0xff] }
 0x8bd   : > { %v6873_v60 = vrot.slane %v6872_v7, 4  ;;  %v6893_v22 = vmax.f32 %v6892_v61, %v6425_v62  ;;  %v5596_v2 = vpop.f32.mrf.mxu0  ;;  %v15717_v62 = vld [vmem:[#allocation261_spill] sm:$0xff] }
 0x8be   : > { %v4791_v18 = vpop.f32.mrf.mxu2  ;;  %7595 = vmatmul.msk.f32.gmra.mxu3 %vm3459_vm4, %v15714_v8 }
 0x8bf   : > { %v6874_v49 = vmax.f32 %v6872_v7, %v6873_v60  ;;  %v6894_v16 = vrot.slane %v6893_v22, 4  ;;  %v5193_v56 = vadd.f32 %v5192_v42, %v4791_v18 }
 0x8c0   : > { %v5994_v0 = vpop.f32.mrf.mxu1  ;;  %5643 = vmatmul.f32.gmra.mxu0 %v15715_v35 }
 0x8c1   : > { %v6875_v40 = vrot.slane %v6874_v49, 2  ;;  %v6895_v28 = vmax.f32 %v6893_v22, %v6894_v16  ;;  %v5198_v32 = vpop.f32.mrf.mxu3  ;;  %v5995_v3 = vadd.f32 %v5994_v0, %v5593_v48  ;;  %v6427_v29 = vadd.f32 %v13756_v25, %v5193_v56  ;;  %v15718_v0 = vld [vmem:[#allocation281_spill] sm:$0xff] }
 0x8c3   : > { %v6876_v20 = vmax.f32 %v6874_v49, %v6875_v40  ;;  %v6896_v63 = vrot.slane %v6895_v28, 2  ;;  %4841 = vmatmul.f32.gmra.mxu2 %v15715_v35  ;;  %7721 = vmatmul.msk.f32.gmra.mxu1 %vm3459_vm4, %v15710_v17  ;;  %v6428_v48 = vadd.f32 %v13770_v43, %v5995_v3 }
 0x8c5   : > { %v6877_v38 = vrot.slane %v6876_v20, 1  ;;  %v6897_v39 = vmax.f32 %v6895_v28, %v6896_v63  ;;  %v5599_v42 = vpop.f32.mrf.mxu0 }
 0x8c6   : > { %v4794_v12 = vpop.f32.mrf.mxu2  ;;  %7596 = vmatmul.msk.f32.gmra.mxu3 %vm3459_vm4, %v15716_v15 }
 0x8c7   : > { %v6878_v61 = vmax.f32 %v6876_v20, %v6877_v38  ;;  %v6898_v36 = vrot.slane %v6897_v39, 1  ;;  %v5196_v55 = vadd.f32 %v5195_v4, %v4794_v12 }
 0x8c8   : > { %v5997_v24 = vpop.f32.mrf.mxu1  ;;  %5646 = vmatmul.f32.gmra.mxu0 %v15717_v62 }
 0x8c9   : > { %v7050_v11 = vadd.f32 %v13137_v14, %v6878_v61  ;;  %v6899_v52 = vmax.f32 %v6897_v39, %v6898_v36  ;;  %v6430_v51 = vadd.f32 %v13763_v30, %v5196_v55  ;;  %v5998_v17 = vadd.f32 %v5997_v24, %v5596_v2  ;;  %v5201_v7 = vpop.f32.mrf.mxu3  ;;  %v15720_v55 = vld [vmem:[#allocation291_spill] sm:$0xff] }
 0x8cb   : > { %v7074_v60 = vmax.f32 %v7050_v11, 0.0  ;;  %v7051_v22 = vadd.f32 %v13139_v47, %v6899_v52  ;;  %v6921_v18 = vmax.f32 %v6427_v29, %v6430_v51  ;;  %v6431_v4 = vadd.f32 %v13777_v41, %v5998_v17  ;;  %4844 = vmatmul.f32.gmra.mxu2 %v15717_v62  ;;  %7722 = vmatmul.msk.f32.gmra.mxu1 %vm3459_vm4, %v15712_v19  ;;  %v15719_v19 = vld [vmem:[#allocation271_spill] sm:$0xff] }
 0x8cc   : > { %v15721_v51 = vld [vmem:[#allocation279_spill] sm:$0xff] }
 0x8cd   : > { %v7075_v49 = vmax.f32 %v7051_v22, 0.0  ;;  %v6942_v16 = vmax.f32 %v6428_v48, %v6431_v4  ;;  %v7187_v56 = vrot.slane %v7074_v60, 3  ;;  %v5602_v40 = vpop.f32.mrf.mxu0  ;;  %v15722_v60 = vld [vmem:[#allocation301_spill] sm:$0xff] }
 0x8ce   : > { %v4797_v2 = vpop.f32.mrf.mxu2  ;;  %7597 = vmatmul.msk.f32.gmra.mxu3 %vm3459_vm4, %v15718_v0 }
 0x8cf   : > { %v5199_v28 = vadd.f32 %v5198_v32, %v4797_v2  ;;  %v14037_v35 = vsel %vm7171_vm9, %v7187_v56, %v13787_v9  ;;  %v7201_v20 = vrot.slane %v7075_v49, 3  ;;  %v15723_v56 = vld [vmem:[#allocation285_spill] sm:$0xff] }
 0x8d0   : > { %v6000_v63 = vpop.f32.mrf.mxu1  ;;  %5649 = vmatmul.f32.gmra.mxu0 %v15719_v19 }
 0x8d1   : > { %v6433_v38 = vadd.f32 %v13792_v45, %v5199_v28  ;;  %v6001_v39 = vadd.f32 %v6000_v63, %v5599_v42  ;;  %v5204_v3 = vpop.f32.mrf.mxu3  ;;  %v14043_v12 = vsel %vm7171_vm9, %v7201_v20, %v13798_v44  ;;  %v15724_v20 = vld [vmem:[#allocation305_spill] sm:$0xff] }
 0x8d3   : > { %v6922_v61 = vmax.f32 %v6921_v18, %v6433_v38  ;;  %v6434_v36 = vadd.f32 %v13803_v10, %v6001_v39  ;;  %4847 = vmatmul.f32.gmra.mxu2 %v15719_v19  ;;  %7723 = vmatmul.msk.f32.gmra.mxu1 %vm3459_vm4, %v15714_v8 }
 0x8d5   : > { %v6943_v9 = vmax.f32 %v6942_v16, %v6434_v36  ;;  %v5605_v42 = vpop.f32.mrf.mxu0  ;;  %v15725_v36 = vld [vmem:[#allocation295_spill] sm:$0xff] }
 0x8d6   : > { %v4800_v32 = vpop.f32.mrf.mxu2  ;;  %7598 = vmatmul.msk.f32.gmra.mxu3 %vm3459_vm4, %v15720_v55 }
 0x8d7   : > { %v5202_v29 = vadd.f32 %v5201_v7, %v4800_v32 }
 0x8d8   : > { %v6003_v24 = vpop.f32.mrf.mxu1  ;;  %5652 = vmatmul.f32.gmra.mxu0 %v15721_v51 }
 0x8d9   : > { %v6436_v11 = vadd.f32 %v13814_v58, %v5202_v29  ;;  %v6004_v44 = vadd.f32 %v6003_v24, %v5602_v40  ;;  %v5207_v52 = vpop.f32.mrf.mxu3  ;;  %v15726_v24 = vld [vmem:[#allocation314_spill] sm:$0xff] }
 0x8db   : > { %v6923_v17 = vmax.f32 %v6922_v61, %v6436_v11  ;;  %v6437_v62 = vadd.f32 %v13821_v5, %v6004_v44  ;;  %4850 = vmatmul.f32.gmra.mxu2 %v15721_v51  ;;  %7724 = vmatmul.msk.f32.gmra.mxu1 %vm3459_vm4, %v15716_v15 }
 0x8dd   : > { %v6944_v8 = vmax.f32 %v6943_v9, %v6437_v62  ;;  %v5608_v7 = vpop.f32.mrf.mxu0 }
 0x8de   : > { %v4803_v48 = vpop.f32.mrf.mxu2  ;;  %7599 = vmatmul.msk.f32.gmra.mxu3 %vm3459_vm4, %v15722_v60 }
 0x8df   : > { %v5205_v22 = vadd.f32 %v5204_v3, %v4803_v48  ;;  %v7100_v48 = vld [vmem:[%s14379_s4 + $0x90] sm:$0xff] }
 0x8e0   : > { %v6006_v18 = vpop.f32.mrf.mxu1  ;;  %5655 = vmatmul.f32.gmra.mxu0 %v15723_v56  ;;  %7243 = vmatpush.msra.mxu3 %v7100_v48 }
 0x8e1   : > { %v6439_v4 = vadd.f32 %v13832_v23, %v5205_v22  ;;  %v6007_v49 = vadd.f32 %v6006_v18, %v5605_v42  ;;  %v5210_v16 = vpop.f32.mrf.mxu3  ;;  %v7084_v42 = vld [vmem:[%s14379_s4 + $0x10] sm:$0xff]  ;;  %v15728_v22 = vld [vmem:[#allocation327_spill] sm:$0xff] }
 0x8e2   : > { %7223 = vmatpush.msra.mxu2 %v7084_v42  ;;  %v15732_v42 = vld [vmem:[#allocation349_spill] sm:$0xff] }
 0x8e3   : > { %v6924_v2 = vmax.f32 %v6923_v17, %v6439_v4  ;;  %v6440_v40 = vadd.f32 %v13839_v21, %v6007_v49  ;;  %4853 = vmatmul.f32.gmra.mxu2 %v15723_v56  ;;  %7725 = vmatmul.msk.f32.gmra.mxu1 %vm3459_vm4, %v15718_v0  ;;  %v15727_v17 = vld [vmem:[#allocation303_spill] sm:$0xff]  ;;  %v15729_v56 = vld [vmem:[#allocation309_spill] sm:$0xff] }
 0x8e5   : > { %v6945_v15 = vmax.f32 %v6944_v8, %v6440_v40  ;;  %v5611_v63 = vpop.f32.mrf.mxu0 }
 0x8e6   : > { %v4806_v28 = vpop.f32.mrf.mxu2  ;;  %7600 = vmatmul.msk.f32.gmra.mxu3 %vm3459_vm4, %v15724_v20 }
 0x8e7   : > { %v5208_v38 = vadd.f32 %v5207_v52, %v4806_v28  ;;  %v15730_v28 = vld [vmem:[#allocation337_spill] sm:$0xff] }
 0x8e8   : > { %v6009_v39 = vpop.f32.mrf.mxu1  ;;  %5658 = vmatmul.f32.gmra.mxu0 %v15725_v36 }
 0x8e9   : > { %v6442_v3 = vadd.f32 %v13850_v26, %v5208_v38  ;;  %v6010_v19 = vadd.f32 %v6009_v39, %v5608_v7  ;;  %v5213_v61 = vpop.f32.mrf.mxu3 }
 0x8eb   : > { %v6925_v9 = vmax.f32 %v6924_v2, %v6442_v3  ;;  %v6443_v32 = vadd.f32 %v13857_v1, %v6010_v19  ;;  %4856 = vmatmul.f32.gmra.mxu2 %v15725_v36  ;;  %7726 = vmatmul.msk.f32.gmra.mxu1 %vm3459_vm4, %v15720_v55  ;;  %v15731_v36 = vld [vmem:[#allocation319_spill] sm:$0xff] }
 0x8ed   : > { %v6946_v0 = vmax.f32 %v6945_v15, %v6443_v32  ;;  %v5614_v26 = vpop.f32.mrf.mxu0 }
 0x8ee   : > { %v4809_v29 = vpop.f32.mrf.mxu2  ;;  %7601 = vmatmul.msk.f32.gmra.mxu3 %vm3459_vm4, %v15726_v24 }
 0x8ef   : > { %v5211_v11 = vadd.f32 %v5210_v16, %v4809_v29 }
 0x8f0   : > { %v6012_v44 = vpop.f32.mrf.mxu1  ;;  %5661 = vmatmul.f32.gmra.mxu0 %v15727_v17 }
 0x8f1   : > { %v6445_v1 = vadd.f32 %v13871_v57, %v5211_v11  ;;  %v6013_v52 = vadd.f32 %v6012_v44, %v5611_v63  ;;  %v5216_v51 = vpop.f32.mrf.mxu3 }
 0x8f3   : > { %v6926_v55 = vmax.f32 %v6925_v9, %v6445_v1  ;;  %v6446_v62 = vadd.f32 %v13878_v59, %v6013_v52  ;;  %4859 = vmatmul.f32.gmra.mxu2 %v15727_v17  ;;  %7727 = vmatmul.msk.f32.gmra.mxu1 %vm3459_vm4, %v15722_v60 }
 0x8f5   : > { %v6947_v8 = vmax.f32 %v6946_v0, %v6446_v62  ;;  %v5617_v57 = vpop.f32.mrf.mxu0 }
 0x8f6   : > { %v4812_v7 = vpop.f32.mrf.mxu2  ;;  %7602 = vmatmul.msk.f32.gmra.mxu3 %vm3459_vm4, %v15728_v22 }
 0x8f7   : > { %v5214_v18 = vadd.f32 %v5213_v61, %v4812_v7 }
 0x8f8   : > { %v6015_v4 = vpop.f32.mrf.mxu1  ;;  %5664 = vmatmul.f32.gmra.mxu0 %v15729_v56 }
 0x8f9   : > { %v6448_v59 = vadd.f32 %v13892_v27, %v5214_v18  ;;  %v6016_v49 = vadd.f32 %v6015_v4, %v5614_v26  ;;  %v5219_v16 = vpop.f32.mrf.mxu3 }
 0x8fb   : > { %v6927_v60 = vmax.f32 %v6926_v55, %v6448_v59  ;;  %v6449_v2 = vadd.f32 %v13899_v6, %v6016_v49  ;;  %4862 = vmatmul.f32.gmra.mxu2 %v15729_v56  ;;  %7728 = vmatmul.msk.f32.gmra.mxu1 %vm3459_vm4, %v15724_v20  ;;  %v15735_v49 = vld [vmem:[#allocation342_spill] sm:$0xff] }
 0x8fd   : > { %v6948_v40 = vmax.f32 %v6947_v8, %v6449_v2  ;;  %v5620_v63 = vpop.f32.mrf.mxu0  ;;  %v15734_v8 = vld [vmem:[#allocation366_spill] sm:$0xff] }
 0x8fe   : > { %v4815_v15 = vpop.f32.mrf.mxu2  ;;  %7603 = vmatmul.msk.f32.gmra.mxu3 %vm3459_vm4, %v15730_v28  ;;  %v15736_v2 = vld [vmem:[#allocation374_spill] sm:$0xff] }
 0x8ff   : > { %v5217_v38 = vadd.f32 %v5216_v51, %v4815_v15  ;;  %v15733_v51 = vld [vmem:[#allocation332_spill] sm:$0xff] }
 0x900   : > { %v6018_v39 = vpop.f32.mrf.mxu1  ;;  %5667 = vmatmul.f32.gmra.mxu0 %v15731_v36 }
 0x901   : > { %v6451_v3 = vadd.f32 %v13910_v46, %v5217_v38  ;;  %v6019_v19 = vadd.f32 %v6018_v39, %v5617_v57  ;;  %v5222_v61 = vpop.f32.mrf.mxu3  ;;  %v7083_v38 = vld [vmem:[%s14379_s4 + $0x8] sm:$0xff] }
 0x902   : > { %7224 = vmatpush.msra.mxu2 %v7083_v38 }
 0x903   : > { %v6928_v9 = vmax.f32 %v6927_v60, %v6451_v3  ;;  %v6452_v32 = vadd.f32 %v13917_v37, %v6019_v19  ;;  %4865 = vmatmul.f32.gmra.mxu2 %v15731_v36  ;;  %7729 = vmatmul.msk.f32.gmra.mxu1 %vm3459_vm4, %v15726_v24 }
 0x905   : > { %v6949_v20 = vmax.f32 %v6948_v40, %v6452_v32  ;;  %v5623_v29 = vpop.f32.mrf.mxu0 }
 0x906   : > { %v4818_v0 = vpop.f32.mrf.mxu2  ;;  %7604 = vmatmul.msk.f32.gmra.mxu3 %vm3459_vm4, %v15732_v42 }
 0x907   : > { %v5220_v26 = vadd.f32 %v5219_v16, %v4818_v0  ;;  %v15738_v0 = vld [vmem:[#allocation388_spill] sm:$0xff] }
 0x908   : > { %v6021_v11 = vpop.f32.mrf.mxu1  ;;  %5670 = vmatmul.f32.gmra.mxu0 %v15733_v51 }
 0x909   : > { %v6454_v44 = vadd.f32 %v13928_v34, %v5220_v26  ;;  %v6022_v1 = vadd.f32 %v6021_v11, %v5620_v63  ;;  %v5225_v52 = vpop.f32.mrf.mxu3 }
 0x90b   : > { %v6929_v17 = vmax.f32 %v6928_v9, %v6454_v44  ;;  %v6455_v55 = vadd.f32 %v13935_v31, %v6022_v1  ;;  %4868 = vmatmul.f32.gmra.mxu2 %v15733_v51  ;;  %7730 = vmatmul.msk.f32.gmra.mxu1 %vm3459_vm4, %v15728_v22  ;;  %v14138_v44 = vld [vmem:[%s14377_s2 + $0x128] sm:$0xff] }
 0x90d   : > { %v6950_v24 = vmax.f32 %v6949_v20, %v6455_v55  ;;  %v5626_v48 = vpop.f32.mrf.mxu0  ;;  %v14145_v55 = vld [vmem:[%s14377_s2 + $0x130] sm:$0xff] }
 0x90e   : > { %v4821_v62 = vpop.f32.mrf.mxu2  ;;  %7605 = vmatmul.msk.f32.gmra.mxu3 %vm3459_vm4, %v15734_v8 }
 0x90f   : > { %v5223_v7 = vadd.f32 %v5222_v61, %v4821_v62  ;;  %v15737_v61 = vld [vmem:[#allocation355_spill] sm:$0xff] }
 0x910   : > { %v6024_v57 = vpop.f32.mrf.mxu1  ;;  %5673 = vmatmul.f32.gmra.mxu0 %v15735_v49 }
 0x911   : > { %v6457_v18 = vadd.f32 %v13946_v54, %v5223_v7  ;;  %v6025_v4 = vadd.f32 %v6024_v57, %v5623_v29  ;;  %v5228_v59 = vpop.f32.mrf.mxu3  ;;  %v15740_v7 = vld [vmem:[#allocation401_spill] sm:$0xff] }
 0x913   : > { %v6930_v16 = vmax.f32 %v6929_v17, %v6457_v18  ;;  %v6458_v56 = vadd.f32 %v13953_v33, %v6025_v4  ;;  %4871 = vmatmul.f32.gmra.mxu2 %v15735_v49  ;;  %7731 = vmatmul.msk.f32.gmra.mxu1 %vm3459_vm4, %v15730_v28  ;;  %v7082_v28 = vld [vmem:[%s14379_s4] sm:$0xff] }
 0x914   : > { %7225 = vmatpush.msra.mxu2 %v7082_v28  ;;  %v15739_v17 = vld [vmem:[#allocation371_spill] sm:$0xff] }
 0x915   : > { %v6951_v22 = vmax.f32 %v6950_v24, %v6458_v56  ;;  %v5629_v40 = vpop.f32.mrf.mxu0 }
 0x916   : > { %v4824_v60 = vpop.f32.mrf.mxu2  ;;  %7606 = vmatmul.msk.f32.gmra.mxu3 %vm3459_vm4, %v15736_v2 }
 0x917   : > { %v5226_v15 = vadd.f32 %v5225_v52, %v4824_v60  ;;  %v14163_v60 = vld [vmem:[%s14377_s2 + $0x148] sm:$0xff] }
 0x918   : > { %v6027_v63 = vpop.f32.mrf.mxu1  ;;  %5676 = vmatmul.f32.gmra.mxu0 %v15737_v61 }
 0x919   : > { %v6460_v39 = vadd.f32 %v13964_v53, %v5226_v15  ;;  %v6028_v3 = vadd.f32 %v6027_v63, %v5626_v48  ;;  %v5231_v19 = vpop.f32.mrf.mxu3 }
 0x91b   : > { %v6931_v36 = vmax.f32 %v6930_v16, %v6460_v39  ;;  %v6461_v9 = vadd.f32 %v13971_v50, %v6028_v3  ;;  %4874 = vmatmul.f32.gmra.mxu2 %v15737_v61  ;;  %7732 = vmatmul.msk.f32.gmra.mxu1 %vm3459_vm4, %v15732_v42 }
 0x91d   : > { %v6952_v32 = vmax.f32 %v6951_v22, %v6461_v9  ;;  %v5632_v29 = vpop.f32.mrf.mxu0  ;;  %v15741_v22 = vld [vmem:[#allocation380_spill] sm:$0xff]  ;;  %v15742_v9 = vld [vmem:[#allocation394_spill] sm:$0xff] }
 0x91e   : > { %v4827_v20 = vpop.f32.mrf.mxu2  ;;  %7607 = vmatmul.msk.f32.gmra.mxu3 %vm3459_vm4, %v15738_v0 }
 0x91f   : > { %v5229_v26 = vadd.f32 %v5228_v59, %v4827_v20  ;;  %v14156_v59 = vld [vmem:[%s14377_s2 + $0x140] sm:$0xff] }
 0x920   : > { %v6030_v11 = vpop.f32.mrf.mxu1  ;;  %5679 = vmatmul.f32.gmra.mxu0 %v15739_v17 }
 0x921   : > { %v6463_v1 = vadd.f32 %v14138_v44, %v5229_v26  ;;  %v6031_v52 = vadd.f32 %v6030_v11, %v5629_v40  ;;  %v5234_v51 = vpop.f32.mrf.mxu3  ;;  %v7099_v26 = vld [vmem:[%s14379_s4 + $0x88] sm:$0xff] }
 0x922   : > { %7244 = vmatpush.msra.mxu3 %v7099_v26 }
 0x923   : > { %v6932_v42 = vmax.f32 %v6931_v36, %v6463_v1  ;;  %v6464_v24 = vadd.f32 %v14145_v55, %v6031_v52  ;;  %4877 = vmatmul.f32.gmra.mxu2 %v15739_v17  ;;  %7733 = vmatmul.msk.f32.gmra.mxu1 %vm3459_vm4, %v15734_v8  ;;  %v14191_v17 = vld [vmem:[%s14377_s2 + $0x170] sm:$0xff] }
 0x925   : > { %v6953_v62 = vmax.f32 %v6952_v32, %v6464_v24  ;;  %v5635_v57 = vpop.f32.mrf.mxu0 }
 0x926   : > { %v4830_v48 = vpop.f32.mrf.mxu2  ;;  %7608 = vmatmul.msk.f32.gmra.mxu3 %vm3459_vm4, %v15740_v7 }
 0x927   : > { %v5232_v18 = vadd.f32 %v5231_v19, %v4830_v48  ;;  %v14172_v19 = vld [vmem:[%s14377_s2 + $0x158] sm:$0xff] }
 0x928   : > { %v6033_v4 = vpop.f32.mrf.mxu1  ;;  %5682 = vmatmul.f32.gmra.mxu0 %v15741_v22  ;;  %v14197_v48 = vld [vmem:[%s14377_s2 + $0x178] sm:$0xff] }
 0x929   : > { %v6466_v49 = vadd.f32 %v14156_v59, %v5232_v18  ;;  %v6034_v16 = vadd.f32 %v6033_v4, %v5632_v29  ;;  %v5237_v56 = vpop.f32.mrf.mxu3 }
 0x92b   : > { %v6933_v8 = vmax.f32 %v6932_v42, %v6466_v49  ;;  %v6467_v40 = vadd.f32 %v14163_v60, %v6034_v16  ;;  %4880 = vmatmul.f32.gmra.mxu2 %v15741_v22  ;;  %7734 = vmatmul.msk.f32.gmra.mxu1 %vm3459_vm4, %v15736_v2  ;;  %v14179_v2 = vld [vmem:[%s14377_s2 + $0x160] sm:$0xff] }
 0x92d   : > { %v6954_v15 = vmax.f32 %v6953_v62, %v6467_v40  ;;  %v5638_v38 = vpop.f32.mrf.mxu0 }
 0x92e   : > { %v4833_v63 = vpop.f32.mrf.mxu2 }
 0x92f   : > { %v5235_v39 = vadd.f32 %v5234_v51, %v4833_v63 }
 0x930   : > { %v6036_v3 = vpop.f32.mrf.mxu1  ;;  %5685 = vmatmul.f32.gmra.mxu0 %v15742_v9 }
 0x931   : > { %v6469_v61 = vadd.f32 %v14172_v19, %v5235_v39  ;;  %v6037_v28 = vadd.f32 %v6036_v3, %v5635_v57  ;;  %v5240_v36 = vpop.f32.mrf.mxu3 }
 0x933   : > { %v6934_v32 = vmax.f32 %v6933_v8, %v6469_v61  ;;  %v6470_v20 = vadd.f32 %v14179_v2, %v6037_v28  ;;  %4883 = vmatmul.f32.gmra.mxu2 %v15742_v9  ;;  %7735 = vmatmul.msk.f32.gmra.mxu1 %vm3459_vm4, %v15738_v0 }
 0x935   : > { %v6955_v29 = vmax.f32 %v6954_v15, %v6470_v20  ;;  %v5641_v1 = vpop.f32.mrf.mxu0 }
 0x936   : > { %v4836_v11 = vpop.f32.mrf.mxu2 }
 0x937   : > { %v5238_v52 = vadd.f32 %v5237_v56, %v4836_v11 }
 0x938   : > { %v6039_v51 = vpop.f32.mrf.mxu1 }
 0x939   : > { %v6472_v42 = vadd.f32 %v14191_v17, %v5238_v52  ;;  %v6040_v24 = vadd.f32 %v6039_v51, %v5638_v38  ;;  %v5243_v62 = vpop.f32.mrf.mxu3 }
 0x93b   : > { %v6935_v0 = vmax.f32 %v6934_v32, %v6472_v42  ;;  %v6473_v57 = vadd.f32 %v14197_v48, %v6040_v24  ;;  %7736 = vmatmul.msk.f32.gmra.mxu1 %vm3459_vm4, %v15740_v7  ;;  %7226 = vmatmul.f32.vlgmr.msra.gmra.mxu2 %v12739_v13 }
 0x93d   : > { %v6936_v18 = vrot.slane %v6935_v0, 4  ;;  %v6956_v4 = vmax.f32 %v6955_v29, %v6473_v57  ;;  %v5644_v16 = vpop.f32.mrf.mxu0 }
 0x93e   : > { %v4839_v49 = vpop.f32.mrf.mxu2 }
 0x93f   : > { %v6937_v56 = vmax.f32 %v6935_v0, %v6936_v18  ;;  %v6957_v22 = vrot.slane %v6956_v4, 4  ;;  %v5241_v8 = vadd.f32 %v5240_v36, %v4839_v49 }
 0x940   : > { %v6042_v40 = vpop.f32.mrf.mxu1 }
 0x941   : > { %v6938_v15 = vrot.slane %v6937_v56, 2  ;;  %v6958_v63 = vmax.f32 %v6956_v4, %v6957_v22  ;;  %v6043_v38 = vadd.f32 %v6042_v40, %v5641_v1  ;;  %v5246_v39 = vpop.f32.mrf.mxu3  ;;  %v6475_v29 = vadd.f32 %v13756_v25, %v5241_v8 }
 0x943   : > { %v6939_v3 = vmax.f32 %v6937_v56, %v6938_v15  ;;  %v6959_v61 = vrot.slane %v6958_v63, 2  ;;  %v6476_v24 = vadd.f32 %v13770_v43, %v6043_v38 }
 0x945   : > { %v6940_v28 = vrot.slane %v6939_v3, 1  ;;  %v6960_v9 = vmax.f32 %v6958_v63, %v6959_v61  ;;  %v5647_v7 = vpop.f32.mrf.mxu0 }
 0x946   : > { %v4842_v32 = vpop.f32.mrf.mxu2 }
 0x947   : > { %v6941_v20 = vmax.f32 %v6939_v3, %v6940_v28  ;;  %v6961_v13 = vrot.slane %v6960_v9, 1  ;;  %v5244_v26 = vadd.f32 %v5243_v62, %v4842_v32 }
 0x948   : > { %v6045_v11 = vpop.f32.mrf.mxu1 }
 0x949   : > { %v7053_v52 = vadd.f32 %v13137_v14, %v6941_v20  ;;  %v6962_v36 = vmax.f32 %v6960_v9, %v6961_v13  ;;  %v6478_v51 = vadd.f32 %v13763_v30, %v5244_v26  ;;  %v6046_v42 = vadd.f32 %v6045_v11, %v5644_v16  ;;  %v5249_v1 = vpop.f32.mrf.mxu3 }
 0x94b   : > { %v7054_v0 = vadd.f32 %v13139_v47, %v6962_v36  ;;  %v6984_v57 = vmax.f32 %v6475_v29, %v6478_v51  ;;  %v6479_v18 = vadd.f32 %v13777_v41, %v6046_v42  ;;  %v7077_v4 = vmax.f32 %v7053_v52, 0.0 }
 0x94d   : > { %v7005_v49 = vmax.f32 %v6476_v24, %v6479_v18  ;;  %v7189_v62 = vrot.slane %v7077_v4, 2  ;;  %v7078_v56 = vmax.f32 %v7054_v0, 0.0  ;;  %v5650_v22 = vpop.f32.mrf.mxu0 }
 0x94e   : > { %v4845_v25 = vpop.f32.mrf.mxu2 }
 0x94f   : > { %v5247_v8 = vadd.f32 %v5246_v39, %v4845_v25  ;;  %v14211_v40 = vsel %vm7174_vm10, %v7189_v62, %v14037_v35  ;;  %v7203_v30 = vrot.slane %v7078_v56, 2 }
 0x950   : > { %v6048_v16 = vpop.f32.mrf.mxu1 }
 0x951   : > { %v6481_v43 = vadd.f32 %v13792_v45, %v5247_v8  ;;  %v6049_v15 = vadd.f32 %v6048_v16, %v5647_v7  ;;  %v5252_v63 = vpop.f32.mrf.mxu3  ;;  %v14216_v41 = vsel %vm7174_vm10, %v7203_v30, %v14043_v12 }
 0x953   : > { %v6985_v38 = vmax.f32 %v6984_v57, %v6481_v43  ;;  %v6482_v3 = vadd.f32 %v13803_v10, %v6049_v15 }
 0x955   : > { %v7006_v61 = vmax.f32 %v7005_v49, %v6482_v3  ;;  %v5653_v39 = vpop.f32.mrf.mxu0 }
 0x956   : > { %v4848_v28 = vpop.f32.mrf.mxu2 }
 0x957   : > { %v5250_v9 = vadd.f32 %v5249_v1, %v4848_v28 }
 0x958   : > { %v6051_v32 = vpop.f32.mrf.mxu1 }
 0x959   : > { %v6484_v35 = vadd.f32 %v13814_v58, %v5250_v9  ;;  %v6052_v20 = vadd.f32 %v6051_v32, %v5650_v22  ;;  %v5255_v13 = vpop.f32.mrf.mxu3  ;;  %v7129_v9 = vld [vmem:[%s14379_s4 + $0x178] sm:$0xff]  ;;  %v7128_v32 = vld [vmem:[%s14379_s4 + $0x170] sm:$0xff] }
 0x95a   : > { %7250 = vmatpush.msrb.mxu2 %v7129_v9  ;;  %v7123_v9 = vld [vmem:[%s14379_s4 + $0x148] sm:$0xff] }
 0x95b   : > { %v6986_v26 = vmax.f32 %v6985_v38, %v6484_v35  ;;  %v6485_v45 = vadd.f32 %v13821_v5, %v6052_v20  ;;  %v7127_v20 = vld [vmem:[%s14379_s4 + $0x168] sm:$0xff] }
 0x95c   : > { %7251 = vmatpush.msrb.mxu2 %v7128_v32 }
 0x95d   : > { %v7007_v7 = vmax.f32 %v7006_v61, %v6485_v45  ;;  %v5656_v11 = vpop.f32.mrf.mxu0 }
 0x95e   : > { %v4851_v29 = vpop.f32.mrf.mxu2  ;;  %7252 = vmatpush.msrb.mxu2 %v7127_v20  ;;  %v8205_v20 = vld [vmem:[%s14377_s2 + $0x80] sm:$0xff] }
 0x95f   : > { %v5253_v12 = vadd.f32 %v5252_v63, %v4851_v29 }
 0x960   : > { %v6054_v52 = vpop.f32.mrf.mxu1 }
 0x961   : > { %v6487_v36 = vadd.f32 %v13832_v23, %v5253_v12  ;;  %v6055_v10 = vadd.f32 %v6054_v52, %v5653_v39  ;;  %v5258_v51 = vpop.f32.mrf.mxu3  ;;  %v7098_v23 = vld [vmem:[%s14379_s4 + $0x80] sm:$0xff]  ;;  %v7125_v12 = vld [vmem:[%s14379_s4 + $0x158] sm:$0xff] }
 0x962   : > { %7245 = vmatpush.msra.mxu3 %v7098_v23 }
 0x963   : > { %v14222_v42 = vmax.f32 %v6986_v26, %v6487_v36  ;;  %v6488_v1 = vadd.f32 %v13839_v21, %v6055_v10  ;;  %v7124_v36 = vld [vmem:[%s14379_s4 + $0x150] sm:$0xff] }
 0x965   : > { %v14225_v24 = vmax.f32 %v7007_v7, %v6488_v1  ;;  %v5659_v0 = vpop.f32.mrf.mxu0  ;;  %v7126_v7 = vld [vmem:[%s14379_s4 + $0x160] sm:$0xff] }
 0x966   : > { %v4854_v58 = vpop.f32.mrf.mxu2  ;;  %7253 = vmatpush.msrb.mxu2 %v7126_v7 }
 0x967   : > { %v5256_v52 = vadd.f32 %v5255_v13, %v4854_v58  ;;  %v7122_v58 = vld [vmem:[%s14379_s4 + $0x140] sm:$0xff] }
 0x968   : > { %v6057_v57 = vpop.f32.mrf.mxu1  ;;  %7254 = vmatpush.msrb.mxu2 %v7125_v12 }
 0x969   : > { %v5261_v18 = vpop.f32.mrf.mxu3  ;;  %v6058_v1 = vadd.f32 %v6057_v57, %v5656_v11  ;;  %v6490_v7 = vadd.f32 %v8205_v20, %v5256_v52  ;;  %v8206_v11 = vld [vmem:[%s14377_s2 + $0x88] sm:$0xff]  ;;  %v8207_v57 = vld [vmem:[%s14377_s2 + $0x98] sm:$0xff]  ;;  %v7120_v20 = vld [vmem:[%s14379_s4 + $0x130] sm:$0xff] }
 0x96a   : > { %7255 = vmatpush.msrb.mxu2 %v7124_v36 }
 0x96c   : > { %7256 = vmatpush.msrb.mxu2 %v7123_v9 }
 0x96d   : > { %v5662_v4 = vpop.f32.mrf.mxu0 }
 0x96e   : > { %v4857_v5 = vpop.f32.mrf.mxu2  ;;  %7257 = vmatpush.msrb.mxu2 %v7122_v58 }
 0x96f   : > { %v5259_v23 = vadd.f32 %v5258_v51, %v4857_v5  ;;  %v6491_v51 = vadd.f32 %v8206_v11, %v6058_v1 }
 0x970   : > { %v6060_v49 = vpop.f32.mrf.mxu1 }
 0x971   : > { %v5264_v62 = vpop.f32.mrf.mxu3  ;;  %v6061_v13 = vadd.f32 %v6060_v49, %v5659_v0  ;;  %v6493_v5 = vadd.f32 %v8207_v57, %v5259_v23  ;;  %v7121_v0 = vld [vmem:[%s14379_s4 + $0x138] sm:$0xff] }
 0x972   : > { %7258 = vmatpush.msrb.mxu2 %v7121_v0 }
 0x974   : > { %7259 = vmatpush.msrb.mxu2 %v7120_v20 }
 0x975   : > { %v5665_v25 = vpop.f32.mrf.mxu0 }
 0x976   : > { %v4860_v56 = vpop.f32.mrf.mxu2 }
 0x977   : > { %v5262_v12 = vadd.f32 %v5261_v18, %v4860_v56  ;;  %v6988_v18 = vmax.f32 %v14222_v42, %v6490_v7  ;;  %v8208_v56 = vld [vmem:[%s14377_s2 + $0xa0] sm:$0xff]  ;;  %v7119_v42 = vld [vmem:[%s14379_s4 + $0x128] sm:$0xff] }
 0x978   : > { %v6063_v22 = vpop.f32.mrf.mxu1  ;;  %v6494_v1 = vadd.f32 %v8208_v56, %v6061_v13  ;;  %7260 = vmatpush.msrb.mxu2 %v7119_v42 }
 0x979   : > { %v5267_v8 = vpop.f32.mrf.mxu3  ;;  %v6064_v49 = vadd.f32 %v6063_v22, %v5662_v4  ;;  %v6496_v23 = vadd.f32 %v13892_v27, %v5262_v12  ;;  %v7009_v4 = vmax.f32 %v14225_v24, %v6491_v51  ;;  %v7117_v24 = vld [vmem:[%s14379_s4 + $0x118] sm:$0xff] }
 0x97b   : > { %v6497_v22 = vadd.f32 %v13899_v6, %v6064_v49  ;;  %v7010_v27 = vmax.f32 %v7009_v4, %v6494_v1 }
 0x97d   : > { %v14230_v30 = vpop.f32.mrf.mxu0 }
 0x97e   : > { %v4863_v21 = vpop.f32.mrf.mxu2 }
 0x97f   : > { %v5265_v52 = vadd.f32 %v5264_v62, %v4863_v21  ;;  %v6989_v62 = vmax.f32 %v6988_v18, %v6493_v5 }
 0x980   : > { %v6066_v16 = vpop.f32.mrf.mxu1 }
 0x981   : > { %v5270_v43 = vpop.f32.mrf.mxu3  ;;  %v6067_v58 = vadd.f32 %v6066_v16, %v5665_v25  ;;  %v6499_v21 = vadd.f32 %v13910_v46, %v5265_v52  ;;  %v7118_v25 = vld [vmem:[%s14379_s4 + $0x120] sm:$0xff] }
 0x982   : > { %7261 = vmatpush.msrb.mxu2 %v7118_v25 }
 0x983   : > { %v6500_v16 = vadd.f32 %v13917_v37, %v6067_v58 }
 0x984   : > { %7262 = vmatpush.msrb.mxu2 %v7117_v24 }
 0x985   : > { %v14232_v63 = vpop.f32.mrf.mxu0 }
 0x986   : > { %v4866_v15 = vpop.f32.mrf.mxu2 }
 0x987   : > { %v5268_v11 = vadd.f32 %v5267_v8, %v4866_v15  ;;  %v6990_v8 = vmax.f32 %v6989_v62, %v6496_v23  ;;  %v7011_v15 = vmax.f32 %v7010_v27, %v6497_v22 }
 0x988   : > { %v6069_v38 = vpop.f32.mrf.mxu1 }
 0x989   : > { %v14234_v3 = vpop.f32.mrf.mxu3  ;;  %v6070_v7 = vadd.f32 %v6069_v38, %v14230_v30  ;;  %v6502_v6 = vadd.f32 %v13928_v34, %v5268_v11  ;;  %v6991_v38 = vmax.f32 %v6990_v8, %v6499_v21 }
 0x98d   : > { %v14236_v28 = vpop.f32.mrf.mxu0 }
 0x98e   : > { %v4869_v61 = vpop.f32.mrf.mxu2 }
 0x98f   : > { %v5271_v13 = vadd.f32 %v5270_v43, %v4869_v61  ;;  %v7116_v43 = vld [vmem:[%s14379_s4 + $0x110] sm:$0xff]  ;;  %v6503_v61 = vadd.f32 %v13935_v31, %v6070_v7 }
 0x990   : > { %v14238_v39 = vpop.f32.mrf.mxu1  ;;  %7263 = vmatpush.msrb.mxu2 %v7116_v43 }
 0x991   : > { %v14249_v26 = vpop.f32.mrf.mxu3  ;;  %v6073_v46 = vadd.f32 %v14238_v39, %v14232_v63  ;;  %v6505_v12 = vadd.f32 %v13946_v54, %v5271_v13  ;;  %v7115_v63 = vld [vmem:[%s14379_s4 + $0x108] sm:$0xff]  ;;  %v6992_v39 = vmax.f32 %v6991_v38, %v6502_v6 }
 0x992   : > { %7264 = vmatpush.msrb.mxu2 %v7115_v63 }
 0x995   : > { %v14256_v29 = vpop.f32.mrf.mxu0 }
 0x996   : > { %v4872_v35 = vpop.f32.mrf.mxu2 }
 0x997   : > { %v5274_v30 = vadd.f32 %v14234_v3, %v4872_v35  ;;  %v7012_v3 = vmax.f32 %v7011_v15, %v6500_v16  ;;  %v6506_v35 = vadd.f32 %v13953_v33, %v6073_v46 }
 0x998   : > { %v14251_v45 = vpop.f32.mrf.mxu1 }
 0x999   : > { %v5279_v36 = vpop.f32.mrf.mxu3  ;;  %v6076_v37 = vadd.f32 %v14251_v45, %v14236_v28  ;;  %v6508_v31 = vadd.f32 %v13964_v53, %v5274_v30  ;;  %v7013_v18 = vmax.f32 %v7012_v3, %v6503_v61  ;;  %v6993_v28 = vmax.f32 %v6992_v39, %v6505_v12 }
 0x99b   : > { %v7014_v20 = vmax.f32 %v7013_v18, %v6506_v35  ;;  %v6994_v53 = vmax.f32 %v6993_v28, %v6508_v31 }
 0x99d   : > { %v5680_v9 = vpop.f32.mrf.mxu0 }
 0x99e   : > { %v4875_v10 = vpop.f32.mrf.mxu2 }
 0x99f   : > { %v5277_v34 = vadd.f32 %v14249_v26, %v4875_v10  ;;  %v7114_v26 = vld [vmem:[%s14379_s4 + $0x100] sm:$0xff]  ;;  %v6509_v10 = vadd.f32 %v13971_v50, %v6076_v37 }
 0x9a0   : > { %v6078_v32 = vpop.f32.mrf.mxu1  ;;  %7265 = vmatpush.msrb.mxu2 %v7114_v26 }
 0x9a1   : > { %v5282_v51 = vpop.f32.mrf.mxu3  ;;  %v6079_v54 = vadd.f32 %v6078_v32, %v14256_v29  ;;  %v6511_v33 = vadd.f32 %v14138_v44, %v5277_v34  ;;  %v7015_v23 = vmax.f32 %v7014_v20, %v6509_v10 }
 0x9a3   : > { %v6512_v29 = vadd.f32 %v14145_v55, %v6079_v54  ;;  %v6995_v58 = vmax.f32 %v6994_v53, %v6511_v33 }
 0x9a5   : > { %v5683_v5 = vpop.f32.mrf.mxu0  ;;  %v7016_v62 = vmax.f32 %v7015_v23, %v6512_v29 }
 0x9a6   : > { %v4878_v57 = vpop.f32.mrf.mxu2 }
 0x9a7   : > { %v5280_v52 = vadd.f32 %v5279_v36, %v4878_v57 }
 0x9a8   : > { %v6081_v0 = vpop.f32.mrf.mxu1 }
 0x9a9   : > { %v6082_v56 = vadd.f32 %v6081_v0, %v5680_v9  ;;  %v6514_v32 = vadd.f32 %v14156_v59, %v5280_v52  ;;  %v5285_v4 = vpop.f32.mrf.mxu3 }
 0x9ab   : > { %v6515_v11 = vadd.f32 %v14163_v60, %v6082_v56  ;;  %v6996_v44 = vmax.f32 %v6995_v58, %v6514_v32 }
 0x9ad   : > { %v5686_v22 = vpop.f32.mrf.mxu0  ;;  %v7017_v7 = vmax.f32 %v7016_v62, %v6515_v11 }
 0x9ae   : > { %v4881_v49 = vpop.f32.mrf.mxu2 }
 0x9af   : > { %v5283_v1 = vadd.f32 %v5282_v51, %v4881_v49 }
 0x9b0   : > { %v6084_v45 = vpop.f32.mrf.mxu1 }
 0x9b1   : > { %v6085_v36 = vadd.f32 %v6084_v45, %v5683_v5  ;;  %v6517_v57 = vadd.f32 %v14172_v19, %v5283_v1 }
 0x9b3   : > { %v6518_v9 = vadd.f32 %v14179_v2, %v6085_v36  ;;  %v6997_v55 = vmax.f32 %v6996_v44, %v6517_v57 }
 0x9b5   : > { %v7018_v0 = vmax.f32 %v7017_v7, %v6518_v9 }
 0x9b6   : > { %v4884_v50 = vpop.f32.mrf.mxu2 }
 0x9b7   : > { %v5286_v42 = vadd.f32 %v5285_v4, %v4884_v50 }
 0x9b8   : > { %v6087_v21 = vpop.f32.mrf.mxu1 }
 0x9b9   : > { %v6520_v59 = vadd.f32 %v14191_v17, %v5286_v42  ;;  %v6088_v13 = vadd.f32 %v6087_v21, %v5686_v22 }
 0x9bb   : > { %v6998_v27 = vmax.f32 %v6997_v55, %v6520_v59  ;;  %v6521_v60 = vadd.f32 %v14197_v48, %v6088_v13 }
 0x9bd   : > { %v6999_v25 = vrot.slane %v6998_v27, 4  ;;  %v7019_v19 = vmax.f32 %v7018_v0, %v6521_v60 }
 0x9be   : > { %v7227_v39 = vpop.f32.mrf.mxu2 }
 0x9bf   : > { %v7000_v24 = vmax.f32 %v6998_v27, %v6999_v25  ;;  %v7020_v8 = vrot.slane %v7019_v19, 4 }
 0x9c1   : > { %v7001_v16 = vrot.slane %v7000_v24, 2  ;;  %v7021_v6 = vmax.f32 %v7019_v19, %v7020_v8 }
 0x9c3   : > { %v7002_v46 = vmax.f32 %v7000_v24, %v7001_v16  ;;  %v7022_v2 = vrot.slane %v7021_v6, 2 }
 0x9c5   : > { %v7003_v30 = vrot.slane %v7002_v46, 1  ;;  %v7023_v43 = vmax.f32 %v7021_v6, %v7022_v2 }
 0x9c7   : > { %v7004_v15 = vmax.f32 %v7002_v46, %v7003_v30  ;;  %v7024_v38 = vrot.slane %v7023_v43, 1 }
 0x9c9   : > { %v7025_v17 = vmax.f32 %v7023_v43, %v7024_v38  ;;  %v7056_v61 = vadd.f32 %v13137_v14, %v7004_v15  ;;  %v8137_v14 = vld [vmem:[%s14380_s5] ss:$0 sm:$0xff] }
 0x9cb   : > { %v7080_v12 = vmax.f32 %v7056_v61, 0.0  ;;  %v7057_v48 = vadd.f32 %v13139_v47, %v7025_v17  ;;  %v7228_v47 = vadd.f32 %v8137_v14, %v7227_v39 }
 0x9cd   : > { %v7191_v51 = vrot.slane %v7080_v12, 1  ;;  %v7081_v37 = vmax.f32 %v7057_v48, 0.0 }
 0x9cf   : > { %v7192_v34 = vsel %vm7177_vm11, %v7191_v51, %v14211_v40  ;;  %v7205_v63 = vrot.slane %v7081_v37, 1 }
 0x9d0   : > { %7246 = vmatmul.f32.vlgmr.msra.gmra.mxu3 %v7192_v34 }
 0x9d1   : > { %v7206_v3 = vsel %vm7177_vm11, %v7205_v63, %v14216_v41 }
 0x9d2   : > { %7266 = vmatmul.f32.vlgmr.msrb.gmra.mxu2 %v7206_v3 }
 0xa53   : > { %v7247_v40 = vpop.f32.mrf.mxu3 }
 0xa54   : > { %v7248_v35 = vadd.f32 %v7247_v40, %v7228_v47 }
 0xa55   : > { %v7267_v41 = vpop.f32.mrf.mxu2 }
 0xa56   : > { %v7268_v5 = vadd.f32 %v7267_v41, %v7248_v35 }
 0xa58   : > { %7270 = vst [vmem:[%s247_s18] sm:$0xff] %v7268_v5 }
 0xa59   : > { %8236 = shalt.err (!%p8233_p3)
}
 0xa5a   : > { %7774 = dma.vmem_to_hbm [thread:$0]  (%p8347_p5), %s7285_s26, 128, %s7287_s14, %s7272_s28  }
 0xa5b PF: > { %p7780_p4 = scmp.ge.s32.totalorder %s8271_s24, 2  ;;  %s7298_s12 = sand.u32 1, %s8259_s21  }
 0xa5c   : > { %s7299_s15 = scalar_lea.sflag [#allocation3], %s7298_s12 }
 0xa5d   : > { %p7777_p7 = pnand %p7780_p4, %p8351_p6 }
 0xa5f   : > { %p7778_p8 = pneg %p7777_p7 }
 0xa61   : > { %8254 = dma.done.wait (%p7778_p8), %s7299_s15, 128  }
 0xa62   : > { %8256 = vsyncadd (%p7778_p8), %s7299_s15, 4294967168  ;;  %p16_p9 = scmp.ge.s32.totalorder %s8335_s27, 4   ;;  %s15743_s21 = smov %s8263_s22 }
 0xa63   : > { %s15744_s22 = smov %s8267_s23  ;;  %s15745_s23 = smov %s8345_s30 }
 0xa64   : > { %s15746_s24 = smov %s8335_s27  ;;  %18 = sbr.rel (!%p16_p9) target bundleno = 3 (0x3), region = 79 }
 0xa69   :  { %7305 = vsyncpa [#allocation3], 1 }
 0xa6a   :  { %7307 = vsyncpa [#allocation3 + $0x1], 1 }

</bundles_post_ra>
